<compile_context>
chip_gen: v7x
topology: tpu7x:2x2x1
jax: 0.10.0
libtpu: 0.0.40
codegen_flags: <defaults>
</compile_context>

<pallas_src>
import functools
import math

import jax
import jax.numpy as jnp
from jax.experimental import pallas as pl
from jax.experimental.pallas import tpu as pltpu

_MIB = 1024 * 1024


def _compiler_params(semantics, vmem_bytes):
    # Raise the scoped-VMEM limit above the 16/32 MiB defaults, but keep
    # headroom under v7x's 64 MiB physical VMEM.
    return pltpu.CompilerParams(
        dimension_semantics=semantics,
        vmem_limit_bytes=int(min(max(vmem_bytes, 32 * _MIB), 48 * _MIB)))


# ----------------------------------------------------------------------------
# Kernel 1: fused 3x3 to_qkv conv + multi-head cosine attention (per batch elt)
# ----------------------------------------------------------------------------
def _qkv_attn_kernel(xp_ref, w_ref, dis_ref, factor_ref, o_ref, *,
                     H, W, C, heads, dim_head, smooth):
    """xp_ref    : [1, H+2, W+2, C] bf16 zero-padded token map (conv padding=1)
       w_ref     : [9, C, 3*inner]  bf16 to_qkv weights, slab index = kh*3+kw
       dis_ref   : [N, N]           f32  relative-position distance matrix
       factor_ref: [heads]          f32  1/(2*sita^2) per head (SMEM)
       o_ref     : [1, N, inner]    bf16 attention output 'n (g d)', lane-dense
    """
    N = H * W
    inner = heads * dim_head

    # to_qkv: 3x3 conv (padding=1, bias=False) as 9 shifted accumulate-matmuls
    # on the padded token map held in VMEM (im2col never touches HBM).
    qkv = jnp.zeros((N, 3 * inner), jnp.float32)
    for kh in range(3):
        for kw in range(3):
            slab = xp_ref[0, kh:kh + H, kw:kw + W, :].reshape(N, C)
            qkv += jnp.dot(slab, w_ref[kh * 3 + kw],
                           preferred_element_type=jnp.float32)
    qkv_bf = qkv.astype(jnp.bfloat16)        # single hoisted cast for the MXU

    dis = dis_ref[...]                        # [N, N] f32, shared by all heads
    outs = []
    for g in range(heads):                    # static unroll; G is tiny
        q_bf = qkv_bf[:, g * dim_head:(g + 1) * dim_head]
        k_bf = qkv_bf[:, inner + g * dim_head:inner + (g + 1) * dim_head]
        v_bf = qkv_bf[:, 2 * inner + g * dim_head:2 * inner + (g + 1) * dim_head]
        q_f = qkv[:, g * dim_head:(g + 1) * dim_head]
        k_f = qkv[:, inner + g * dim_head:inner + (g + 1) * dim_head]

        # scores q @ k^T (NT matmul; no transposed operand materialized)
        s = jax.lax.dot_general(q_bf, k_bf, (((1,), (1,)), ((), ())),
                                preferred_element_type=jnp.float32)   # [N, N]

        # cosine-style qk normalization (f32, exact divide):
        #   qk_norm = sqrt(sum q^2 + smooth) * sqrt(sum k^2 + smooth) + smooth
        qn = jnp.sqrt(jnp.sum(q_f * q_f, axis=1, keepdims=True) + smooth)
        kn = jnp.sqrt(jnp.sum(k_f * k_f, axis=1, keepdims=True) + smooth)
        # outer product qn * kn^T as a K=1 MXU matmul (avoids an [N,1]->[1,N]
        # cross-lane relayout).
        denom = jax.lax.dot_general(qn, kn, (((1,), (1,)), ((), ())),
                                    preferred_element_type=jnp.float32) + smooth
        attn = s / denom

        # gaussian relative-position modulation recomputed in-kernel (EUP exp)
        dm = jnp.exp(-factor_ref[g] * dis)
        dm = dm / jnp.sum(dm, axis=-1, keepdims=True)
        attn = attn * dm

        outs.append(jnp.dot(attn.astype(jnp.bfloat16), v_bf,
                            preferred_element_type=jnp.float32))      # [N, D]

    # one lane-dense store of the whole [N, heads*dim_head] block
    o_ref[0] = jnp.concatenate(outs, axis=-1).astype(o_ref.dtype)


def qkv_attention_pallas(x_pad, wqkv9, dis, factor, *, heads, dim_head,
                         smooth=1e-4):
    """x_pad: [B, H+2, W+2, C] bf16, wqkv9: [9, C, 3*inner] bf16,
    dis: [N, N] f32, factor: [heads] f32 -> [B, N, inner] bf16."""
    B, Hp, Wp, C = x_pad.shape
    H, W = Hp - 2, Wp - 2
    N = H * W
    inner = heads * dim_head
    kernel = functools.partial(_qkv_attn_kernel, H=H, W=W, C=C, heads=heads,
                               dim_head=dim_head, smooth=smooth)
    blk_bytes = (Hp * Wp * C * 2 + 9 * C * 3 * inner * 2 + N * N * 4
                 + N * inner * 2)
    tmp_bytes = N * 3 * inner * 6 + 6 * N * N * 4
    return pl.pallas_call(
        kernel,
        out_shape=jax.ShapeDtypeStruct((B, N, inner), jnp.bfloat16),
        grid=(B,),
        in_specs=[pl.BlockSpec((1, Hp, Wp, C), lambda b: (b, 0, 0, 0)),
                  pl.BlockSpec((9, C, 3 * inner), lambda b: (0, 0, 0)),
                  pl.BlockSpec((N, N), lambda b: (0, 0)),
                  pl.BlockSpec(memory_space=pltpu.MemorySpace.SMEM)],
        out_specs=pl.BlockSpec((1, N, inner), lambda b: (b, 0, 0)),
        compiler_params=_compiler_params(("parallel",),
                                         2 * blk_bytes + tmp_bytes),
    )(x_pad, wqkv9, dis.astype(jnp.float32), factor.astype(jnp.float32))


# ----------------------------------------------------------------------------
# Kernel 2: fused to_out + BN + ReLU + residual + full feed-forward + residual
# ----------------------------------------------------------------------------
def _bn_relu(y, g, b, eps=1e-5):
    # Train-mode BatchNorm2d over all B*H*W tokens, biased variance.
    mu = jnp.mean(y, axis=0, keepdims=True)
    var = jnp.mean(jnp.square(y - mu), axis=0, keepdims=True)
    return jnp.maximum((y - mu) * jax.lax.rsqrt(var + eps) * g + b, 0.0)


def _out_ff_kernel(a_ref, wo_ref, go_ref, bo_ref, res_ref,
                   w1_ref, g1_ref, b1_ref, w2_ref, g2_ref, b2_ref, o_ref):
    """Per-layer epilogue fully in VMEM: the intermediate activation x1 and
    the FF hidden never touch HBM."""
    y = jnp.dot(a_ref[...], wo_ref[...], preferred_element_type=jnp.float32)
    x1 = _bn_relu(y, go_ref[...], bo_ref[...]) + res_ref[...]         # [M, C]

    h = jnp.dot(x1.astype(jnp.bfloat16), w1_ref[...],
                preferred_element_type=jnp.float32)                   # [M,mlp]
    h = _bn_relu(h, g1_ref[...], b1_ref[...])

    y2 = jnp.dot(h.astype(jnp.bfloat16), w2_ref[...],
                 preferred_element_type=jnp.float32)                  # [M, C]
    o_ref[...] = _bn_relu(y2, g2_ref[...], b2_ref[...]) + x1


def out_ff_residual_pallas(a, w_out, g_out, b_out, res, w1, g1, b1, w2, g2, b2):
    """a: [M, inner] bf16 (attention tokens), res: [M, C] f32 -> [M, C] f32."""
    M, inner = a.shape
    C = w_out.shape[1]
    mlp = w1.shape[1]

    def full2(r, c):
        return pl.BlockSpec((r, c), lambda i: (0, 0))

    blk_bytes = (M * inner * 2 + inner * C * 2 + M * C * 4 * 2
                 + C * mlp * 2 + mlp * C * 2 + 4 * C * 4 + 2 * mlp * 4)
    tmp_bytes = 4 * M * C * 4 + 2 * M * mlp * 4 + M * mlp * 2 + M * C * 2
    return pl.pallas_call(
        _out_ff_kernel,
        out_shape=jax.ShapeDtypeStruct((M, C), jnp.float32),
        grid=(1,),
        in_specs=[full2(M, inner), full2(inner, C), full2(1, C), full2(1, C),
                  full2(M, C), full2(C, mlp), full2(1, mlp), full2(1, mlp),
                  full2(mlp, C), full2(1, C), full2(1, C)],
        out_specs=full2(M, C),
        compiler_params=_compiler_params(("arbitrary",),
                                         2 * blk_bytes + tmp_bytes),
    )(a, w_out, g_out.reshape(1, -1).astype(jnp.float32),
      b_out.reshape(1, -1).astype(jnp.float32), res,
      w1, g1.reshape(1, -1).astype(jnp.float32),
      b1.reshape(1, -1).astype(jnp.float32),
      w2, g2.reshape(1, -1).astype(jnp.float32),
      b2.reshape(1, -1).astype(jnp.float32))


# ----------------------------------------------------------------------------
# Plain-JAX glue (layout, padding, parameter folding)
# ----------------------------------------------------------------------------
def relative_pos_dis(height, width):
    ch, cw = jnp.meshgrid(jnp.arange(height), jnp.arange(width), indexing="ij")
    coords = jnp.stack([ch, cw]).reshape(2, -1)                 # [2, N]
    rel = coords[:, :, None] - coords[:, None, :]               # [2, N, N]
    dis = (rel[0].astype(jnp.float32) / height) ** 2 \
        + (rel[1].astype(jnp.float32) / width) ** 2
    return dis                                                  # [N, N]


def cnn_transformer_forward(params, x, dis, *, heads, dim_head, smooth=1e-4):
    B, C, H, W = x.shape
    N = H * W
    inner = heads * dim_head

    # NCHW -> tokens [B, N, C] (h-major) once for the whole stack.
    t = x.transpose(0, 2, 3, 1).reshape(B, N, C)

    for p in params:
        # -------------- attention block: x = to_out(attn(x)) + x ------------
        xp = jnp.pad(t.reshape(B, H, W, C),
                     ((0, 0), (1, 1), (1, 1), (0, 0))).astype(jnp.bfloat16)
        # to_qkv weights [3*inner, C, 3, 3] -> 9 slabs [(kh*3+kw), C, out].
        wqkv9 = p["w_qkv"].transpose(2, 3, 1, 0).reshape(9, C, 3 * inner)
        wqkv9 = wqkv9.astype(jnp.bfloat16)
        sita = jax.nn.sigmoid(p["headsita"]) * (0.4 - 0.003) + 0.003
        factor = 1.0 / (2.0 * sita ** 2)                         # [heads]

        attn_tok = qkv_attention_pallas(xp, wqkv9, dis, factor, heads=heads,
                                        dim_head=dim_head, smooth=smooth)

        # ---- to_out + BN + ReLU + residual, then feed-forward + residual ----
        w_out = p["w_out"].reshape(C, inner).T.astype(jnp.bfloat16)
        mlp = p["w1"].shape[0]
        w1 = p["w1"].reshape(mlp, C).T.astype(jnp.bfloat16)
        w2 = p["w2"].reshape(C, mlp).T.astype(jnp.bfloat16)
        t = out_ff_residual_pallas(
            attn_tok.reshape(B * N, inner), w_out, p["g_out"], p["b_out"],
            t.reshape(B * N, C), w1, p["g1"], p["b1"], w2, p["g2"], p["b2"],
        ).reshape(B, N, C)

    return t.reshape(B, H, W, C).transpose(0, 3, 1, 2)               # NCHW


def init_params(key, dim, depth, heads, dim_head, mlp_dim):
    inner = heads * dim_head
    params = []
    for _ in range(depth):
        key, k0, k1, k2, k3, k4 = jax.random.split(key, 6)
        params.append(dict(
            w_qkv=jax.random.normal(k0, (3 * inner, dim, 3, 3), jnp.float32)
            * (1.0 / math.sqrt(dim * 9)),
            headsita=jax.random.normal(k1, (heads,), jnp.float32),
            w_out=jax.random.normal(k2, (dim, inner, 1, 1), jnp.float32)
            * (1.0 / math.sqrt(inner)),
            g_out=jnp.ones((dim,), jnp.float32),
            b_out=jnp.zeros((dim,), jnp.float32),
            w1=jax.random.normal(k3, (mlp_dim, dim, 1, 1), jnp.float32)
            * (1.0 / math.sqrt(dim)),
            g1=jnp.ones((mlp_dim,), jnp.float32),
            b1=jnp.zeros((mlp_dim,), jnp.float32),
            w2=jax.random.normal(k4, (dim, mlp_dim, 1, 1), jnp.float32)
            * (1.0 / math.sqrt(mlp_dim)),
            g2=jnp.ones((dim,), jnp.float32),
            b2=jnp.zeros((dim,), jnp.float32),
        ))
    return params


if __name__ == "__main__":
    B, DIM, H, W = 2, 32, 8, 8          # num_patches = H*W = 64
    DEPTH, HEADS, DIM_HEAD, MLP_DIM = 2, 4, 32, 64   # inner = 128 (lane-dense)

    key = jax.random.PRNGKey(0)
    kx, kp = jax.random.split(key)
    x = jax.random.normal(kx, (B, DIM, H, W), jnp.float32)
    params = init_params(kp, DIM, DEPTH, HEADS, DIM_HEAD, MLP_DIM)
    dis = relative_pos_dis(H, W)        # [N, N]

    fwd = jax.jit(functools.partial(cnn_transformer_forward,
                                    heads=HEADS, dim_head=DIM_HEAD))
    y = fwd(params, x, dis)
    jax.block_until_ready(y)
    assert y.shape == (B, DIM, H, W) and y.dtype == jnp.float32
    assert bool(jnp.all(jnp.isfinite(y)))
    print("KERNEL_OK")
</pallas_src>

<mosaic_0001>
module attributes {stable_mosaic.version = 11 : i64} {
  func.func @_qkv_attn_kernel(%arg0: i32, %arg1: memref<1x10x10x32xbf16, #tpu.memory_space<vmem>>, %arg2: memref<9x32x384xbf16, #tpu.memory_space<vmem>>, %arg3: memref<64x64xf32, #tpu.memory_space<vmem>>, %arg4: memref<4xf32, #tpu.memory_space<smem>>, %arg5: memref<1x64x128xbf16, #tpu.memory_space<vmem>>) attributes {dimension_semantics = [#tpu.dimension_semantics<parallel>], iteration_bounds = array<i64: 2>, scalar_prefetch = 0 : i64, scratch_operands = 0 : i64, tpu.core_type = #tpu.core_type<tc>, window_params = [{transform_indices = @transform_0, window_bounds = array<i64: 1, 10, 10, 32>}, {pipeline_mode = #tpu.pipeline_mode<synchronous>, transform_indices = @transform_1, window_bounds = array<i64: 9, 32, 384>}, {pipeline_mode = #tpu.pipeline_mode<synchronous>, transform_indices = @transform_2, window_bounds = array<i64: 64, 64>}, {transform_indices = @transform_3, window_bounds = array<i64: 4>}, {transform_indices = @transform_4, window_bounds = array<i64: 1, 64, 128>}]} {
    %cst = arith.constant 0.000000e+00 : f32
    %0 = vector.broadcast %cst : f32 to vector<64x384xf32>
    %c0 = arith.constant 0 : index
    %c0_0 = arith.constant 0 : index
    %c0_1 = arith.constant 0 : index
    %c0_2 = arith.constant 0 : index
    %1 = vector.load %arg1[%c0, %c0_0, %c0_1, %c0_2] : memref<1x10x10x32xbf16, #tpu.memory_space<vmem>>, vector<1x8x8x32xbf16>
    %2 = vector.shape_cast %1 : vector<1x8x8x32xbf16> to vector<8x8x32xbf16>
    %3 = vector.shape_cast %2 : vector<8x8x32xbf16> to vector<64x32xbf16>
    %c0_3 = arith.constant 0 : index
    %c0_4 = arith.constant 0 : index
    %c0_5 = arith.constant 0 : index
    %4 = vector.load %arg2[%c0_3, %c0_4, %c0_5] : memref<9x32x384xbf16, #tpu.memory_space<vmem>>, vector<1x32x384xbf16>
    %5 = vector.shape_cast %4 : vector<1x32x384xbf16> to vector<32x384xbf16>
    %cst_6 = arith.constant dense<0.000000e+00> : vector<64x384xf32>
    %6 = tpu.matmul %3, %5, %cst_6 {dimension_numbers = #tpu.dot_dimension_numbers<[1], [0], [0], [1], [0, 0, 1, 1], [], []>} : vector<64x32xbf16>, vector<32x384xbf16>, vector<64x384xf32> -> vector<64x384xf32>
    %7 = arith.addf %0, %6 : vector<64x384xf32>
    %c0_7 = arith.constant 0 : index
    %c0_8 = arith.constant 0 : index
    %c1 = arith.constant 1 : index
    %c0_9 = arith.constant 0 : index
    %8 = vector.load %arg1[%c0_7, %c0_8, %c1, %c0_9] : memref<1x10x10x32xbf16, #tpu.memory_space<vmem>>, vector<1x8x8x32xbf16>
    %9 = vector.shape_cast %8 : vector<1x8x8x32xbf16> to vector<8x8x32xbf16>
    %10 = vector.shape_cast %9 : vector<8x8x32xbf16> to vector<64x32xbf16>
    %c1_10 = arith.constant 1 : index
    %c0_11 = arith.constant 0 : index
    %c0_12 = arith.constant 0 : index
    %11 = vector.load %arg2[%c1_10, %c0_11, %c0_12] : memref<9x32x384xbf16, #tpu.memory_space<vmem>>, vector<1x32x384xbf16>
    %12 = vector.shape_cast %11 : vector<1x32x384xbf16> to vector<32x384xbf16>
    %cst_13 = arith.constant dense<0.000000e+00> : vector<64x384xf32>
    %13 = tpu.matmul %10, %12, %cst_13 {dimension_numbers = #tpu.dot_dimension_numbers<[1], [0], [0], [1], [0, 0, 1, 1], [], []>} : vector<64x32xbf16>, vector<32x384xbf16>, vector<64x384xf32> -> vector<64x384xf32>
    %14 = arith.addf %7, %13 : vector<64x384xf32>
    %c0_14 = arith.constant 0 : index
    %c0_15 = arith.constant 0 : index
    %c2 = arith.constant 2 : index
    %c0_16 = arith.constant 0 : index
    %15 = vector.load %arg1[%c0_14, %c0_15, %c2, %c0_16] : memref<1x10x10x32xbf16, #tpu.memory_space<vmem>>, vector<1x8x8x32xbf16>
    %16 = vector.shape_cast %15 : vector<1x8x8x32xbf16> to vector<8x8x32xbf16>
    %17 = vector.shape_cast %16 : vector<8x8x32xbf16> to vector<64x32xbf16>
    %c2_17 = arith.constant 2 : index
    %c0_18 = arith.constant 0 : index
    %c0_19 = arith.constant 0 : index
    %18 = vector.load %arg2[%c2_17, %c0_18, %c0_19] : memref<9x32x384xbf16, #tpu.memory_space<vmem>>, vector<1x32x384xbf16>
    %19 = vector.shape_cast %18 : vector<1x32x384xbf16> to vector<32x384xbf16>
    %cst_20 = arith.constant dense<0.000000e+00> : vector<64x384xf32>
    %20 = tpu.matmul %17, %19, %cst_20 {dimension_numbers = #tpu.dot_dimension_numbers<[1], [0], [0], [1], [0, 0, 1, 1], [], []>} : vector<64x32xbf16>, vector<32x384xbf16>, vector<64x384xf32> -> vector<64x384xf32>
    %21 = arith.addf %14, %20 : vector<64x384xf32>
    %c0_21 = arith.constant 0 : index
    %c1_22 = arith.constant 1 : index
    %c0_23 = arith.constant 0 : index
    %c0_24 = arith.constant 0 : index
    %22 = vector.load %arg1[%c0_21, %c1_22, %c0_23, %c0_24] : memref<1x10x10x32xbf16, #tpu.memory_space<vmem>>, vector<1x8x8x32xbf16>
    %23 = vector.shape_cast %22 : vector<1x8x8x32xbf16> to vector<8x8x32xbf16>
    %24 = vector.shape_cast %23 : vector<8x8x32xbf16> to vector<64x32xbf16>
    %c3 = arith.constant 3 : index
    %c0_25 = arith.constant 0 : index
    %c0_26 = arith.constant 0 : index
    %25 = vector.load %arg2[%c3, %c0_25, %c0_26] : memref<9x32x384xbf16, #tpu.memory_space<vmem>>, vector<1x32x384xbf16>
    %26 = vector.shape_cast %25 : vector<1x32x384xbf16> to vector<32x384xbf16>
    %cst_27 = arith.constant dense<0.000000e+00> : vector<64x384xf32>
    %27 = tpu.matmul %24, %26, %cst_27 {dimension_numbers = #tpu.dot_dimension_numbers<[1], [0], [0], [1], [0, 0, 1, 1], [], []>} : vector<64x32xbf16>, vector<32x384xbf16>, vector<64x384xf32> -> vector<64x384xf32>
    %28 = arith.addf %21, %27 : vector<64x384xf32>
    %c0_28 = arith.constant 0 : index
    %c1_29 = arith.constant 1 : index
    %c1_30 = arith.constant 1 : index
    %c0_31 = arith.constant 0 : index
    %29 = vector.load %arg1[%c0_28, %c1_29, %c1_30, %c0_31] : memref<1x10x10x32xbf16, #tpu.memory_space<vmem>>, vector<1x8x8x32xbf16>
    %30 = vector.shape_cast %29 : vector<1x8x8x32xbf16> to vector<8x8x32xbf16>
    %31 = vector.shape_cast %30 : vector<8x8x32xbf16> to vector<64x32xbf16>
    %c4 = arith.constant 4 : index
    %c0_32 = arith.constant 0 : index
    %c0_33 = arith.constant 0 : index
    %32 = vector.load %arg2[%c4, %c0_32, %c0_33] : memref<9x32x384xbf16, #tpu.memory_space<vmem>>, vector<1x32x384xbf16>
    %33 = vector.shape_cast %32 : vector<1x32x384xbf16> to vector<32x384xbf16>
    %cst_34 = arith.constant dense<0.000000e+00> : vector<64x384xf32>
    %34 = tpu.matmul %31, %33, %cst_34 {dimension_numbers = #tpu.dot_dimension_numbers<[1], [0], [0], [1], [0, 0, 1, 1], [], []>} : vector<64x32xbf16>, vector<32x384xbf16>, vector<64x384xf32> -> vector<64x384xf32>
    %35 = arith.addf %28, %34 : vector<64x384xf32>
    %c0_35 = arith.constant 0 : index
    %c1_36 = arith.constant 1 : index
    %c2_37 = arith.constant 2 : index
    %c0_38 = arith.constant 0 : index
    %36 = vector.load %arg1[%c0_35, %c1_36, %c2_37, %c0_38] : memref<1x10x10x32xbf16, #tpu.memory_space<vmem>>, vector<1x8x8x32xbf16>
    %37 = vector.shape_cast %36 : vector<1x8x8x32xbf16> to vector<8x8x32xbf16>
    %38 = vector.shape_cast %37 : vector<8x8x32xbf16> to vector<64x32xbf16>
    %c5 = arith.constant 5 : index
    %c0_39 = arith.constant 0 : index
    %c0_40 = arith.constant 0 : index
    %39 = vector.load %arg2[%c5, %c0_39, %c0_40] : memref<9x32x384xbf16, #tpu.memory_space<vmem>>, vector<1x32x384xbf16>
    %40 = vector.shape_cast %39 : vector<1x32x384xbf16> to vector<32x384xbf16>
    %cst_41 = arith.constant dense<0.000000e+00> : vector<64x384xf32>
    %41 = tpu.matmul %38, %40, %cst_41 {dimension_numbers = #tpu.dot_dimension_numbers<[1], [0], [0], [1], [0, 0, 1, 1], [], []>} : vector<64x32xbf16>, vector<32x384xbf16>, vector<64x384xf32> -> vector<64x384xf32>
    %42 = arith.addf %35, %41 : vector<64x384xf32>
    %c0_42 = arith.constant 0 : index
    %c2_43 = arith.constant 2 : index
    %c0_44 = arith.constant 0 : index
    %c0_45 = arith.constant 0 : index
    %43 = vector.load %arg1[%c0_42, %c2_43, %c0_44, %c0_45] : memref<1x10x10x32xbf16, #tpu.memory_space<vmem>>, vector<1x8x8x32xbf16>
    %44 = vector.shape_cast %43 : vector<1x8x8x32xbf16> to vector<8x8x32xbf16>
    %45 = vector.shape_cast %44 : vector<8x8x32xbf16> to vector<64x32xbf16>
    %c6 = arith.constant 6 : index
    %c0_46 = arith.constant 0 : index
    %c0_47 = arith.constant 0 : index
    %46 = vector.load %arg2[%c6, %c0_46, %c0_47] : memref<9x32x384xbf16, #tpu.memory_space<vmem>>, vector<1x32x384xbf16>
    %47 = vector.shape_cast %46 : vector<1x32x384xbf16> to vector<32x384xbf16>
    %cst_48 = arith.constant dense<0.000000e+00> : vector<64x384xf32>
    %48 = tpu.matmul %45, %47, %cst_48 {dimension_numbers = #tpu.dot_dimension_numbers<[1], [0], [0], [1], [0, 0, 1, 1], [], []>} : vector<64x32xbf16>, vector<32x384xbf16>, vector<64x384xf32> -> vector<64x384xf32>
    %49 = arith.addf %42, %48 : vector<64x384xf32>
    %c0_49 = arith.constant 0 : index
    %c2_50 = arith.constant 2 : index
    %c1_51 = arith.constant 1 : index
    %c0_52 = arith.constant 0 : index
    %50 = vector.load %arg1[%c0_49, %c2_50, %c1_51, %c0_52] : memref<1x10x10x32xbf16, #tpu.memory_space<vmem>>, vector<1x8x8x32xbf16>
    %51 = vector.shape_cast %50 : vector<1x8x8x32xbf16> to vector<8x8x32xbf16>
    %52 = vector.shape_cast %51 : vector<8x8x32xbf16> to vector<64x32xbf16>
    %c7 = arith.constant 7 : index
    %c0_53 = arith.constant 0 : index
    %c0_54 = arith.constant 0 : index
    %53 = vector.load %arg2[%c7, %c0_53, %c0_54] : memref<9x32x384xbf16, #tpu.memory_space<vmem>>, vector<1x32x384xbf16>
    %54 = vector.shape_cast %53 : vector<1x32x384xbf16> to vector<32x384xbf16>
    %cst_55 = arith.constant dense<0.000000e+00> : vector<64x384xf32>
    %55 = tpu.matmul %52, %54, %cst_55 {dimension_numbers = #tpu.dot_dimension_numbers<[1], [0], [0], [1], [0, 0, 1, 1], [], []>} : vector<64x32xbf16>, vector<32x384xbf16>, vector<64x384xf32> -> vector<64x384xf32>
    %56 = arith.addf %49, %55 : vector<64x384xf32>
    %c0_56 = arith.constant 0 : index
    %c2_57 = arith.constant 2 : index
    %c2_58 = arith.constant 2 : index
    %c0_59 = arith.constant 0 : index
    %57 = vector.load %arg1[%c0_56, %c2_57, %c2_58, %c0_59] : memref<1x10x10x32xbf16, #tpu.memory_space<vmem>>, vector<1x8x8x32xbf16>
    %58 = vector.shape_cast %57 : vector<1x8x8x32xbf16> to vector<8x8x32xbf16>
    %59 = vector.shape_cast %58 : vector<8x8x32xbf16> to vector<64x32xbf16>
    %c8 = arith.constant 8 : index
    %c0_60 = arith.constant 0 : index
    %c0_61 = arith.constant 0 : index
    %60 = vector.load %arg2[%c8, %c0_60, %c0_61] : memref<9x32x384xbf16, #tpu.memory_space<vmem>>, vector<1x32x384xbf16>
    %61 = vector.shape_cast %60 : vector<1x32x384xbf16> to vector<32x384xbf16>
    %cst_62 = arith.constant dense<0.000000e+00> : vector<64x384xf32>
    %62 = tpu.matmul %59, %61, %cst_62 {dimension_numbers = #tpu.dot_dimension_numbers<[1], [0], [0], [1], [0, 0, 1, 1], [], []>} : vector<64x32xbf16>, vector<32x384xbf16>, vector<64x384xf32> -> vector<64x384xf32>
    %63 = arith.addf %56, %62 : vector<64x384xf32>
    %64 = arith.truncf %63 : vector<64x384xf32> to vector<64x384xbf16>
    %c0_63 = arith.constant 0 : index
    %c0_64 = arith.constant 0 : index
    %65 = vector.load %arg3[%c0_63, %c0_64] : memref<64x64xf32, #tpu.memory_space<vmem>>, vector<64x64xf32>
    %66 = vector.extract_strided_slice %64 {offsets = [0, 0], sizes = [64, 32], strides = [1, 1]} : vector<64x384xbf16> to vector<64x32xbf16>
    %67 = vector.extract_strided_slice %64 {offsets = [0, 128], sizes = [64, 32], strides = [1, 1]} : vector<64x384xbf16> to vector<64x32xbf16>
    %68 = vector.extract_strided_slice %64 {offsets = [0, 256], sizes = [64, 32], strides = [1, 1]} : vector<64x384xbf16> to vector<64x32xbf16>
    %69 = vector.extract_strided_slice %63 {offsets = [0, 0], sizes = [64, 32], strides = [1, 1]} : vector<64x384xf32> to vector<64x32xf32>
    %70 = vector.extract_strided_slice %63 {offsets = [0, 128], sizes = [64, 32], strides = [1, 1]} : vector<64x384xf32> to vector<64x32xf32>
    %cst_65 = arith.constant dense<0.000000e+00> : vector<64x64xf32>
    %71 = tpu.matmul %66, %67, %cst_65 {dimension_numbers = #tpu.dot_dimension_numbers<[1], [1], [0], [0], [0, 0, 1, 0], [], []>} : vector<64x32xbf16>, vector<64x32xbf16>, vector<64x64xf32> -> vector<64x64xf32>
    %72 = arith.mulf %69, %69 : vector<64x32xf32>
    %cst_66 = arith.constant dense<0.000000e+00> : vector<64xf32>
    %73 = vector.multi_reduction <add>, %72, %cst_66 [1] : vector<64x32xf32> to vector<64xf32>
    %74 = vector.shape_cast %73 : vector<64xf32> to vector<64x1xf32>
    %cst_67 = arith.constant 9.99999974E-5 : f32
    %75 = vector.broadcast %cst_67 : f32 to vector<64x1xf32>
    %76 = arith.addf %74, %75 : vector<64x1xf32>
    %77 = math.sqrt %76 : vector<64x1xf32>
    %78 = arith.mulf %70, %70 : vector<64x32xf32>
    %cst_68 = arith.constant dense<0.000000e+00> : vector<64xf32>
    %79 = vector.multi_reduction <add>, %78, %cst_68 [1] : vector<64x32xf32> to vector<64xf32>
    %80 = vector.shape_cast %79 : vector<64xf32> to vector<64x1xf32>
    %cst_69 = arith.constant 9.99999974E-5 : f32
    %81 = vector.broadcast %cst_69 : f32 to vector<64x1xf32>
    %82 = arith.addf %80, %81 : vector<64x1xf32>
    %83 = math.sqrt %82 : vector<64x1xf32>
    %cst_70 = arith.constant dense<0.000000e+00> : vector<64x64xf32>
    %84 = tpu.matmul %77, %83, %cst_70 {dimension_numbers = #tpu.dot_dimension_numbers<[1], [1], [0], [0], [0, 0, 1, 0], [], []>} : vector<64x1xf32>, vector<64x1xf32>, vector<64x64xf32> -> vector<64x64xf32>
    %cst_71 = arith.constant 9.99999974E-5 : f32
    %85 = vector.broadcast %cst_71 : f32 to vector<64x64xf32>
    %86 = arith.addf %84, %85 : vector<64x64xf32>
    %87 = arith.divf %71, %86 : vector<64x64xf32>
    %c0_72 = arith.constant 0 : index
    %88 = memref.load %arg4[%c0_72] : memref<4xf32, #tpu.memory_space<smem>>
    %cst_73 = arith.constant 0.000000e+00 : f32
    %89 = arith.subf %cst_73, %88 : f32
    %90 = vector.broadcast %89 : f32 to vector<64x64xf32>
    %91 = arith.mulf %90, %65 : vector<64x64xf32>
    %92 = math.exp %91 : vector<64x64xf32>
    %cst_74 = arith.constant dense<0.000000e+00> : vector<64xf32>
    %93 = vector.multi_reduction <add>, %92, %cst_74 [1] : vector<64x64xf32> to vector<64xf32>
    %94 = vector.shape_cast %93 : vector<64xf32> to vector<64x1xf32>
    %95 = vector.broadcast %94 : vector<64x1xf32> to vector<64x64xf32>
    %96 = arith.divf %92, %95 : vector<64x64xf32>
    %97 = arith.mulf %87, %96 : vector<64x64xf32>
    %98 = arith.truncf %97 : vector<64x64xf32> to vector<64x64xbf16>
    %cst_75 = arith.constant dense<0.000000e+00> : vector<64x32xf32>
    %99 = tpu.matmul %98, %68, %cst_75 {dimension_numbers = #tpu.dot_dimension_numbers<[1], [0], [0], [1], [0, 0, 1, 1], [], []>} : vector<64x64xbf16>, vector<64x32xbf16>, vector<64x32xf32> -> vector<64x32xf32>
    %100 = vector.extract_strided_slice %64 {offsets = [0, 32], sizes = [64, 32], strides = [1, 1]} : vector<64x384xbf16> to vector<64x32xbf16>
    %101 = vector.extract_strided_slice %64 {offsets = [0, 160], sizes = [64, 32], strides = [1, 1]} : vector<64x384xbf16> to vector<64x32xbf16>
    %102 = vector.extract_strided_slice %64 {offsets = [0, 288], sizes = [64, 32], strides = [1, 1]} : vector<64x384xbf16> to vector<64x32xbf16>
    %103 = vector.extract_strided_slice %63 {offsets = [0, 32], sizes = [64, 32], strides = [1, 1]} : vector<64x384xf32> to vector<64x32xf32>
    %104 = vector.extract_strided_slice %63 {offsets = [0, 160], sizes = [64, 32], strides = [1, 1]} : vector<64x384xf32> to vector<64x32xf32>
    %cst_76 = arith.constant dense<0.000000e+00> : vector<64x64xf32>
    %105 = tpu.matmul %100, %101, %cst_76 {dimension_numbers = #tpu.dot_dimension_numbers<[1], [1], [0], [0], [0, 0, 1, 0], [], []>} : vector<64x32xbf16>, vector<64x32xbf16>, vector<64x64xf32> -> vector<64x64xf32>
    %106 = arith.mulf %103, %103 : vector<64x32xf32>
    %cst_77 = arith.constant dense<0.000000e+00> : vector<64xf32>
    %107 = vector.multi_reduction <add>, %106, %cst_77 [1] : vector<64x32xf32> to vector<64xf32>
    %108 = vector.shape_cast %107 : vector<64xf32> to vector<64x1xf32>
    %cst_78 = arith.constant 9.99999974E-5 : f32
    %109 = vector.broadcast %cst_78 : f32 to vector<64x1xf32>
    %110 = arith.addf %108, %109 : vector<64x1xf32>
    %111 = math.sqrt %110 : vector<64x1xf32>
    %112 = arith.mulf %104, %104 : vector<64x32xf32>
    %cst_79 = arith.constant dense<0.000000e+00> : vector<64xf32>
    %113 = vector.multi_reduction <add>, %112, %cst_79 [1] : vector<64x32xf32> to vector<64xf32>
    %114 = vector.shape_cast %113 : vector<64xf32> to vector<64x1xf32>
    %cst_80 = arith.constant 9.99999974E-5 : f32
    %115 = vector.broadcast %cst_80 : f32 to vector<64x1xf32>
    %116 = arith.addf %114, %115 : vector<64x1xf32>
    %117 = math.sqrt %116 : vector<64x1xf32>
    %cst_81 = arith.constant dense<0.000000e+00> : vector<64x64xf32>
    %118 = tpu.matmul %111, %117, %cst_81 {dimension_numbers = #tpu.dot_dimension_numbers<[1], [1], [0], [0], [0, 0, 1, 0], [], []>} : vector<64x1xf32>, vector<64x1xf32>, vector<64x64xf32> -> vector<64x64xf32>
    %cst_82 = arith.constant 9.99999974E-5 : f32
    %119 = vector.broadcast %cst_82 : f32 to vector<64x64xf32>
    %120 = arith.addf %118, %119 : vector<64x64xf32>
    %121 = arith.divf %105, %120 : vector<64x64xf32>
    %c1_83 = arith.constant 1 : index
    %122 = memref.load %arg4[%c1_83] : memref<4xf32, #tpu.memory_space<smem>>
    %cst_84 = arith.constant 0.000000e+00 : f32
    %123 = arith.subf %cst_84, %122 : f32
    %124 = vector.broadcast %123 : f32 to vector<64x64xf32>
    %125 = arith.mulf %124, %65 : vector<64x64xf32>
    %126 = math.exp %125 : vector<64x64xf32>
    %cst_85 = arith.constant dense<0.000000e+00> : vector<64xf32>
    %127 = vector.multi_reduction <add>, %126, %cst_85 [1] : vector<64x64xf32> to vector<64xf32>
    %128 = vector.shape_cast %127 : vector<64xf32> to vector<64x1xf32>
    %129 = vector.broadcast %128 : vector<64x1xf32> to vector<64x64xf32>
    %130 = arith.divf %126, %129 : vector<64x64xf32>
    %131 = arith.mulf %121, %130 : vector<64x64xf32>
    %132 = arith.truncf %131 : vector<64x64xf32> to vector<64x64xbf16>
    %cst_86 = arith.constant dense<0.000000e+00> : vector<64x32xf32>
    %133 = tpu.matmul %132, %102, %cst_86 {dimension_numbers = #tpu.dot_dimension_numbers<[1], [0], [0], [1], [0, 0, 1, 1], [], []>} : vector<64x64xbf16>, vector<64x32xbf16>, vector<64x32xf32> -> vector<64x32xf32>
    %134 = vector.extract_strided_slice %64 {offsets = [0, 64], sizes = [64, 32], strides = [1, 1]} : vector<64x384xbf16> to vector<64x32xbf16>
    %135 = vector.extract_strided_slice %64 {offsets = [0, 192], sizes = [64, 32], strides = [1, 1]} : vector<64x384xbf16> to vector<64x32xbf16>
    %136 = vector.extract_strided_slice %64 {offsets = [0, 320], sizes = [64, 32], strides = [1, 1]} : vector<64x384xbf16> to vector<64x32xbf16>
    %137 = vector.extract_strided_slice %63 {offsets = [0, 64], sizes = [64, 32], strides = [1, 1]} : vector<64x384xf32> to vector<64x32xf32>
    %138 = vector.extract_strided_slice %63 {offsets = [0, 192], sizes = [64, 32], strides = [1, 1]} : vector<64x384xf32> to vector<64x32xf32>
    %cst_87 = arith.constant dense<0.000000e+00> : vector<64x64xf32>
    %139 = tpu.matmul %134, %135, %cst_87 {dimension_numbers = #tpu.dot_dimension_numbers<[1], [1], [0], [0], [0, 0, 1, 0], [], []>} : vector<64x32xbf16>, vector<64x32xbf16>, vector<64x64xf32> -> vector<64x64xf32>
    %140 = arith.mulf %137, %137 : vector<64x32xf32>
    %cst_88 = arith.constant dense<0.000000e+00> : vector<64xf32>
    %141 = vector.multi_reduction <add>, %140, %cst_88 [1] : vector<64x32xf32> to vector<64xf32>
    %142 = vector.shape_cast %141 : vector<64xf32> to vector<64x1xf32>
    %cst_89 = arith.constant 9.99999974E-5 : f32
    %143 = vector.broadcast %cst_89 : f32 to vector<64x1xf32>
    %144 = arith.addf %142, %143 : vector<64x1xf32>
    %145 = math.sqrt %144 : vector<64x1xf32>
    %146 = arith.mulf %138, %138 : vector<64x32xf32>
    %cst_90 = arith.constant dense<0.000000e+00> : vector<64xf32>
    %147 = vector.multi_reduction <add>, %146, %cst_90 [1] : vector<64x32xf32> to vector<64xf32>
    %148 = vector.shape_cast %147 : vector<64xf32> to vector<64x1xf32>
    %cst_91 = arith.constant 9.99999974E-5 : f32
    %149 = vector.broadcast %cst_91 : f32 to vector<64x1xf32>
    %150 = arith.addf %148, %149 : vector<64x1xf32>
    %151 = math.sqrt %150 : vector<64x1xf32>
    %cst_92 = arith.constant dense<0.000000e+00> : vector<64x64xf32>
    %152 = tpu.matmul %145, %151, %cst_92 {dimension_numbers = #tpu.dot_dimension_numbers<[1], [1], [0], [0], [0, 0, 1, 0], [], []>} : vector<64x1xf32>, vector<64x1xf32>, vector<64x64xf32> -> vector<64x64xf32>
    %cst_93 = arith.constant 9.99999974E-5 : f32
    %153 = vector.broadcast %cst_93 : f32 to vector<64x64xf32>
    %154 = arith.addf %152, %153 : vector<64x64xf32>
    %155 = arith.divf %139, %154 : vector<64x64xf32>
    %c2_94 = arith.constant 2 : index
    %156 = memref.load %arg4[%c2_94] : memref<4xf32, #tpu.memory_space<smem>>
    %cst_95 = arith.constant 0.000000e+00 : f32
    %157 = arith.subf %cst_95, %156 : f32
    %158 = vector.broadcast %157 : f32 to vector<64x64xf32>
    %159 = arith.mulf %158, %65 : vector<64x64xf32>
    %160 = math.exp %159 : vector<64x64xf32>
    %cst_96 = arith.constant dense<0.000000e+00> : vector<64xf32>
    %161 = vector.multi_reduction <add>, %160, %cst_96 [1] : vector<64x64xf32> to vector<64xf32>
    %162 = vector.shape_cast %161 : vector<64xf32> to vector<64x1xf32>
    %163 = vector.broadcast %162 : vector<64x1xf32> to vector<64x64xf32>
    %164 = arith.divf %160, %163 : vector<64x64xf32>
    %165 = arith.mulf %155, %164 : vector<64x64xf32>
    %166 = arith.truncf %165 : vector<64x64xf32> to vector<64x64xbf16>
    %cst_97 = arith.constant dense<0.000000e+00> : vector<64x32xf32>
    %167 = tpu.matmul %166, %136, %cst_97 {dimension_numbers = #tpu.dot_dimension_numbers<[1], [0], [0], [1], [0, 0, 1, 1], [], []>} : vector<64x64xbf16>, vector<64x32xbf16>, vector<64x32xf32> -> vector<64x32xf32>
    %168 = vector.extract_strided_slice %64 {offsets = [0, 96], sizes = [64, 32], strides = [1, 1]} : vector<64x384xbf16> to vector<64x32xbf16>
    %169 = vector.extract_strided_slice %64 {offsets = [0, 224], sizes = [64, 32], strides = [1, 1]} : vector<64x384xbf16> to vector<64x32xbf16>
    %170 = vector.extract_strided_slice %64 {offsets = [0, 352], sizes = [64, 32], strides = [1, 1]} : vector<64x384xbf16> to vector<64x32xbf16>
    %171 = vector.extract_strided_slice %63 {offsets = [0, 96], sizes = [64, 32], strides = [1, 1]} : vector<64x384xf32> to vector<64x32xf32>
    %172 = vector.extract_strided_slice %63 {offsets = [0, 224], sizes = [64, 32], strides = [1, 1]} : vector<64x384xf32> to vector<64x32xf32>
    %cst_98 = arith.constant dense<0.000000e+00> : vector<64x64xf32>
    %173 = tpu.matmul %168, %169, %cst_98 {dimension_numbers = #tpu.dot_dimension_numbers<[1], [1], [0], [0], [0, 0, 1, 0], [], []>} : vector<64x32xbf16>, vector<64x32xbf16>, vector<64x64xf32> -> vector<64x64xf32>
    %174 = arith.mulf %171, %171 : vector<64x32xf32>
    %cst_99 = arith.constant dense<0.000000e+00> : vector<64xf32>
    %175 = vector.multi_reduction <add>, %174, %cst_99 [1] : vector<64x32xf32> to vector<64xf32>
    %176 = vector.shape_cast %175 : vector<64xf32> to vector<64x1xf32>
    %cst_100 = arith.constant 9.99999974E-5 : f32
    %177 = vector.broadcast %cst_100 : f32 to vector<64x1xf32>
    %178 = arith.addf %176, %177 : vector<64x1xf32>
    %179 = math.sqrt %178 : vector<64x1xf32>
    %180 = arith.mulf %172, %172 : vector<64x32xf32>
    %cst_101 = arith.constant dense<0.000000e+00> : vector<64xf32>
    %181 = vector.multi_reduction <add>, %180, %cst_101 [1] : vector<64x32xf32> to vector<64xf32>
    %182 = vector.shape_cast %181 : vector<64xf32> to vector<64x1xf32>
    %cst_102 = arith.constant 9.99999974E-5 : f32
    %183 = vector.broadcast %cst_102 : f32 to vector<64x1xf32>
    %184 = arith.addf %182, %183 : vector<64x1xf32>
    %185 = math.sqrt %184 : vector<64x1xf32>
    %cst_103 = arith.constant dense<0.000000e+00> : vector<64x64xf32>
    %186 = tpu.matmul %179, %185, %cst_103 {dimension_numbers = #tpu.dot_dimension_numbers<[1], [1], [0], [0], [0, 0, 1, 0], [], []>} : vector<64x1xf32>, vector<64x1xf32>, vector<64x64xf32> -> vector<64x64xf32>
    %cst_104 = arith.constant 9.99999974E-5 : f32
    %187 = vector.broadcast %cst_104 : f32 to vector<64x64xf32>
    %188 = arith.addf %186, %187 : vector<64x64xf32>
    %189 = arith.divf %173, %188 : vector<64x64xf32>
    %c3_105 = arith.constant 3 : index
    %190 = memref.load %arg4[%c3_105] : memref<4xf32, #tpu.memory_space<smem>>
    %cst_106 = arith.constant 0.000000e+00 : f32
    %191 = arith.subf %cst_106, %190 : f32
    %192 = vector.broadcast %191 : f32 to vector<64x64xf32>
    %193 = arith.mulf %192, %65 : vector<64x64xf32>
    %194 = math.exp %193 : vector<64x64xf32>
    %cst_107 = arith.constant dense<0.000000e+00> : vector<64xf32>
    %195 = vector.multi_reduction <add>, %194, %cst_107 [1] : vector<64x64xf32> to vector<64xf32>
    %196 = vector.shape_cast %195 : vector<64xf32> to vector<64x1xf32>
    %197 = vector.broadcast %196 : vector<64x1xf32> to vector<64x64xf32>
    %198 = arith.divf %194, %197 : vector<64x64xf32>
    %199 = arith.mulf %189, %198 : vector<64x64xf32>
    %200 = arith.truncf %199 : vector<64x64xf32> to vector<64x64xbf16>
    %cst_108 = arith.constant dense<0.000000e+00> : vector<64x32xf32>
    %201 = tpu.matmul %200, %170, %cst_108 {dimension_numbers = #tpu.dot_dimension_numbers<[1], [0], [0], [1], [0, 0, 1, 1], [], []>} : vector<64x64xbf16>, vector<64x32xbf16>, vector<64x32xf32> -> vector<64x32xf32>
    %202 = tpu.concatenate %99, %133, %167, %201 in 1 : vector<64x32xf32>, vector<64x32xf32>, vector<64x32xf32>, vector<64x32xf32> -> vector<64x128xf32>
    %203 = arith.truncf %202 : vector<64x128xf32> to vector<64x128xbf16>
    %c0_109 = arith.constant 0 : index
    %c0_110 = arith.constant 0 : index
    %c0_111 = arith.constant 0 : index
    %204 = vector.load %arg5[%c0_109, %c0_110, %c0_111] : memref<1x64x128xbf16, #tpu.memory_space<vmem>>, vector<1x64x128xbf16>
    %205 = vector.shape_cast %204 : vector<1x64x128xbf16> to vector<64x128xbf16>
    %206 = vector.shape_cast %203 : vector<64x128xbf16> to vector<1x64x128xbf16>
    tpu.vector_store %arg5[%c0_109, %c0_110, %c0_111], %206 {strides = array<i32>} : memref<1x64x128xbf16, #tpu.memory_space<vmem>>, vector<1x64x128xbf16>,
    return
  }
  func.func @transform_0(%arg0: i32) -> (i32, i32, i32, i32) {
    %c0_i32 = arith.constant 0 : i32
    %c0_i32_0 = arith.constant 0 : i32
    %c0_i32_1 = arith.constant 0 : i32
    %c0_i32_2 = arith.constant 0 : i32
    return %arg0, %c0_i32, %c0_i32_0, %c0_i32_1 : i32, i32, i32, i32
  }
  func.func @transform_1(%arg0: i32) -> (i32, i32, i32) {
    %c0_i32 = arith.constant 0 : i32
    %c0_i32_0 = arith.constant 0 : i32
    %c0_i32_1 = arith.constant 0 : i32
    %c0_i32_2 = arith.constant 0 : i32
    return %c0_i32, %c0_i32_0, %c0_i32_1 : i32, i32, i32
  }
  func.func @transform_2(%arg0: i32) -> (i32, i32) {
    %c0_i32 = arith.constant 0 : i32
    %c0_i32_0 = arith.constant 0 : i32
    %c0_i32_1 = arith.constant 0 : i32
    return %c0_i32, %c0_i32_0 : i32, i32
  }
  func.func @transform_3(%arg0: i32) -> i32 {
    %c0_i32 = arith.constant 0 : i32
    %c0_i32_0 = arith.constant 0 : i32
    return %c0_i32 : i32
  }
  func.func @transform_4(%arg0: i32) -> (i32, i32, i32) {
    %c0_i32 = arith.constant 0 : i32
    %c0_i32_0 = arith.constant 0 : i32
    %c0_i32_1 = arith.constant 0 : i32
    return %arg0, %c0_i32, %c0_i32_0 : i32, i32, i32
  }
}

module attributes {stable_mosaic.version = 11 : i64} {
  func.func @_out_ff_kernel(%arg0: i32, %arg1: memref<128x128xbf16, #tpu.memory_space<vmem>>, %arg2: memref<128x32xbf16, #tpu.memory_space<vmem>>, %arg3: memref<1x32xf32, #tpu.memory_space<vmem>>, %arg4: memref<1x32xf32, #tpu.memory_space<vmem>>, %arg5: memref<128x32xf32, #tpu.memory_space<vmem>>, %arg6: memref<32x64xbf16, #tpu.memory_space<vmem>>, %arg7: memref<1x64xf32, #tpu.memory_space<vmem>>, %arg8: memref<1x64xf32, #tpu.memory_space<vmem>>, %arg9: memref<64x32xbf16, #tpu.memory_space<vmem>>, %arg10: memref<1x32xf32, #tpu.memory_space<vmem>>, %arg11: memref<1x32xf32, #tpu.memory_space<vmem>>, %arg12: memref<128x32xf32, #tpu.memory_space<vmem>>) attributes {dimension_semantics = [#tpu.dimension_semantics<arbitrary>], iteration_bounds = array<i64: 1>, scalar_prefetch = 0 : i64, scratch_operands = 0 : i64, tpu.core_type = #tpu.core_type<tc>, window_params = [{pipeline_mode = #tpu.pipeline_mode<synchronous>, transform_indices = @transform_0, window_bounds = array<i64: 128, 128>}, {pipeline_mode = #tpu.pipeline_mode<synchronous>, transform_indices = @transform_1, window_bounds = array<i64: 128, 32>}, {pipeline_mode = #tpu.pipeline_mode<synchronous>, transform_indices = @transform_2, window_bounds = array<i64: 1, 32>}, {pipeline_mode = #tpu.pipeline_mode<synchronous>, transform_indices = @transform_3, window_bounds = array<i64: 1, 32>}, {pipeline_mode = #tpu.pipeline_mode<synchronous>, transform_indices = @transform_4, window_bounds = array<i64: 128, 32>}, {pipeline_mode = #tpu.pipeline_mode<synchronous>, transform_indices = @transform_5, window_bounds = array<i64: 32, 64>}, {pipeline_mode = #tpu.pipeline_mode<synchronous>, transform_indices = @transform_6, window_bounds = array<i64: 1, 64>}, {pipeline_mode = #tpu.pipeline_mode<synchronous>, transform_indices = @transform_7, window_bounds = array<i64: 1, 64>}, {pipeline_mode = #tpu.pipeline_mode<synchronous>, transform_indices = @transform_8, window_bounds = array<i64: 64, 32>}, {pipeline_mode = #tpu.pipeline_mode<synchronous>, transform_indices = @transform_9, window_bounds = array<i64: 1, 32>}, {pipeline_mode = #tpu.pipeline_mode<synchronous>, transform_indices = @transform_10, window_bounds = array<i64: 1, 32>}, {pipeline_mode = #tpu.pipeline_mode<synchronous>, transform_indices = @transform_11, window_bounds = array<i64: 128, 32>}]} {
    %c0 = arith.constant 0 : index
    %c0_0 = arith.constant 0 : index
    %0 = vector.load %arg1[%c0, %c0_0] : memref<128x128xbf16, #tpu.memory_space<vmem>>, vector<128x128xbf16>
    %c0_1 = arith.constant 0 : index
    %c0_2 = arith.constant 0 : index
    %1 = vector.load %arg2[%c0_1, %c0_2] : memref<128x32xbf16, #tpu.memory_space<vmem>>, vector<128x32xbf16>
    %cst = arith.constant dense<0.000000e+00> : vector<128x32xf32>
    %2 = tpu.matmul %0, %1, %cst {dimension_numbers = #tpu.dot_dimension_numbers<[1], [0], [0], [1], [0, 0, 1, 1], [], []>} : vector<128x128xbf16>, vector<128x32xbf16>, vector<128x32xf32> -> vector<128x32xf32>
    %c0_3 = arith.constant 0 : index
    %c0_4 = arith.constant 0 : index
    %3 = vector.load %arg3[%c0_3, %c0_4] : memref<1x32xf32, #tpu.memory_space<vmem>>, vector<1x32xf32>
    %c0_5 = arith.constant 0 : index
    %c0_6 = arith.constant 0 : index
    %4 = vector.load %arg4[%c0_5, %c0_6] : memref<1x32xf32, #tpu.memory_space<vmem>>, vector<1x32xf32>
    %cst_7 = arith.constant dense<0.000000e+00> : vector<32xf32>
    %5 = vector.multi_reduction <add>, %2, %cst_7 [0] : vector<128x32xf32> to vector<32xf32>
    %6 = vector.shape_cast %5 : vector<32xf32> to vector<1x32xf32>
    %cst_8 = arith.constant 1.280000e+02 : f32
    %7 = vector.broadcast %cst_8 : f32 to vector<1x32xf32>
    %8 = arith.divf %6, %7 : vector<1x32xf32>
    %9 = vector.broadcast %8 : vector<1x32xf32> to vector<128x32xf32>
    %10 = arith.subf %2, %9 : vector<128x32xf32>
    %11 = arith.mulf %10, %10 : vector<128x32xf32>
    %cst_9 = arith.constant dense<0.000000e+00> : vector<32xf32>
    %12 = vector.multi_reduction <add>, %11, %cst_9 [0] : vector<128x32xf32> to vector<32xf32>
    %13 = vector.shape_cast %12 : vector<32xf32> to vector<1x32xf32>
    %cst_10 = arith.constant 1.280000e+02 : f32
    %14 = vector.broadcast %cst_10 : f32 to vector<1x32xf32>
    %15 = arith.divf %13, %14 : vector<1x32xf32>
    %16 = vector.broadcast %8 : vector<1x32xf32> to vector<128x32xf32>
    %17 = arith.subf %2, %16 : vector<128x32xf32>
    %cst_11 = arith.constant 9.99999974E-6 : f32
    %18 = vector.broadcast %cst_11 : f32 to vector<1x32xf32>
    %19 = arith.addf %15, %18 : vector<1x32xf32>
    %20 = math.rsqrt %19 : vector<1x32xf32>
    %21 = vector.broadcast %20 : vector<1x32xf32> to vector<128x32xf32>
    %22 = arith.mulf %17, %21 : vector<128x32xf32>
    %23 = vector.broadcast %3 : vector<1x32xf32> to vector<128x32xf32>
    %24 = arith.mulf %22, %23 : vector<128x32xf32>
    %25 = vector.broadcast %4 : vector<1x32xf32> to vector<128x32xf32>
    %26 = arith.addf %24, %25 : vector<128x32xf32>
    %cst_12 = arith.constant 0.000000e+00 : f32
    %27 = vector.broadcast %cst_12 : f32 to vector<128x32xf32>
    %28 = arith.maximumf %26, %27 : vector<128x32xf32>
    %c0_13 = arith.constant 0 : index
    %c0_14 = arith.constant 0 : index
    %29 = vector.load %arg5[%c0_13, %c0_14] : memref<128x32xf32, #tpu.memory_space<vmem>>, vector<128x32xf32>
    %30 = arith.addf %28, %29 : vector<128x32xf32>
    %31 = arith.truncf %30 : vector<128x32xf32> to vector<128x32xbf16>
    %c0_15 = arith.constant 0 : index
    %c0_16 = arith.constant 0 : index
    %32 = vector.load %arg6[%c0_15, %c0_16] : memref<32x64xbf16, #tpu.memory_space<vmem>>, vector<32x64xbf16>
    %cst_17 = arith.constant dense<0.000000e+00> : vector<128x64xf32>
    %33 = tpu.matmul %31, %32, %cst_17 {dimension_numbers = #tpu.dot_dimension_numbers<[1], [0], [0], [1], [0, 0, 1, 1], [], []>} : vector<128x32xbf16>, vector<32x64xbf16>, vector<128x64xf32> -> vector<128x64xf32>
    %c0_18 = arith.constant 0 : index
    %c0_19 = arith.constant 0 : index
    %34 = vector.load %arg7[%c0_18, %c0_19] : memref<1x64xf32, #tpu.memory_space<vmem>>, vector<1x64xf32>
    %c0_20 = arith.constant 0 : index
    %c0_21 = arith.constant 0 : index
    %35 = vector.load %arg8[%c0_20, %c0_21] : memref<1x64xf32, #tpu.memory_space<vmem>>, vector<1x64xf32>
    %cst_22 = arith.constant dense<0.000000e+00> : vector<64xf32>
    %36 = vector.multi_reduction <add>, %33, %cst_22 [0] : vector<128x64xf32> to vector<64xf32>
    %37 = vector.shape_cast %36 : vector<64xf32> to vector<1x64xf32>
    %cst_23 = arith.constant 1.280000e+02 : f32
    %38 = vector.broadcast %cst_23 : f32 to vector<1x64xf32>
    %39 = arith.divf %37, %38 : vector<1x64xf32>
    %40 = vector.broadcast %39 : vector<1x64xf32> to vector<128x64xf32>
    %41 = arith.subf %33, %40 : vector<128x64xf32>
    %42 = arith.mulf %41, %41 : vector<128x64xf32>
    %cst_24 = arith.constant dense<0.000000e+00> : vector<64xf32>
    %43 = vector.multi_reduction <add>, %42, %cst_24 [0] : vector<128x64xf32> to vector<64xf32>
    %44 = vector.shape_cast %43 : vector<64xf32> to vector<1x64xf32>
    %cst_25 = arith.constant 1.280000e+02 : f32
    %45 = vector.broadcast %cst_25 : f32 to vector<1x64xf32>
    %46 = arith.divf %44, %45 : vector<1x64xf32>
    %47 = vector.broadcast %39 : vector<1x64xf32> to vector<128x64xf32>
    %48 = arith.subf %33, %47 : vector<128x64xf32>
    %cst_26 = arith.constant 9.99999974E-6 : f32
    %49 = vector.broadcast %cst_26 : f32 to vector<1x64xf32>
    %50 = arith.addf %46, %49 : vector<1x64xf32>
    %51 = math.rsqrt %50 : vector<1x64xf32>
    %52 = vector.broadcast %51 : vector<1x64xf32> to vector<128x64xf32>
    %53 = arith.mulf %48, %52 : vector<128x64xf32>
    %54 = vector.broadcast %34 : vector<1x64xf32> to vector<128x64xf32>
    %55 = arith.mulf %53, %54 : vector<128x64xf32>
    %56 = vector.broadcast %35 : vector<1x64xf32> to vector<128x64xf32>
    %57 = arith.addf %55, %56 : vector<128x64xf32>
    %cst_27 = arith.constant 0.000000e+00 : f32
    %58 = vector.broadcast %cst_27 : f32 to vector<128x64xf32>
    %59 = arith.maximumf %57, %58 : vector<128x64xf32>
    %60 = arith.truncf %59 : vector<128x64xf32> to vector<128x64xbf16>
    %c0_28 = arith.constant 0 : index
    %c0_29 = arith.constant 0 : index
    %61 = vector.load %arg9[%c0_28, %c0_29] : memref<64x32xbf16, #tpu.memory_space<vmem>>, vector<64x32xbf16>
    %cst_30 = arith.constant dense<0.000000e+00> : vector<128x32xf32>
    %62 = tpu.matmul %60, %61, %cst_30 {dimension_numbers = #tpu.dot_dimension_numbers<[1], [0], [0], [1], [0, 0, 1, 1], [], []>} : vector<128x64xbf16>, vector<64x32xbf16>, vector<128x32xf32> -> vector<128x32xf32>
    %c0_31 = arith.constant 0 : index
    %c0_32 = arith.constant 0 : index
    %63 = vector.load %arg10[%c0_31, %c0_32] : memref<1x32xf32, #tpu.memory_space<vmem>>, vector<1x32xf32>
    %c0_33 = arith.constant 0 : index
    %c0_34 = arith.constant 0 : index
    %64 = vector.load %arg11[%c0_33, %c0_34] : memref<1x32xf32, #tpu.memory_space<vmem>>, vector<1x32xf32>
    %cst_35 = arith.constant dense<0.000000e+00> : vector<32xf32>
    %65 = vector.multi_reduction <add>, %62, %cst_35 [0] : vector<128x32xf32> to vector<32xf32>
    %66 = vector.shape_cast %65 : vector<32xf32> to vector<1x32xf32>
    %cst_36 = arith.constant 1.280000e+02 : f32
    %67 = vector.broadcast %cst_36 : f32 to vector<1x32xf32>
    %68 = arith.divf %66, %67 : vector<1x32xf32>
    %69 = vector.broadcast %68 : vector<1x32xf32> to vector<128x32xf32>
    %70 = arith.subf %62, %69 : vector<128x32xf32>
    %71 = arith.mulf %70, %70 : vector<128x32xf32>
    %cst_37 = arith.constant dense<0.000000e+00> : vector<32xf32>
    %72 = vector.multi_reduction <add>, %71, %cst_37 [0] : vector<128x32xf32> to vector<32xf32>
    %73 = vector.shape_cast %72 : vector<32xf32> to vector<1x32xf32>
    %cst_38 = arith.constant 1.280000e+02 : f32
    %74 = vector.broadcast %cst_38 : f32 to vector<1x32xf32>
    %75 = arith.divf %73, %74 : vector<1x32xf32>
    %76 = vector.broadcast %68 : vector<1x32xf32> to vector<128x32xf32>
    %77 = arith.subf %62, %76 : vector<128x32xf32>
    %cst_39 = arith.constant 9.99999974E-6 : f32
    %78 = vector.broadcast %cst_39 : f32 to vector<1x32xf32>
    %79 = arith.addf %75, %78 : vector<1x32xf32>
    %80 = math.rsqrt %79 : vector<1x32xf32>
    %81 = vector.broadcast %80 : vector<1x32xf32> to vector<128x32xf32>
    %82 = arith.mulf %77, %81 : vector<128x32xf32>
    %83 = vector.broadcast %63 : vector<1x32xf32> to vector<128x32xf32>
    %84 = arith.mulf %82, %83 : vector<128x32xf32>
    %85 = vector.broadcast %64 : vector<1x32xf32> to vector<128x32xf32>
    %86 = arith.addf %84, %85 : vector<128x32xf32>
    %cst_40 = arith.constant 0.000000e+00 : f32
    %87 = vector.broadcast %cst_40 : f32 to vector<128x32xf32>
    %88 = arith.maximumf %86, %87 : vector<128x32xf32>
    %89 = arith.addf %88, %30 : vector<128x32xf32>
    %c0_41 = arith.constant 0 : index
    %c0_42 = arith.constant 0 : index
    %90 = vector.load %arg12[%c0_41, %c0_42] : memref<128x32xf32, #tpu.memory_space<vmem>>, vector<128x32xf32>
    tpu.vector_store %arg12[%c0_41, %c0_42], %89 {strides = array<i32>} : memref<128x32xf32, #tpu.memory_space<vmem>>, vector<128x32xf32>,
    return
  }
  func.func @transform_0(%arg0: i32) -> (i32, i32) {
    %c0_i32 = arith.constant 0 : i32
    %c0_i32_0 = arith.constant 0 : i32
    %c0_i32_1 = arith.constant 0 : i32
    return %c0_i32, %c0_i32_0 : i32, i32
  }
  func.func @transform_1(%arg0: i32) -> (i32, i32) {
    %c0_i32 = arith.constant 0 : i32
    %c0_i32_0 = arith.constant 0 : i32
    %c0_i32_1 = arith.constant 0 : i32
    return %c0_i32, %c0_i32_0 : i32, i32
  }
  func.func @transform_2(%arg0: i32) -> (i32, i32) {
    %c0_i32 = arith.constant 0 : i32
    %c0_i32_0 = arith.constant 0 : i32
    %c0_i32_1 = arith.constant 0 : i32
    return %c0_i32, %c0_i32_0 : i32, i32
  }
  func.func @transform_3(%arg0: i32) -> (i32, i32) {
    %c0_i32 = arith.constant 0 : i32
    %c0_i32_0 = arith.constant 0 : i32
    %c0_i32_1 = arith.constant 0 : i32
    return %c0_i32, %c0_i32_0 : i32, i32
  }
  func.func @transform_4(%arg0: i32) -> (i32, i32) {
    %c0_i32 = arith.constant 0 : i32
    %c0_i32_0 = arith.constant 0 : i32
    %c0_i32_1 = arith.constant 0 : i32
    return %c0_i32, %c0_i32_0 : i32, i32
  }
  func.func @transform_5(%arg0: i32) -> (i32, i32) {
    %c0_i32 = arith.constant 0 : i32
    %c0_i32_0 = arith.constant 0 : i32
    %c0_i32_1 = arith.constant 0 : i32
    return %c0_i32, %c0_i32_0 : i32, i32
  }
  func.func @transform_6(%arg0: i32) -> (i32, i32) {
    %c0_i32 = arith.constant 0 : i32
    %c0_i32_0 = arith.constant 0 : i32
    %c0_i32_1 = arith.constant 0 : i32
    return %c0_i32, %c0_i32_0 : i32, i32
  }
  func.func @transform_7(%arg0: i32) -> (i32, i32) {
    %c0_i32 = arith.constant 0 : i32
    %c0_i32_0 = arith.constant 0 : i32
    %c0_i32_1 = arith.constant 0 : i32
    return %c0_i32, %c0_i32_0 : i32, i32
  }
  func.func @transform_8(%arg0: i32) -> (i32, i32) {
    %c0_i32 = arith.constant 0 : i32
    %c0_i32_0 = arith.constant 0 : i32
    %c0_i32_1 = arith.constant 0 : i32
    return %c0_i32, %c0_i32_0 : i32, i32
  }
  func.func @transform_9(%arg0: i32) -> (i32, i32) {
    %c0_i32 = arith.constant 0 : i32
    %c0_i32_0 = arith.constant 0 : i32
    %c0_i32_1 = arith.constant 0 : i32
    return %c0_i32, %c0_i32_0 : i32, i32
  }
  func.func @transform_10(%arg0: i32) -> (i32, i32) {
    %c0_i32 = arith.constant 0 : i32
    %c0_i32_0 = arith.constant 0 : i32
    %c0_i32_1 = arith.constant 0 : i32
    return %c0_i32, %c0_i32_0 : i32, i32
  }
  func.func @transform_11(%arg0: i32) -> (i32, i32) {
    %c0_i32 = arith.constant 0 : i32
    %c0_i32_0 = arith.constant 0 : i32
    %c0_i32_1 = arith.constant 0 : i32
    return %c0_i32, %c0_i32_0 : i32, i32
  }
}

module attributes {stable_mosaic.version = 11 : i64} {
  func.func @_out_ff_kernel(%arg0: i32, %arg1: memref<128x128xbf16, #tpu.memory_space<vmem>>, %arg2: memref<128x32xbf16, #tpu.memory_space<vmem>>, %arg3: memref<1x32xf32, #tpu.memory_space<vmem>>, %arg4: memref<1x32xf32, #tpu.memory_space<vmem>>, %arg5: memref<128x32xf32, #tpu.memory_space<vmem>>, %arg6: memref<32x64xbf16, #tpu.memory_space<vmem>>, %arg7: memref<1x64xf32, #tpu.memory_space<vmem>>, %arg8: memref<1x64xf32, #tpu.memory_space<vmem>>, %arg9: memref<64x32xbf16, #tpu.memory_space<vmem>>, %arg10: memref<1x32xf32, #tpu.memory_space<vmem>>, %arg11: memref<1x32xf32, #tpu.memory_space<vmem>>, %arg12: memref<128x32xf32, #tpu.memory_space<vmem>>) attributes {dimension_semantics = [#tpu.dimension_semantics<arbitrary>], iteration_bounds = array<i64: 1>, scalar_prefetch = 0 : i64, scratch_operands = 0 : i64, tpu.core_type = #tpu.core_type<tc>, window_params = [{pipeline_mode = #tpu.pipeline_mode<synchronous>, transform_indices = @transform_0, window_bounds = array<i64: 128, 128>}, {pipeline_mode = #tpu.pipeline_mode<synchronous>, transform_indices = @transform_1, window_bounds = array<i64: 128, 32>}, {pipeline_mode = #tpu.pipeline_mode<synchronous>, transform_indices = @transform_2, window_bounds = array<i64: 1, 32>}, {pipeline_mode = #tpu.pipeline_mode<synchronous>, transform_indices = @transform_3, window_bounds = array<i64: 1, 32>}, {pipeline_mode = #tpu.pipeline_mode<synchronous>, transform_indices = @transform_4, window_bounds = array<i64: 128, 32>}, {pipeline_mode = #tpu.pipeline_mode<synchronous>, transform_indices = @transform_5, window_bounds = array<i64: 32, 64>}, {pipeline_mode = #tpu.pipeline_mode<synchronous>, transform_indices = @transform_6, window_bounds = array<i64: 1, 64>}, {pipeline_mode = #tpu.pipeline_mode<synchronous>, transform_indices = @transform_7, window_bounds = array<i64: 1, 64>}, {pipeline_mode = #tpu.pipeline_mode<synchronous>, transform_indices = @transform_8, window_bounds = array<i64: 64, 32>}, {pipeline_mode = #tpu.pipeline_mode<synchronous>, transform_indices = @transform_9, window_bounds = array<i64: 1, 32>}, {pipeline_mode = #tpu.pipeline_mode<synchronous>, transform_indices = @transform_10, window_bounds = array<i64: 1, 32>}, {pipeline_mode = #tpu.pipeline_mode<synchronous>, transform_indices = @transform_11, window_bounds = array<i64: 128, 32>}]} {
    %c0 = arith.constant 0 : index
    %c0_0 = arith.constant 0 : index
    %0 = vector.load %arg1[%c0, %c0_0] : memref<128x128xbf16, #tpu.memory_space<vmem>>, vector<128x128xbf16>
    %c0_1 = arith.constant 0 : index
    %c0_2 = arith.constant 0 : index
    %1 = vector.load %arg2[%c0_1, %c0_2] : memref<128x32xbf16, #tpu.memory_space<vmem>>, vector<128x32xbf16>
    %cst = arith.constant dense<0.000000e+00> : vector<128x32xf32>
    %2 = tpu.matmul %0, %1, %cst {dimension_numbers = #tpu.dot_dimension_numbers<[1], [0], [0], [1], [0, 0, 1, 1], [], []>} : vector<128x128xbf16>, vector<128x32xbf16>, vector<128x32xf32> -> vector<128x32xf32>
    %c0_3 = arith.constant 0 : index
    %c0_4 = arith.constant 0 : index
    %3 = vector.load %arg3[%c0_3, %c0_4] : memref<1x32xf32, #tpu.memory_space<vmem>>, vector<1x32xf32>
    %c0_5 = arith.constant 0 : index
    %c0_6 = arith.constant 0 : index
    %4 = vector.load %arg4[%c0_5, %c0_6] : memref<1x32xf32, #tpu.memory_space<vmem>>, vector<1x32xf32>
    %cst_7 = arith.constant dense<0.000000e+00> : vector<32xf32>
    %5 = vector.multi_reduction <add>, %2, %cst_7 [0] : vector<128x32xf32> to vector<32xf32>
    %6 = vector.shape_cast %5 : vector<32xf32> to vector<1x32xf32>
    %cst_8 = arith.constant 1.280000e+02 : f32
    %7 = vector.broadcast %cst_8 : f32 to vector<1x32xf32>
    %8 = arith.divf %6, %7 : vector<1x32xf32>
    %9 = vector.broadcast %8 : vector<1x32xf32> to vector<128x32xf32>
    %10 = arith.subf %2, %9 : vector<128x32xf32>
    %11 = arith.mulf %10, %10 : vector<128x32xf32>
    %cst_9 = arith.constant dense<0.000000e+00> : vector<32xf32>
    %12 = vector.multi_reduction <add>, %11, %cst_9 [0] : vector<128x32xf32> to vector<32xf32>
    %13 = vector.shape_cast %12 : vector<32xf32> to vector<1x32xf32>
    %cst_10 = arith.constant 1.280000e+02 : f32
    %14 = vector.broadcast %cst_10 : f32 to vector<1x32xf32>
    %15 = arith.divf %13, %14 : vector<1x32xf32>
    %16 = vector.broadcast %8 : vector<1x32xf32> to vector<128x32xf32>
    %17 = arith.subf %2, %16 : vector<128x32xf32>
    %cst_11 = arith.constant 9.99999974E-6 : f32
    %18 = vector.broadcast %cst_11 : f32 to vector<1x32xf32>
    %19 = arith.addf %15, %18 : vector<1x32xf32>
    %20 = math.rsqrt %19 : vector<1x32xf32>
    %21 = vector.broadcast %20 : vector<1x32xf32> to vector<128x32xf32>
    %22 = arith.mulf %17, %21 : vector<128x32xf32>
    %23 = vector.broadcast %3 : vector<1x32xf32> to vector<128x32xf32>
    %24 = arith.mulf %22, %23 : vector<128x32xf32>
    %25 = vector.broadcast %4 : vector<1x32xf32> to vector<128x32xf32>
    %26 = arith.addf %24, %25 : vector<128x32xf32>
    %cst_12 = arith.constant 0.000000e+00 : f32
    %27 = vector.broadcast %cst_12 : f32 to vector<128x32xf32>
    %28 = arith.maximumf %26, %27 : vector<128x32xf32>
    %c0_13 = arith.constant 0 : index
    %c0_14 = arith.constant 0 : index
    %29 = vector.load %arg5[%c0_13, %c0_14] : memref<128x32xf32, #tpu.memory_space<vmem>>, vector<128x32xf32>
    %30 = arith.addf %28, %29 : vector<128x32xf32>
    %31 = arith.truncf %30 : vector<128x32xf32> to vector<128x32xbf16>
    %c0_15 = arith.constant 0 : index
    %c0_16 = arith.constant 0 : index
    %32 = vector.load %arg6[%c0_15, %c0_16] : memref<32x64xbf16, #tpu.memory_space<vmem>>, vector<32x64xbf16>
    %cst_17 = arith.constant dense<0.000000e+00> : vector<128x64xf32>
    %33 = tpu.matmul %31, %32, %cst_17 {dimension_numbers = #tpu.dot_dimension_numbers<[1], [0], [0], [1], [0, 0, 1, 1], [], []>} : vector<128x32xbf16>, vector<32x64xbf16>, vector<128x64xf32> -> vector<128x64xf32>
    %c0_18 = arith.constant 0 : index
    %c0_19 = arith.constant 0 : index
    %34 = vector.load %arg7[%c0_18, %c0_19] : memref<1x64xf32, #tpu.memory_space<vmem>>, vector<1x64xf32>
    %c0_20 = arith.constant 0 : index
    %c0_21 = arith.constant 0 : index
    %35 = vector.load %arg8[%c0_20, %c0_21] : memref<1x64xf32, #tpu.memory_space<vmem>>, vector<1x64xf32>
    %cst_22 = arith.constant dense<0.000000e+00> : vector<64xf32>
    %36 = vector.multi_reduction <add>, %33, %cst_22 [0] : vector<128x64xf32> to vector<64xf32>
    %37 = vector.shape_cast %36 : vector<64xf32> to vector<1x64xf32>
    %cst_23 = arith.constant 1.280000e+02 : f32
    %38 = vector.broadcast %cst_23 : f32 to vector<1x64xf32>
    %39 = arith.divf %37, %38 : vector<1x64xf32>
    %40 = vector.broadcast %39 : vector<1x64xf32> to vector<128x64xf32>
    %41 = arith.subf %33, %40 : vector<128x64xf32>
    %42 = arith.mulf %41, %41 : vector<128x64xf32>
    %cst_24 = arith.constant dense<0.000000e+00> : vector<64xf32>
    %43 = vector.multi_reduction <add>, %42, %cst_24 [0] : vector<128x64xf32> to vector<64xf32>
    %44 = vector.shape_cast %43 : vector<64xf32> to vector<1x64xf32>
    %cst_25 = arith.constant 1.280000e+02 : f32
    %45 = vector.broadcast %cst_25 : f32 to vector<1x64xf32>
    %46 = arith.divf %44, %45 : vector<1x64xf32>
    %47 = vector.broadcast %39 : vector<1x64xf32> to vector<128x64xf32>
    %48 = arith.subf %33, %47 : vector<128x64xf32>
    %cst_26 = arith.constant 9.99999974E-6 : f32
    %49 = vector.broadcast %cst_26 : f32 to vector<1x64xf32>
    %50 = arith.addf %46, %49 : vector<1x64xf32>
    %51 = math.rsqrt %50 : vector<1x64xf32>
    %52 = vector.broadcast %51 : vector<1x64xf32> to vector<128x64xf32>
    %53 = arith.mulf %48, %52 : vector<128x64xf32>
    %54 = vector.broadcast %34 : vector<1x64xf32> to vector<128x64xf32>
    %55 = arith.mulf %53, %54 : vector<128x64xf32>
    %56 = vector.broadcast %35 : vector<1x64xf32> to vector<128x64xf32>
    %57 = arith.addf %55, %56 : vector<128x64xf32>
    %cst_27 = arith.constant 0.000000e+00 : f32
    %58 = vector.broadcast %cst_27 : f32 to vector<128x64xf32>
    %59 = arith.maximumf %57, %58 : vector<128x64xf32>
    %60 = arith.truncf %59 : vector<128x64xf32> to vector<128x64xbf16>
    %c0_28 = arith.constant 0 : index
    %c0_29 = arith.constant 0 : index
    %61 = vector.load %arg9[%c0_28, %c0_29] : memref<64x32xbf16, #tpu.memory_space<vmem>>, vector<64x32xbf16>
    %cst_30 = arith.constant dense<0.000000e+00> : vector<128x32xf32>
    %62 = tpu.matmul %60, %61, %cst_30 {dimension_numbers = #tpu.dot_dimension_numbers<[1], [0], [0], [1], [0, 0, 1, 1], [], []>} : vector<128x64xbf16>, vector<64x32xbf16>, vector<128x32xf32> -> vector<128x32xf32>
    %c0_31 = arith.constant 0 : index
    %c0_32 = arith.constant 0 : index
    %63 = vector.load %arg10[%c0_31, %c0_32] : memref<1x32xf32, #tpu.memory_space<vmem>>, vector<1x32xf32>
    %c0_33 = arith.constant 0 : index
    %c0_34 = arith.constant 0 : index
    %64 = vector.load %arg11[%c0_33, %c0_34] : memref<1x32xf32, #tpu.memory_space<vmem>>, vector<1x32xf32>
    %cst_35 = arith.constant dense<0.000000e+00> : vector<32xf32>
    %65 = vector.multi_reduction <add>, %62, %cst_35 [0] : vector<128x32xf32> to vector<32xf32>
    %66 = vector.shape_cast %65 : vector<32xf32> to vector<1x32xf32>
    %cst_36 = arith.constant 1.280000e+02 : f32
    %67 = vector.broadcast %cst_36 : f32 to vector<1x32xf32>
    %68 = arith.divf %66, %67 : vector<1x32xf32>
    %69 = vector.broadcast %68 : vector<1x32xf32> to vector<128x32xf32>
    %70 = arith.subf %62, %69 : vector<128x32xf32>
    %71 = arith.mulf %70, %70 : vector<128x32xf32>
    %cst_37 = arith.constant dense<0.000000e+00> : vector<32xf32>
    %72 = vector.multi_reduction <add>, %71, %cst_37 [0] : vector<128x32xf32> to vector<32xf32>
    %73 = vector.shape_cast %72 : vector<32xf32> to vector<1x32xf32>
    %cst_38 = arith.constant 1.280000e+02 : f32
    %74 = vector.broadcast %cst_38 : f32 to vector<1x32xf32>
    %75 = arith.divf %73, %74 : vector<1x32xf32>
    %76 = vector.broadcast %68 : vector<1x32xf32> to vector<128x32xf32>
    %77 = arith.subf %62, %76 : vector<128x32xf32>
    %cst_39 = arith.constant 9.99999974E-6 : f32
    %78 = vector.broadcast %cst_39 : f32 to vector<1x32xf32>
    %79 = arith.addf %75, %78 : vector<1x32xf32>
    %80 = math.rsqrt %79 : vector<1x32xf32>
    %81 = vector.broadcast %80 : vector<1x32xf32> to vector<128x32xf32>
    %82 = arith.mulf %77, %81 : vector<128x32xf32>
    %83 = vector.broadcast %63 : vector<1x32xf32> to vector<128x32xf32>
    %84 = arith.mulf %82, %83 : vector<128x32xf32>
    %85 = vector.broadcast %64 : vector<1x32xf32> to vector<128x32xf32>
    %86 = arith.addf %84, %85 : vector<128x32xf32>
    %cst_40 = arith.constant 0.000000e+00 : f32
    %87 = vector.broadcast %cst_40 : f32 to vector<128x32xf32>
    %88 = arith.maximumf %86, %87 : vector<128x32xf32>
    %89 = arith.addf %88, %30 : vector<128x32xf32>
    %c0_41 = arith.constant 0 : index
    %c0_42 = arith.constant 0 : index
    %90 = vector.load %arg12[%c0_41, %c0_42] : memref<128x32xf32, #tpu.memory_space<vmem>>, vector<128x32xf32>
    tpu.vector_store %arg12[%c0_41, %c0_42], %89 {strides = array<i32>} : memref<128x32xf32, #tpu.memory_space<vmem>>, vector<128x32xf32>,
    return
  }
  func.func @transform_0(%arg0: i32) -> (i32, i32) {
    %c0_i32 = arith.constant 0 : i32
    %c0_i32_0 = arith.constant 0 : i32
    %c0_i32_1 = arith.constant 0 : i32
    return %c0_i32, %c0_i32_0 : i32, i32
  }
  func.func @transform_1(%arg0: i32) -> (i32, i32) {
    %c0_i32 = arith.constant 0 : i32
    %c0_i32_0 = arith.constant 0 : i32
    %c0_i32_1 = arith.constant 0 : i32
    return %c0_i32, %c0_i32_0 : i32, i32
  }
  func.func @transform_2(%arg0: i32) -> (i32, i32) {
    %c0_i32 = arith.constant 0 : i32
    %c0_i32_0 = arith.constant 0 : i32
    %c0_i32_1 = arith.constant 0 : i32
    return %c0_i32, %c0_i32_0 : i32, i32
  }
  func.func @transform_3(%arg0: i32) -> (i32, i32) {
    %c0_i32 = arith.constant 0 : i32
    %c0_i32_0 = arith.constant 0 : i32
    %c0_i32_1 = arith.constant 0 : i32
    return %c0_i32, %c0_i32_0 : i32, i32
  }
  func.func @transform_4(%arg0: i32) -> (i32, i32) {
    %c0_i32 = arith.constant 0 : i32
    %c0_i32_0 = arith.constant 0 : i32
    %c0_i32_1 = arith.constant 0 : i32
    return %c0_i32, %c0_i32_0 : i32, i32
  }
  func.func @transform_5(%arg0: i32) -> (i32, i32) {
    %c0_i32 = arith.constant 0 : i32
    %c0_i32_0 = arith.constant 0 : i32
    %c0_i32_1 = arith.constant 0 : i32
    return %c0_i32, %c0_i32_0 : i32, i32
  }
  func.func @transform_6(%arg0: i32) -> (i32, i32) {
    %c0_i32 = arith.constant 0 : i32
    %c0_i32_0 = arith.constant 0 : i32
    %c0_i32_1 = arith.constant 0 : i32
    return %c0_i32, %c0_i32_0 : i32, i32
  }
  func.func @transform_7(%arg0: i32) -> (i32, i32) {
    %c0_i32 = arith.constant 0 : i32
    %c0_i32_0 = arith.constant 0 : i32
    %c0_i32_1 = arith.constant 0 : i32
    return %c0_i32, %c0_i32_0 : i32, i32
  }
  func.func @transform_8(%arg0: i32) -> (i32, i32) {
    %c0_i32 = arith.constant 0 : i32
    %c0_i32_0 = arith.constant 0 : i32
    %c0_i32_1 = arith.constant 0 : i32
    return %c0_i32, %c0_i32_0 : i32, i32
  }
  func.func @transform_9(%arg0: i32) -> (i32, i32) {
    %c0_i32 = arith.constant 0 : i32
    %c0_i32_0 = arith.constant 0 : i32
    %c0_i32_1 = arith.constant 0 : i32
    return %c0_i32, %c0_i32_0 : i32, i32
  }
  func.func @transform_10(%arg0: i32) -> (i32, i32) {
    %c0_i32 = arith.constant 0 : i32
    %c0_i32_0 = arith.constant 0 : i32
    %c0_i32_1 = arith.constant 0 : i32
    return %c0_i32, %c0_i32_0 : i32, i32
  }
  func.func @transform_11(%arg0: i32) -> (i32, i32) {
    %c0_i32 = arith.constant 0 : i32
    %c0_i32_0 = arith.constant 0 : i32
    %c0_i32_1 = arith.constant 0 : i32
    return %c0_i32, %c0_i32_0 : i32, i32
  }
}

</mosaic_0001>

<bundles_post_ra>
// kernel: cnn_transformer_forward.7
= control target key start
LH: loop header
LB: loop body
LE: loop exit
PB: predicated region body
PF: predicated region fallthrough
CT: control target
= control target key end

     0   :  { %s2150_s0 = inlined_call_operand.vmem [shape: bf16[128,128], index: 0, kind: input, shape index: {}]   ;;  %s2151_s1 = inlined_call_operand.vmem [shape: bf16[128,32], index: 1, kind: input, shape index: {}]   ;;  %s2152_s2 = inlined_call_operand.vmem [shape: f32[1,32], index: 2, kind: input, shape index: {}]   ;;  %s2153_s3 = inlined_call_operand.vmem [shape: f32[1,32], index: 3, kind: input, shape index: {}]   ;;  %s2154_s4 = inlined_call_operand.vmem [shape: f32[128,32], index: 4, kind: input, shape index: {}]   ;;  %s2155_s5 = inlined_call_operand.vmem [shape: bf16[32,64], index: 5, kind: input, shape index: {}]   ;;  %s2156_s6 = inlined_call_operand.vmem [shape: f32[1,64], index: 6, kind: input, shape index: {}]   ;;  %s2157_s7 = inlined_call_operand.vmem [shape: f32[1,64], index: 7, kind: input, shape index: {}]   ;;  %s2158_s8 = inlined_call_operand.vmem [shape: bf16[64,32], index: 8, kind: input, shape index: {}]   ;;  %s2159_s9 = inlined_call_operand.vmem [shape: f32[1,32], index: 9, kind: input, shape index: {}]   ;;  %s2160_s10 = inlined_call_operand.vmem [shape: f32[1,32], index: 10, kind: input, shape index: {}]   ;;  %s2161_s11 = inlined_call_operand.hbm [shape: f32[128,32], index: 11, kind: output, shape index: {}]  }
   0x1   :  { %v1379_v0 = vld [vmem:[%s2151_s1] sm:$0xff]   ;;  %v1380_v1 = vld [vmem:[%s2151_s1 + $0x8] sm:$0xff]   ;;  %v1381_v2 = vld [vmem:[%s2151_s1 + $0x10] sm:$0xff]  }
   0x2   :  { %1300 = vmatprep.subr.bf16.mxu0 %v1379_v0  ;;  %v1382_v3 = vld [vmem:[%s2151_s1 + $0x18] sm:$0xff]   ;;  %v1387_v4 = vld [vmem:[%s2150_s0] sm:$0xff]   ;;  %v1384_v6 = vld [vmem:[%s2151_s1 + $0x28] sm:$0xff]  }
   0x3   :  { %1301 = vmatpush3.bf16.msra.mxu0 %v1379_v0  ;;  %1316 = vmatprep.mubr.bf16.mxu0 %v1387_v4  ;;  %v1383_v5 = vld [vmem:[%s2151_s1 + $0x20] sm:$0xff]   ;;  %v1385_v7 = vld [vmem:[%s2151_s1 + $0x30] sm:$0xff]  }
   0x4   :  { %1302 = vmatprep.subr.bf16.mxu0 %v1380_v1 }
   0x7   :  { %1303 = vmatpush3.bf16.msra.mxu0 %v1380_v1 }
   0x8   :  { %1304 = vmatprep.subr.bf16.mxu0 %v1381_v2 }
   0xb   :  { %1305 = vmatpush3.bf16.msra.mxu0 %v1381_v2 }
   0xc   :  { %1306 = vmatprep.subr.bf16.mxu0 %v1382_v3 }
   0xf   :  { %1307 = vmatpush3.bf16.msra.mxu0 %v1382_v3 }
  0x10   :  { %1308 = vmatprep.subr.bf16.mxu0 %v1383_v5 }
  0x13   :  { %1309 = vmatpush3.bf16.msra.mxu0 %v1383_v5 }
  0x14   :  { %1310 = vmatprep.subr.bf16.mxu0 %v1384_v6 }
  0x15   :  { %16 = vsyncpa [#allocation3], 0  ;;  %v1386_v8 = vld [vmem:[%s2151_s1 + $0x38] sm:$0xff]   ;;  %v1388_v9 = vld [vmem:[%s2150_s0 + $0x8] sm:$0xff]   ;;  %vm267_vm0 = vcmask 261120   ;;  %vm634_vm1 = vcmask 523264  }
  0x16   :  { %v1389_v10 = vld [vmem:[%s2150_s0 + $0x10] sm:$0xff]   ;;  %v1390_v11 = vld [vmem:[%s2150_s0 + $0x18] sm:$0xff]   ;;  %v1391_v12 = vld [vmem:[%s2150_s0 + $0x20] sm:$0xff]  }
  0x17   :  { %1311 = vmatpush3.bf16.msra.mxu0 %v1384_v6  ;;  %v1392_v13 = vld [vmem:[%s2150_s0 + $0x28] sm:$0xff]   ;;  %v1393_v14 = vld [vmem:[%s2150_s0 + $0x30] sm:$0xff]   ;;  %v1394_v15 = vld [vmem:[%s2150_s0 + $0x38] sm:$0xff]  }
  0x18   :  { %1312 = vmatprep.subr.bf16.mxu0 %v1385_v7  ;;  %v1395_v16 = vld [vmem:[%s2155_s5] sm:$0xff]   ;;  %v1396_v17 = vld [vmem:[%s2155_s5 + $0x8] sm:$0xff]  }
  0x19   :  { %1332 = vmatprep.subr.bf16.mxu1 %v1395_v16 }
  0x1a   :  { %1333 = vmatpush3.bf16.msra.mxu1 %v1395_v16 }
  0x1b   :  { %1313 = vmatpush3.bf16.msra.mxu0 %v1385_v7  ;;  %1334 = vmatprep.subr.bf16.mxu1 %v1396_v17 }
  0x1c   :  { %1314 = vmatprep.subr.bf16.mxu0 %v1386_v8 }
  0x1e   :  { %1335 = vmatpush3.bf16.msra.mxu1 %v1396_v17 }
  0x1f   :  { %1315 = vmatpush3.bf16.msra.mxu0 %v1386_v8 }
  0x22   :  { %1317 = vmatmul.mubr.bf16.vlgmr.msra.gmra.mrb[0].mxu0 %v1388_v9 }
  0x23   :  { %1320 = vmatprep.mubr.bf16.mxu0 %v1389_v10 }
  0x2a   :  { %1321 = vmatmul.mubr.bf16.gmra.mrb[4].mxu0 %v1390_v11 }
  0x2b   :  { %1324 = vmatprep.mubr.bf16.mxu0 %v1391_v12 }
  0x32   :  { %1325 = vmatmul.mubr.bf16.gmra.mrb[8].mxu0 %v1392_v13 }
  0x33   :  { %1328 = vmatprep.mubr.bf16.mxu0 %v1393_v14 }
  0x3a   :  { %1329 = vmatmul.mubr.bf16.gmra.mrb[12].mxu0 %v1394_v15 }
  0xf5   :  { %v1318_v18 = vpop.f32.mrb[0].mxu0 }
  0xf6   :  { %v202_v19 = vpop.f32.mrb[1].mxu0  ;;  %v271_v25 = vsel %vm267_vm0, %v1318_v18, 0.0 }
  0xf7   :  { %v1319_v20 = vpop.f32.mrb[2].mxu0  ;;  %v268_v22 = vsel %vm267_vm0, %v202_v19, 0.0 }
  0xf8   :  { %v205_v21 = vpop.f32.mrb[3].mxu0  ;;  %v273_v27 = vsel %vm267_vm0, %v1319_v20, 0.0 }
  0xf9   :  { %v269_v23 = vsel %vm267_vm0, %v205_v21, 0.0 }
  0xfa   :  { %v270_v24 = vadd.f32 %v269_v23, %v268_v22 }
  0xfc   :  { %v272_v26 = vadd.f32 %v271_v25, %v270_v24 }
  0xfd   :  { %v1322_v28 = vpop.f32.mrb[4].mxu0 }
  0xfe   :  { %v218_v29 = vpop.f32.mrb[5].mxu0  ;;  %v274_v30 = vadd.f32 %v273_v27, %v272_v26  ;;  %v279_v37 = vsel %vm267_vm0, %v1322_v28, 0.0 }
  0xff   :  { %v275_v31 = vsel %vm267_vm0, %v218_v29, 0.0  ;;  %v1323_v32 = vpop.f32.mrb[6].mxu0 }
 0x100   :  { %v276_v33 = vadd.f32 %v275_v31, %v274_v30  ;;  %v221_v34 = vpop.f32.mrb[7].mxu0  ;;  %v281_v39 = vsel %vm267_vm0, %v1323_v32, 0.0 }
 0x101   :  { %v277_v35 = vsel %vm267_vm0, %v221_v34, 0.0 }
 0x102   :  { %v278_v36 = vadd.f32 %v277_v35, %v276_v33 }
 0x104   :  { %v280_v38 = vadd.f32 %v279_v37, %v278_v36 }
 0x105   :  { %v1326_v40 = vpop.f32.mrb[8].mxu0 }
 0x106   :  { %v234_v41 = vpop.f32.mrb[9].mxu0  ;;  %v282_v42 = vadd.f32 %v281_v39, %v280_v38  ;;  %v287_v49 = vsel %vm267_vm0, %v1326_v40, 0.0 }
 0x107   :  { %v283_v43 = vsel %vm267_vm0, %v234_v41, 0.0  ;;  %v1327_v44 = vpop.f32.mrb[10].mxu0 }
 0x108   :  { %v284_v45 = vadd.f32 %v283_v43, %v282_v42  ;;  %v237_v46 = vpop.f32.mrb[11].mxu0  ;;  %v289_v51 = vsel %vm267_vm0, %v1327_v44, 0.0 }
 0x109   :  { %v285_v47 = vsel %vm267_vm0, %v237_v46, 0.0 }
 0x10a   :  { %v286_v48 = vadd.f32 %v285_v47, %v284_v45 }
 0x10c   :  { %v288_v50 = vadd.f32 %v287_v49, %v286_v48 }
 0x10d   :  { %v1330_v52 = vpop.f32.mrb[12].mxu0 }
 0x10e   :  { %v250_v53 = vpop.f32.mrb[13].mxu0  ;;  %v290_v54 = vadd.f32 %v289_v51, %v288_v50  ;;  %v295_v61 = vsel %vm267_vm0, %v1330_v52, 0.0 }
 0x10f   :  { %v291_v55 = vsel %vm267_vm0, %v250_v53, 0.0  ;;  %v1331_v56 = vpop.f32.mrb[14].mxu0 }
 0x110   :  { %v292_v57 = vadd.f32 %v291_v55, %v290_v54  ;;  %v253_v58 = vpop.f32.mrb[15].mxu0  ;;  %v297_v63 = vsel %vm267_vm0, %v1331_v56, 0.0 }
 0x111   :  { %v293_v59 = vsel %vm267_vm0, %v253_v58, 0.0 }
 0x112   :  { %v294_v60 = vadd.f32 %v293_v59, %v292_v57 }
 0x114   :  { %v296_v62 = vadd.f32 %v295_v61, %v294_v60 }
 0x116   :  { %v298_v0 = vadd.f32 %v297_v63, %v296_v62 }
 0x118   :  { %v299_v1 = vrot.slane %v298_v0, 4 }
 0x11a   :  { %v300_v2 = vadd.f32 %v299_v1, %v298_v0 }
 0x11c   :  { %v301_v3 = vrot.slane %v300_v2, 2 }
 0x11e   :  { %v302_v4 = vadd.f32 %v301_v3, %v300_v2 }
 0x120   :  { %v303_v5 = vrot.slane %v302_v4, 1 }
 0x122   :  { %v304_v6 = vadd.f32 %v303_v5, %v302_v4 }
 0x124   :  { %v306_v7 = vmul.f32 0.0078125, %v304_v6 }
 0x126   :  { %v1564_v8 = vsub.f32 %v202_v19, %v306_v7  ;;  %v1566_v9 = vsub.f32 %v205_v21, %v306_v7  ;;  %v1568_v10 = vsub.f32 %v1318_v18, %v306_v7  ;;  %v1570_v11 = vsub.f32 %v1319_v20, %v306_v7 }
 0x127   :  { %v1572_v12 = vsub.f32 %v218_v29, %v306_v7  ;;  %v1574_v13 = vsub.f32 %v221_v34, %v306_v7  ;;  %v1576_v14 = vsub.f32 %v1322_v28, %v306_v7  ;;  %v1578_v15 = vsub.f32 %v1323_v32, %v306_v7 }
 0x128   :  { %v1580_v16 = vsub.f32 %v234_v41, %v306_v7  ;;  %v1582_v17 = vsub.f32 %v237_v46, %v306_v7  ;;  %v1584_v19 = vsub.f32 %v1326_v40, %v306_v7  ;;  %v1586_v21 = vsub.f32 %v1327_v44, %v306_v7 }
 0x129   :  { %v319_v18 = vsub.f32 %v250_v53, %v306_v7  ;;  %v320_v22 = vsub.f32 %v253_v58, %v306_v7  ;;  %v321_v20 = vsub.f32 %v1330_v52, %v306_v7  ;;  %v1588_v23 = vsub.f32 %v1331_v56, %v306_v7 }
 0x12a   :  { %v323_v24 = vmul.f32 %v1564_v8, %v1564_v8  ;;  %v324_v25 = vmul.f32 %v1566_v9, %v1566_v9  ;;  %v325_v26 = vmul.f32 %v1568_v10, %v1568_v10  ;;  %v326_v27 = vmul.f32 %v1570_v11, %v1570_v11 }
 0x12b   :  { %v327_v31 = vmul.f32 %v1572_v12, %v1572_v12  ;;  %v328_v34 = vmul.f32 %v1574_v13, %v1574_v13  ;;  %v329_v37 = vmul.f32 %v1576_v14, %v1576_v14  ;;  %v330_v40 = vmul.f32 %v1578_v15, %v1578_v15 }
 0x12c   :  { %v339_v28 = vsel %vm267_vm0, %v323_v24, 0.0  ;;  %v340_v29 = vsel %vm267_vm0, %v324_v25, 0.0  ;;  %v342_v32 = vsel %vm267_vm0, %v325_v26, 0.0  ;;  %v344_v35 = vsel %vm267_vm0, %v326_v27, 0.0 }
 0x12d   :  { %v341_v30 = vadd.f32 %v340_v29, %v339_v28  ;;  %v346_v38 = vsel %vm267_vm0, %v327_v31, 0.0  ;;  %v348_v41 = vsel %vm267_vm0, %v328_v34, 0.0  ;;  %v331_v43 = vmul.f32 %v1580_v16, %v1580_v16 }
 0x12e   :  { %v350_v44 = vsel %vm267_vm0, %v329_v37, 0.0  ;;  %v332_v46 = vmul.f32 %v1582_v17, %v1582_v17  ;;  %v352_v47 = vsel %vm267_vm0, %v330_v40, 0.0  ;;  %v333_v49 = vmul.f32 %v1584_v19, %v1584_v19  ;;  %v1649_v37 = vld [vmem:[%s2153_s3] ss:$0 sm:$0xff] }
 0x12f   :  { %v343_v33 = vadd.f32 %v342_v32, %v341_v30  ;;  %v354_v50 = vsel %vm267_vm0, %v331_v43, 0.0  ;;  %v334_v52 = vmul.f32 %v1586_v21, %v1586_v21  ;;  %v335_v55 = vmul.f32 %v319_v18, %v319_v18  ;;  %v1637_v32 = vld [vmem:[%s2152_s2] ss:$0 sm:$0xff] }
 0x130   :  { %v356_v53 = vsel %vm267_vm0, %v332_v46, 0.0  ;;  %v358_v56 = vsel %vm267_vm0, %v333_v49, 0.0  ;;  %v336_v58 = vmul.f32 %v320_v22, %v320_v22  ;;  %v337_v61 = vmul.f32 %v321_v20, %v321_v20  ;;  %v458_v49 = vld [vmem:[%s2154_s4 + $0x18] sm:$0xff] }
 0x131   :  { %v345_v36 = vadd.f32 %v344_v35, %v343_v33  ;;  %v360_v59 = vsel %vm267_vm0, %v334_v52, 0.0  ;;  %v362_v62 = vsel %vm267_vm0, %v335_v55, 0.0  ;;  %v338_v0 = vmul.f32 %v1588_v23, %v1588_v23 }
 0x132   :  { %v364_v1 = vsel %vm267_vm0, %v336_v58, 0.0  ;;  %v366_v3 = vsel %vm267_vm0, %v337_v61, 0.0 }
 0x133   :  { %v347_v39 = vadd.f32 %v346_v38, %v345_v36  ;;  %v368_v5 = vsel %vm267_vm0, %v338_v0, 0.0 }
 0x135   :  { %v349_v42 = vadd.f32 %v348_v41, %v347_v39 }
 0x137   :  { %v351_v45 = vadd.f32 %v350_v44, %v349_v42  ;;  %v456_v44 = vld [vmem:[%s2154_s4 + $0x8] sm:$0xff] }
 0x139   :  { %v353_v48 = vadd.f32 %v352_v47, %v351_v45 }
 0x13b   :  { %v355_v51 = vadd.f32 %v354_v50, %v353_v48 }
 0x13d   :  { %v357_v54 = vadd.f32 %v356_v53, %v355_v51  ;;  %v459_v51 = vld [vmem:[%s2154_s4 + $0x20] sm:$0xff] }
 0x13f   :  { %v359_v57 = vadd.f32 %v358_v56, %v357_v54 }
 0x141   :  { %v361_v60 = vadd.f32 %v360_v59, %v359_v57  ;;  %v460_v57 = vld [vmem:[%s2154_s4 + $0x28] sm:$0xff] }
 0x143   :  { %v363_v63 = vadd.f32 %v362_v62, %v361_v60 }
 0x145   :  { %v365_v2 = vadd.f32 %v364_v1, %v363_v63 }
 0x147   :  { %v367_v4 = vadd.f32 %v366_v3, %v365_v2 }
 0x149   :  { %v369_v6 = vadd.f32 %v368_v5, %v367_v4 }
 0x14b   :  { %v370_v7 = vrot.slane %v369_v6, 4 }
 0x14d   :  { %v371_v24 = vadd.f32 %v370_v7, %v369_v6 }
 0x14f   :  { %v372_v25 = vrot.slane %v371_v24, 2 }
 0x151   :  { %v373_v26 = vadd.f32 %v372_v25, %v371_v24 }
 0x153   :  { %v374_v27 = vrot.slane %v373_v26, 1 }
 0x155   :  { %v375_v28 = vadd.f32 %v374_v27, %v373_v26 }
 0x157   :  { %v376_v29 = vmul.f32 0.0078125, %v375_v28 }
 0x159   :  { %v377_v30 = vadd.f32 1e-05, %v376_v29  ;;  %v462_v29 = vld [vmem:[%s2154_s4 + $0x38] sm:$0xff] }
 0x15b   :  { %1401 = vrsqrt.f32 %v377_v30 }
 0x165   :  { %v1632_v31 = vpop.eup %1401 }
 0x166   :  { %v391_v33 = vmul.f32 %v1632_v31, %v319_v18  ;;  %v392_v34 = vmul.f32 %v1632_v31, %v320_v22  ;;  %v1642_v35 = vmul.f32 %v1632_v31, %v321_v20  ;;  %v379_v36 = vmul.f32 %v1632_v31, %v1564_v8 }
 0x167   :  { %v380_v38 = vmul.f32 %v1632_v31, %v1566_v9  ;;  %v381_v39 = vmul.f32 %v1632_v31, %v1568_v10  ;;  %v382_v18 = vmul.f32 %v1632_v31, %v1570_v11  ;;  %v383_v22 = vmul.f32 %v1632_v31, %v1572_v12 }
 0x168   :  { %v401_v20 = vmul.f32 %v1637_v32, %v379_v36  ;;  %v384_v8 = vmul.f32 %v1632_v31, %v1574_v13  ;;  %v385_v40 = vmul.f32 %v1632_v31, %v1576_v14  ;;  %v386_v43 = vmul.f32 %v1632_v31, %v1578_v15  ;;  %v455_v14 = vld [vmem:[%s2154_s4] sm:$0xff]  ;;  %v457_v15 = vld [vmem:[%s2154_s4 + $0x10] sm:$0xff] }
 0x169   :  { %v402_v41 = vmul.f32 %v1637_v32, %v380_v38  ;;  %v403_v9 = vmul.f32 %v1637_v32, %v381_v39  ;;  %v404_v10 = vmul.f32 %v1637_v32, %v382_v18  ;;  %v405_v42 = vmul.f32 %v1637_v32, %v383_v22 }
 0x16a   :  { %v423_v11 = vadd.f32 %v1649_v37, %v401_v20  ;;  %v406_v12 = vmul.f32 %v1637_v32, %v384_v8  ;;  %v407_v52 = vmul.f32 %v1637_v32, %v385_v40  ;;  %v414_v58 = vmul.f32 %v1637_v32, %v392_v34  ;;  %v464_v40 = vld [vmem:[%s2154_s4 + $0x48] sm:$0xff] }
 0x16b   :  { %v424_v13 = vadd.f32 %v1649_v37, %v402_v41  ;;  %v425_v45 = vadd.f32 %v1649_v37, %v403_v9  ;;  %v426_v46 = vadd.f32 %v1649_v37, %v404_v10  ;;  %v427_v47 = vadd.f32 %v1649_v37, %v405_v42 }
 0x16c   :  { %v439_v48 = vmax.f32 %v423_v11, 0.0  ;;  %v428_v50 = vadd.f32 %v1649_v37, %v406_v12  ;;  %v408_v61 = vmul.f32 %v1637_v32, %v386_v43  ;;  %v429_v3 = vadd.f32 %v1649_v37, %v407_v52 }
 0x16d   :  { %v440_v53 = vmax.f32 %v424_v13, 0.0  ;;  %v441_v54 = vmax.f32 %v425_v45, 0.0  ;;  %v442_v55 = vmax.f32 %v426_v46, 0.0  ;;  %v443_v56 = vmax.f32 %v427_v47, 0.0  ;;  %v465_v47 = vld [vmem:[%s2154_s4 + $0x50] sm:$0xff] }
 0x16e   :  { %v1697_v59 = vadd.f32 %v455_v14, %v439_v48  ;;  %v444_v60 = vmax.f32 %v428_v50, 0.0  ;;  %v430_v4 = vadd.f32 %v1649_v37, %v408_v61  ;;  %v387_v5 = vmul.f32 %v1632_v31, %v1580_v16  ;;  %v461_v16 = vld [vmem:[%s2154_s4 + $0x30] sm:$0xff]  ;;  %v466_v48 = vld [vmem:[%s2154_s4 + $0x58] sm:$0xff] }
 0x16f   :  { %v1700_v62 = vadd.f32 %v456_v44, %v440_v53  ;;  %v1702_v63 = vadd.f32 %v457_v15, %v441_v54  ;;  %v1704_v0 = vadd.f32 %v458_v49, %v442_v55  ;;  %v1706_v1 = vadd.f32 %v459_v51, %v443_v56  ;;  %v468_v49 = vld [vmem:[%s2154_s4 + $0x68] sm:$0xff] }
 0x170   :  { %v1708_v2 = vadd.f32 %v460_v57, %v444_v60  ;;  %v388_v24 = vmul.f32 %v1632_v31, %v1582_v17  ;;  %v389_v25 = vmul.f32 %v1632_v31, %v1584_v19  ;;  %v445_v27 = vmax.f32 %v429_v3, 0.0  ;;  %v469_v60 = vld [vmem:[%s2154_s4 + $0x70] sm:$0xff] }
 0x171   :  { %v487_v6 = vpack.c.bf16 %v1700_v62, %v1697_v59  ;;  %v488_v7 = vpack.c.bf16 %v1704_v0, %v1702_v63  ;;  %v446_v28 = vmax.f32 %v430_v4, 0.0  ;;  %v409_v30 = vmul.f32 %v1637_v32, %v387_v5  ;;  %v1397_v5 = vld [vmem:[%s2158_s8] sm:$0xff]  }
 0x172   :  { %v489_v26 = vpack.c.bf16 %v1708_v2, %v1706_v1  ;;  %v410_v17 = vmul.f32 %v1637_v32, %v388_v24  ;;  %v390_v19 = vmul.f32 %v1632_v31, %v1586_v21  ;;  %v411_v34 = vmul.f32 %v1637_v32, %v389_v25  ;;  %v463_v21 = vld [vmem:[%s2154_s4 + $0x40] sm:$0xff]  ;;  %1352 = vmatprep.subr.bf16.mxu1 %v1397_v5  ;;  %v1400_v24 = vld [vmem:[%s2158_s8 + $0x18] sm:$0xff]  }
 0x173   :  { %1336 = vmatprep.mubr.msk.bf16.mxu1 %vm267_vm0, %v487_v6  ;;  %v413_v36 = vmul.f32 %v1637_v32, %v391_v33  ;;  %v431_v38 = vadd.f32 %v1649_v37, %v409_v30  ;;  %v394_v39 = vmul.f32 %v1632_v31, %v1588_v23  ;;  %v1742_v18 = vadd.f32 %v461_v16, %v445_v27  ;;  %v1398_v6 = vld [vmem:[%s2158_s8 + $0x8] sm:$0xff]  }
 0x174   :  { %1337 = vmatmul.mubr.msk.bf16.vlgmr.msra.gmra.mrb[0].mxu1 %vm267_vm0, %v488_v7  ;;  %v1744_v22 = vadd.f32 %v462_v29, %v446_v28  ;;  %v432_v20 = vadd.f32 %v1649_v37, %v410_v17  ;;  %v412_v33 = vmul.f32 %v1637_v32, %v390_v19  ;;  %v433_v23 = vadd.f32 %v1649_v37, %v411_v34  ;;  %v1399_v7 = vld [vmem:[%s2158_s8 + $0x10] sm:$0xff]  }
 0x175   :  { %1340 = vmatprep.mubr.msk.bf16.mxu1 %vm267_vm0, %v489_v26  ;;  %v447_v8 = vmax.f32 %v431_v38, 0.0  ;;  %v436_v31 = vadd.f32 %v1649_v37, %v414_v58  ;;  %v435_v10 = vadd.f32 %v1649_v37, %v413_v36  ;;  %v415_v14 = vmul.f32 %v1637_v32, %v1642_v35  ;;  %1353 = vmatpush3.bf16.msra.mxu1 %v1397_v5 }
 0x176   :  { %v448_v41 = vmax.f32 %v432_v20, 0.0  ;;  %v434_v9 = vadd.f32 %v1649_v37, %v412_v33  ;;  %v490_v11 = vpack.c.bf16 %v1744_v22, %v1742_v18  ;;  %v449_v43 = vmax.f32 %v433_v23, 0.0  ;;  %1354 = vmatprep.subr.bf16.mxu1 %v1398_v6 }
 0x177   :  { %v1758_v42 = vadd.f32 %v463_v21, %v447_v8  ;;  %v416_v44 = vmul.f32 %v1637_v32, %v394_v39  ;;  %v452_v45 = vmax.f32 %v436_v31, 0.0  ;;  %v451_v15 = vmax.f32 %v435_v10, 0.0  ;;  %v467_v32 = vld [vmem:[%s2154_s4 + $0x60] sm:$0xff] }
 0x178   :  { %v1762_v12 = vadd.f32 %v464_v40, %v448_v41  ;;  %v450_v13 = vmax.f32 %v434_v9, 0.0  ;;  %v1783_v35 = vadd.f32 %v465_v47, %v449_v43  ;;  %v437_v51 = vadd.f32 %v1649_v37, %v415_v14 }
 0x179   :  { %v438_v52 = vadd.f32 %v1649_v37, %v416_v44  ;;  %v1789_v53 = vadd.f32 %v468_v49, %v452_v45  ;;  %v1791_v54 = vadd.f32 %v467_v32, %v451_v15  ;;  %v470_v37 = vld [vmem:[%s2154_s4 + $0x78] sm:$0xff]  ;;  %1355 = vmatpush3.bf16.msra.mxu1 %v1398_v6 }
 0x17a   :  { %v491_v46 = vpack.c.bf16 %v1762_v12, %v1758_v42  ;;  %v1785_v50 = vadd.f32 %v466_v48, %v450_v13  ;;  %v453_v56 = vmax.f32 %v437_v51, 0.0  ;;  %1356 = vmatprep.subr.bf16.mxu1 %v1399_v7 }
 0x17b   :  { %v454_v57 = vmax.f32 %v438_v52, 0.0  ;;  %v493_v58 = vpack.c.bf16 %v1789_v53, %v1791_v54 }
 0x17c   :  { %1341 = vmatmul.mubr.msk.bf16.gmra.mrb[4].mxu1 %vm267_vm0, %v490_v11  ;;  %v492_v55 = vpack.c.bf16 %v1785_v50, %v1783_v35  ;;  %v1805_v61 = vadd.f32 %v469_v60, %v453_v56 }
 0x17d   :  { %1344 = vmatprep.mubr.msk.bf16.mxu1 %vm267_vm0, %v491_v46  ;;  %v1807_v3 = vadd.f32 %v470_v37, %v454_v57  ;;  %1357 = vmatpush3.bf16.msra.mxu1 %v1399_v7 }
 0x17e   :  { %1358 = vmatprep.subr.bf16.mxu1 %v1400_v24 }
 0x17f   :  { %v494_v4 = vpack.c.bf16 %v1807_v3, %v1805_v61 }
 0x181   :  { %1359 = vmatpush3.bf16.msra.mxu1 %v1400_v24 }
 0x184   :  { %1345 = vmatmul.mubr.msk.bf16.gmra.mrb[8].mxu1 %vm267_vm0, %v492_v55 }
 0x185   :  { %1348 = vmatprep.mubr.msk.bf16.mxu1 %vm267_vm0, %v493_v58 }
 0x18c   :  { %1349 = vmatmul.mubr.msk.bf16.gmra.mrb[12].mxu1 %vm267_vm0, %v494_v4 }
 0x247   :  { %v1338_v25 = vpop.f32.mrb[0].mxu1 }
 0x248   :  { %v569_v26 = vpop.f32.mrb[1].mxu1  ;;  %v638_v17 = vsel %vm634_vm1, %v1338_v25, 0.0 }
 0x249   :  { %v1339_v27 = vpop.f32.mrb[2].mxu1  ;;  %v635_v16 = vsel %vm634_vm1, %v569_v26, 0.0 }
 0x24a   :  { %v572_v28 = vpop.f32.mrb[3].mxu1  ;;  %v640_v34 = vsel %vm634_vm1, %v1339_v27, 0.0 }
 0x24b   :  { %v636_v29 = vsel %vm634_vm1, %v572_v28, 0.0 }
 0x24c   :  { %v637_v30 = vadd.f32 %v636_v29, %v635_v16 }
 0x24e   :  { %v639_v19 = vadd.f32 %v638_v17, %v637_v30 }
 0x24f   :  { %v1342_v36 = vpop.f32.mrb[4].mxu1 }
 0x250   :  { %v585_v38 = vpop.f32.mrb[5].mxu1  ;;  %v641_v39 = vadd.f32 %v640_v34, %v639_v19  ;;  %v646_v31 = vsel %vm634_vm1, %v1342_v36, 0.0 }
 0x251   :  { %v642_v20 = vsel %vm634_vm1, %v585_v38, 0.0  ;;  %v1343_v21 = vpop.f32.mrb[6].mxu1 }
 0x252   :  { %v643_v33 = vadd.f32 %v642_v20, %v641_v39  ;;  %v588_v8 = vpop.f32.mrb[7].mxu1  ;;  %v648_v9 = vsel %vm634_vm1, %v1343_v21, 0.0 }
 0x253   :  { %v644_v40 = vsel %vm634_vm1, %v588_v8, 0.0 }
 0x254   :  { %v645_v23 = vadd.f32 %v644_v40, %v643_v33 }
 0x256   :  { %v647_v41 = vadd.f32 %v646_v31, %v645_v23 }
 0x257   :  { %v1346_v10 = vpop.f32.mrb[8].mxu1 }
 0x258   :  { %v601_v11 = vpop.f32.mrb[9].mxu1  ;;  %v649_v43 = vadd.f32 %v648_v9, %v647_v41  ;;  %v654_v48 = vsel %vm634_vm1, %v1346_v10, 0.0 }
 0x259   :  { %v650_v13 = vsel %vm634_vm1, %v601_v11, 0.0  ;;  %v1347_v14 = vpop.f32.mrb[10].mxu1 }
 0x25a   :  { %v651_v44 = vadd.f32 %v650_v13, %v649_v43  ;;  %v604_v45 = vpop.f32.mrb[11].mxu1  ;;  %v656_v49 = vsel %vm634_vm1, %v1347_v14, 0.0 }
 0x25b   :  { %v652_v46 = vsel %vm634_vm1, %v604_v45, 0.0 }
 0x25c   :  { %v653_v47 = vadd.f32 %v652_v46, %v651_v44 }
 0x25e   :  { %v655_v15 = vadd.f32 %v654_v48, %v653_v47 }
 0x25f   :  { %v1350_v32 = vpop.f32.mrb[12].mxu1 }
 0x260   :  { %v617_v51 = vpop.f32.mrb[13].mxu1  ;;  %v657_v52 = vadd.f32 %v656_v49, %v655_v15  ;;  %v662_v4 = vsel %vm634_vm1, %v1350_v32, 0.0 }
 0x261   :  { %v658_v55 = vsel %vm634_vm1, %v617_v51, 0.0  ;;  %v1351_v56 = vpop.f32.mrb[14].mxu1 }
 0x262   :  { %v659_v57 = vadd.f32 %v658_v55, %v657_v52  ;;  %v620_v58 = vpop.f32.mrb[15].mxu1  ;;  %v664_v6 = vsel %vm634_vm1, %v1351_v56, 0.0 }
 0x263   :  { %v660_v60 = vsel %vm634_vm1, %v620_v58, 0.0 }
 0x264   :  { %v661_v37 = vadd.f32 %v660_v60, %v659_v57 }
 0x266   :  { %v663_v5 = vadd.f32 %v662_v4, %v661_v37 }
 0x268   :  { %v665_v7 = vadd.f32 %v664_v6, %v663_v5 }
 0x26a   :  { %v666_v24 = vrot.slane %v665_v7, 4 }
 0x26c   :  { %v667_v16 = vadd.f32 %v666_v24, %v665_v7 }
 0x26e   :  { %v668_v29 = vrot.slane %v667_v16, 2 }
 0x270   :  { %v669_v30 = vadd.f32 %v668_v29, %v667_v16 }
 0x272   :  { %v670_v17 = vrot.slane %v669_v30, 1 }
 0x274   :  { %v671_v19 = vadd.f32 %v670_v17, %v669_v30 }
 0x276   :  { %v672_v34 = vmul.f32 0.0078125, %v671_v19 }
 0x278   :  { %v1840_v39 = vsub.f32 %v569_v26, %v672_v34  ;;  %v1842_v20 = vsub.f32 %v572_v28, %v672_v34  ;;  %v1844_v33 = vsub.f32 %v1338_v25, %v672_v34  ;;  %v1846_v40 = vsub.f32 %v1339_v27, %v672_v34 }
 0x279   :  { %v1848_v23 = vsub.f32 %v585_v38, %v672_v34  ;;  %v1850_v31 = vsub.f32 %v588_v8, %v672_v34  ;;  %v1852_v41 = vsub.f32 %v1342_v36, %v672_v34  ;;  %v1854_v9 = vsub.f32 %v1343_v21, %v672_v34 }
 0x27a   :  { %v1856_v43 = vsub.f32 %v601_v11, %v672_v34  ;;  %v1858_v13 = vsub.f32 %v604_v45, %v672_v34  ;;  %v1860_v26 = vsub.f32 %v1346_v10, %v672_v34  ;;  %v1862_v28 = vsub.f32 %v1347_v14, %v672_v34 }
 0x27b   :  { %v1864_v25 = vsub.f32 %v617_v51, %v672_v34  ;;  %v686_v27 = vsub.f32 %v620_v58, %v672_v34  ;;  %v1866_v44 = vsub.f32 %v1350_v32, %v672_v34  ;;  %v1868_v38 = vsub.f32 %v1351_v56, %v672_v34 }
 0x27c   :  { %v689_v36 = vmul.f32 %v1840_v39, %v1840_v39  ;;  %v690_v21 = vmul.f32 %v1842_v20, %v1842_v20  ;;  %v691_v8 = vmul.f32 %v1844_v33, %v1844_v33  ;;  %v692_v10 = vmul.f32 %v1846_v40, %v1846_v40 }
 0x27d   :  { %v693_v46 = vmul.f32 %v1848_v23, %v1848_v23  ;;  %v694_v15 = vmul.f32 %v1850_v31, %v1850_v31  ;;  %v695_v51 = vmul.f32 %v1852_v41, %v1852_v41  ;;  %v696_v56 = vmul.f32 %v1854_v9, %v1854_v9 }
 0x27e   :  { %v705_v11 = vsel %vm634_vm1, %v689_v36, 0.0  ;;  %v706_v14 = vsel %vm634_vm1, %v690_v21, 0.0  ;;  %v708_v47 = vsel %vm634_vm1, %v691_v8, 0.0  ;;  %v710_v49 = vsel %vm634_vm1, %v692_v10, 0.0 }
 0x27f   :  { %v707_v45 = vadd.f32 %v706_v14, %v705_v11  ;;  %v712_v52 = vsel %vm634_vm1, %v693_v46, 0.0  ;;  %v714_v57 = vsel %vm634_vm1, %v694_v15, 0.0  ;;  %v697_v60 = vmul.f32 %v1856_v43, %v1856_v43 }
 0x280   :  { %v716_v37 = vsel %vm634_vm1, %v695_v51, 0.0  ;;  %v698_v5 = vmul.f32 %v1858_v13, %v1858_v13  ;;  %v718_v6 = vsel %vm634_vm1, %v696_v56, 0.0  ;;  %v699_v24 = vmul.f32 %v1860_v26, %v1860_v26 }
 0x281   :  { %v709_v48 = vadd.f32 %v708_v47, %v707_v45  ;;  %v720_v16 = vsel %vm634_vm1, %v697_v60, 0.0  ;;  %v700_v30 = vmul.f32 %v1862_v28, %v1862_v28  ;;  %v701_v34 = vmul.f32 %v1864_v25, %v1864_v25 }
 0x282   :  { %v722_v17 = vsel %vm634_vm1, %v698_v5, 0.0  ;;  %v724_v36 = vsel %vm634_vm1, %v699_v24, 0.0  ;;  %v702_v8 = vmul.f32 %v686_v27, %v686_v27  ;;  %v703_v14 = vmul.f32 %v1866_v44, %v1866_v44 }
 0x283   :  { %v711_v32 = vadd.f32 %v710_v49, %v709_v48  ;;  %v726_v10 = vsel %vm634_vm1, %v700_v30, 0.0  ;;  %v728_v45 = vsel %vm634_vm1, %v701_v34, 0.0  ;;  %v704_v47 = vmul.f32 %v1868_v38, %v1868_v38 }
 0x284   :  { %v730_v48 = vsel %vm634_vm1, %v702_v8, 0.0  ;;  %v732_v49 = vsel %vm634_vm1, %v703_v14, 0.0 }
 0x285   :  { %v713_v55 = vadd.f32 %v712_v52, %v711_v32  ;;  %v734_v51 = vsel %vm634_vm1, %v704_v47, 0.0 }
 0x287   :  { %v715_v58 = vadd.f32 %v714_v57, %v713_v55 }
 0x289   :  { %v717_v4 = vadd.f32 %v716_v37, %v715_v58 }
 0x28b   :  { %v719_v7 = vadd.f32 %v718_v6, %v717_v4 }
 0x28d   :  { %v721_v29 = vadd.f32 %v720_v16, %v719_v7  ;;  %v1919_v7 = vld [vmem:[%s2156_s6] ss:$0 sm:$0xff] }
 0x28f   :  { %v723_v19 = vadd.f32 %v722_v17, %v721_v29  ;;  %v1927_v17 = vld [vmem:[%s2157_s7] ss:$0 sm:$0xff] }
 0x291   :  { %v725_v21 = vadd.f32 %v724_v36, %v723_v19 }
 0x293   :  { %v727_v11 = vadd.f32 %v726_v10, %v725_v21 }
 0x295   :  { %v729_v46 = vadd.f32 %v728_v45, %v727_v11 }
 0x297   :  { %v731_v15 = vadd.f32 %v730_v48, %v729_v46 }
 0x299   :  { %v733_v32 = vadd.f32 %v732_v49, %v731_v15 }
 0x29b   :  { %v735_v52 = vadd.f32 %v734_v51, %v733_v32 }
 0x29d   :  { %v736_v55 = vrot.slane %v735_v52, 4 }
 0x29f   :  { %v737_v56 = vadd.f32 %v736_v55, %v735_v52 }
 0x2a1   :  { %v738_v57 = vrot.slane %v737_v56, 2 }
 0x2a3   :  { %v739_v58 = vadd.f32 %v738_v57, %v737_v56 }
 0x2a5   :  { %v740_v60 = vrot.slane %v739_v58, 1 }
 0x2a7   :  { %v741_v37 = vadd.f32 %v740_v60, %v739_v58 }
 0x2a9   :  { %v742_v4 = vmul.f32 0.0078125, %v741_v37 }
 0x2ab   :  { %v743_v5 = vadd.f32 1e-05, %v742_v4 }
 0x2ad   :  { %1403 = vrsqrt.f32 %v743_v5 }
 0x2b7   :  { %v1404_v6 = vpop.eup %1403 }
 0x2b8   :  { %v758_v24 = vmul.f32 %v1404_v6, %v686_v27  ;;  %v745_v16 = vmul.f32 %v1404_v6, %v1840_v39  ;;  %v746_v29 = vmul.f32 %v1404_v6, %v1842_v20  ;;  %v747_v30 = vmul.f32 %v1404_v6, %v1844_v33 }
 0x2b9   :  { %v748_v19 = vmul.f32 %v1404_v6, %v1846_v40  ;;  %v749_v34 = vmul.f32 %v1404_v6, %v1848_v23  ;;  %v750_v36 = vmul.f32 %v1404_v6, %v1850_v31  ;;  %v751_v21 = vmul.f32 %v1404_v6, %v1852_v41 }
 0x2ba   :  { %v780_v27 = vmul.f32 %v1919_v7, %v758_v24  ;;  %v767_v39 = vmul.f32 %v1919_v7, %v745_v16  ;;  %v768_v20 = vmul.f32 %v1919_v7, %v746_v29  ;;  %v769_v33 = vmul.f32 %v1919_v7, %v747_v30 }
 0x2bb   :  { %v770_v8 = vmul.f32 %v1919_v7, %v748_v19  ;;  %v771_v10 = vmul.f32 %v1919_v7, %v749_v34  ;;  %v772_v40 = vmul.f32 %v1919_v7, %v750_v36  ;;  %v752_v23 = vmul.f32 %v1404_v6, %v1854_v9 }
 0x2bc   :  { %v789_v31 = vadd.f32 %v1927_v17, %v767_v39  ;;  %v790_v41 = vadd.f32 %v1927_v17, %v768_v20  ;;  %v791_v11 = vadd.f32 %v1927_v17, %v769_v33  ;;  %v773_v47 = vmul.f32 %v1919_v7, %v751_v21 }
 0x2bd   :  { %v792_v14 = vadd.f32 %v1927_v17, %v770_v8  ;;  %v793_v45 = vadd.f32 %v1927_v17, %v771_v10  ;;  %v794_v46 = vadd.f32 %v1927_v17, %v772_v40  ;;  %v802_v48 = vadd.f32 %v1927_v17, %v780_v27 }
 0x2be   :  { %v805_v15 = vmax.f32 %v789_v31, 0.0  ;;  %v806_v49 = vmax.f32 %v790_v41, 0.0  ;;  %v807_v32 = vmax.f32 %v791_v11, 0.0  ;;  %v774_v55 = vmul.f32 %v1919_v7, %v752_v23 }
 0x2bf   :  { %v808_v9 = vmax.f32 %v792_v14, 0.0  ;;  %v809_v51 = vmax.f32 %v793_v45, 0.0  ;;  %v810_v52 = vmax.f32 %v794_v46, 0.0  ;;  %v795_v57 = vadd.f32 %v1927_v17, %v773_v47 }
 0x2c0   :  { %v821_v56 = vpack.c.bf16 %v806_v49, %v805_v15  ;;  %v753_v58 = vmul.f32 %v1404_v6, %v1856_v43  ;;  %v754_v60 = vmul.f32 %v1404_v6, %v1858_v13  ;;  %v796_v5 = vadd.f32 %v1927_v17, %v774_v55 }
 0x2c1   :  { %v822_v37 = vpack.c.bf16 %v808_v9, %v807_v32  ;;  %v823_v4 = vpack.c.bf16 %v810_v52, %v809_v51  ;;  %v755_v24 = vmul.f32 %v1404_v6, %v1860_v26  ;;  %v811_v16 = vmax.f32 %v795_v57, 0.0 }
 0x2c2   :  { %1360 = vmatprep.mubr.msk.bf16.mxu1 %vm634_vm1, %v821_v56  ;;  %v775_v29 = vmul.f32 %v1919_v7, %v753_v58  ;;  %v776_v30 = vmul.f32 %v1919_v7, %v754_v60  ;;  %v756_v19 = vmul.f32 %v1404_v6, %v1862_v28  ;;  %v812_v43 = vmax.f32 %v796_v5, 0.0 }
 0x2c3   :  { %1361 = vmatmul.mubr.msk.bf16.vlgmr.msra.gmra.mrb[16].mxu1 %vm634_vm1, %v822_v37  ;;  %v777_v13 = vmul.f32 %v1919_v7, %v755_v24  ;;  %v757_v34 = vmul.f32 %v1404_v6, %v1864_v25  ;;  %v759_v36 = vmul.f32 %v1404_v6, %v1866_v44  ;;  %v760_v39 = vmul.f32 %v1404_v6, %v1868_v38 }
 0x2c4   :  { %1364 = vmatprep.mubr.msk.bf16.mxu1 %vm634_vm1, %v823_v4  ;;  %v797_v26 = vadd.f32 %v1927_v17, %v775_v29  ;;  %v798_v21 = vadd.f32 %v1927_v17, %v776_v30  ;;  %v778_v27 = vmul.f32 %v1919_v7, %v756_v19  ;;  %v824_v28 = vpack.c.bf16 %v812_v43, %v811_v16 }
 0x2c5   :  { %v799_v20 = vadd.f32 %v1927_v17, %v777_v13  ;;  %v779_v33 = vmul.f32 %v1919_v7, %v757_v34  ;;  %v781_v8 = vmul.f32 %v1919_v7, %v759_v36  ;;  %v782_v40 = vmul.f32 %v1919_v7, %v760_v39 }
 0x2c6   :  { %v813_v25 = vmax.f32 %v797_v26, 0.0  ;;  %v814_v10 = vmax.f32 %v798_v21, 0.0  ;;  %v800_v44 = vadd.f32 %v1927_v17, %v778_v27  ;;  %v818_v23 = vmax.f32 %v802_v48, 0.0 }
 0x2c7   :  { %v815_v31 = vmax.f32 %v799_v20, 0.0  ;;  %v801_v41 = vadd.f32 %v1927_v17, %v779_v33  ;;  %v803_v11 = vadd.f32 %v1927_v17, %v781_v8  ;;  %v804_v14 = vadd.f32 %v1927_v17, %v782_v40 }
 0x2c8   :  { %v825_v38 = vpack.c.bf16 %v814_v10, %v813_v25  ;;  %v816_v6 = vmax.f32 %v800_v44, 0.0 }
 0x2c9   :  { %v817_v45 = vmax.f32 %v801_v41, 0.0  ;;  %v819_v46 = vmax.f32 %v803_v11, 0.0  ;;  %v820_v15 = vmax.f32 %v804_v14, 0.0 }
 0x2ca   :  { %v826_v47 = vpack.c.bf16 %v816_v6, %v815_v31 }
 0x2cb   :  { %1365 = vmatmul.mubr.msk.bf16.gmra.mrb[20].mxu1 %vm634_vm1, %v824_v28  ;;  %v827_v49 = vpack.c.bf16 %v818_v23, %v817_v45  ;;  %v828_v7 = vpack.c.bf16 %v820_v15, %v819_v46 }
 0x2cc   :  { %1368 = vmatprep.mubr.msk.bf16.mxu1 %vm634_vm1, %v825_v38 }
 0x2d3   :  { %1369 = vmatmul.mubr.msk.bf16.gmra.mrb[24].mxu1 %vm634_vm1, %v826_v47 }
 0x2d4   :  { %1372 = vmatprep.mubr.msk.bf16.mxu1 %vm634_vm1, %v827_v49 }
 0x2db   :  { %1373 = vmatmul.mubr.msk.bf16.gmra.mrb[28].mxu1 %vm634_vm1, %v828_v7 }
 0x396   :  { %v1362_v48 = vpop.f32.mrb[16].mxu1 }
 0x397   :  { %v919_v32 = vpop.f32.mrb[17].mxu1  ;;  %v987_v56 = vsel %vm267_vm0, %v1362_v48, 0.0 }
 0x398   :  { %v1363_v9 = vpop.f32.mrb[18].mxu1  ;;  %v984_v51 = vsel %vm267_vm0, %v919_v32, 0.0 }
 0x399   :  { %v922_v17 = vpop.f32.mrb[19].mxu1  ;;  %v989_v58 = vsel %vm267_vm0, %v1363_v9, 0.0 }
 0x39a   :  { %v985_v52 = vsel %vm267_vm0, %v922_v17, 0.0 }
 0x39b   :  { %v986_v55 = vadd.f32 %v985_v52, %v984_v51 }
 0x39d   :  { %v988_v57 = vadd.f32 %v987_v56, %v986_v55 }
 0x39e   :  { %v1366_v60 = vpop.f32.mrb[20].mxu1 }
 0x39f   :  { %v935_v37 = vpop.f32.mrb[21].mxu1  ;;  %v990_v4 = vadd.f32 %v989_v58, %v988_v57  ;;  %v995_v43 = vsel %vm267_vm0, %v1366_v60, 0.0 }
 0x3a0   :  { %v991_v5 = vsel %vm267_vm0, %v935_v37, 0.0  ;;  %v1367_v24 = vpop.f32.mrb[22].mxu1 }
 0x3a1   :  { %v992_v16 = vadd.f32 %v991_v5, %v990_v4  ;;  %v938_v29 = vpop.f32.mrb[23].mxu1  ;;  %v997_v34 = vsel %vm267_vm0, %v1367_v24, 0.0 }
 0x3a2   :  { %v993_v30 = vsel %vm267_vm0, %v938_v29, 0.0 }
 0x3a3   :  { %v994_v19 = vadd.f32 %v993_v30, %v992_v16 }
 0x3a5   :  { %v996_v13 = vadd.f32 %v995_v43, %v994_v19 }
 0x3a6   :  { %v1370_v36 = vpop.f32.mrb[24].mxu1 }
 0x3a7   :  { %v951_v26 = vpop.f32.mrb[25].mxu1  ;;  %v998_v21 = vadd.f32 %v997_v34, %v996_v13  ;;  %v1003_v25 = vsel %vm267_vm0, %v1370_v36, 0.0 }
 0x3a8   :  { %v999_v27 = vsel %vm267_vm0, %v951_v26, 0.0  ;;  %v1371_v39 = vpop.f32.mrb[26].mxu1 }
 0x3a9   :  { %v1000_v28 = vadd.f32 %v999_v27, %v998_v21  ;;  %v954_v20 = vpop.f32.mrb[27].mxu1  ;;  %v1005_v44 = vsel %vm267_vm0, %v1371_v39, 0.0 }
 0x3aa   :  { %v1001_v33 = vsel %vm267_vm0, %v954_v20, 0.0 }
 0x3ab   :  { %v1002_v8 = vadd.f32 %v1001_v33, %v1000_v28 }
 0x3ad   :  { %v1004_v10 = vadd.f32 %v1003_v25, %v1002_v8 }
 0x3ae   :  { %v1374_v40 = vpop.f32.mrb[28].mxu1 }
 0x3af   :  { %v967_v23 = vpop.f32.mrb[29].mxu1  ;;  %v1006_v31 = vadd.f32 %v1005_v44, %v1004_v10  ;;  %v1011_v46 = vsel %vm267_vm0, %v1374_v40, 0.0 }
 0x3b0   :  { %v1007_v41 = vsel %vm267_vm0, %v967_v23, 0.0  ;;  %v1375_v11 = vpop.f32.mrb[30].mxu1 }
 0x3b1   :  { %v1008_v38 = vadd.f32 %v1007_v41, %v1006_v31  ;;  %v970_v6 = vpop.f32.mrb[31].mxu1  ;;  %v1013_v15 = vsel %vm267_vm0, %v1375_v11, 0.0 }
 0x3b2   :  { %v1009_v14 = vsel %vm267_vm0, %v970_v6, 0.0 }
 0x3b3   :  { %v1010_v45 = vadd.f32 %v1009_v14, %v1008_v38 }
 0x3b5   :  { %v1012_v47 = vadd.f32 %v1011_v46, %v1010_v45 }
 0x3b7   :  { %v1014_v49 = vadd.f32 %v1013_v15, %v1012_v47 }
 0x3b9   :  { %v1015_v7 = vrot.slane %v1014_v49, 4 }
 0x3bb   :  { %v1016_v51 = vadd.f32 %v1015_v7, %v1014_v49 }
 0x3bd   :  { %v1017_v52 = vrot.slane %v1016_v51, 2 }
 0x3bf   :  { %v1018_v55 = vadd.f32 %v1017_v52, %v1016_v51 }
 0x3c1   :  { %v1019_v56 = vrot.slane %v1018_v55, 1 }
 0x3c3   :  { %v1020_v57 = vadd.f32 %v1019_v56, %v1018_v55 }
 0x3c5   :  { %v1021_v58 = vmul.f32 0.0078125, %v1020_v57 }
 0x3c7   :  { %v1997_v4 = vsub.f32 %v919_v32, %v1021_v58  ;;  %v1999_v5 = vsub.f32 %v922_v17, %v1021_v58  ;;  %v2001_v16 = vsub.f32 %v1362_v48, %v1021_v58  ;;  %v2003_v30 = vsub.f32 %v1363_v9, %v1021_v58 }
 0x3c8   :  { %v2005_v19 = vsub.f32 %v935_v37, %v1021_v58  ;;  %v2007_v43 = vsub.f32 %v938_v29, %v1021_v58  ;;  %v2009_v13 = vsub.f32 %v1366_v60, %v1021_v58  ;;  %v2011_v34 = vsub.f32 %v1367_v24, %v1021_v58 }
 0x3c9   :  { %v2013_v21 = vsub.f32 %v951_v26, %v1021_v58  ;;  %v2015_v27 = vsub.f32 %v954_v20, %v1021_v58  ;;  %v2017_v32 = vsub.f32 %v1370_v36, %v1021_v58  ;;  %v2019_v17 = vsub.f32 %v1371_v39, %v1021_v58 }
 0x3ca   :  { %v2021_v48 = vsub.f32 %v967_v23, %v1021_v58  ;;  %v2023_v9 = vsub.f32 %v970_v6, %v1021_v58  ;;  %v2025_v37 = vsub.f32 %v1374_v40, %v1021_v58  ;;  %v2027_v29 = vsub.f32 %v1375_v11, %v1021_v58 }
 0x3cb   :  { %v1038_v60 = vmul.f32 %v1997_v4, %v1997_v4  ;;  %v1039_v24 = vmul.f32 %v1999_v5, %v1999_v5  ;;  %v1040_v36 = vmul.f32 %v2001_v16, %v2001_v16  ;;  %v1041_v26 = vmul.f32 %v2003_v30, %v2003_v30 }
 0x3cc   :  { %v1042_v33 = vmul.f32 %v2005_v19, %v2005_v19  ;;  %v1043_v10 = vmul.f32 %v2007_v43, %v2007_v43  ;;  %v1044_v23 = vmul.f32 %v2009_v13, %v2009_v13  ;;  %v1045_v11 = vmul.f32 %v2011_v34, %v2011_v34 }
 0x3cd   :  { %v1054_v39 = vsel %vm267_vm0, %v1038_v60, 0.0  ;;  %v1055_v28 = vsel %vm267_vm0, %v1039_v24, 0.0  ;;  %v1057_v8 = vsel %vm267_vm0, %v1040_v36, 0.0  ;;  %v1059_v44 = vsel %vm267_vm0, %v1041_v26, 0.0 }
 0x3ce   :  { %v1056_v20 = vadd.f32 %v1055_v28, %v1054_v39  ;;  %v1061_v31 = vsel %vm267_vm0, %v1042_v33, 0.0  ;;  %v1063_v38 = vsel %vm267_vm0, %v1043_v10, 0.0  ;;  %v1046_v14 = vmul.f32 %v2013_v21, %v2013_v21 }
 0x3cf   :  { %v1065_v45 = vsel %vm267_vm0, %v1044_v23, 0.0  ;;  %v1047_v47 = vmul.f32 %v2015_v27, %v2015_v27  ;;  %v1067_v15 = vsel %vm267_vm0, %v1045_v11, 0.0  ;;  %v1048_v7 = vmul.f32 %v2017_v32, %v2017_v32 }
 0x3d0   :  { %v1058_v25 = vadd.f32 %v1057_v8, %v1056_v20  ;;  %v1069_v51 = vsel %vm267_vm0, %v1046_v14, 0.0  ;;  %v1049_v55 = vmul.f32 %v2019_v17, %v2019_v17  ;;  %v1050_v58 = vmul.f32 %v2021_v48, %v2021_v48 }
 0x3d1   :  { %v1071_v56 = vsel %vm267_vm0, %v1047_v47, 0.0  ;;  %v1073_v60 = vsel %vm267_vm0, %v1048_v7, 0.0  ;;  %v1051_v36 = vmul.f32 %v2023_v9, %v2023_v9  ;;  %v1052_v28 = vmul.f32 %v2025_v37, %v2025_v37 }
 0x3d2   :  { %v1060_v40 = vadd.f32 %v1059_v44, %v1058_v25  ;;  %v1075_v26 = vsel %vm267_vm0, %v1049_v55, 0.0  ;;  %v1077_v20 = vsel %vm267_vm0, %v1050_v58, 0.0  ;;  %v1053_v8 = vmul.f32 %v2027_v29, %v2027_v29  ;;  %v1260_v55 = vld [vmem:[%s2159_s9] ss:$0 sm:$0xff] }
 0x3d3   :  { %v1079_v25 = vsel %vm267_vm0, %v1051_v36, 0.0  ;;  %v1081_v44 = vsel %vm267_vm0, %v1052_v28, 0.0 }
 0x3d4   :  { %v1062_v41 = vadd.f32 %v1061_v31, %v1060_v40  ;;  %v1083_v23 = vsel %vm267_vm0, %v1053_v8, 0.0 }
 0x3d6   :  { %v1064_v6 = vadd.f32 %v1063_v38, %v1062_v41 }
 0x3d8   :  { %v1066_v46 = vadd.f32 %v1065_v45, %v1064_v6 }
 0x3da   :  { %v1068_v49 = vadd.f32 %v1067_v15, %v1066_v46 }
 0x3dc   :  { %v1070_v52 = vadd.f32 %v1069_v51, %v1068_v49 }
 0x3de   :  { %v1072_v57 = vadd.f32 %v1071_v56, %v1070_v52 }
 0x3e0   :  { %v1074_v24 = vadd.f32 %v1073_v60, %v1072_v57 }
 0x3e2   :  { %v1076_v39 = vadd.f32 %v1075_v26, %v1074_v24 }
 0x3e4   :  { %v1078_v33 = vadd.f32 %v1077_v20, %v1076_v39 }
 0x3e6   :  { %v1080_v10 = vadd.f32 %v1079_v25, %v1078_v33 }
 0x3e8   :  { %v1082_v40 = vadd.f32 %v1081_v44, %v1080_v10 }
 0x3ea   :  { %v1084_v31 = vadd.f32 %v1083_v23, %v1082_v40 }
 0x3ec   :  { %v1085_v41 = vrot.slane %v1084_v31, 4 }
 0x3ee   :  { %v1086_v11 = vadd.f32 %v1085_v41, %v1084_v31 }
 0x3f0   :  { %v1087_v38 = vrot.slane %v1086_v11, 2 }
 0x3f2   :  { %v1088_v6 = vadd.f32 %v1087_v38, %v1086_v11 }
 0x3f4   :  { %v1089_v14 = vrot.slane %v1088_v6, 1 }
 0x3f6   :  { %v1090_v45 = vadd.f32 %v1089_v14, %v1088_v6 }
 0x3f8   :  { %v1091_v46 = vmul.f32 0.0078125, %v1090_v45 }
 0x3fa   :  { %v1092_v47 = vadd.f32 1e-05, %v1091_v46 }
 0x3fc   :  { %1405 = vrsqrt.f32 %v1092_v47 }
 0x406   :  { %v1406_v15 = vpop.eup %1405 }
 0x407   :  { %v1094_v49 = vmul.f32 %v1406_v15, %v1997_v4  ;;  %v1095_v7 = vmul.f32 %v1406_v15, %v1999_v5  ;;  %v1096_v51 = vmul.f32 %v1406_v15, %v2001_v16  ;;  %v1097_v52 = vmul.f32 %v1406_v15, %v2003_v30 }
 0x408   :  { %v1098_v56 = vmul.f32 %v1406_v15, %v2005_v19  ;;  %v1099_v57 = vmul.f32 %v1406_v15, %v2007_v43  ;;  %v1100_v58 = vmul.f32 %v1406_v15, %v2009_v13  ;;  %v1101_v60 = vmul.f32 %v1406_v15, %v2011_v34 }
 0x409   :  { %v1102_v4 = vmul.f32 %v1406_v15, %v2013_v21  ;;  %v1103_v5 = vmul.f32 %v1406_v15, %v2015_v27  ;;  %v1104_v16 = vmul.f32 %v1406_v15, %v2017_v32  ;;  %v1105_v30 = vmul.f32 %v1406_v15, %v2019_v17  ;;  %v1261_v21 = vld [vmem:[%s2160_s10] ss:$0 sm:$0xff]  ;;  %s1431_s10 = smov [#allocation2]  }
 0x40a   :  { %v1106_v24 = vmul.f32 %v1406_v15, %v2021_v48  ;;  %v1107_v36 = vmul.f32 %v1406_v15, %v2023_v9  ;;  %v1108_v19 = vmul.f32 %v1406_v15, %v2025_v37  ;;  %v1109_v43 = vmul.f32 %v1406_v15, %v2027_v29  ;;  %s1207_s13 = sshll.u32 %s1431_s10, 4  ;;  %s2115_s13 = int_to_ptr.vmem [resolvable:$true] %s1207_s13 }
 0x40b   :  { %v1116_v26 = vmul.f32 %v1260_v55, %v1094_v49  ;;  %v1117_v13 = vmul.f32 %v1260_v55, %v1095_v7  ;;  %v1118_v39 = vmul.f32 %v1260_v55, %v1096_v51  ;;  %v1119_v34 = vmul.f32 %v1260_v55, %v1097_v52  ;;  %s1407_s0 = scalar_lea.vmem %s2115_s13, 2048  ;;  %p1412_p1 = scmp.lt.s32.totalorder %s2115_s13, %s2115_s13 }
 0x40c   :  { %v1120_v27 = vmul.f32 %v1260_v55, %v1098_v56  ;;  %v1121_v32 = vmul.f32 %v1260_v55, %v1099_v57  ;;  %v1122_v28 = vmul.f32 %v1260_v55, %v1100_v58  ;;  %v1123_v17 = vmul.f32 %v1260_v55, %v1101_v60  ;;  %p1408_p0 = scmp.ne.s32.totalorder %s2115_s13, %s1407_s0  ;;  %p1413_p2 = scmp.lt.s32.totalorder %s1407_s0, %s1407_s0 }
 0x40d   :  { %v1124_v20 = vmul.f32 %v1260_v55, %v1102_v4  ;;  %v1125_v48 = vmul.f32 %v1260_v55, %v1103_v5  ;;  %v1126_v33 = vmul.f32 %v1260_v55, %v1104_v16  ;;  %v1127_v9 = vmul.f32 %v1260_v55, %v1105_v30 }
 0x40e   :  { %v1128_v8 = vmul.f32 %v1260_v55, %v1106_v24  ;;  %v1129_v37 = vmul.f32 %v1260_v55, %v1107_v36  ;;  %v1130_v25 = vmul.f32 %v1260_v55, %v1108_v19  ;;  %v1131_v29 = vmul.f32 %v1260_v55, %v1109_v43  ;;  %p1414_p3 = por %p1413_p2, %p1412_p1 }
 0x40f   :  { %v1138_v10 = vadd.f32 %v1261_v21, %v1116_v26  ;;  %v1139_v44 = vadd.f32 %v1261_v21, %v1117_v13  ;;  %v1140_v40 = vadd.f32 %v1261_v21, %v1118_v39  ;;  %v1141_v23 = vadd.f32 %v1261_v21, %v1119_v34 }
 0x410   :  { %v1142_v31 = vadd.f32 %v1261_v21, %v1120_v27  ;;  %v1143_v41 = vadd.f32 %v1261_v21, %v1121_v32  ;;  %v1144_v11 = vadd.f32 %v1261_v21, %v1122_v28  ;;  %v1145_v38 = vadd.f32 %v1261_v21, %v1123_v17  ;;  %p1415_p4 = pnand %p1414_p3, %p1408_p0 }
 0x411   :  { %v1146_v6 = vadd.f32 %v1261_v21, %v1124_v20  ;;  %v1147_v14 = vadd.f32 %v1261_v21, %v1125_v48  ;;  %v1148_v45 = vadd.f32 %v1261_v21, %v1126_v33  ;;  %v1149_v46 = vadd.f32 %v1261_v21, %v1127_v9 }
 0x412   :  { %v1150_v47 = vadd.f32 %v1261_v21, %v1128_v8  ;;  %v1151_v15 = vadd.f32 %v1261_v21, %v1129_v37  ;;  %v1152_v49 = vadd.f32 %v1261_v21, %v1130_v25  ;;  %v1153_v7 = vadd.f32 %v1261_v21, %v1131_v29 }
 0x413   :  { %v1154_v51 = vmax.f32 %v1138_v10, 0.0  ;;  %v1155_v52 = vmax.f32 %v1139_v44, 0.0  ;;  %v1156_v56 = vmax.f32 %v1140_v40, 0.0  ;;  %v1157_v55 = vmax.f32 %v1141_v23, 0.0 }
 0x414   :  { %v1158_v57 = vmax.f32 %v1142_v31, 0.0  ;;  %v1159_v58 = vmax.f32 %v1143_v41, 0.0  ;;  %v1160_v60 = vmax.f32 %v1144_v11, 0.0  ;;  %v1161_v4 = vmax.f32 %v1145_v38, 0.0 }
 0x415   :  { %v1162_v5 = vmax.f32 %v1146_v6, 0.0  ;;  %v1163_v16 = vmax.f32 %v1147_v14, 0.0  ;;  %v1164_v30 = vmax.f32 %v1148_v45, 0.0  ;;  %v1165_v24 = vmax.f32 %v1149_v46, 0.0 }
 0x416   :  { %v1166_v36 = vmax.f32 %v1150_v47, 0.0  ;;  %v1167_v19 = vmax.f32 %v1151_v15, 0.0  ;;  %v1168_v43 = vmax.f32 %v1152_v49, 0.0  ;;  %v1169_v26 = vmax.f32 %v1153_v7, 0.0 }
 0x417   :  { %v1170_v13 = vadd.f32 %v1154_v51, %v1697_v59  ;;  %v1171_v39 = vadd.f32 %v1155_v52, %v1700_v62  ;;  %v1172_v34 = vadd.f32 %v1156_v56, %v1702_v63  ;;  %v1173_v21 = vadd.f32 %v1157_v55, %v1704_v0 }
 0x418   :  { %v1174_v27 = vadd.f32 %v1158_v57, %v1706_v1  ;;  %v1175_v32 = vadd.f32 %v1159_v58, %v1708_v2  ;;  %v1176_v28 = vadd.f32 %v1160_v60, %v1742_v18  ;;  %v1177_v17 = vadd.f32 %v1161_v4, %v1744_v22 }
 0x419   :  { %v1178_v20 = vadd.f32 %v1162_v5, %v1758_v42  ;;  %v1179_v48 = vadd.f32 %v1163_v16, %v1762_v12  ;;  %v1180_v59 = vadd.f32 %v1164_v30, %v1783_v35  ;;  %v1181_v62 = vadd.f32 %v1165_v24, %v1785_v50  ;;  %1186 = vst.msk [vmem:[#allocation2] sm:$0xff] %vm267_vm0, %v1170_v13 }
 0x41a   :  { %1187 = vst.msk [vmem:[#allocation2 + $0x8] sm:$0xff] %vm267_vm0, %v1171_v39  ;;  %1188 = vst.msk [vmem:[#allocation2 + $0x10] sm:$0xff] %vm267_vm0, %v1172_v34  ;;  %v1182_v63 = vadd.f32 %v1166_v36, %v1791_v54  ;;  %v1183_v0 = vadd.f32 %v1167_v19, %v1789_v53  ;;  %v1184_v1 = vadd.f32 %v1168_v43, %v1805_v61 }
 0x41b   :  { %1189 = vst.msk [vmem:[#allocation2 + $0x18] sm:$0xff] %vm267_vm0, %v1173_v21  ;;  %v1185_v2 = vadd.f32 %v1169_v26, %v1807_v3  ;;  %1190 = vst.msk [vmem:[#allocation2 + $0x20] sm:$0xff] %vm267_vm0, %v1174_v27 }
 0x41c   :  { %1191 = vst.msk [vmem:[#allocation2 + $0x28] sm:$0xff] %vm267_vm0, %v1175_v32  ;;  %1192 = vst.msk [vmem:[#allocation2 + $0x30] sm:$0xff] %vm267_vm0, %v1176_v28 }
 0x41d   :  { %1193 = vst.msk [vmem:[#allocation2 + $0x38] sm:$0xff] %vm267_vm0, %v1177_v17  ;;  %1194 = vst.msk [vmem:[#allocation2 + $0x40] sm:$0xff] %vm267_vm0, %v1178_v20 }
 0x41e   :  { %1195 = vst.msk [vmem:[#allocation2 + $0x48] sm:$0xff] %vm267_vm0, %v1179_v48  ;;  %1196 = vst.msk [vmem:[#allocation2 + $0x50] sm:$0xff] %vm267_vm0, %v1180_v59 }
 0x41f   :  { %1197 = vst.msk [vmem:[#allocation2 + $0x58] sm:$0xff] %vm267_vm0, %v1181_v62  ;;  %1198 = vst.msk [vmem:[#allocation2 + $0x60] sm:$0xff] %vm267_vm0, %v1182_v63 }
 0x420   :  { %1199 = vst.msk [vmem:[#allocation2 + $0x68] sm:$0xff] %vm267_vm0, %v1183_v0  ;;  %1200 = vst.msk [vmem:[#allocation2 + $0x70] sm:$0xff] %vm267_vm0, %v1184_v1 }
 0x421   :  { %1201 = vst.msk [vmem:[#allocation2 + $0x78] sm:$0xff] %vm267_vm0, %v1185_v2 }
 0x422   :  { %1418 = shalt.err (!%p1415_p4)
}
 0x423   :  { %s1419_s15 = scalar_lea.hbm %s2161_s11, 2048 }
 0x424   :  { %p1420_p5 = scmp.ne.s32.totalorder %s2161_s11, %s1419_s15  ;;  %p1423_p6 = scmp.lt.u32.totalorder %s1419_s15, %s2161_s11 }
 0x426   :  { %p1425_p7 = pnand %p1423_p6, %p1420_p5 }
 0x428   :  { %1428 = shalt.err (!%p1425_p7)
}
 0x429   :  { %s1432_s18 = smov 128   ;;  %s1433_s19 = smov 8  }
 0x42a   :  { %1213 = dma.vmem_to_hbm [thread:$0]  %s2115_s13, 2048, %s2161_s11, [#allocation3], %s1432_s18, %s1432_s18, %s1433_s19  }
 0x42b   :  { %1429 = dma.done.wait [#allocation3], 2048  }
 0x42c   :  { %1430 = vsyncadd [#allocation3], 4294965248 }
 0x42d   :  { %1217 = vsyncpa [#allocation3], 1 }

// kernel: cnn_transformer_forward.5
= control target key start
LH: loop header
LB: loop body
LE: loop exit
PB: predicated region body
PF: predicated region fallthrough
CT: control target
= control target key end

     0   :  { %vm266_vm0 = vcmask 261120   ;;  %vm633_vm1 = vcmask 523264   ;;  %s2159_s1 = inlined_call_operand.vmem [shape: bf16[128,32], index: 1, kind: input, shape index: {}]   ;;  %s2160_s0 = inlined_call_operand.vmem [shape: bf16[128,128], index: 0, kind: input, shape index: {}]   ;;  %s2161_s5 = inlined_call_operand.vmem [shape: bf16[32,64], index: 5, kind: input, shape index: {}]   ;;  %s2162_s2 = inlined_call_operand.vmem [shape: f32[1,32], index: 2, kind: input, shape index: {}]   ;;  %s2163_s3 = inlined_call_operand.vmem [shape: f32[1,32], index: 3, kind: input, shape index: {}]   ;;  %s2164_s4 = inlined_call_operand.vmem [shape: f32[128,32], index: 4, kind: input, shape index: {}]   ;;  %s2165_s8 = inlined_call_operand.vmem [shape: bf16[64,32], index: 8, kind: input, shape index: {}]   ;;  %s2166_s6 = inlined_call_operand.vmem [shape: f32[1,64], index: 6, kind: input, shape index: {}]   ;;  %s2167_s7 = inlined_call_operand.vmem [shape: f32[1,64], index: 7, kind: input, shape index: {}]   ;;  %s2168_s9 = inlined_call_operand.vmem [shape: f32[1,32], index: 9, kind: input, shape index: {}]   ;;  %s2169_s10 = inlined_call_operand.vmem [shape: f32[1,32], index: 10, kind: input, shape index: {}]   ;;  %s2170_s11 = inlined_call_operand.vmem [shape: f32[128,32], index: 11, kind: output, shape index: {}]  }
   0x1   :  { %v1363_v0 = vld [vmem:[%s2159_s1] sm:$0xff]   ;;  %v1364_v1 = vld [vmem:[%s2159_s1 + $0x8] sm:$0xff]   ;;  %v1365_v2 = vld [vmem:[%s2159_s1 + $0x10] sm:$0xff]  }
   0x2   :  { %1287 = vmatprep.subr.bf16.mxu0 %v1363_v0  ;;  %v1366_v3 = vld [vmem:[%s2159_s1 + $0x18] sm:$0xff]   ;;  %v1371_v4 = vld [vmem:[%s2160_s0] sm:$0xff]   ;;  %v1368_v6 = vld [vmem:[%s2159_s1 + $0x28] sm:$0xff]  }
   0x3   :  { %1288 = vmatpush3.bf16.msra.mxu0 %v1363_v0  ;;  %1303 = vmatprep.mubr.bf16.mxu0 %v1371_v4  ;;  %v1367_v5 = vld [vmem:[%s2159_s1 + $0x20] sm:$0xff]   ;;  %v1369_v7 = vld [vmem:[%s2159_s1 + $0x30] sm:$0xff]   ;;  %v1370_v8 = vld [vmem:[%s2159_s1 + $0x38] sm:$0xff]  }
   0x4   :  { %1289 = vmatprep.subr.bf16.mxu0 %v1364_v1  ;;  %v1372_v9 = vld [vmem:[%s2160_s0 + $0x8] sm:$0xff]   ;;  %v1373_v10 = vld [vmem:[%s2160_s0 + $0x10] sm:$0xff]   ;;  %v1374_v11 = vld [vmem:[%s2160_s0 + $0x18] sm:$0xff]  }
   0x5   :  { %v1375_v12 = vld [vmem:[%s2160_s0 + $0x20] sm:$0xff]   ;;  %v1376_v13 = vld [vmem:[%s2160_s0 + $0x28] sm:$0xff]   ;;  %v1377_v14 = vld [vmem:[%s2160_s0 + $0x30] sm:$0xff]  }
   0x6   :  { %v1378_v15 = vld [vmem:[%s2160_s0 + $0x38] sm:$0xff]   ;;  %v1379_v16 = vld [vmem:[%s2161_s5] sm:$0xff]   ;;  %v1380_v17 = vld [vmem:[%s2161_s5 + $0x8] sm:$0xff]  }
   0x7   :  { %1290 = vmatpush3.bf16.msra.mxu0 %v1364_v1  ;;  %1319 = vmatprep.subr.bf16.mxu1 %v1379_v16 }
   0x8   :  { %1291 = vmatprep.subr.bf16.mxu0 %v1365_v2  ;;  %1320 = vmatpush3.bf16.msra.mxu1 %v1379_v16 }
   0x9   :  { %1321 = vmatprep.subr.bf16.mxu1 %v1380_v17 }
   0xb   :  { %1292 = vmatpush3.bf16.msra.mxu0 %v1365_v2 }
   0xc   :  { %1293 = vmatprep.subr.bf16.mxu0 %v1366_v3  ;;  %1322 = vmatpush3.bf16.msra.mxu1 %v1380_v17 }
   0xf   :  { %1294 = vmatpush3.bf16.msra.mxu0 %v1366_v3 }
  0x10   :  { %1295 = vmatprep.subr.bf16.mxu0 %v1367_v5 }
  0x13   :  { %1296 = vmatpush3.bf16.msra.mxu0 %v1367_v5 }
  0x14   :  { %1297 = vmatprep.subr.bf16.mxu0 %v1368_v6 }
  0x17   :  { %1298 = vmatpush3.bf16.msra.mxu0 %v1368_v6 }
  0x18   :  { %1299 = vmatprep.subr.bf16.mxu0 %v1369_v7 }
  0x1b   :  { %1300 = vmatpush3.bf16.msra.mxu0 %v1369_v7 }
  0x1c   :  { %1301 = vmatprep.subr.bf16.mxu0 %v1370_v8 }
  0x1f   :  { %1302 = vmatpush3.bf16.msra.mxu0 %v1370_v8 }
  0x22   :  { %1304 = vmatmul.mubr.bf16.vlgmr.msra.gmra.mrb[0].mxu0 %v1372_v9 }
  0x23   :  { %1307 = vmatprep.mubr.bf16.mxu0 %v1373_v10 }
  0x2a   :  { %1308 = vmatmul.mubr.bf16.gmra.mrb[4].mxu0 %v1374_v11 }
  0x2b   :  { %1311 = vmatprep.mubr.bf16.mxu0 %v1375_v12 }
  0x32   :  { %1312 = vmatmul.mubr.bf16.gmra.mrb[8].mxu0 %v1376_v13 }
  0x33   :  { %1315 = vmatprep.mubr.bf16.mxu0 %v1377_v14 }
  0x3a   :  { %1316 = vmatmul.mubr.bf16.gmra.mrb[12].mxu0 %v1378_v15 }
  0xf5   :  { %v1305_v18 = vpop.f32.mrb[0].mxu0 }
  0xf6   :  { %v201_v19 = vpop.f32.mrb[1].mxu0  ;;  %v270_v25 = vsel %vm266_vm0, %v1305_v18, 0.0 }
  0xf7   :  { %v1306_v20 = vpop.f32.mrb[2].mxu0  ;;  %v267_v22 = vsel %vm266_vm0, %v201_v19, 0.0 }
  0xf8   :  { %v204_v21 = vpop.f32.mrb[3].mxu0  ;;  %v272_v27 = vsel %vm266_vm0, %v1306_v20, 0.0 }
  0xf9   :  { %v268_v23 = vsel %vm266_vm0, %v204_v21, 0.0 }
  0xfa   :  { %v269_v24 = vadd.f32 %v268_v23, %v267_v22 }
  0xfc   :  { %v271_v26 = vadd.f32 %v270_v25, %v269_v24 }
  0xfd   :  { %v1309_v28 = vpop.f32.mrb[4].mxu0 }
  0xfe   :  { %v217_v29 = vpop.f32.mrb[5].mxu0  ;;  %v273_v30 = vadd.f32 %v272_v27, %v271_v26  ;;  %v278_v37 = vsel %vm266_vm0, %v1309_v28, 0.0 }
  0xff   :  { %v274_v31 = vsel %vm266_vm0, %v217_v29, 0.0  ;;  %v1310_v32 = vpop.f32.mrb[6].mxu0 }
 0x100   :  { %v275_v33 = vadd.f32 %v274_v31, %v273_v30  ;;  %v220_v34 = vpop.f32.mrb[7].mxu0  ;;  %v280_v39 = vsel %vm266_vm0, %v1310_v32, 0.0 }
 0x101   :  { %v276_v35 = vsel %vm266_vm0, %v220_v34, 0.0 }
 0x102   :  { %v277_v36 = vadd.f32 %v276_v35, %v275_v33 }
 0x104   :  { %v279_v38 = vadd.f32 %v278_v37, %v277_v36 }
 0x105   :  { %v1313_v40 = vpop.f32.mrb[8].mxu0 }
 0x106   :  { %v233_v41 = vpop.f32.mrb[9].mxu0  ;;  %v281_v42 = vadd.f32 %v280_v39, %v279_v38  ;;  %v286_v49 = vsel %vm266_vm0, %v1313_v40, 0.0 }
 0x107   :  { %v282_v43 = vsel %vm266_vm0, %v233_v41, 0.0  ;;  %v1314_v44 = vpop.f32.mrb[10].mxu0 }
 0x108   :  { %v283_v45 = vadd.f32 %v282_v43, %v281_v42  ;;  %v236_v46 = vpop.f32.mrb[11].mxu0  ;;  %v288_v51 = vsel %vm266_vm0, %v1314_v44, 0.0 }
 0x109   :  { %v284_v47 = vsel %vm266_vm0, %v236_v46, 0.0 }
 0x10a   :  { %v285_v48 = vadd.f32 %v284_v47, %v283_v45 }
 0x10c   :  { %v287_v50 = vadd.f32 %v286_v49, %v285_v48 }
 0x10d   :  { %v1317_v52 = vpop.f32.mrb[12].mxu0 }
 0x10e   :  { %v249_v53 = vpop.f32.mrb[13].mxu0  ;;  %v289_v54 = vadd.f32 %v288_v51, %v287_v50  ;;  %v294_v61 = vsel %vm266_vm0, %v1317_v52, 0.0 }
 0x10f   :  { %v290_v55 = vsel %vm266_vm0, %v249_v53, 0.0  ;;  %v1318_v56 = vpop.f32.mrb[14].mxu0 }
 0x110   :  { %v291_v57 = vadd.f32 %v290_v55, %v289_v54  ;;  %v252_v58 = vpop.f32.mrb[15].mxu0  ;;  %v296_v63 = vsel %vm266_vm0, %v1318_v56, 0.0 }
 0x111   :  { %v292_v59 = vsel %vm266_vm0, %v252_v58, 0.0 }
 0x112   :  { %v293_v60 = vadd.f32 %v292_v59, %v291_v57 }
 0x114   :  { %v295_v62 = vadd.f32 %v294_v61, %v293_v60 }
 0x116   :  { %v297_v0 = vadd.f32 %v296_v63, %v295_v62 }
 0x118   :  { %v298_v1 = vrot.slane %v297_v0, 4 }
 0x11a   :  { %v299_v2 = vadd.f32 %v298_v1, %v297_v0 }
 0x11c   :  { %v300_v3 = vrot.slane %v299_v2, 2 }
 0x11e   :  { %v301_v4 = vadd.f32 %v300_v3, %v299_v2 }
 0x120   :  { %v302_v5 = vrot.slane %v301_v4, 1 }
 0x122   :  { %v303_v6 = vadd.f32 %v302_v5, %v301_v4 }
 0x124   :  { %v305_v7 = vmul.f32 0.0078125, %v303_v6 }
 0x126   :  { %v1521_v8 = vsub.f32 %v201_v19, %v305_v7  ;;  %v1523_v9 = vsub.f32 %v204_v21, %v305_v7  ;;  %v1525_v10 = vsub.f32 %v1305_v18, %v305_v7  ;;  %v1527_v11 = vsub.f32 %v1306_v20, %v305_v7 }
 0x127   :  { %v1529_v12 = vsub.f32 %v217_v29, %v305_v7  ;;  %v1531_v13 = vsub.f32 %v220_v34, %v305_v7  ;;  %v1533_v14 = vsub.f32 %v1309_v28, %v305_v7  ;;  %v1535_v15 = vsub.f32 %v1310_v32, %v305_v7 }
 0x128   :  { %v1537_v16 = vsub.f32 %v233_v41, %v305_v7  ;;  %v1539_v17 = vsub.f32 %v236_v46, %v305_v7  ;;  %v1541_v19 = vsub.f32 %v1313_v40, %v305_v7  ;;  %v1543_v21 = vsub.f32 %v1314_v44, %v305_v7 }
 0x129   :  { %v1545_v18 = vsub.f32 %v249_v53, %v305_v7  ;;  %v1547_v20 = vsub.f32 %v252_v58, %v305_v7  ;;  %v1549_v22 = vsub.f32 %v1317_v52, %v305_v7  ;;  %v1551_v23 = vsub.f32 %v1318_v56, %v305_v7 }
 0x12a   :  { %v322_v24 = vmul.f32 %v1521_v8, %v1521_v8  ;;  %v323_v25 = vmul.f32 %v1523_v9, %v1523_v9  ;;  %v324_v26 = vmul.f32 %v1525_v10, %v1525_v10  ;;  %v325_v27 = vmul.f32 %v1527_v11, %v1527_v11 }
 0x12b   :  { %v326_v31 = vmul.f32 %v1529_v12, %v1529_v12  ;;  %v327_v34 = vmul.f32 %v1531_v13, %v1531_v13  ;;  %v328_v37 = vmul.f32 %v1533_v14, %v1533_v14  ;;  %v329_v40 = vmul.f32 %v1535_v15, %v1535_v15 }
 0x12c   :  { %v338_v28 = vsel %vm266_vm0, %v322_v24, 0.0  ;;  %v339_v29 = vsel %vm266_vm0, %v323_v25, 0.0  ;;  %v341_v32 = vsel %vm266_vm0, %v324_v26, 0.0  ;;  %v343_v35 = vsel %vm266_vm0, %v325_v27, 0.0 }
 0x12d   :  { %v340_v30 = vadd.f32 %v339_v29, %v338_v28  ;;  %v345_v38 = vsel %vm266_vm0, %v326_v31, 0.0  ;;  %v347_v41 = vsel %vm266_vm0, %v327_v34, 0.0  ;;  %v330_v43 = vmul.f32 %v1537_v16, %v1537_v16 }
 0x12e   :  { %v349_v44 = vsel %vm266_vm0, %v328_v37, 0.0  ;;  %v331_v46 = vmul.f32 %v1539_v17, %v1539_v17  ;;  %v351_v47 = vsel %vm266_vm0, %v329_v40, 0.0  ;;  %v332_v49 = vmul.f32 %v1541_v19, %v1541_v19  ;;  %v1623_v37 = vld [vmem:[%s2163_s3] ss:$0 sm:$0xff] }
 0x12f   :  { %v342_v33 = vadd.f32 %v341_v32, %v340_v30  ;;  %v353_v50 = vsel %vm266_vm0, %v330_v43, 0.0  ;;  %v333_v52 = vmul.f32 %v1543_v21, %v1543_v21  ;;  %v334_v55 = vmul.f32 %v1545_v18, %v1545_v18  ;;  %v1606_v32 = vld [vmem:[%s2162_s2] ss:$0 sm:$0xff] }
 0x130   :  { %v355_v53 = vsel %vm266_vm0, %v331_v46, 0.0  ;;  %v357_v56 = vsel %vm266_vm0, %v332_v49, 0.0  ;;  %v335_v58 = vmul.f32 %v1547_v20, %v1547_v20  ;;  %v336_v61 = vmul.f32 %v1549_v22, %v1549_v22  ;;  %v457_v49 = vld [vmem:[%s2164_s4 + $0x18] sm:$0xff] }
 0x131   :  { %v344_v36 = vadd.f32 %v343_v35, %v342_v33  ;;  %v359_v59 = vsel %vm266_vm0, %v333_v52, 0.0  ;;  %v361_v62 = vsel %vm266_vm0, %v334_v55, 0.0  ;;  %v337_v0 = vmul.f32 %v1551_v23, %v1551_v23 }
 0x132   :  { %v363_v1 = vsel %vm266_vm0, %v335_v58, 0.0  ;;  %v365_v3 = vsel %vm266_vm0, %v336_v61, 0.0 }
 0x133   :  { %v346_v39 = vadd.f32 %v345_v38, %v344_v36  ;;  %v367_v5 = vsel %vm266_vm0, %v337_v0, 0.0 }
 0x135   :  { %v348_v42 = vadd.f32 %v347_v41, %v346_v39 }
 0x137   :  { %v350_v45 = vadd.f32 %v349_v44, %v348_v42  ;;  %v455_v44 = vld [vmem:[%s2164_s4 + $0x8] sm:$0xff] }
 0x139   :  { %v352_v48 = vadd.f32 %v351_v47, %v350_v45 }
 0x13b   :  { %v354_v51 = vadd.f32 %v353_v50, %v352_v48 }
 0x13d   :  { %v356_v54 = vadd.f32 %v355_v53, %v354_v51  ;;  %v458_v51 = vld [vmem:[%s2164_s4 + $0x20] sm:$0xff] }
 0x13f   :  { %v358_v57 = vadd.f32 %v357_v56, %v356_v54 }
 0x141   :  { %v360_v60 = vadd.f32 %v359_v59, %v358_v57  ;;  %v459_v57 = vld [vmem:[%s2164_s4 + $0x28] sm:$0xff] }
 0x143   :  { %v362_v63 = vadd.f32 %v361_v62, %v360_v60 }
 0x145   :  { %v364_v2 = vadd.f32 %v363_v1, %v362_v63 }
 0x147   :  { %v366_v4 = vadd.f32 %v365_v3, %v364_v2 }
 0x149   :  { %v368_v6 = vadd.f32 %v367_v5, %v366_v4 }
 0x14b   :  { %v369_v7 = vrot.slane %v368_v6, 4 }
 0x14d   :  { %v370_v24 = vadd.f32 %v369_v7, %v368_v6 }
 0x14f   :  { %v371_v25 = vrot.slane %v370_v24, 2 }
 0x151   :  { %v372_v26 = vadd.f32 %v371_v25, %v370_v24 }
 0x153   :  { %v373_v27 = vrot.slane %v372_v26, 1 }
 0x155   :  { %v374_v28 = vadd.f32 %v373_v27, %v372_v26 }
 0x157   :  { %v375_v29 = vmul.f32 0.0078125, %v374_v28 }
 0x159   :  { %v376_v30 = vadd.f32 1e-05, %v375_v29  ;;  %v461_v29 = vld [vmem:[%s2164_s4 + $0x38] sm:$0xff] }
 0x15b   :  { %1385 = vrsqrt.f32 %v376_v30 }
 0x165   :  { %v1601_v31 = vpop.eup %1385 }
 0x166   :  { %v1610_v33 = vmul.f32 %v1601_v31, %v1545_v18  ;;  %v391_v34 = vmul.f32 %v1601_v31, %v1547_v20  ;;  %v1616_v35 = vmul.f32 %v1601_v31, %v1549_v22  ;;  %v378_v36 = vmul.f32 %v1601_v31, %v1521_v8 }
 0x167   :  { %v379_v38 = vmul.f32 %v1601_v31, %v1523_v9  ;;  %v380_v18 = vmul.f32 %v1601_v31, %v1525_v10  ;;  %v381_v20 = vmul.f32 %v1601_v31, %v1527_v11  ;;  %v382_v22 = vmul.f32 %v1601_v31, %v1529_v12 }
 0x168   :  { %v400_v39 = vmul.f32 %v1606_v32, %v378_v36  ;;  %v383_v8 = vmul.f32 %v1601_v31, %v1531_v13  ;;  %v384_v40 = vmul.f32 %v1601_v31, %v1533_v14  ;;  %v385_v43 = vmul.f32 %v1601_v31, %v1535_v15  ;;  %v454_v14 = vld [vmem:[%s2164_s4] sm:$0xff]  ;;  %v456_v15 = vld [vmem:[%s2164_s4 + $0x10] sm:$0xff] }
 0x169   :  { %v401_v41 = vmul.f32 %v1606_v32, %v379_v38  ;;  %v402_v9 = vmul.f32 %v1606_v32, %v380_v18  ;;  %v403_v10 = vmul.f32 %v1606_v32, %v381_v20  ;;  %v404_v42 = vmul.f32 %v1606_v32, %v382_v22 }
 0x16a   :  { %v422_v11 = vadd.f32 %v1623_v37, %v400_v39  ;;  %v405_v12 = vmul.f32 %v1606_v32, %v383_v8  ;;  %v406_v52 = vmul.f32 %v1606_v32, %v384_v40  ;;  %v413_v58 = vmul.f32 %v1606_v32, %v391_v34  ;;  %v462_v39 = vld [vmem:[%s2164_s4 + $0x40] sm:$0xff]  ;;  %v463_v40 = vld [vmem:[%s2164_s4 + $0x48] sm:$0xff] }
 0x16b   :  { %v423_v13 = vadd.f32 %v1623_v37, %v401_v41  ;;  %v424_v45 = vadd.f32 %v1623_v37, %v402_v9  ;;  %v425_v46 = vadd.f32 %v1623_v37, %v403_v10  ;;  %v426_v47 = vadd.f32 %v1623_v37, %v404_v42 }
 0x16c   :  { %v438_v48 = vmax.f32 %v422_v11, 0.0  ;;  %v427_v50 = vadd.f32 %v1623_v37, %v405_v12  ;;  %v407_v61 = vmul.f32 %v1606_v32, %v385_v43  ;;  %v428_v3 = vadd.f32 %v1623_v37, %v406_v52 }
 0x16d   :  { %v439_v53 = vmax.f32 %v423_v13, 0.0  ;;  %v440_v54 = vmax.f32 %v424_v45, 0.0  ;;  %v441_v55 = vmax.f32 %v425_v46, 0.0  ;;  %v442_v56 = vmax.f32 %v426_v47, 0.0  ;;  %v464_v47 = vld [vmem:[%s2164_s4 + $0x50] sm:$0xff] }
 0x16e   :  { %v1671_v59 = vadd.f32 %v454_v14, %v438_v48  ;;  %v443_v60 = vmax.f32 %v427_v50, 0.0  ;;  %v429_v4 = vadd.f32 %v1623_v37, %v407_v61  ;;  %v386_v5 = vmul.f32 %v1601_v31, %v1537_v16  ;;  %v460_v16 = vld [vmem:[%s2164_s4 + $0x30] sm:$0xff]  ;;  %v465_v48 = vld [vmem:[%s2164_s4 + $0x58] sm:$0xff] }
 0x16f   :  { %v1674_v62 = vadd.f32 %v455_v44, %v439_v53  ;;  %v1676_v63 = vadd.f32 %v456_v15, %v440_v54  ;;  %v1678_v0 = vadd.f32 %v457_v49, %v441_v55  ;;  %v1680_v1 = vadd.f32 %v458_v51, %v442_v56  ;;  %v467_v49 = vld [vmem:[%s2164_s4 + $0x68] sm:$0xff] }
 0x170   :  { %v1682_v2 = vadd.f32 %v459_v57, %v443_v60  ;;  %v387_v24 = vmul.f32 %v1601_v31, %v1539_v17  ;;  %v388_v25 = vmul.f32 %v1601_v31, %v1541_v19  ;;  %v444_v27 = vmax.f32 %v428_v3, 0.0  ;;  %v468_v60 = vld [vmem:[%s2164_s4 + $0x70] sm:$0xff] }
 0x171   :  { %v486_v6 = vpack.c.bf16 %v1674_v62, %v1671_v59  ;;  %v487_v7 = vpack.c.bf16 %v1678_v0, %v1676_v63  ;;  %v445_v28 = vmax.f32 %v429_v4, 0.0  ;;  %v408_v30 = vmul.f32 %v1606_v32, %v386_v5  ;;  %v1381_v5 = vld [vmem:[%s2165_s8] sm:$0xff]  }
 0x172   :  { %v488_v26 = vpack.c.bf16 %v1682_v2, %v1680_v1  ;;  %v409_v17 = vmul.f32 %v1606_v32, %v387_v24  ;;  %v389_v19 = vmul.f32 %v1601_v31, %v1543_v21  ;;  %v410_v34 = vmul.f32 %v1606_v32, %v388_v25  ;;  %1339 = vmatprep.subr.bf16.mxu1 %v1381_v5  ;;  %v1384_v24 = vld [vmem:[%s2165_s8 + $0x18] sm:$0xff]  }
 0x173   :  { %1323 = vmatprep.mubr.msk.bf16.mxu1 %vm266_vm0, %v486_v6  ;;  %v412_v36 = vmul.f32 %v1606_v32, %v1610_v33  ;;  %v430_v38 = vadd.f32 %v1623_v37, %v408_v30  ;;  %v393_v18 = vmul.f32 %v1601_v31, %v1551_v23  ;;  %v1717_v20 = vadd.f32 %v460_v16, %v444_v27  ;;  %v1382_v6 = vld [vmem:[%s2165_s8 + $0x8] sm:$0xff]  }
 0x174   :  { %1324 = vmatmul.mubr.msk.bf16.vlgmr.msra.gmra.mrb[0].mxu1 %vm266_vm0, %v487_v7  ;;  %v1719_v22 = vadd.f32 %v461_v29, %v445_v28  ;;  %v431_v21 = vadd.f32 %v1623_v37, %v409_v17  ;;  %v411_v33 = vmul.f32 %v1606_v32, %v389_v19  ;;  %v432_v23 = vadd.f32 %v1623_v37, %v410_v34  ;;  %v1383_v7 = vld [vmem:[%s2165_s8 + $0x10] sm:$0xff]  }
 0x175   :  { %1327 = vmatprep.mubr.msk.bf16.mxu1 %vm266_vm0, %v488_v26  ;;  %v446_v8 = vmax.f32 %v430_v38, 0.0  ;;  %v435_v31 = vadd.f32 %v1623_v37, %v413_v58  ;;  %v434_v10 = vadd.f32 %v1623_v37, %v412_v36  ;;  %v414_v14 = vmul.f32 %v1606_v32, %v1616_v35  ;;  %1340 = vmatpush3.bf16.msra.mxu1 %v1381_v5 }
 0x176   :  { %v447_v41 = vmax.f32 %v431_v21, 0.0  ;;  %v433_v9 = vadd.f32 %v1623_v37, %v411_v33  ;;  %v489_v11 = vpack.c.bf16 %v1719_v22, %v1717_v20  ;;  %v448_v43 = vmax.f32 %v432_v23, 0.0  ;;  %1341 = vmatprep.subr.bf16.mxu1 %v1382_v6 }
 0x177   :  { %v1733_v42 = vadd.f32 %v462_v39, %v446_v8  ;;  %v415_v44 = vmul.f32 %v1606_v32, %v393_v18  ;;  %v451_v45 = vmax.f32 %v435_v31, 0.0  ;;  %v450_v15 = vmax.f32 %v434_v10, 0.0  ;;  %v466_v32 = vld [vmem:[%s2164_s4 + $0x60] sm:$0xff] }
 0x178   :  { %v1737_v12 = vadd.f32 %v463_v40, %v447_v41  ;;  %v449_v13 = vmax.f32 %v433_v9, 0.0  ;;  %v1758_v35 = vadd.f32 %v464_v47, %v448_v43  ;;  %v436_v51 = vadd.f32 %v1623_v37, %v414_v14 }
 0x179   :  { %v437_v52 = vadd.f32 %v1623_v37, %v415_v44  ;;  %v1764_v53 = vadd.f32 %v467_v49, %v451_v45  ;;  %v1766_v54 = vadd.f32 %v466_v32, %v450_v15  ;;  %v469_v37 = vld [vmem:[%s2164_s4 + $0x78] sm:$0xff]  ;;  %1342 = vmatpush3.bf16.msra.mxu1 %v1382_v6 }
 0x17a   :  { %v490_v46 = vpack.c.bf16 %v1737_v12, %v1733_v42  ;;  %v1760_v50 = vadd.f32 %v465_v48, %v449_v13  ;;  %v452_v56 = vmax.f32 %v436_v51, 0.0  ;;  %1343 = vmatprep.subr.bf16.mxu1 %v1383_v7 }
 0x17b   :  { %v453_v57 = vmax.f32 %v437_v52, 0.0  ;;  %v492_v58 = vpack.c.bf16 %v1764_v53, %v1766_v54 }
 0x17c   :  { %1328 = vmatmul.mubr.msk.bf16.gmra.mrb[4].mxu1 %vm266_vm0, %v489_v11  ;;  %v491_v55 = vpack.c.bf16 %v1760_v50, %v1758_v35  ;;  %v1780_v61 = vadd.f32 %v468_v60, %v452_v56 }
 0x17d   :  { %1331 = vmatprep.mubr.msk.bf16.mxu1 %vm266_vm0, %v490_v46  ;;  %v1782_v3 = vadd.f32 %v469_v37, %v453_v57  ;;  %1344 = vmatpush3.bf16.msra.mxu1 %v1383_v7 }
 0x17e   :  { %1345 = vmatprep.subr.bf16.mxu1 %v1384_v24 }
 0x17f   :  { %v493_v4 = vpack.c.bf16 %v1782_v3, %v1780_v61 }
 0x181   :  { %1346 = vmatpush3.bf16.msra.mxu1 %v1384_v24 }
 0x184   :  { %1332 = vmatmul.mubr.msk.bf16.gmra.mrb[8].mxu1 %vm266_vm0, %v491_v55 }
 0x185   :  { %1335 = vmatprep.mubr.msk.bf16.mxu1 %vm266_vm0, %v492_v58 }
 0x18c   :  { %1336 = vmatmul.mubr.msk.bf16.gmra.mrb[12].mxu1 %vm266_vm0, %v493_v4 }
 0x247   :  { %v1325_v25 = vpop.f32.mrb[0].mxu1 }
 0x248   :  { %v568_v26 = vpop.f32.mrb[1].mxu1  ;;  %v637_v17 = vsel %vm633_vm1, %v1325_v25, 0.0 }
 0x249   :  { %v1326_v27 = vpop.f32.mrb[2].mxu1  ;;  %v634_v16 = vsel %vm633_vm1, %v568_v26, 0.0 }
 0x24a   :  { %v571_v28 = vpop.f32.mrb[3].mxu1  ;;  %v639_v34 = vsel %vm633_vm1, %v1326_v27, 0.0 }
 0x24b   :  { %v635_v29 = vsel %vm633_vm1, %v571_v28, 0.0 }
 0x24c   :  { %v636_v30 = vadd.f32 %v635_v29, %v634_v16 }
 0x24e   :  { %v638_v19 = vadd.f32 %v637_v17, %v636_v30 }
 0x24f   :  { %v1329_v36 = vpop.f32.mrb[4].mxu1 }
 0x250   :  { %v584_v38 = vpop.f32.mrb[5].mxu1  ;;  %v640_v18 = vadd.f32 %v639_v34, %v638_v19  ;;  %v645_v31 = vsel %vm633_vm1, %v1329_v36, 0.0 }
 0x251   :  { %v641_v21 = vsel %vm633_vm1, %v584_v38, 0.0  ;;  %v1330_v39 = vpop.f32.mrb[6].mxu1 }
 0x252   :  { %v642_v33 = vadd.f32 %v641_v21, %v640_v18  ;;  %v587_v8 = vpop.f32.mrb[7].mxu1  ;;  %v647_v9 = vsel %vm633_vm1, %v1330_v39, 0.0 }
 0x253   :  { %v643_v40 = vsel %vm633_vm1, %v587_v8, 0.0 }
 0x254   :  { %v644_v23 = vadd.f32 %v643_v40, %v642_v33 }
 0x256   :  { %v646_v41 = vadd.f32 %v645_v31, %v644_v23 }
 0x257   :  { %v1333_v10 = vpop.f32.mrb[8].mxu1 }
 0x258   :  { %v600_v11 = vpop.f32.mrb[9].mxu1  ;;  %v648_v43 = vadd.f32 %v647_v9, %v646_v41  ;;  %v653_v48 = vsel %vm633_vm1, %v1333_v10, 0.0 }
 0x259   :  { %v649_v13 = vsel %vm633_vm1, %v600_v11, 0.0  ;;  %v1334_v14 = vpop.f32.mrb[10].mxu1 }
 0x25a   :  { %v650_v44 = vadd.f32 %v649_v13, %v648_v43  ;;  %v603_v45 = vpop.f32.mrb[11].mxu1  ;;  %v655_v49 = vsel %vm633_vm1, %v1334_v14, 0.0 }
 0x25b   :  { %v651_v46 = vsel %vm633_vm1, %v603_v45, 0.0 }
 0x25c   :  { %v652_v47 = vadd.f32 %v651_v46, %v650_v44 }
 0x25e   :  { %v654_v15 = vadd.f32 %v653_v48, %v652_v47 }
 0x25f   :  { %v1337_v32 = vpop.f32.mrb[12].mxu1 }
 0x260   :  { %v616_v51 = vpop.f32.mrb[13].mxu1  ;;  %v656_v52 = vadd.f32 %v655_v49, %v654_v15  ;;  %v661_v4 = vsel %vm633_vm1, %v1337_v32, 0.0 }
 0x261   :  { %v657_v55 = vsel %vm633_vm1, %v616_v51, 0.0  ;;  %v1338_v56 = vpop.f32.mrb[14].mxu1 }
 0x262   :  { %v658_v57 = vadd.f32 %v657_v55, %v656_v52  ;;  %v619_v58 = vpop.f32.mrb[15].mxu1  ;;  %v663_v6 = vsel %vm633_vm1, %v1338_v56, 0.0 }
 0x263   :  { %v659_v60 = vsel %vm633_vm1, %v619_v58, 0.0 }
 0x264   :  { %v660_v37 = vadd.f32 %v659_v60, %v658_v57 }
 0x266   :  { %v662_v5 = vadd.f32 %v661_v4, %v660_v37 }
 0x268   :  { %v664_v7 = vadd.f32 %v663_v6, %v662_v5 }
 0x26a   :  { %v665_v24 = vrot.slane %v664_v7, 4 }
 0x26c   :  { %v666_v16 = vadd.f32 %v665_v24, %v664_v7 }
 0x26e   :  { %v667_v29 = vrot.slane %v666_v16, 2 }
 0x270   :  { %v668_v30 = vadd.f32 %v667_v29, %v666_v16 }
 0x272   :  { %v669_v17 = vrot.slane %v668_v30, 1 }
 0x274   :  { %v670_v19 = vadd.f32 %v669_v17, %v668_v30 }
 0x276   :  { %v671_v34 = vmul.f32 0.0078125, %v670_v19 }
 0x278   :  { %v1815_v18 = vsub.f32 %v568_v26, %v671_v34  ;;  %v1817_v21 = vsub.f32 %v571_v28, %v671_v34  ;;  %v1819_v33 = vsub.f32 %v1325_v25, %v671_v34  ;;  %v1821_v40 = vsub.f32 %v1326_v27, %v671_v34 }
 0x279   :  { %v1823_v23 = vsub.f32 %v584_v38, %v671_v34  ;;  %v1825_v31 = vsub.f32 %v587_v8, %v671_v34  ;;  %v1827_v41 = vsub.f32 %v1329_v36, %v671_v34  ;;  %v1829_v9 = vsub.f32 %v1330_v39, %v671_v34 }
 0x27a   :  { %v1831_v43 = vsub.f32 %v600_v11, %v671_v34  ;;  %v1833_v13 = vsub.f32 %v603_v45, %v671_v34  ;;  %v1835_v26 = vsub.f32 %v1333_v10, %v671_v34  ;;  %v1837_v28 = vsub.f32 %v1334_v14, %v671_v34 }
 0x27b   :  { %v1839_v25 = vsub.f32 %v616_v51, %v671_v34  ;;  %v1841_v27 = vsub.f32 %v619_v58, %v671_v34  ;;  %v1843_v38 = vsub.f32 %v1337_v32, %v671_v34  ;;  %v1845_v8 = vsub.f32 %v1338_v56, %v671_v34 }
 0x27c   :  { %v688_v36 = vmul.f32 %v1815_v18, %v1815_v18  ;;  %v689_v39 = vmul.f32 %v1817_v21, %v1817_v21  ;;  %v690_v10 = vmul.f32 %v1819_v33, %v1819_v33  ;;  %v691_v11 = vmul.f32 %v1821_v40, %v1821_v40 }
 0x27d   :  { %v692_v46 = vmul.f32 %v1823_v23, %v1823_v23  ;;  %v693_v15 = vmul.f32 %v1825_v31, %v1825_v31  ;;  %v694_v51 = vmul.f32 %v1827_v41, %v1827_v41  ;;  %v695_v56 = vmul.f32 %v1829_v9, %v1829_v9 }
 0x27e   :  { %v704_v14 = vsel %vm633_vm1, %v688_v36, 0.0  ;;  %v705_v44 = vsel %vm633_vm1, %v689_v39, 0.0  ;;  %v707_v47 = vsel %vm633_vm1, %v690_v10, 0.0  ;;  %v709_v49 = vsel %vm633_vm1, %v691_v11, 0.0 }
 0x27f   :  { %v706_v45 = vadd.f32 %v705_v44, %v704_v14  ;;  %v711_v52 = vsel %vm633_vm1, %v692_v46, 0.0  ;;  %v713_v57 = vsel %vm633_vm1, %v693_v15, 0.0  ;;  %v696_v60 = vmul.f32 %v1831_v43, %v1831_v43 }
 0x280   :  { %v715_v37 = vsel %vm633_vm1, %v694_v51, 0.0  ;;  %v697_v5 = vmul.f32 %v1833_v13, %v1833_v13  ;;  %v717_v6 = vsel %vm633_vm1, %v695_v56, 0.0  ;;  %v698_v24 = vmul.f32 %v1835_v26, %v1835_v26 }
 0x281   :  { %v708_v48 = vadd.f32 %v707_v47, %v706_v45  ;;  %v719_v16 = vsel %vm633_vm1, %v696_v60, 0.0  ;;  %v699_v30 = vmul.f32 %v1837_v28, %v1837_v28  ;;  %v700_v34 = vmul.f32 %v1839_v25, %v1839_v25 }
 0x282   :  { %v721_v17 = vsel %vm633_vm1, %v697_v5, 0.0  ;;  %v723_v36 = vsel %vm633_vm1, %v698_v24, 0.0  ;;  %v701_v10 = vmul.f32 %v1841_v27, %v1841_v27  ;;  %v702_v44 = vmul.f32 %v1843_v38, %v1843_v38 }
 0x283   :  { %v710_v32 = vadd.f32 %v709_v49, %v708_v48  ;;  %v725_v11 = vsel %vm633_vm1, %v699_v30, 0.0  ;;  %v727_v45 = vsel %vm633_vm1, %v700_v34, 0.0  ;;  %v703_v47 = vmul.f32 %v1845_v8, %v1845_v8 }
 0x284   :  { %v729_v48 = vsel %vm633_vm1, %v701_v10, 0.0  ;;  %v731_v49 = vsel %vm633_vm1, %v702_v44, 0.0 }
 0x285   :  { %v712_v55 = vadd.f32 %v711_v52, %v710_v32  ;;  %v733_v51 = vsel %vm633_vm1, %v703_v47, 0.0 }
 0x287   :  { %v714_v58 = vadd.f32 %v713_v57, %v712_v55 }
 0x289   :  { %v716_v4 = vadd.f32 %v715_v37, %v714_v58 }
 0x28b   :  { %v718_v7 = vadd.f32 %v717_v6, %v716_v4 }
 0x28d   :  { %v720_v29 = vadd.f32 %v719_v16, %v718_v7  ;;  %v1898_v7 = vld [vmem:[%s2166_s6] ss:$0 sm:$0xff] }
 0x28f   :  { %v722_v19 = vadd.f32 %v721_v17, %v720_v29  ;;  %v1907_v17 = vld [vmem:[%s2167_s7] ss:$0 sm:$0xff] }
 0x291   :  { %v724_v39 = vadd.f32 %v723_v36, %v722_v19 }
 0x293   :  { %v726_v14 = vadd.f32 %v725_v11, %v724_v39 }
 0x295   :  { %v728_v46 = vadd.f32 %v727_v45, %v726_v14 }
 0x297   :  { %v730_v15 = vadd.f32 %v729_v48, %v728_v46 }
 0x299   :  { %v732_v32 = vadd.f32 %v731_v49, %v730_v15 }
 0x29b   :  { %v734_v52 = vadd.f32 %v733_v51, %v732_v32 }
 0x29d   :  { %v735_v55 = vrot.slane %v734_v52, 4 }
 0x29f   :  { %v736_v56 = vadd.f32 %v735_v55, %v734_v52 }
 0x2a1   :  { %v737_v57 = vrot.slane %v736_v56, 2 }
 0x2a3   :  { %v738_v58 = vadd.f32 %v737_v57, %v736_v56 }
 0x2a5   :  { %v739_v60 = vrot.slane %v738_v58, 1 }
 0x2a7   :  { %v740_v37 = vadd.f32 %v739_v60, %v738_v58 }
 0x2a9   :  { %v741_v4 = vmul.f32 0.0078125, %v740_v37 }
 0x2ab   :  { %v742_v5 = vadd.f32 1e-05, %v741_v4 }
 0x2ad   :  { %1387 = vrsqrt.f32 %v742_v5 }
 0x2b7   :  { %v1388_v6 = vpop.eup %1387 }
 0x2b8   :  { %v757_v24 = vmul.f32 %v1388_v6, %v1841_v27  ;;  %v744_v16 = vmul.f32 %v1388_v6, %v1815_v18  ;;  %v745_v29 = vmul.f32 %v1388_v6, %v1817_v21  ;;  %v746_v30 = vmul.f32 %v1388_v6, %v1819_v33 }
 0x2b9   :  { %v747_v19 = vmul.f32 %v1388_v6, %v1821_v40  ;;  %v748_v34 = vmul.f32 %v1388_v6, %v1823_v23  ;;  %v749_v36 = vmul.f32 %v1388_v6, %v1825_v31  ;;  %v750_v39 = vmul.f32 %v1388_v6, %v1827_v41 }
 0x2ba   :  { %v779_v27 = vmul.f32 %v1898_v7, %v757_v24  ;;  %v766_v18 = vmul.f32 %v1898_v7, %v744_v16  ;;  %v767_v21 = vmul.f32 %v1898_v7, %v745_v29  ;;  %v768_v33 = vmul.f32 %v1898_v7, %v746_v30 }
 0x2bb   :  { %v769_v10 = vmul.f32 %v1898_v7, %v747_v19  ;;  %v770_v11 = vmul.f32 %v1898_v7, %v748_v34  ;;  %v771_v40 = vmul.f32 %v1898_v7, %v749_v36  ;;  %v751_v23 = vmul.f32 %v1388_v6, %v1829_v9 }
 0x2bc   :  { %v788_v31 = vadd.f32 %v1907_v17, %v766_v18  ;;  %v789_v41 = vadd.f32 %v1907_v17, %v767_v21  ;;  %v790_v14 = vadd.f32 %v1907_v17, %v768_v33  ;;  %v772_v47 = vmul.f32 %v1898_v7, %v750_v39 }
 0x2bd   :  { %v791_v44 = vadd.f32 %v1907_v17, %v769_v10  ;;  %v792_v45 = vadd.f32 %v1907_v17, %v770_v11  ;;  %v793_v46 = vadd.f32 %v1907_v17, %v771_v40  ;;  %v801_v48 = vadd.f32 %v1907_v17, %v779_v27 }
 0x2be   :  { %v804_v15 = vmax.f32 %v788_v31, 0.0  ;;  %v805_v49 = vmax.f32 %v789_v41, 0.0  ;;  %v806_v32 = vmax.f32 %v790_v14, 0.0  ;;  %v773_v55 = vmul.f32 %v1898_v7, %v751_v23 }
 0x2bf   :  { %v807_v9 = vmax.f32 %v791_v44, 0.0  ;;  %v808_v51 = vmax.f32 %v792_v45, 0.0  ;;  %v809_v52 = vmax.f32 %v793_v46, 0.0  ;;  %v794_v57 = vadd.f32 %v1907_v17, %v772_v47 }
 0x2c0   :  { %v820_v56 = vpack.c.bf16 %v805_v49, %v804_v15  ;;  %v752_v58 = vmul.f32 %v1388_v6, %v1831_v43  ;;  %v753_v60 = vmul.f32 %v1388_v6, %v1833_v13  ;;  %v795_v5 = vadd.f32 %v1907_v17, %v773_v55 }
 0x2c1   :  { %v821_v37 = vpack.c.bf16 %v807_v9, %v806_v32  ;;  %v822_v4 = vpack.c.bf16 %v809_v52, %v808_v51  ;;  %v754_v24 = vmul.f32 %v1388_v6, %v1835_v26  ;;  %v810_v16 = vmax.f32 %v794_v57, 0.0 }
 0x2c2   :  { %1347 = vmatprep.mubr.msk.bf16.mxu1 %vm633_vm1, %v820_v56  ;;  %v774_v29 = vmul.f32 %v1898_v7, %v752_v58  ;;  %v775_v30 = vmul.f32 %v1898_v7, %v753_v60  ;;  %v755_v19 = vmul.f32 %v1388_v6, %v1837_v28  ;;  %v811_v43 = vmax.f32 %v795_v5, 0.0 }
 0x2c3   :  { %1348 = vmatmul.mubr.msk.bf16.vlgmr.msra.gmra.mrb[16].mxu1 %vm633_vm1, %v821_v37  ;;  %v776_v13 = vmul.f32 %v1898_v7, %v754_v24  ;;  %v756_v34 = vmul.f32 %v1388_v6, %v1839_v25  ;;  %v758_v36 = vmul.f32 %v1388_v6, %v1843_v38  ;;  %v759_v18 = vmul.f32 %v1388_v6, %v1845_v8 }
 0x2c4   :  { %1351 = vmatprep.mubr.msk.bf16.mxu1 %vm633_vm1, %v822_v4  ;;  %v796_v26 = vadd.f32 %v1907_v17, %v774_v29  ;;  %v797_v39 = vadd.f32 %v1907_v17, %v775_v30  ;;  %v777_v27 = vmul.f32 %v1898_v7, %v755_v19  ;;  %v823_v28 = vpack.c.bf16 %v811_v43, %v810_v16 }
 0x2c5   :  { %v798_v21 = vadd.f32 %v1907_v17, %v776_v13  ;;  %v778_v33 = vmul.f32 %v1898_v7, %v756_v34  ;;  %v780_v10 = vmul.f32 %v1898_v7, %v758_v36  ;;  %v781_v40 = vmul.f32 %v1898_v7, %v759_v18 }
 0x2c6   :  { %v812_v25 = vmax.f32 %v796_v26, 0.0  ;;  %v813_v11 = vmax.f32 %v797_v39, 0.0  ;;  %v799_v38 = vadd.f32 %v1907_v17, %v777_v27  ;;  %v817_v23 = vmax.f32 %v801_v48, 0.0 }
 0x2c7   :  { %v814_v31 = vmax.f32 %v798_v21, 0.0  ;;  %v800_v41 = vadd.f32 %v1907_v17, %v778_v33  ;;  %v802_v14 = vadd.f32 %v1907_v17, %v780_v10  ;;  %v803_v44 = vadd.f32 %v1907_v17, %v781_v40 }
 0x2c8   :  { %v824_v8 = vpack.c.bf16 %v813_v11, %v812_v25  ;;  %v815_v6 = vmax.f32 %v799_v38, 0.0 }
 0x2c9   :  { %v816_v45 = vmax.f32 %v800_v41, 0.0  ;;  %v818_v46 = vmax.f32 %v802_v14, 0.0  ;;  %v819_v15 = vmax.f32 %v803_v44, 0.0 }
 0x2ca   :  { %v825_v47 = vpack.c.bf16 %v815_v6, %v814_v31 }
 0x2cb   :  { %1352 = vmatmul.mubr.msk.bf16.gmra.mrb[20].mxu1 %vm633_vm1, %v823_v28  ;;  %v826_v49 = vpack.c.bf16 %v817_v23, %v816_v45  ;;  %v827_v7 = vpack.c.bf16 %v819_v15, %v818_v46 }
 0x2cc   :  { %1355 = vmatprep.mubr.msk.bf16.mxu1 %vm633_vm1, %v824_v8 }
 0x2d3   :  { %1356 = vmatmul.mubr.msk.bf16.gmra.mrb[24].mxu1 %vm633_vm1, %v825_v47 }
 0x2d4   :  { %1359 = vmatprep.mubr.msk.bf16.mxu1 %vm633_vm1, %v826_v49 }
 0x2db   :  { %1360 = vmatmul.mubr.msk.bf16.gmra.mrb[28].mxu1 %vm633_vm1, %v827_v7 }
 0x396   :  { %v1349_v48 = vpop.f32.mrb[16].mxu1 }
 0x397   :  { %v918_v32 = vpop.f32.mrb[17].mxu1  ;;  %v986_v56 = vsel %vm266_vm0, %v1349_v48, 0.0 }
 0x398   :  { %v1350_v9 = vpop.f32.mrb[18].mxu1  ;;  %v983_v51 = vsel %vm266_vm0, %v918_v32, 0.0 }
 0x399   :  { %v921_v17 = vpop.f32.mrb[19].mxu1  ;;  %v988_v58 = vsel %vm266_vm0, %v1350_v9, 0.0 }
 0x39a   :  { %v984_v52 = vsel %vm266_vm0, %v921_v17, 0.0 }
 0x39b   :  { %v985_v55 = vadd.f32 %v984_v52, %v983_v51 }
 0x39d   :  { %v987_v57 = vadd.f32 %v986_v56, %v985_v55 }
 0x39e   :  { %v1353_v60 = vpop.f32.mrb[20].mxu1 }
 0x39f   :  { %v934_v37 = vpop.f32.mrb[21].mxu1  ;;  %v989_v4 = vadd.f32 %v988_v58, %v987_v57  ;;  %v994_v43 = vsel %vm266_vm0, %v1353_v60, 0.0 }
 0x3a0   :  { %v990_v5 = vsel %vm266_vm0, %v934_v37, 0.0  ;;  %v1354_v24 = vpop.f32.mrb[22].mxu1 }
 0x3a1   :  { %v991_v16 = vadd.f32 %v990_v5, %v989_v4  ;;  %v937_v29 = vpop.f32.mrb[23].mxu1  ;;  %v996_v34 = vsel %vm266_vm0, %v1354_v24, 0.0 }
 0x3a2   :  { %v992_v30 = vsel %vm266_vm0, %v937_v29, 0.0 }
 0x3a3   :  { %v993_v19 = vadd.f32 %v992_v30, %v991_v16 }
 0x3a5   :  { %v995_v13 = vadd.f32 %v994_v43, %v993_v19 }
 0x3a6   :  { %v1357_v36 = vpop.f32.mrb[24].mxu1 }
 0x3a7   :  { %v950_v26 = vpop.f32.mrb[25].mxu1  ;;  %v997_v39 = vadd.f32 %v996_v34, %v995_v13  ;;  %v1002_v25 = vsel %vm266_vm0, %v1357_v36, 0.0 }
 0x3a8   :  { %v998_v27 = vsel %vm266_vm0, %v950_v26, 0.0  ;;  %v1358_v18 = vpop.f32.mrb[26].mxu1 }
 0x3a9   :  { %v999_v28 = vadd.f32 %v998_v27, %v997_v39  ;;  %v953_v21 = vpop.f32.mrb[27].mxu1  ;;  %v1004_v38 = vsel %vm266_vm0, %v1358_v18, 0.0 }
 0x3aa   :  { %v1000_v33 = vsel %vm266_vm0, %v953_v21, 0.0 }
 0x3ab   :  { %v1001_v10 = vadd.f32 %v1000_v33, %v999_v28 }
 0x3ad   :  { %v1003_v11 = vadd.f32 %v1002_v25, %v1001_v10 }
 0x3ae   :  { %v1361_v40 = vpop.f32.mrb[28].mxu1 }
 0x3af   :  { %v966_v23 = vpop.f32.mrb[29].mxu1  ;;  %v1005_v31 = vadd.f32 %v1004_v38, %v1003_v11  ;;  %v1010_v46 = vsel %vm266_vm0, %v1361_v40, 0.0 }
 0x3b0   :  { %v1006_v41 = vsel %vm266_vm0, %v966_v23, 0.0  ;;  %v1362_v14 = vpop.f32.mrb[30].mxu1 }
 0x3b1   :  { %v1007_v8 = vadd.f32 %v1006_v41, %v1005_v31  ;;  %v969_v6 = vpop.f32.mrb[31].mxu1  ;;  %v1012_v15 = vsel %vm266_vm0, %v1362_v14, 0.0 }
 0x3b2   :  { %v1008_v44 = vsel %vm266_vm0, %v969_v6, 0.0 }
 0x3b3   :  { %v1009_v45 = vadd.f32 %v1008_v44, %v1007_v8 }
 0x3b5   :  { %v1011_v47 = vadd.f32 %v1010_v46, %v1009_v45 }
 0x3b7   :  { %v1013_v49 = vadd.f32 %v1012_v15, %v1011_v47 }
 0x3b9   :  { %v1014_v7 = vrot.slane %v1013_v49, 4 }
 0x3bb   :  { %v1015_v51 = vadd.f32 %v1014_v7, %v1013_v49 }
 0x3bd   :  { %v1016_v52 = vrot.slane %v1015_v51, 2 }
 0x3bf   :  { %v1017_v55 = vadd.f32 %v1016_v52, %v1015_v51 }
 0x3c1   :  { %v1018_v56 = vrot.slane %v1017_v55, 1 }
 0x3c3   :  { %v1019_v57 = vadd.f32 %v1018_v56, %v1017_v55 }
 0x3c5   :  { %v1020_v58 = vmul.f32 0.0078125, %v1019_v57 }
 0x3c7   :  { %v1977_v4 = vsub.f32 %v918_v32, %v1020_v58  ;;  %v1979_v5 = vsub.f32 %v921_v17, %v1020_v58  ;;  %v1981_v16 = vsub.f32 %v1349_v48, %v1020_v58  ;;  %v1983_v30 = vsub.f32 %v1350_v9, %v1020_v58 }
 0x3c8   :  { %v1985_v19 = vsub.f32 %v934_v37, %v1020_v58  ;;  %v1987_v43 = vsub.f32 %v937_v29, %v1020_v58  ;;  %v1989_v13 = vsub.f32 %v1353_v60, %v1020_v58  ;;  %v1991_v34 = vsub.f32 %v1354_v24, %v1020_v58 }
 0x3c9   :  { %v1993_v39 = vsub.f32 %v950_v26, %v1020_v58  ;;  %v1995_v27 = vsub.f32 %v953_v21, %v1020_v58  ;;  %v1997_v32 = vsub.f32 %v1357_v36, %v1020_v58  ;;  %v1999_v17 = vsub.f32 %v1358_v18, %v1020_v58 }
 0x3ca   :  { %v2001_v48 = vsub.f32 %v966_v23, %v1020_v58  ;;  %v2003_v9 = vsub.f32 %v969_v6, %v1020_v58  ;;  %v2005_v37 = vsub.f32 %v1361_v40, %v1020_v58  ;;  %v2007_v29 = vsub.f32 %v1362_v14, %v1020_v58 }
 0x3cb   :  { %v1037_v60 = vmul.f32 %v1977_v4, %v1977_v4  ;;  %v1038_v24 = vmul.f32 %v1979_v5, %v1979_v5  ;;  %v1039_v36 = vmul.f32 %v1981_v16, %v1981_v16  ;;  %v1040_v26 = vmul.f32 %v1983_v30, %v1983_v30 }
 0x3cc   :  { %v1041_v33 = vmul.f32 %v1985_v19, %v1985_v19  ;;  %v1042_v11 = vmul.f32 %v1987_v43, %v1987_v43  ;;  %v1043_v23 = vmul.f32 %v1989_v13, %v1989_v13  ;;  %v1044_v14 = vmul.f32 %v1991_v34, %v1991_v34 }
 0x3cd   :  { %v1053_v18 = vsel %vm266_vm0, %v1037_v60, 0.0  ;;  %v1054_v28 = vsel %vm266_vm0, %v1038_v24, 0.0  ;;  %v1056_v10 = vsel %vm266_vm0, %v1039_v36, 0.0  ;;  %v1058_v38 = vsel %vm266_vm0, %v1040_v26, 0.0 }
 0x3ce   :  { %v1055_v21 = vadd.f32 %v1054_v28, %v1053_v18  ;;  %v1060_v31 = vsel %vm266_vm0, %v1041_v33, 0.0  ;;  %v1062_v8 = vsel %vm266_vm0, %v1042_v11, 0.0  ;;  %v1045_v44 = vmul.f32 %v1993_v39, %v1993_v39 }
 0x3cf   :  { %v1064_v45 = vsel %vm266_vm0, %v1043_v23, 0.0  ;;  %v1046_v47 = vmul.f32 %v1995_v27, %v1995_v27  ;;  %v1066_v15 = vsel %vm266_vm0, %v1044_v14, 0.0  ;;  %v1047_v7 = vmul.f32 %v1997_v32, %v1997_v32 }
 0x3d0   :  { %v1057_v25 = vadd.f32 %v1056_v10, %v1055_v21  ;;  %v1068_v51 = vsel %vm266_vm0, %v1045_v44, 0.0  ;;  %v1048_v55 = vmul.f32 %v1999_v17, %v1999_v17  ;;  %v1049_v58 = vmul.f32 %v2001_v48, %v2001_v48 }
 0x3d1   :  { %v1070_v56 = vsel %vm266_vm0, %v1046_v47, 0.0  ;;  %v1072_v60 = vsel %vm266_vm0, %v1047_v7, 0.0  ;;  %v1050_v36 = vmul.f32 %v2003_v9, %v2003_v9  ;;  %v1051_v28 = vmul.f32 %v2005_v37, %v2005_v37 }
 0x3d2   :  { %v1059_v40 = vadd.f32 %v1058_v38, %v1057_v25  ;;  %v1074_v26 = vsel %vm266_vm0, %v1048_v55, 0.0  ;;  %v1076_v21 = vsel %vm266_vm0, %v1049_v58, 0.0  ;;  %v1052_v10 = vmul.f32 %v2007_v29, %v2007_v29  ;;  %v1247_v55 = vld [vmem:[%s2168_s9] ss:$0 sm:$0xff] }
 0x3d3   :  { %v1078_v25 = vsel %vm266_vm0, %v1050_v36, 0.0  ;;  %v1080_v38 = vsel %vm266_vm0, %v1051_v28, 0.0 }
 0x3d4   :  { %v1061_v41 = vadd.f32 %v1060_v31, %v1059_v40  ;;  %v1082_v23 = vsel %vm266_vm0, %v1052_v10, 0.0 }
 0x3d6   :  { %v1063_v6 = vadd.f32 %v1062_v8, %v1061_v41 }
 0x3d8   :  { %v1065_v46 = vadd.f32 %v1064_v45, %v1063_v6 }
 0x3da   :  { %v1067_v49 = vadd.f32 %v1066_v15, %v1065_v46 }
 0x3dc   :  { %v1069_v52 = vadd.f32 %v1068_v51, %v1067_v49 }
 0x3de   :  { %v1071_v57 = vadd.f32 %v1070_v56, %v1069_v52 }
 0x3e0   :  { %v1073_v24 = vadd.f32 %v1072_v60, %v1071_v57 }
 0x3e2   :  { %v1075_v18 = vadd.f32 %v1074_v26, %v1073_v24 }
 0x3e4   :  { %v1077_v33 = vadd.f32 %v1076_v21, %v1075_v18 }
 0x3e6   :  { %v1079_v11 = vadd.f32 %v1078_v25, %v1077_v33 }
 0x3e8   :  { %v1081_v40 = vadd.f32 %v1080_v38, %v1079_v11 }
 0x3ea   :  { %v1083_v31 = vadd.f32 %v1082_v23, %v1081_v40 }
 0x3ec   :  { %v1084_v41 = vrot.slane %v1083_v31, 4 }
 0x3ee   :  { %v1085_v14 = vadd.f32 %v1084_v41, %v1083_v31 }
 0x3f0   :  { %v1086_v8 = vrot.slane %v1085_v14, 2 }
 0x3f2   :  { %v1087_v6 = vadd.f32 %v1086_v8, %v1085_v14 }
 0x3f4   :  { %v1088_v44 = vrot.slane %v1087_v6, 1 }
 0x3f6   :  { %v1089_v45 = vadd.f32 %v1088_v44, %v1087_v6 }
 0x3f8   :  { %v1090_v46 = vmul.f32 0.0078125, %v1089_v45 }
 0x3fa   :  { %v1091_v47 = vadd.f32 1e-05, %v1090_v46 }
 0x3fc   :  { %1389 = vrsqrt.f32 %v1091_v47 }
 0x406   :  { %v1390_v15 = vpop.eup %1389 }
 0x407   :  { %v1093_v49 = vmul.f32 %v1390_v15, %v1977_v4  ;;  %v1094_v7 = vmul.f32 %v1390_v15, %v1979_v5  ;;  %v1095_v51 = vmul.f32 %v1390_v15, %v1981_v16  ;;  %v1096_v52 = vmul.f32 %v1390_v15, %v1983_v30 }
 0x408   :  { %v1097_v56 = vmul.f32 %v1390_v15, %v1985_v19  ;;  %v1098_v57 = vmul.f32 %v1390_v15, %v1987_v43  ;;  %v1099_v58 = vmul.f32 %v1390_v15, %v1989_v13  ;;  %v1100_v60 = vmul.f32 %v1390_v15, %v1991_v34 }
 0x409   :  { %v1101_v4 = vmul.f32 %v1390_v15, %v1993_v39  ;;  %v1102_v5 = vmul.f32 %v1390_v15, %v1995_v27  ;;  %v1103_v16 = vmul.f32 %v1390_v15, %v1997_v32  ;;  %v1104_v30 = vmul.f32 %v1390_v15, %v1999_v17  ;;  %v1248_v39 = vld [vmem:[%s2169_s10] ss:$0 sm:$0xff] }
 0x40a   :  { %v1105_v24 = vmul.f32 %v1390_v15, %v2001_v48  ;;  %v1106_v36 = vmul.f32 %v1390_v15, %v2003_v9  ;;  %v1107_v19 = vmul.f32 %v1390_v15, %v2005_v37  ;;  %v1108_v43 = vmul.f32 %v1390_v15, %v2007_v29 }
 0x40b   :  { %v1115_v26 = vmul.f32 %v1247_v55, %v1093_v49  ;;  %v1116_v13 = vmul.f32 %v1247_v55, %v1094_v7  ;;  %v1117_v18 = vmul.f32 %v1247_v55, %v1095_v51  ;;  %v1118_v34 = vmul.f32 %v1247_v55, %v1096_v52 }
 0x40c   :  { %v1119_v27 = vmul.f32 %v1247_v55, %v1097_v56  ;;  %v1120_v32 = vmul.f32 %v1247_v55, %v1098_v57  ;;  %v1121_v28 = vmul.f32 %v1247_v55, %v1099_v58  ;;  %v1122_v17 = vmul.f32 %v1247_v55, %v1100_v60 }
 0x40d   :  { %v1123_v21 = vmul.f32 %v1247_v55, %v1101_v4  ;;  %v1124_v48 = vmul.f32 %v1247_v55, %v1102_v5  ;;  %v1125_v33 = vmul.f32 %v1247_v55, %v1103_v16  ;;  %v1126_v9 = vmul.f32 %v1247_v55, %v1104_v30 }
 0x40e   :  { %v1127_v10 = vmul.f32 %v1247_v55, %v1105_v24  ;;  %v1128_v37 = vmul.f32 %v1247_v55, %v1106_v36  ;;  %v1129_v25 = vmul.f32 %v1247_v55, %v1107_v19  ;;  %v1130_v29 = vmul.f32 %v1247_v55, %v1108_v43 }
 0x40f   :  { %v1137_v11 = vadd.f32 %v1248_v39, %v1115_v26  ;;  %v1138_v38 = vadd.f32 %v1248_v39, %v1116_v13  ;;  %v1139_v40 = vadd.f32 %v1248_v39, %v1117_v18  ;;  %v1140_v23 = vadd.f32 %v1248_v39, %v1118_v34 }
 0x410   :  { %v1141_v31 = vadd.f32 %v1248_v39, %v1119_v27  ;;  %v1142_v41 = vadd.f32 %v1248_v39, %v1120_v32  ;;  %v1143_v14 = vadd.f32 %v1248_v39, %v1121_v28  ;;  %v1144_v8 = vadd.f32 %v1248_v39, %v1122_v17 }
 0x411   :  { %v1145_v6 = vadd.f32 %v1248_v39, %v1123_v21  ;;  %v1146_v44 = vadd.f32 %v1248_v39, %v1124_v48  ;;  %v1147_v45 = vadd.f32 %v1248_v39, %v1125_v33  ;;  %v1148_v46 = vadd.f32 %v1248_v39, %v1126_v9 }
 0x412   :  { %v1149_v47 = vadd.f32 %v1248_v39, %v1127_v10  ;;  %v1150_v15 = vadd.f32 %v1248_v39, %v1128_v37  ;;  %v1151_v49 = vadd.f32 %v1248_v39, %v1129_v25  ;;  %v1152_v7 = vadd.f32 %v1248_v39, %v1130_v29 }
 0x413   :  { %v1153_v51 = vmax.f32 %v1137_v11, 0.0  ;;  %v1154_v52 = vmax.f32 %v1138_v38, 0.0  ;;  %v1155_v56 = vmax.f32 %v1139_v40, 0.0  ;;  %v1156_v55 = vmax.f32 %v1140_v23, 0.0 }
 0x414   :  { %v1157_v57 = vmax.f32 %v1141_v31, 0.0  ;;  %v1158_v58 = vmax.f32 %v1142_v41, 0.0  ;;  %v1159_v60 = vmax.f32 %v1143_v14, 0.0  ;;  %v1160_v4 = vmax.f32 %v1144_v8, 0.0 }
 0x415   :  { %v1161_v5 = vmax.f32 %v1145_v6, 0.0  ;;  %v1162_v16 = vmax.f32 %v1146_v44, 0.0  ;;  %v1163_v30 = vmax.f32 %v1147_v45, 0.0  ;;  %v1164_v24 = vmax.f32 %v1148_v46, 0.0 }
 0x416   :  { %v1165_v36 = vmax.f32 %v1149_v47, 0.0  ;;  %v1166_v19 = vmax.f32 %v1150_v15, 0.0  ;;  %v1167_v43 = vmax.f32 %v1151_v49, 0.0  ;;  %v1168_v26 = vmax.f32 %v1152_v7, 0.0 }
 0x417   :  { %v1169_v13 = vadd.f32 %v1153_v51, %v1671_v59  ;;  %v1170_v18 = vadd.f32 %v1154_v52, %v1674_v62  ;;  %v1171_v34 = vadd.f32 %v1155_v56, %v1676_v63  ;;  %v1172_v39 = vadd.f32 %v1156_v55, %v1678_v0 }
 0x418   :  { %v1173_v27 = vadd.f32 %v1157_v57, %v1680_v1  ;;  %v1174_v32 = vadd.f32 %v1158_v58, %v1682_v2  ;;  %v1175_v28 = vadd.f32 %v1159_v60, %v1717_v20  ;;  %v1176_v17 = vadd.f32 %v1160_v4, %v1719_v22 }
 0x419   :  { %v1177_v21 = vadd.f32 %v1161_v5, %v1733_v42  ;;  %v1178_v48 = vadd.f32 %v1162_v16, %v1737_v12  ;;  %v1179_v59 = vadd.f32 %v1163_v30, %v1758_v35  ;;  %v1180_v62 = vadd.f32 %v1164_v24, %v1760_v50  ;;  %1185 = vst.msk [vmem:[%s2170_s11] sm:$0xff] %vm266_vm0, %v1169_v13 }
 0x41a   :  { %1186 = vst.msk [vmem:[%s2170_s11 + $0x8] sm:$0xff] %vm266_vm0, %v1170_v18  ;;  %1187 = vst.msk [vmem:[%s2170_s11 + $0x10] sm:$0xff] %vm266_vm0, %v1171_v34  ;;  %v1181_v63 = vadd.f32 %v1165_v36, %v1766_v54  ;;  %v1182_v0 = vadd.f32 %v1166_v19, %v1764_v53  ;;  %v1183_v1 = vadd.f32 %v1167_v43, %v1780_v61 }
 0x41b   :  { %1188 = vst.msk [vmem:[%s2170_s11 + $0x18] sm:$0xff] %vm266_vm0, %v1172_v39  ;;  %v1184_v2 = vadd.f32 %v1168_v26, %v1782_v3  ;;  %1189 = vst.msk [vmem:[%s2170_s11 + $0x20] sm:$0xff] %vm266_vm0, %v1173_v27 }
 0x41c   :  { %1190 = vst.msk [vmem:[%s2170_s11 + $0x28] sm:$0xff] %vm266_vm0, %v1174_v32  ;;  %1191 = vst.msk [vmem:[%s2170_s11 + $0x30] sm:$0xff] %vm266_vm0, %v1175_v28 }
 0x41d   :  { %1192 = vst.msk [vmem:[%s2170_s11 + $0x38] sm:$0xff] %vm266_vm0, %v1176_v17  ;;  %1193 = vst.msk [vmem:[%s2170_s11 + $0x40] sm:$0xff] %vm266_vm0, %v1177_v21 }
 0x41e   :  { %1194 = vst.msk [vmem:[%s2170_s11 + $0x48] sm:$0xff] %vm266_vm0, %v1178_v48  ;;  %1195 = vst.msk [vmem:[%s2170_s11 + $0x50] sm:$0xff] %vm266_vm0, %v1179_v59 }
 0x41f   :  { %1196 = vst.msk [vmem:[%s2170_s11 + $0x58] sm:$0xff] %vm266_vm0, %v1180_v62  ;;  %1197 = vst.msk [vmem:[%s2170_s11 + $0x60] sm:$0xff] %vm266_vm0, %v1181_v63 }
 0x420   :  { %1198 = vst.msk [vmem:[%s2170_s11 + $0x68] sm:$0xff] %vm266_vm0, %v1182_v0  ;;  %1199 = vst.msk [vmem:[%s2170_s11 + $0x70] sm:$0xff] %vm266_vm0, %v1183_v1 }
 0x421   :  { %1200 = vst.msk [vmem:[%s2170_s11 + $0x78] sm:$0xff] %vm266_vm0, %v1184_v2 }

// kernel: cnn_transformer_forward.4
= control target key start
LH: loop header
LB: loop body
LE: loop exit
PB: predicated region body
PF: predicated region fallthrough
CT: control target
= control target key end

     0   :  { %9 = vsyncpa [#allocation3], 0  ;;  %s7550_s15 = smov 0   ;;  %s9822_s0 = inlined_call_operand.vmem [shape: bf16[2,10,10,32], index: 0, kind: input, shape index: {}]   ;;  %s9823_s1 = inlined_call_operand.vmem [shape: bf16[9,32,384], index: 1, kind: input, shape index: {}]   ;;  %s9824_s2 = inlined_call_operand.vmem [shape: f32[64,64], index: 2, kind: input, shape index: {}]   ;;  %s9825_s3 = inlined_call_operand.vmem [shape: f32[4], index: 3, kind: input, shape index: {}]   ;;  %s9826_s4 = inlined_call_operand.vmem [shape: bf16[2,64,128], index: 4, kind: output, shape index: {}]  }
   0x1 LB: > { %s7556_s16 = sadd.s32 4294967295, %s7518_s15   ;;  %p5692_p0 = scmp.ge.s32.totalorder %s7518_s15, 1  ;;  %s7518_s15 = sphi %s7550_s15, %s15_s15  }
   0x2   : > { %p135_p1 = scmp.lt.s32.totalorder %s7518_s15, 3  ;;  %s154_s19 = sshll.u32 %s9825_s3, 4  ;;  %s155_s19 = int_to_ptr.vmem [resolvable:$true] %s154_s19 }
   0x3   : > { %p7002_p3 = scmp.eq.s32.totalorder %s7556_s16, 0  ;;  %s7493_s21 = scalar_lea.vmem %s155_s19, 16 }
   0x4   : > { %p7563_p2 = pnand %p5692_p0, %p135_p1  ;;  %p7494_p6 = scmp.ne.s32.totalorder %s155_s19, %s7493_s21 }
   0x5   : > { %p7501_p10 = scmp.lt.s32.totalorder %s155_s19, %s155_s19  ;;  %p7502_p11 = scmp.lt.s32.totalorder %s7493_s21, %s7493_s21 }
   0x6   : > { %p6998_p4 = pneg %p7563_p2 }
   0x7   : > { %p7503_p12 = por %p7502_p11, %p7501_p10 }
   0x8   : > { %p6999_p5 = pnand %p7002_p3, %p6998_p4 }
   0xa   : > { %p7495_p7 = pneg %p6999_p5 }
   0xc   : > { %p7496_p8 = pnand %p7495_p7, %p7494_p6 }
   0xe   : > { %p7497_p9 = pneg %p7496_p8 }
  0x10   : > { %p7504_p13 = pnand %p7503_p12, %p7497_p9 }
  0x12   : > { %7507 = shalt.err (!%p7504_p13)
}
  0x13   : > { %s7520_s22 = smov [#allocation2]   ;;  %175 = sbr.rel (%p7563_p2) target bundleno = 2186 (0x88a), region = 36 }
  0x14   : > { %7001 = dma.vmem_to_smem (!%p6999_p5), %s155_s19, 16, %s7520_s22, [#allocation3]  }
  0x1a   : > { %7513 = dma.done.wait (%p7002_p3), [#allocation3], 16  }
  0x1b   : > { %7515 = vsyncadd (%p7002_p3), [#allocation3], 4294967280 }
  0x1c   : > { %181 = sfence }
  0x1d   : > { %v7077_v0 = vld [vmem:[%s9823_s1 + $0x34] ss:$12 sps:$4 sm:$0xff]   ;;  %p202_p0 = scmp.lt.s32.totalorder %s7556_s16, 1  ;;  %v7079_v1 = vld [vmem:[%s9823_s1 + $0x30] ss:$12 sps:$4 sm:$0xff]   ;;  %v7521_v2 = vmov 0  }
  0x1e   : > { %450 = vmatprep.mubr.bf16.mxu0 %v7521_v2  ;;  %480 = vmatprep.mubr.bf16.mxu1 %v7521_v2  ;;  %v7080_v3 = vld [vmem:[%s9823_s1 + $0x4c] ss:$12 sps:$4 sm:$0xff]   ;;  %v7082_v4 = vld [vmem:[%s9823_s1 + $0x48] ss:$12 sps:$4 sm:$0xff]   ;;  %v7085_v5 = vld [vmem:[%s9823_s1 + $0x4] ss:$12 sps:$4 sm:$0xff]  }
  0x1f   : > { %418 = vmatprep.subr.bf16.mxu0 %v7077_v0  ;;  %s9931_s16 = smov (!%p202_p0, %s7556_s16), 1  ;;  %6781 = vmatprep.subr.bf16.mxu1 %v7077_v0  ;;  %vm237_vm0 = vsmask.f32 3328  ;;  %vm238_vm1 = vsmask.f32 7440  ;;  %vm405_vm3 = vcmask 261120  }
  0x20   : > { %419 = vmatpush1.bf16.msra.mxu0 %v7079_v1  ;;  %6783 = vmatpush1.bf16.msra.mxu1 %v7079_v1  ;;  %s6993_s7 = smul.u32 80, %s9931_s16  ;;  %vm7640_vm2 = vmor %vm237_vm0, %vm238_vm1  ;;  %v7083_v44 = vld [vmem:[%s9823_s1] ss:$12 sps:$4 sm:$0xff]   ;;  %v7088_v47 = vld [vmem:[%s9823_s1 + $0x1c] ss:$12 sps:$4 sm:$0xff]   ;;  %vm782_vm4 = vcmask 1042432  }
  0x21   : > { %420 = vmatprep.subr.bf16.mxu0 %v7080_v3  ;;  %6782 = vmatprep.subr.bf16.mxu1 %v7080_v3  ;;  %v7086_v3 = vld [vmem:[%s9823_s1 + $0x18] ss:$12 sps:$4 sm:$0xff]   ;;  %vm783_vm5 = vcmask 1046532   ;;  %s3279_s19 = sld [smem:[#allocation2]]  ;;  %vm3306_vm7 = vcmask 523264   ;;  %vm3109_vm9 = vcmask 7168  }
  0x22   : > { %s7603_s10 = scalar_lea.vmem %s9822_s0, %s6993_s7  ;;  %vm7748_vm6 = vmor %vm782_vm4, %vm783_vm5  ;;  %s7523_s12 = smov 64  }
  0x23   : > { %v7606_v6 = vld [vmem:[%s7603_s10] sm:$0xf]  ;;  %v7609_v7 = vld [vmem:[%s7603_s10 + $0x8] sm:$0xf]  ;;  %v7612_v8 = vld [vmem:[%s7603_s10 + $0x4] sm:$0x1] }
  0x24   : > { %421 = vmatpush1.bf16.msra.mxu0 %v7082_v4  ;;  %6784 = vmatpush1.bf16.msra.mxu1 %v7082_v4  ;;  %v7615_v9 = vld [vmem:[%s7603_s10 + $0xc] sm:$0x1]  ;;  %v241_v10 = vshrl.u32 %v7606_v6, 16  ;;  %v244_v11 = vshll.u32 %v7606_v6, 16  ;;  %v250_v12 = vshll.u32 %v7612_v8, 16  ;;  %v255_v13 = vshrl.u32 %v7609_v7, 16  ;;  %vm8519_vm13 = vmpackc.low %vm3109_vm9, %vm3109_vm9 }
  0x25   : > { %620 = vmatprep.subr.bf16.mxu0 %v7085_v5  ;;  %v258_v14 = vshll.u32 %v7609_v7, 16  ;;  %v264_v15 = vshll.u32 %v7615_v9, 16  ;;  %v7624_v16 = vld [vmem:[%s7603_s10 + $0x10] sm:$0xf]  ;;  %v7627_v21 = vld [vmem:[%s7603_s10 + $0x18] sm:$0xf] }
  0x26   : > { %v243_v17 = vrot.slane %v241_v10, 4  ;;  %v246_v18 = vrot.slane %v244_v11, 5  ;;  %v252_v19 = vrot.slane %v250_v12, 5  ;;  %v257_v20 = vrot.slane %v255_v13, 4  ;;  %v7630_v24 = vld [vmem:[%s7603_s10 + $0x14] sm:$0x1] }
  0x27   : > { %v260_v22 = vrot.slane %v258_v14, 5  ;;  %v266_v23 = vrot.slane %v264_v15, 5  ;;  %v7633_v25 = vld [vmem:[%s7603_s10 + $0x1c] sm:$0x1]  ;;  %v269_v27 = vshrl.u32 %v7624_v16, 16  ;;  %v272_v28 = vshll.u32 %v7624_v16, 16 }
  0x28   : > { %v247_v26 = vor.u32 %v246_v18, %v243_v17  ;;  %v278_v29 = vshll.u32 %v7630_v24, 16  ;;  %v283_v32 = vshrl.u32 %v7627_v21, 16  ;;  %v286_v33 = vshll.u32 %v7627_v21, 16  ;;  %v7648_v35 = vld [vmem:[%s7603_s10 + $0x20] sm:$0xf]  ;;  %s3280_s20 = ssub.f32 0.0, %s3279_s19 }
  0x29   : > { %v261_v31 = vor.u32 %v260_v22, %v257_v20  ;;  %v292_v34 = vshll.u32 %v7633_v25, 16  ;;  %v271_v37 = vrot.slane %v269_v27, 4  ;;  %v274_v38 = vrot.slane %v272_v28, 5  ;;  %v7651_v39 = vld [vmem:[%s7603_s10 + $0x28] sm:$0xf]  ;;  %s6058_s13 = sld [smem:[#allocation2 + $0x1]] }
  0x2a   : > { %v248_v36 = vrot.slane %v247_v26, 4  ;;  %v280_v41 = vrot.slane %v278_v29, 5  ;;  %v285_v42 = vrot.slane %v283_v32, 4  ;;  %v288_v43 = vrot.slane %v286_v33, 5  ;;  %v7666_v53 = vld [vmem:[%s7603_s10 + $0x24] sm:$0x1] }
  0x2b   : > { %v262_v40 = vrot.slane %v261_v31, 4  ;;  %v275_v46 = vor.u32 %v274_v38, %v271_v37  ;;  %v297_v48 = vshrl.u32 %v7648_v35, 16  ;;  %v300_v49 = vshll.u32 %v7648_v35, 16  ;;  %v7669_v54 = vld [vmem:[%s7603_s10 + $0x2c] sm:$0x1]  ;;  %s7524_s25 = smov 32  }
  0x2c   : > { %v253_v45 = vsel %vm7640_vm2, %v248_v36, %v252_v19  ;;  %v289_v51 = vor.u32 %v288_v43, %v285_v42  ;;  %v294_v52 = vrot.slane %v292_v34, 5  ;;  %v311_v55 = vshrl.u32 %v7651_v39, 16  ;;  %v7091_v11 = vld [vmem:[%s9823_s1 + $0x64] ss:$12 sps:$4 sm:$0xff]   ;;  %v7096_v27 = vld [vmem:[%s9823_s1 + $0x7c] ss:$12 sps:$4 sm:$0xff]  }
  0x2d   : > { %v267_v50 = vsel %vm7640_vm2, %v262_v40, %v266_v23  ;;  %v276_v57 = vrot.slane %v275_v46, 4  ;;  %v299_v58 = vrot.slane %v297_v48, 4  ;;  %v302_v59 = vrot.slane %v300_v49, 5  ;;  %v7089_v23 = vld [vmem:[%s9823_s1 + $0x60] ss:$12 sps:$4 sm:$0xff]   ;;  %s9251_s26 = sld [smem:[#allocation2 + $0x2]] }
  0x2e   : > { %v7672_v56 = vcombine.low %v253_v45, %v267_v50  ;;  %v290_v60 = vrot.slane %v289_v51, 4  ;;  %v313_v61 = vrot.slane %v311_v55, 4  ;;  %v314_v62 = vshll.u32 %v7651_v39, 16  ;;  %v7094_v28 = vld [vmem:[%s9823_s1 + $0x78] ss:$12 sps:$4 sm:$0xff]   ;;  %s6108_s11 = sld [smem:[#allocation2 + $0x3]] }
  0x2f   : > { %v281_v63 = vsel %vm7640_vm2, %v276_v57, %v280_v41  ;;  %v306_v0 = vshll.u32 %v7666_v53, 16  ;;  %v303_v4 = vor.u32 %v302_v59, %v299_v58  ;;  %v320_v10 = vshll.u32 %v7669_v54, 16  ;;  %v758_v31 = vld [vmem:[%s7603_s10] sm:$0xe]  ;;  %v759_v32 = vld [vmem:[%s7603_s10 + $0x8] sm:$0xe] }
  0x30   : > { %5718 = vmatmul.mubr.msk.bf16.vlgmr.msra.gmra.mrb[0].mxu0 %vm405_vm3, %v7672_v56  ;;  %v295_v1 = vsel %vm7640_vm2, %v290_v60, %v294_v52  ;;  %v316_v5 = vrot.slane %v314_v62, 5  ;;  %v7709_v26 = vcombine.low %v7606_v6, %v7609_v7  ;;  %v7101_v6 = vld [vmem:[%s9823_s1 + $0x94] ss:$12 sps:$4 sm:$0xff]   ;;  %v7725_v7 = vcombine.low %v7624_v16, %v7627_v21  ;;  %v760_v16 = vld [vmem:[%s7603_s10 + $0x10] sm:$0xe]  ;;  %s3959_s14 = ssub.f32 0.0, %s6058_s13 }
  0x31   : > { %621 = vmatpush1.bf16.msra.mxu0 %v7083_v44  ;;  %460 = vmatprep.mubr.bf16.mxu0 %v7521_v2  ;;  %v7690_v13 = vcombine.low %v281_v63, %v295_v1  ;;  %v304_v14 = vrot.slane %v303_v4, 4  ;;  %v308_v15 = vrot.slane %v306_v0, 5  ;;  %v322_v18 = vrot.slane %v320_v10, 5  ;;  %v7743_v34 = vld [vmem:[%s7603_s10 + $0x30] sm:$0xf] }
  0x32   : > { %622 = vmatprep.subr.bf16.mxu0 %v7088_v47  ;;  %v317_v12 = vor.u32 %v316_v5, %v313_v61  ;;  %v7732_v29 = vcombine.low %v7648_v35, %v7651_v39  ;;  %v787_v21 = vrot.slane %v7612_v8, 5  ;;  %v791_v33 = vrot.slane %v7615_v9, 5  ;;  %v7746_v36 = vld [vmem:[%s7603_s10 + $0x38] sm:$0xf]  ;;  %v7099_v45 = vld [vmem:[%s9823_s1 + $0x90] ss:$12 sps:$4 sm:$0xff]  }
  0x33   : > { %v309_v19 = vsel %vm7640_vm2, %v304_v14, %v308_v15  ;;  %v5744_v37 = vrot.slane %v758_v31, 9  ;;  %v5745_v38 = vrot.slane %v759_v32, 9  ;;  %v5746_v39 = vrot.slane %v760_v16, 9  ;;  %v761_v8 = vld [vmem:[%s7603_s10 + $0x18] sm:$0xe]  ;;  %s4629_s27 = ssub.f32 0.0, %s9251_s26 }
  0x34   : > { %v318_v17 = vrot.slane %v317_v12, 4  ;;  %v7754_v40 = vcombine.low %v7743_v34, %v7746_v36  ;;  %v795_v42 = vrot.slane %v7630_v24, 5  ;;  %v5747_v43 = vrot.slane %v761_v8, 9  ;;  %v7104_v47 = vld [vmem:[%s9823_s1 + $0xac] ss:$12 sps:$4 sm:$0xff]   ;;  %s5295_s13 = ssub.f32 0.0, %s6108_s11 }
  0x35   : > { %623 = vmatpush1.bf16.msra.mxu0 %v7086_v3  ;;  %v788_v9 = vsel %vm7748_vm6, %v5744_v37, %v787_v21  ;;  %v792_v41 = vsel %vm7748_vm6, %v5745_v38, %v791_v33  ;;  %v799_v44 = vrot.slane %v7633_v25, 5  ;;  %v7102_v48 = vld [vmem:[%s9823_s1 + $0xa8] ss:$12 sps:$4 sm:$0xff]   ;;  %v762_v49 = vld [vmem:[%s7603_s10 + $0x20] sm:$0xe]  ;;  %v803_v57 = vrot.slane %v7666_v53, 5 }
  0x36   : > { %882 = vmatprep.subr.bf16.mxu0 %v7091_v11  ;;  %v323_v20 = vsel %vm7640_vm2, %v318_v17, %v322_v18  ;;  %v7769_v46 = vcombine.low %v788_v9, %v792_v41  ;;  %v796_v24 = vsel %vm7748_vm6, %v5746_v39, %v795_v42  ;;  %v763_v50 = vld [vmem:[%s7603_s10 + $0x28] sm:$0xe]  ;;  %v7107_v51 = vld [vmem:[%s9823_s1 + $0xc4] ss:$12 sps:$4 sm:$0xff]   ;;  %v5748_v55 = vrot.slane %v762_v49, 9 }
  0x37   : > { %v7699_v22 = vcombine.low %v309_v19, %v323_v20  ;;  %v800_v25 = vsel %vm7748_vm6, %v5747_v43, %v799_v44  ;;  %v5749_v58 = vrot.slane %v763_v50, 9  ;;  %v807_v59 = vrot.slane %v7669_v54, 5  ;;  %v7801_v62 = vld [vmem:[%s7603_s10 + $0x34] sm:$0x1]  ;;  %v7804_v53 = vld [vmem:[%s7603_s10 + $0x3c] sm:$0x1] }
  0x38   : > { %5719 = vmatmul.mubr.msk.bf16.gmra.mrb[4].mxu0 %vm405_vm3, %v7690_v13  ;;  %v7789_v52 = vcombine.low %v796_v24, %v800_v25  ;;  %v804_v60 = vsel %vm7748_vm6, %v5748_v55, %v803_v57  ;;  %v764_v63 = vld [vmem:[%s7603_s10 + $0x30] sm:$0xe]  ;;  %v765_v54 = vld [vmem:[%s7603_s10 + $0x38] sm:$0xe]  ;;  %v811_v3 = vrot.slane %v7801_v62, 5  ;;  %v815_v5 = vrot.slane %v7804_v53, 5 }
  0x39   : > { %470 = vmatprep.mubr.bf16.mxu0 %v7521_v2  ;;  %v808_v61 = vsel %vm7748_vm6, %v5749_v58, %v807_v59  ;;  %v5750_v1 = vrot.slane %v764_v63, 9  ;;  %v5751_v4 = vrot.slane %v765_v54, 9  ;;  %v7825_v14 = vld [vmem:[%s7603_s10 + $0x8] ss:$8 sps:$4 sm:$0xff]   ;;  %v7105_v15 = vld [vmem:[%s9823_s1 + $0xc0] ss:$12 sps:$4 sm:$0xff]  }
  0x3a   : > { %v7808_v0 = vcombine.low %v804_v60, %v808_v61  ;;  %v7112_v17 = vld [vmem:[%s9823_s1 + $0xdc] ss:$12 sps:$4 sm:$0xff]   ;;  %v7110_v18 = vld [vmem:[%s9823_s1 + $0xd8] ss:$12 sps:$4 sm:$0xff]   ;;  %v7117_v19 = vld [vmem:[%s9823_s1 + $0xf4] ss:$12 sps:$4 sm:$0xff]  }
  0x3b   : > { %v812_v10 = vsel %vm7748_vm6, %v5750_v1, %v811_v3  ;;  %v816_v11 = vsel %vm7748_vm6, %v5751_v4, %v815_v5  ;;  %v7843_v20 = vld [vmem:[%s7603_s10 + $0x18] ss:$8 sps:$4 sm:$0xff]   ;;  %v7851_v16 = vld [vmem:[%s7603_s10 + $0x28] ss:$8 sps:$4 sm:$0xff]   ;;  %v7856_v9 = vld [vmem:[%s7603_s10 + $0xc] sm:$0x1] }
  0x3c   : > { %v7819_v12 = vcombine.low %v812_v10, %v816_v11  ;;  %v5816_v21 = vld [vmem:[%s7603_s10 + $0x18] sm:$0xf]  ;;  %v5818_v8 = vld [vmem:[%s7603_s10 + $0x20] sm:$0xf]  ;;  %v7859_v41 = vld [vmem:[%s7603_s10 + $0x14] sm:$0x1] }
  0x3d   : > { %v1333_v42 = vshrl.u32 %v5816_v21, 16  ;;  %v1336_v43 = vshll.u32 %v5816_v21, 16  ;;  %v1347_v44 = vshrl.u32 %v5818_v8, 16  ;;  %v1314_v24 = vshll.u32 %v7856_v9, 16  ;;  %v7867_v49 = vld [vmem:[%s7603_s10 + $0x38] ss:$8 sps:$4 sm:$0xff]  }
  0x3e   : > { %v7870_v55 = vld [vmem:[%s7603_s10 + $0x1c] sm:$0x1]  ;;  %v7873_v57 = vld [vmem:[%s7603_s10 + $0x24] sm:$0x1]  ;;  %v5820_v1 = vld [vmem:[%s7603_s10 + $0x28] sm:$0xf] }
  0x3f   : > { %v1335_v50 = vrot.slane %v1333_v42, 4  ;;  %v1349_v58 = vrot.slane %v1347_v44, 4  ;;  %v1316_v61 = vrot.slane %v1314_v24, 5  ;;  %v5822_v3 = vld [vmem:[%s7603_s10 + $0x30] sm:$0xf]  ;;  %v1342_v5 = vshll.u32 %v7870_v55, 16 }
  0x40   : > { %5720 = vmatmul.mubr.msk.bf16.gmra.mrb[8].mxu0 %vm405_vm3, %v7699_v22  ;;  %v1356_v10 = vshll.u32 %v7873_v57, 16  ;;  %v5824_v44 = vld [vmem:[%s7603_s10 + $0x38] sm:$0xf] }
  0x41   : > { %652 = vmatprep.mubr.bf16.mxu0 %v7521_v2 }
  0x48   : > { %5736 = vmatmul.mubr.msk.bf16.vlgmr.msra.gmra.mrb[0].mxu0 %vm405_vm3, %v7709_v26 }
  0x49   : > { %883 = vmatpush1.bf16.msra.mxu0 %v7089_v23  ;;  %662 = vmatprep.mubr.bf16.mxu0 %v7521_v2  ;;  %v5812_v23 = vld [vmem:[%s7603_s10 + $0x8] sm:$0xf] }
  0x4a   : > { %884 = vmatprep.subr.bf16.mxu0 %v7096_v27  ;;  %v5814_v27 = vld [vmem:[%s7603_s10 + $0x10] sm:$0xf] }
  0x4b   : > { %v1319_v31 = vshrl.u32 %v5814_v27, 16  ;;  %v1322_v32 = vshll.u32 %v5814_v27, 16  ;;  %v1378_v27 = vshll.u32 %v5822_v3, 16 }
  0x4d   : > { %885 = vmatpush1.bf16.msra.mxu0 %v7094_v28  ;;  %v1305_v28 = vshrl.u32 %v5812_v23, 16  ;;  %v1321_v38 = vrot.slane %v1319_v31, 4  ;;  %v1324_v39 = vrot.slane %v1322_v32, 5  ;;  %v1344_v31 = vrot.slane %v1342_v5, 5 }
  0x4e   : > { %1126 = vmatprep.subr.bf16.mxu0 %v7101_v6  ;;  %v1308_v6 = vshll.u32 %v5812_v23, 16  ;;  %v1375_v23 = vshrl.u32 %v5822_v3, 16  ;;  %v1358_v32 = vrot.slane %v1356_v10, 5 }
  0x4f   : > { %v1307_v33 = vrot.slane %v1305_v28, 4  ;;  %v1325_v25 = vor.u32 %v1324_v39, %v1321_v38  ;;  %v7115_v28 = vld [vmem:[%s9823_s1 + $0xf0] ss:$12 sps:$4 sm:$0xff]  }
  0x50   : > { %5737 = vmatmul.mubr.msk.bf16.gmra.mrb[4].mxu0 %vm405_vm3, %v7725_v7  ;;  %v1310_v37 = vrot.slane %v1308_v6, 5  ;;  %v1377_v42 = vrot.slane %v1375_v23, 4 }
  0x51   : > { %672 = vmatprep.mubr.bf16.mxu0 %v7521_v2  ;;  %v1326_v63 = vrot.slane %v1325_v25, 4 }
  0x58   : > { %5738 = vmatmul.mubr.msk.bf16.gmra.mrb[8].mxu0 %vm405_vm3, %v7732_v29 }
  0x59   : > { %682 = vmatprep.mubr.bf16.mxu0 %v7521_v2 }
  0x60   : > { %5739 = vmatmul.mubr.msk.bf16.gmra.mrb[12].mxu0 %vm405_vm3, %v7754_v40 }
  0x61   : > { %914 = vmatprep.mubr.bf16.mxu0 %v7521_v2 }
  0x68   : > { %5770 = vmatmul.mubr.msk.bf16.vlgmr.msra.gmra.mrb[0].mxu0 %vm405_vm3, %v7769_v46 }
  0x69   : > { %1127 = vmatpush1.bf16.msra.mxu0 %v7099_v45  ;;  %924 = vmatprep.mubr.bf16.mxu0 %v7521_v2  ;;  %v1350_v45 = vshll.u32 %v5818_v8, 16  ;;  %v7895_v8 = vld [vmem:[%s7603_s10 + $0x34] sm:$0x1] }
  0x6a   : > { %1128 = vmatprep.subr.bf16.mxu0 %v7104_v47  ;;  %v1311_v47 = vor.u32 %v1310_v37, %v1307_v33  ;;  %v7892_v37 = vld [vmem:[%s7603_s10 + $0x2c] sm:$0x1] }
  0x6b   : > { %v1352_v59 = vrot.slane %v1350_v45, 5  ;;  %v7120_v45 = vld [vmem:[%s9823_s1 + $0x10c] ss:$12 sps:$4 sm:$0xff]   ;;  %v1370_v25 = vshll.u32 %v7892_v37, 16 }
  0x6c   : > { %v1312_v60 = vrot.slane %v1311_v47, 4  ;;  %v5826_v47 = vld [vmem:[%s7603_s10 + $0x40] sm:$0xf] }
  0x6d   : > { %1129 = vmatpush1.bf16.msra.mxu0 %v7102_v48  ;;  %v1328_v48 = vshll.u32 %v7859_v41, 16  ;;  %v1353_v11 = vor.u32 %v1352_v59, %v1349_v58  ;;  %v1389_v58 = vshrl.u32 %v5824_v44, 16  ;;  %v7118_v59 = vld [vmem:[%s9823_s1 + $0x108] ss:$12 sps:$4 sm:$0xff]   ;;  %v1372_v3 = vrot.slane %v1370_v25, 5 }
  0x6e   : > { %1481 = vmatprep.subr.bf16.mxu0 %v7107_v51  ;;  %v1338_v51 = vrot.slane %v1336_v43, 5  ;;  %v1380_v43 = vrot.slane %v1378_v27, 5 }
  0x6f   : > { %v1330_v54 = vrot.slane %v1328_v48, 5  ;;  %v1354_v33 = vrot.slane %v1353_v11, 4  ;;  %v7920_v11 = vld [vmem:[%s7603_s10 + $0x3c] sm:$0x1] }
  0x70   : > { %5771 = vmatmul.mubr.msk.bf16.gmra.mrb[4].mxu0 %vm405_vm3, %v7789_v52  ;;  %v1339_v4 = vor.u32 %v1338_v51, %v1335_v50  ;;  %v1384_v51 = vshll.u32 %v7895_v8, 16 }
  0x71   : > { %934 = vmatprep.mubr.bf16.mxu0 %v7521_v2  ;;  %v1359_v48 = vsel %vm7640_vm2, %v1354_v33, %v1358_v32  ;;  %v342_v32 = vshll.u32 %v7746_v36, 16  ;;  %v1398_v33 = vshll.u32 %v7920_v11, 16 }
  0x72   : > { %v1340_v6 = vrot.slane %v1339_v4, 4  ;;  %v1386_v10 = vrot.slane %v1384_v51, 5 }
  0x74   : > { %v1345_v24 = vsel %vm7640_vm2, %v1340_v6, %v1344_v31  ;;  %v328_v6 = vshll.u32 %v7743_v34, 16  ;;  %v339_v31 = vshrl.u32 %v7746_v36, 16 }
  0x75   : > { %v7917_v4 = vcombine.low %v1345_v24, %v1359_v48  ;;  %v1400_v48 = vrot.slane %v1398_v33, 5  ;;  %v7144_v33 = vld [vmem:[%s9823_s1 + $0x50] ss:$12 sps:$4 sm:$0xff]  }
  0x76   : > { %v330_v36 = vrot.slane %v328_v6, 5 }
  0x78   : > { %5772 = vmatmul.mubr.msk.bf16.gmra.mrb[8].mxu0 %vm405_vm3, %v7808_v0 }
  0x79   : > { %944 = vmatprep.mubr.bf16.mxu0 %v7521_v2 }
  0x80   : > { %5773 = vmatmul.mubr.msk.bf16.gmra.mrb[12].mxu0 %vm405_vm3, %v7819_v12 }
  0x81   : > { %1158 = vmatprep.mubr.bf16.mxu0 %v7521_v2 }
  0x88   : > { %5804 = vmatmul.mubr.msk.bf16.vlgmr.msra.gmra.mrb[0].mxu0 %vm405_vm3, %v7825_v14 }
  0x89   : > { %1482 = vmatpush1.bf16.msra.mxu0 %v7105_v15  ;;  %1168 = vmatprep.mubr.bf16.mxu0 %v7521_v2  ;;  %v1361_v15 = vshrl.u32 %v5820_v1, 16 }
  0x8a   : > { %1483 = vmatprep.subr.bf16.mxu0 %v7112_v17  ;;  %v1364_v17 = vshll.u32 %v5820_v1, 16  ;;  %v7123_v1 = vld [vmem:[%s9823_s1 + $0x124] ss:$12 sps:$4 sm:$0xff]  }
  0x8b   : > { %v1363_v38 = vrot.slane %v1361_v15, 4  ;;  %v1391_v15 = vrot.slane %v1389_v58, 4 }
  0x8c   : > { %v1366_v39 = vrot.slane %v1364_v17, 5 }
  0x8d   : > { %1484 = vmatpush1.bf16.msra.mxu0 %v7110_v18  ;;  %v1317_v18 = vsel %vm7640_vm2, %v1312_v60, %v1316_v61  ;;  %v1381_v60 = vor.u32 %v1380_v43, %v1377_v42  ;;  %v1392_v61 = vshll.u32 %v5824_v44, 16 }
  0x8e   : > { %1764 = vmatprep.subr.bf16.mxu0 %v7117_v19  ;;  %v1331_v19 = vsel %vm7640_vm2, %v1326_v63, %v1330_v54  ;;  %v1367_v50 = vor.u32 %v1366_v39, %v1363_v38  ;;  %v1403_v63 = vshrl.u32 %v5826_v47, 16  ;;  %v1406_v54 = vshll.u32 %v5826_v47, 16 }
  0x8f   : > { %v7889_v21 = vcombine.low %v1317_v18, %v1331_v19  ;;  %v1382_v17 = vrot.slane %v1381_v60, 4  ;;  %v7923_v18 = vld [vmem:[%s7603_s10 + $0x44] sm:$0x1]  ;;  %v1394_v19 = vrot.slane %v1392_v61, 5  ;;  %v344_v47 = vrot.slane %v342_v32, 5 }
  0x90   : > { %5805 = vmatmul.mubr.msk.bf16.gmra.mrb[4].mxu0 %vm405_vm3, %v7843_v20  ;;  %v1368_v5 = vrot.slane %v1367_v50, 4  ;;  %v1405_v23 = vrot.slane %v1403_v63, 4  ;;  %v1408_v27 = vrot.slane %v1406_v54, 5  ;;  %v1412_v38 = vshll.u32 %v7923_v18, 16  ;;  %v7143_v32 = vld [vmem:[%s9823_s1 + $0x38] ss:$12 sps:$4 sm:$0xff]  }
  0x91   : > { %1178 = vmatprep.mubr.bf16.mxu0 %v7521_v2  ;;  %v1395_v42 = vor.u32 %v1394_v19, %v1391_v15  ;;  %v348_v61 = vshll.u32 %v7804_v53, 16  ;;  %v5854_v15 = vld [vmem:[%s7603_s10 + $0x8] sm:$0xe]  ;;  %6337 = vmatprep.subr.bf16.mxu1 %v7143_v32 }
  0x92   : > { %v1373_v39 = vsel %vm7640_vm2, %v1368_v5, %v1372_v3  ;;  %v1409_v43 = vor.u32 %v1408_v27, %v1405_v23  ;;  %v1414_v51 = vrot.slane %v1412_v38, 5  ;;  %v5862_v27 = vrot.slane %v5854_v15, 9  ;;  %v5857_v38 = vld [vmem:[%s7603_s10 + $0x20] sm:$0xe] }
  0x93   : > { %v1396_v25 = vrot.slane %v1395_v42, 4  ;;  %v350_v3 = vrot.slane %v348_v61, 5  ;;  %v7121_v42 = vld [vmem:[%s9823_s1 + $0x120] ss:$12 sps:$4 sm:$0xff]  }
  0x94   : > { %v1410_v50 = vrot.slane %v1409_v43, 4 }
  0x95   : > { %v1401_v5 = vsel %vm7640_vm2, %v1396_v25, %v1400_v48  ;;  %v7146_v25 = vld [vmem:[%s9823_s1 + $0x20] ss:$12 sps:$4 sm:$0xff]   ;;  %v7124_v48 = vld [vmem:[%s9823_s1 + $0x138] ss:$12 sps:$4 sm:$0xff]  }
  0x98   : > { %5806 = vmatmul.mubr.msk.bf16.gmra.mrb[8].mxu0 %vm405_vm3, %v7851_v16 }
  0x99   : > { %1188 = vmatprep.mubr.bf16.mxu0 %v7521_v2 }
  0xa0   : > { %5807 = vmatmul.mubr.msk.bf16.gmra.mrb[12].mxu0 %vm405_vm3, %v7867_v49 }
  0xa1   : > { %1513 = vmatprep.mubr.bf16.mxu0 %v7521_v2 }
  0xa8   : > { %5846 = vmatmul.mubr.msk.bf16.vlgmr.msra.gmra.mrb[0].mxu0 %vm405_vm3, %v7889_v21 }
  0xa9   : > { %1765 = vmatpush1.bf16.msra.mxu0 %v7115_v28  ;;  %1523 = vmatprep.mubr.bf16.mxu0 %v7521_v2  ;;  %v325_v28 = vshrl.u32 %v7743_v34, 16  ;;  %v1387_v34 = vsel %vm7640_vm2, %v1382_v17, %v1386_v10  ;;  %v1415_v10 = vsel %vm7640_vm2, %v1410_v50, %v1414_v51  ;;  %v5858_v50 = vld [vmem:[%s7603_s10 + $0x28] sm:$0xe]  ;;  %v5859_v51 = vld [vmem:[%s7603_s10 + $0x30] sm:$0xe] }
  0xaa   : > { %1766 = vmatprep.subr.bf16.mxu0 %v7120_v45  ;;  %v341_v45 = vrot.slane %v339_v31, 4  ;;  %v7938_v24 = vcombine.low %v1373_v39, %v1387_v34  ;;  %v7955_v23 = vcombine.low %v1401_v5, %v1415_v10  ;;  %v1673_v31 = vrot.slane %v7859_v41, 5  ;;  %v7145_v34 = vld [vmem:[%s9823_s1 + $0x8] ss:$12 sps:$4 sm:$0xff]  }
  0xab   : > { %v327_v44 = vrot.slane %v325_v28, 4  ;;  %v1669_v28 = vrot.slane %v7856_v9, 5  ;;  %v5866_v61 = vrot.slane %v5858_v50, 9  ;;  %v1693_v10 = vrot.slane %v7920_v11, 5 }
  0xac   : > { %v345_v60 = vor.u32 %v344_v47, %v341_v45  ;;  %v1681_v45 = vrot.slane %v7873_v57, 5  ;;  %v7126_v47 = vld [vmem:[%s9823_s1 + $0x13c] ss:$12 sps:$4 sm:$0xff]  }
  0xad   : > { %1767 = vmatpush1.bf16.msra.mxu0 %v7118_v59  ;;  %v331_v58 = vor.u32 %v330_v36, %v327_v44  ;;  %v334_v59 = vshll.u32 %v7801_v62, 16  ;;  %v5855_v62 = vld [vmem:[%s7603_s10 + $0x10] sm:$0xe]  ;;  %v1670_v9 = vsel %vm7748_vm6, %v5862_v27, %v1669_v28  ;;  %v1677_v44 = vrot.slane %v7870_v55, 5 }
  0xae   : > { %2008 = vmatprep.subr.bf16.mxu0 %v7123_v1  ;;  %v346_v1 = vrot.slane %v345_v60, 4  ;;  %v5863_v6 = vrot.slane %v5855_v62, 9  ;;  %v5865_v36 = vrot.slane %v5857_v38, 9  ;;  %v7147_v60 = vld [vmem:[%s9823_s1 + $0x68] ss:$12 sps:$4 sm:$0xff]   ;;  %v1697_v62 = vrot.slane %v7923_v18, 5 }
  0xaf   : > { %v332_v63 = vrot.slane %v331_v58, 4  ;;  %v336_v54 = vrot.slane %v334_v59, 5  ;;  %v7129_v58 = vld [vmem:[%s9823_s1 + $0x154] ss:$12 sps:$4 sm:$0xff]   ;;  %v7149_v18 = vld [vmem:[%s9823_s1 + $0x98] ss:$12 sps:$4 sm:$0xff]  }
  0xb0   : > { %5847 = vmatmul.mubr.msk.bf16.gmra.mrb[4].mxu0 %vm405_vm3, %v7917_v4  ;;  %v351_v17 = vsel %vm7640_vm2, %v346_v1, %v350_v3  ;;  %v1674_v41 = vsel %vm7748_vm6, %v5863_v6, %v1673_v31  ;;  %v1682_v57 = vsel %vm7748_vm6, %v5865_v36, %v1681_v45  ;;  %v1689_v1 = vrot.slane %v7895_v8, 5  ;;  %v5860_v3 = vld [vmem:[%s7603_s10 + $0x38] sm:$0xe]  ;;  %v7139_v27 = vld [vmem:[%s9823_s1 + $0x184] ss:$12 sps:$4 sm:$0xff]  }
  0xb1   : > { %1533 = vmatprep.mubr.bf16.mxu0 %v7521_v2  ;;  %v337_v53 = vsel %vm7640_vm2, %v332_v63, %v336_v54  ;;  %v7977_v39 = vcombine.low %v1670_v9, %v1674_v41  ;;  %v1685_v63 = vrot.slane %v7892_v37, 5  ;;  %v5867_v54 = vrot.slane %v5859_v51, 9  ;;  %v5861_v37 = vld [vmem:[%s7603_s10 + $0x40] sm:$0xe]  ;;  %v5930_v28 = vld [vmem:[%s7603_s10 + $0x10] sm:$0xf] }
  0xb2   : > { %v5711_v19 = vcombine.low %v337_v53, %v351_v17  ;;  %v5868_v5 = vrot.slane %v5860_v3, 9  ;;  %v5869_v15 = vrot.slane %v5861_v37, 9  ;;  %v7148_v53 = vld [vmem:[%s9823_s1 + $0x80] ss:$12 sps:$4 sm:$0xff]   ;;  %v5932_v6 = vld [vmem:[%s7603_s10 + $0x18] sm:$0xf] }
  0xb3   : > { %v8089_v31 = vld [vmem:[%s7603_s10 + $0x20] ss:$8 sps:$4 sm:$0xff]   ;;  %v2201_v9 = vshrl.u32 %v5932_v6, 16  ;;  %v2204_v41 = vshll.u32 %v5932_v6, 16  ;;  %v8128_v37 = vld [vmem:[%s7603_s10 + $0x24] sm:$0x1] }
  0xb4   : > { %5721 = vmatmul.mubr.msk.bf16.vlgmr.msra.gmra.mrb[0].mxu1 %vm405_vm3, %v5711_v19  ;;  %v1698_v17 = vsel %vm7748_vm6, %v5869_v15, %v1697_v62  ;;  %v5934_v36 = vld [vmem:[%s7603_s10 + $0x20] sm:$0xf]  ;;  %v5936_v45 = vld [vmem:[%s7603_s10 + $0x28] sm:$0xf]  ;;  %v5940_v15 = vld [vmem:[%s7603_s10 + $0x38] sm:$0xf] }
  0xb5   : > { %6341 = vmatprep.mubr.msk.bf16.mxu1 %vm405_vm3, %v7672_v56  ;;  %v5856_v56 = vld [vmem:[%s7603_s10 + $0x18] sm:$0xe]  ;;  %6338 = vmatpush3.bf16.msra.mxu1 %v7143_v32  ;;  %v7151_v32 = vld [vmem:[%s9823_s1 + $0xc8] ss:$12 sps:$4 sm:$0xff]   ;;  %v2203_v38 = vrot.slane %v2201_v9, 4  ;;  %v2229_v50 = vshrl.u32 %v5936_v45, 16 }
  0xb6   : > { %6339 = vmatprep.subr.bf16.mxu1 %v7144_v33  ;;  %v5864_v43 = vrot.slane %v5856_v56, 9  ;;  %v2232_v51 = vshll.u32 %v5936_v45, 16  ;;  %v5944_v45 = vld [vmem:[%s7603_s10 + $0x48] sm:$0xf] }
  0xb8   : > { %5848 = vmatmul.mubr.msk.bf16.gmra.mrb[8].mxu0 %vm405_vm3, %v7938_v24  ;;  %v1678_v55 = vsel %vm7748_vm6, %v5864_v43, %v1677_v44  ;;  %v8103_v43 = vld [vmem:[%s7603_s10 + $0x1c] sm:$0x1]  ;;  %v8108_v44 = vld [vmem:[%s7603_s10 + $0x30] ss:$8 sps:$4 sm:$0xff]   ;;  %v2234_v3 = vrot.slane %v2232_v51, 5 }
  0xb9   : > { %1543 = vmatprep.mubr.bf16.mxu0 %v7521_v2  ;;  %6340 = vmatpush3.bf16.msra.mxu1 %v7144_v33  ;;  %v8012_v59 = vcombine.low %v1678_v55, %v1682_v57  ;;  %v2187_v33 = vshrl.u32 %v5930_v28, 16  ;;  %v2210_v57 = vshll.u32 %v8103_v43, 16 }
  0xba   : > { %6349 = vmatprep.subr.bf16.mxu1 %v7145_v34 }
  0xbc   : > { %6342 = vmatmul.mubr.msk.bf16.vlgmr.msra.gmra.mrb[4].mxu1 %vm405_vm3, %v7690_v13  ;;  %v1686_v13 = vsel %vm7748_vm6, %v5866_v61, %v1685_v63  ;;  %v2212_v63 = vrot.slane %v2210_v57, 5 }
  0xbd   : > { %6345 = vmatprep.mubr.msk.bf16.mxu1 %vm405_vm3, %v7699_v22  ;;  %6350 = vmatpush3.bf16.msra.mxu1 %v7145_v34  ;;  %v1690_v22 = vsel %vm7748_vm6, %v5867_v54, %v1689_v1  ;;  %v2206_v34 = vrot.slane %v2204_v41, 5  ;;  %v8123_v54 = vld [vmem:[%s7603_s10 + $0x40] ss:$8 sps:$4 sm:$0xff]  }
  0xbe   : > { %6351 = vmatprep.subr.bf16.mxu1 %v7146_v25  ;;  %v8031_v8 = vcombine.low %v1686_v13, %v1690_v22  ;;  %v2231_v22 = vrot.slane %v2229_v50, 4  ;;  %v7140_v50 = vld [vmem:[%s9823_s1 + $0x198] ss:$12 sps:$4 sm:$0xff]  }
  0xbf   : > { %v2207_v55 = vor.u32 %v2206_v34, %v2203_v38  ;;  %v8157_v38 = vld [vmem:[%s7603_s10 + $0x34] sm:$0x1]  ;;  %v8160_v34 = vld [vmem:[%s7603_s10 + $0x3c] sm:$0x1] }
  0xc0   : > { %5849 = vmatmul.mubr.msk.bf16.gmra.mrb[12].mxu0 %vm405_vm3, %v7955_v23 }
  0xc1   : > { %1796 = vmatprep.mubr.bf16.mxu0 %v7521_v2  ;;  %6352 = vmatpush3.bf16.msra.mxu1 %v7146_v25  ;;  %v2208_v61 = vrot.slane %v2207_v55, 4  ;;  %v2252_v55 = vshll.u32 %v8157_v38, 16 }
  0xc2   : > { %6361 = vmatprep.subr.bf16.mxu1 %v7147_v60 }
  0xc4   : > { %6346 = vmatmul.mubr.msk.bf16.gmra.mrb[8].mxu1 %vm405_vm3, %v5711_v19  ;;  %v7134_v19 = vld [vmem:[%s9823_s1 + $0x16c] ss:$12 sps:$4 sm:$0xff]  }
  0xc5   : > { %6353 = vmatprep.mubr.msk.bf16.mxu1 %vm405_vm3, %v7709_v26  ;;  %v1694_v26 = vsel %vm7748_vm6, %v5868_v5, %v1693_v10  ;;  %v8131_v5 = vld [vmem:[%s7603_s10 + $0x2c] sm:$0x1]  ;;  %v7153_v10 = vld [vmem:[%s9823_s1 + $0xf8] ss:$12 sps:$4 sm:$0xff]  }
  0xc6   : > { %v8049_v11 = vcombine.low %v1694_v26, %v1698_v17  ;;  %v2235_v17 = vor.u32 %v2234_v3, %v2231_v22  ;;  %v7155_v3 = vld [vmem:[%s9823_s1 + $0x128] ss:$12 sps:$4 sm:$0xff]  }
  0xc8   : > { %5888 = vmatmul.mubr.msk.bf16.vlgmr.msra.gmra.mrb[0].mxu0 %vm405_vm3, %v7977_v39 }
  0xc9   : > { %2009 = vmatpush1.bf16.msra.mxu0 %v7121_v42  ;;  %1806 = vmatprep.mubr.bf16.mxu0 %v7521_v2  ;;  %v8100_v42 = vld [vmem:[%s7603_s10 + $0x14] sm:$0x1] }
  0xca   : > { %2010 = vmatprep.subr.bf16.mxu0 %v7126_v47  ;;  %v2196_v25 = vshll.u32 %v8100_v42, 16 }
  0xcc   : > { %6354 = vmatmul.mubr.msk.bf16.vlgmr.msra.gmra.mrb[4].mxu1 %vm405_vm3, %v7725_v7  ;;  %v8062_v7 = vld [vmem:[%s7603_s10 + $0x10] ss:$8 sps:$4 sm:$0xff]  }
  0xcd   : > { %2011 = vmatpush1.bf16.msra.mxu0 %v7124_v48  ;;  %6357 = vmatprep.mubr.msk.bf16.mxu1 %vm405_vm3, %v7732_v29  ;;  %v7127_v29 = vld [vmem:[%s9823_s1 + $0x150] ss:$12 sps:$4 sm:$0xff]   ;;  %v2215_v48 = vshrl.u32 %v5934_v36, 16 }
  0xce   : > { %2363 = vmatprep.subr.bf16.mxu0 %v7129_v58  ;;  %6362 = vmatpush3.bf16.msra.mxu1 %v7147_v60  ;;  %v2198_v60 = vrot.slane %v2196_v25, 5 }
  0xcf   : > { %6363 = vmatprep.subr.bf16.mxu1 %v7148_v53  ;;  %v2217_v1 = vrot.slane %v2215_v48, 4  ;;  %v2266_v48 = vshll.u32 %v8160_v34, 16 }
  0xd0   : > { %5889 = vmatmul.mubr.msk.bf16.gmra.mrb[4].mxu0 %vm405_vm3, %v8012_v59 }
  0xd1   : > { %1816 = vmatprep.mubr.bf16.mxu0 %v7521_v2  ;;  %v2268_v22 = vrot.slane %v2266_v48, 5  ;;  %v5977_v48 = vld [vmem:[%s7603_s10 + $0x38] sm:$0xe] }
  0xd2   : > { %6364 = vmatpush3.bf16.msra.mxu1 %v7148_v53  ;;  %v2213_v53 = vsel %vm7640_vm2, %v2208_v61, %v2212_v63 }
  0xd3   : > { %6373 = vmatprep.subr.bf16.mxu1 %v7149_v18 }
  0xd4   : > { %6358 = vmatmul.mubr.msk.bf16.gmra.mrb[8].mxu1 %vm405_vm3, %v7754_v40  ;;  %v7150_v40 = vld [vmem:[%s9823_s1 + $0xb0] ss:$12 sps:$4 sm:$0xff]  }
  0xd5   : > { %6365 = vmatprep.mubr.msk.bf16.mxu1 %vm405_vm3, %v7769_v46  ;;  %v7132_v46 = vld [vmem:[%s9823_s1 + $0x168] ss:$12 sps:$4 sm:$0xff]  }
  0xd8   : > { %5890 = vmatmul.mubr.msk.bf16.gmra.mrb[8].mxu0 %vm405_vm3, %v8031_v8 }
  0xd9   : > { %1826 = vmatprep.mubr.bf16.mxu0 %v7521_v2 }
  0xdc   : > { %6366 = vmatmul.mubr.msk.bf16.vlgmr.msra.gmra.mrb[4].mxu1 %vm405_vm3, %v7789_v52  ;;  %v2190_v52 = vshll.u32 %v5930_v28, 16 }
  0xdd   : > { %6369 = vmatprep.mubr.msk.bf16.mxu1 %vm405_vm3, %v7808_v0  ;;  %6374 = vmatpush3.bf16.msra.mxu1 %v7149_v18  ;;  %v2189_v0 = vrot.slane %v2187_v33, 4  ;;  %v2238_v18 = vshll.u32 %v8131_v5, 16 }
  0xde   : > { %6375 = vmatprep.subr.bf16.mxu1 %v7150_v40  ;;  %v2192_v56 = vrot.slane %v2190_v52, 5 }
  0xdf   : > { %v2240_v33 = vrot.slane %v2238_v18, 5 }
  0xe0   : > { %5891 = vmatmul.mubr.msk.bf16.gmra.mrb[12].mxu0 %vm405_vm3, %v8049_v11  ;;  %v2193_v47 = vor.u32 %v2192_v56, %v2189_v0  ;;  %v7137_v56 = vld [vmem:[%s9823_s1 + $0x180] ss:$12 sps:$4 sm:$0xff]  }
  0xe1   : > { %2040 = vmatprep.mubr.bf16.mxu0 %v7521_v2  ;;  %6376 = vmatpush3.bf16.msra.mxu1 %v7150_v40  ;;  %v2257_v40 = vshrl.u32 %v5940_v15, 16 }
  0xe2   : > { %6385 = vmatprep.subr.bf16.mxu1 %v7151_v32  ;;  %v2194_v58 = vrot.slane %v2193_v47, 4 }
  0xe3   : > { %v2259_v41 = vrot.slane %v2257_v40, 4 }
  0xe4   : > { %6370 = vmatmul.mubr.msk.bf16.gmra.mrb[8].mxu1 %vm405_vm3, %v7819_v12  ;;  %v2218_v12 = vshll.u32 %v5934_v36, 16  ;;  %v2199_v62 = vsel %vm7640_vm2, %v2194_v58, %v2198_v60  ;;  %v5942_v36 = vld [vmem:[%s7603_s10 + $0x40] sm:$0xf]  ;;  %v2285_v58 = vshrl.u32 %v5944_v45, 16  ;;  %v2288_v60 = vshll.u32 %v5944_v45, 16 }
  0xe5   : > { %6377 = vmatprep.mubr.msk.bf16.mxu1 %vm405_vm3, %v7825_v14  ;;  %v7152_v14 = vld [vmem:[%s9823_s1 + $0xe0] ss:$12 sps:$4 sm:$0xff]   ;;  %v2271_v51 = vshrl.u32 %v5942_v36, 16 }
  0xe6   : > { %v2220_v13 = vrot.slane %v2218_v12, 5  ;;  %v7154_v12 = vld [vmem:[%s9823_s1 + $0x110] ss:$12 sps:$4 sm:$0xff]  }
  0xe8   : > { %5922 = vmatmul.mubr.msk.bf16.vlgmr.msra.gmra.mrb[0].mxu0 %vm405_vm3, %v8062_v7  ;;  %v2221_v26 = vor.u32 %v2220_v13, %v2217_v1  ;;  %v2254_v1 = vrot.slane %v2252_v55, 5  ;;  %v7158_v55 = vld [vmem:[%s9823_s1 + $0x170] ss:$12 sps:$4 sm:$0xff]  }
  0xe9   : > { %2364 = vmatpush1.bf16.msra.mxu0 %v7127_v29  ;;  %2050 = vmatprep.mubr.bf16.mxu0 %v7521_v2 }
  0xea   : > { %2365 = vmatprep.subr.bf16.mxu0 %v7134_v19  ;;  %v2222_v28 = vrot.slane %v2221_v26, 4  ;;  %v8195_v26 = vld [vmem:[%s7603_s10 + $0x4c] sm:$0x1] }
  0xec   : > { %6378 = vmatmul.mubr.msk.bf16.vlgmr.msra.gmra.mrb[4].mxu1 %vm405_vm3, %v7843_v20  ;;  %v5938_v20 = vld [vmem:[%s7603_s10 + $0x30] sm:$0xf] }
  0xed   : > { %2366 = vmatpush1.bf16.msra.mxu0 %v7132_v46  ;;  %6381 = vmatprep.mubr.msk.bf16.mxu1 %vm405_vm3, %v7851_v16  ;;  %v2224_v16 = vshll.u32 %v8128_v37, 16  ;;  %v2243_v29 = vshrl.u32 %v5938_v20, 16  ;;  %v2246_v19 = vshll.u32 %v5938_v20, 16  ;;  %v2260_v46 = vshll.u32 %v5940_v15, 16 }
  0xee   : > { %2646 = vmatprep.subr.bf16.mxu0 %v7139_v27  ;;  %6386 = vmatpush3.bf16.msra.mxu1 %v7151_v32  ;;  %v8147_v27 = vcombine.low %v2199_v62, %v2213_v53  ;;  %v2236_v32 = vrot.slane %v2235_v17, 4  ;;  %v2273_v20 = vrot.slane %v2271_v51, 4  ;;  %v2290_v62 = vrot.slane %v2288_v60, 5  ;;  %v8192_v53 = vld [vmem:[%s7603_s10 + $0x44] sm:$0x1] }
  0xef   : > { %6387 = vmatprep.subr.bf16.mxu1 %v7152_v14  ;;  %v2226_v6 = vrot.slane %v2224_v16, 5  ;;  %v2245_v52 = vrot.slane %v2243_v29, 4  ;;  %v2248_v9 = vrot.slane %v2246_v19, 5  ;;  %v2262_v0 = vrot.slane %v2260_v46, 5  ;;  %v5979_v60 = vld [vmem:[%s7603_s10 + $0x48] sm:$0xe] }
  0xf0   : > { %5923 = vmatmul.mubr.msk.bf16.gmra.mrb[4].mxu0 %vm405_vm3, %v8089_v31  ;;  %v2241_v47 = vsel %vm7640_vm2, %v2236_v32, %v2240_v33  ;;  %v2280_v17 = vshll.u32 %v8192_v53, 16  ;;  %v2294_v29 = vshll.u32 %v8195_v26, 16  ;;  %v7156_v32 = vld [vmem:[%s9823_s1 + $0x140] ss:$12 sps:$4 sm:$0xff]   ;;  %v5972_v33 = vld [vmem:[%s7603_s10 + $0x10] sm:$0xe] }
  0xf1   : > { %2060 = vmatprep.mubr.bf16.mxu0 %v7521_v2  ;;  %v2249_v25 = vor.u32 %v2248_v9, %v2245_v52  ;;  %v2263_v57 = vor.u32 %v2262_v0, %v2259_v41  ;;  %v5973_v52 = vld [vmem:[%s7603_s10 + $0x18] sm:$0xe]  ;;  %v5980_v30 = vrot.slane %v5972_v33, 9  ;;  %v2551_v0 = vrot.slane %v8100_v42, 5  ;;  %v5975_v42 = vld [vmem:[%s7603_s10 + $0x28] sm:$0xe] }
  0xf2   : > { %6388 = vmatpush3.bf16.msra.mxu1 %v7152_v14  ;;  %v2274_v14 = vshll.u32 %v5942_v36, 16  ;;  %v2282_v46 = vrot.slane %v2280_v17, 5  ;;  %v7157_v41 = vld [vmem:[%s9823_s1 + $0x158] ss:$12 sps:$4 sm:$0xff]   ;;  %v5974_v36 = vld [vmem:[%s7603_s10 + $0x20] sm:$0xe] }
  0xf3   : > { %6397 = vmatprep.subr.bf16.mxu1 %v7153_v10  ;;  %v2250_v63 = vrot.slane %v2249_v25, 4  ;;  %v2264_v13 = vrot.slane %v2263_v57, 4  ;;  %v5982_v45 = vrot.slane %v5974_v36, 9  ;;  %v2563_v25 = vrot.slane %v8131_v5, 5  ;;  %v5976_v57 = vld [vmem:[%s7603_s10 + $0x30] sm:$0xe] }
  0xf4   : > { %6382 = vmatmul.mubr.msk.bf16.gmra.mrb[8].mxu1 %vm405_vm3, %v7867_v49  ;;  %v7142_v49 = vld [vmem:[%s9823_s1 + $0x19c] ss:$12 sps:$4 sm:$0xff]   ;;  %v2276_v15 = vrot.slane %v2274_v14, 5  ;;  %v5985_v51 = vrot.slane %v5977_v48, 9  ;;  %v2571_v14 = vrot.slane %v8160_v34, 5 }
  0xf5   : > { %6389 = vmatprep.mubr.msk.bf16.mxu1 %vm405_vm3, %v7889_v21  ;;  %v2227_v21 = vsel %vm7640_vm2, %v2222_v28, %v2226_v6  ;;  %v2296_v6 = vrot.slane %v2294_v29, 5  ;;  %v7159_v5 = vld [vmem:[%s9823_s1 + $0x188] ss:$12 sps:$4 sm:$0xff]  }
  0xf6   : > { %v8184_v61 = vcombine.low %v2227_v21, %v2241_v47  ;;  %v2277_v16 = vor.u32 %v2276_v15, %v2273_v20  ;;  %v2559_v21 = vrot.slane %v8128_v37, 5  ;;  %v5983_v47 = vrot.slane %v5975_v42, 9 }
  0xf8   : > { %5924 = vmatmul.mubr.msk.bf16.gmra.mrb[8].mxu0 %vm405_vm3, %v8108_v44  ;;  %v2278_v40 = vrot.slane %v2277_v16, 4 }
  0xf9   : > { %2070 = vmatprep.mubr.bf16.mxu0 %v7521_v2 }
  0xfc   : > { %6390 = vmatmul.mubr.msk.bf16.vlgmr.msra.gmra.mrb[4].mxu1 %vm405_vm3, %v7917_v4  ;;  %v2287_v4 = vrot.slane %v2285_v58, 4  ;;  %v5978_v58 = vld [vmem:[%s7603_s10 + $0x40] sm:$0xe]  ;;  %s7522_s10 = smov 96  }
  0xfd   : > { %6393 = vmatprep.mubr.msk.bf16.mxu1 %vm405_vm3, %v7938_v24  ;;  %6398 = vmatpush3.bf16.msra.mxu1 %v7153_v10  ;;  %v2255_v24 = vsel %vm7640_vm2, %v2250_v63, %v2254_v1  ;;  %v2269_v10 = vsel %vm7640_vm2, %v2264_v13, %v2268_v22  ;;  %v5986_v34 = vrot.slane %v5978_v58, 9  ;;  %v2575_v63 = vrot.slane %v8192_v53, 5  ;;  %v7160_v22 = vld [vmem:[%s9823_s1 + $0x1a0] ss:$12 sps:$4 sm:$0xff]  }
  0xfe   : > { %6399 = vmatprep.subr.bf16.mxu1 %v7154_v12  ;;  %v2291_v18 = vor.u32 %v2290_v62, %v2287_v4  ;;  %v8210_v19 = vcombine.low %v2255_v24, %v2269_v10  ;;  %v5987_v1 = vrot.slane %v5979_v60, 9  ;;  %v2579_v13 = vrot.slane %v8195_v26, 5 }
 0x100   : > { %5925 = vmatmul.mubr.msk.bf16.gmra.mrb[12].mxu0 %vm405_vm3, %v8123_v54  ;;  %v2292_v28 = vrot.slane %v2291_v18, 4 }
 0x101   : > { %2395 = vmatprep.mubr.bf16.mxu0 %v7521_v2  ;;  %6400 = vmatpush3.bf16.msra.mxu1 %v7154_v12  ;;  %v5984_v12 = vrot.slane %v5976_v57, 9 }
 0x102   : > { %6409 = vmatprep.subr.bf16.mxu1 %v7155_v3 }
 0x104   : > { %6394 = vmatmul.mubr.msk.bf16.gmra.mrb[8].mxu1 %vm405_vm3, %v7955_v23  ;;  %v2283_v23 = vsel %vm7640_vm2, %v2278_v40, %v2282_v46 }
 0x105   : > { %6401 = vmatprep.mubr.msk.bf16.mxu1 %vm405_vm3, %v7977_v39  ;;  %v2297_v39 = vsel %vm7640_vm2, %v2292_v28, %v2296_v6 }
 0x106   : > { %v8228_v9 = vcombine.low %v2283_v23, %v2297_v39 }
 0x108   : > { %5964 = vmatmul.mubr.msk.bf16.vlgmr.msra.gmra.mrb[0].mxu0 %vm405_vm3, %v8147_v27 }
 0x109   : > { %2647 = vmatpush1.bf16.msra.mxu0 %v7137_v56  ;;  %2405 = vmatprep.mubr.bf16.mxu0 %v7521_v2  ;;  %v5981_v56 = vrot.slane %v5973_v52, 9 }
 0x10a   : > { %2648 = vmatprep.subr.bf16.mxu0 %v7142_v49  ;;  %v2555_v49 = vrot.slane %v8103_v43, 5 }
 0x10c   : > { %6402 = vmatmul.mubr.msk.bf16.vlgmr.msra.gmra.mrb[4].mxu1 %vm405_vm3, %v8012_v59  ;;  %v2552_v59 = vsel %vm7748_vm6, %v5980_v30, %v2551_v0 }
 0x10d   : > { %2649 = vmatpush1.bf16.msra.mxu0 %v7140_v50  ;;  %6405 = vmatprep.mubr.msk.bf16.mxu1 %vm405_vm3, %v8031_v8  ;;  %v2556_v8 = vsel %vm7748_vm6, %v5981_v56, %v2555_v49  ;;  %v2567_v50 = vrot.slane %v8157_v38, 5 }
 0x10e   : > { %6410 = vmatpush3.bf16.msra.mxu1 %v7155_v3  ;;  %v5996_v43 = vcombine.low %v2552_v59, %v2556_v8 }
 0x10f   : > { %6411 = vmatprep.subr.bf16.mxu1 %v7156_v32 }
 0x110   : > { %5965 = vmatmul.mubr.msk.bf16.gmra.mrb[4].mxu0 %vm405_vm3, %v8184_v61 }
 0x111   : > { %2415 = vmatprep.mubr.bf16.mxu0 %v7521_v2 }
 0x112   : > { %6412 = vmatpush3.bf16.msra.mxu1 %v7156_v32 }
 0x113   : > { %6421 = vmatprep.subr.bf16.mxu1 %v7157_v41 }
 0x114   : > { %6406 = vmatmul.mubr.msk.bf16.gmra.mrb[8].mxu1 %vm405_vm3, %v8049_v11  ;;  %v2560_v11 = vsel %vm7748_vm6, %v5982_v45, %v2559_v21 }
 0x115   : > { %6413 = vmatprep.mubr.msk.bf16.mxu1 %vm405_vm3, %v8062_v7  ;;  %v2564_v7 = vsel %vm7748_vm6, %v5983_v47, %v2563_v25 }
 0x116   : > { %v5997_v37 = vcombine.low %v2560_v11, %v2564_v7 }
 0x118   : > { %5966 = vmatmul.mubr.msk.bf16.gmra.mrb[8].mxu0 %vm405_vm3, %v8210_v19 }
 0x119   : > { %2425 = vmatprep.mubr.bf16.mxu0 %v7521_v2 }
 0x11c   : > { %6414 = vmatmul.mubr.msk.bf16.vlgmr.msra.gmra.mrb[4].mxu1 %vm405_vm3, %v8089_v31  ;;  %v2568_v31 = vsel %vm7748_vm6, %v5984_v12, %v2567_v50 }
 0x11d   : > { %6417 = vmatprep.mubr.msk.bf16.mxu1 %vm405_vm3, %v8108_v44  ;;  %6422 = vmatpush3.bf16.msra.mxu1 %v7157_v41  ;;  %v2572_v44 = vsel %vm7748_vm6, %v5985_v51, %v2571_v14 }
 0x11e   : > { %6423 = vmatprep.subr.bf16.mxu1 %v7158_v55  ;;  %v5998_v38 = vcombine.low %v2568_v31, %v2572_v44 }
 0x120   : > { %5967 = vmatmul.mubr.msk.bf16.gmra.mrb[12].mxu0 %vm405_vm3, %v8228_v9 }
 0x121   : > { %2678 = vmatprep.mubr.bf16.mxu0 %v7521_v2  ;;  %6424 = vmatpush3.bf16.msra.mxu1 %v7158_v55 }
 0x122   : > { %6433 = vmatprep.subr.bf16.mxu1 %v7159_v5 }
 0x124   : > { %6418 = vmatmul.mubr.msk.bf16.gmra.mrb[8].mxu1 %vm405_vm3, %v8123_v54  ;;  %v2576_v54 = vsel %vm7748_vm6, %v5986_v34, %v2575_v63 }
 0x125   : > { %6425 = vmatprep.mubr.msk.bf16.mxu1 %vm405_vm3, %v8147_v27  ;;  %v2580_v27 = vsel %vm7748_vm6, %v5987_v1, %v2579_v13 }
 0x126   : > { %v5999_v3 = vcombine.low %v2576_v54, %v2580_v27 }
 0x128   : > { %6006 = vmatmul.mubr.msk.bf16.vlgmr.msra.gmra.mrb[0].mxu0 %vm405_vm3, %v5996_v43 }
 0x129   : > { %2688 = vmatprep.mubr.bf16.mxu0 %v7521_v2 }
 0x12c   : > { %6426 = vmatmul.mubr.msk.bf16.vlgmr.msra.gmra.mrb[4].mxu1 %vm405_vm3, %v8184_v61 }
 0x12d   : > { %6429 = vmatprep.mubr.msk.bf16.mxu1 %vm405_vm3, %v8210_v19  ;;  %6434 = vmatpush3.bf16.msra.mxu1 %v7159_v5 }
 0x12e   : > { %6435 = vmatprep.subr.bf16.mxu1 %v7160_v22 }
 0x130   : > { %6007 = vmatmul.mubr.msk.bf16.gmra.mrb[4].mxu0 %vm405_vm3, %v5997_v37 }
 0x131   : > { %2698 = vmatprep.mubr.bf16.mxu0 %v7521_v2  ;;  %6436 = vmatpush3.bf16.msra.mxu1 %v7160_v22 }
 0x134   : > { %6430 = vmatmul.mubr.msk.bf16.gmra.mrb[8].mxu1 %vm405_vm3, %v8228_v9 }
 0x135   : > { %6437 = vmatprep.mubr.msk.bf16.mxu1 %vm405_vm3, %v5996_v43 }
 0x138   : > { %6008 = vmatmul.mubr.msk.bf16.gmra.mrb[8].mxu0 %vm405_vm3, %v5998_v38 }
 0x139   : > { %2708 = vmatprep.mubr.bf16.mxu0 %v7521_v2 }
 0x13c   : > { %6438 = vmatmul.mubr.msk.bf16.vlgmr.msra.gmra.mrb[4].mxu1 %vm405_vm3, %v5997_v37 }
 0x13d   : > { %6441 = vmatprep.mubr.msk.bf16.mxu1 %vm405_vm3, %v5998_v38 }
 0x140   : > { %6009 = vmatmul.mubr.msk.bf16.gmra.mrb[12].mxu0 %vm405_vm3, %v5999_v3 }
 0x144   : > { %6442 = vmatmul.mubr.msk.bf16.gmra.mrb[8].mxu1 %vm405_vm3, %v5999_v3 }
 0x187   : > { %v482_v2 = vpop.f32.mrb[0].mxu1 }
 0x188   : > { %v484_v35 = vpop.f32.mrb[1].mxu1 }
 0x189   : > { %v486_v61 = vpop.f32.mrb[2].mxu1 }
 0x18a   : > { %v488_v20 = vpop.f32.mrb[3].mxu1 }
 0x1fb   : > { %v2680_v15 = vpop.f32.mrb[0].mxu0 }
 0x1fc   : > { %v2682_v4 = vpop.f32.mrb[1].mxu0  ;;  %v8358_v12 = vmul.f32 %v2680_v15, %v2680_v15 }
 0x1fd   : > { %v8304_v62 = vmul.f32 %v2682_v4, %v2682_v4  ;;  %v2684_v53 = vpop.f32.mrb[2].mxu0 }
 0x1fe   : > { %v8306_v26 = vpack.c.bf16 %v2684_v53, %v2680_v15  ;;  %v2686_v24 = vpop.f32.mrb[3].mxu0  ;;  %9873 = vst [vmem:[#allocation17_spill] sm:$0xff] %v8358_v12  ;;  %v8366_v31 = vmul.f32 %v2684_v53, %v2684_v53  ;;  %v2925_v38 = vsel %vm405_vm3, %v8358_v12, 0.0  ;;  %v8425_v15 = vld [vmem:[%s9824_s2] sm:$0xff] }
 0x1ff   : > { %9861 = vst [vmem:[#allocation5_spill] sm:$0xff] %v8304_v62  ;;  %v8308_v10 = vpack.c.bf16 %v2686_v24, %v2682_v4  ;;  %v8310_v16 = vmul.f32 %v2686_v24, %v2686_v24  ;;  %v3021_v17 = vsel %vm405_vm3, %v8304_v62, 0.0  ;;  %v8427_v4 = vstv %s3280_s20  ;;  %v8436_v24 = vld [vmem:[%s9824_s2 + $0x10] sm:$0xff] }
 0x200   : > { %9862 = vst [vmem:[#allocation6_spill] sm:$0xff] %v8306_v26  ;;  %3022 = vadd.xlane.f32.xlu0 %v3021_v17  ;;  %6453 = vmatprep.mubr.msk.bf16.mxu1 %vm405_vm3, %v8306_v26  ;;  %9875 = vst [vmem:[#allocation19_spill] sm:$0xff] %v8366_v31  ;;  %v2928_v63 = vsel %vm405_vm3, %v8366_v31, 0.0  ;;  %v3282_v53 = vmul.f32 %v8427_v4, %v8425_v15 }
 0x201   : > { %9863 = vst [vmem:[#allocation7_spill] sm:$0xff] %v8310_v16  ;;  %6977 = vmatprep.subr.msk.bf16.mxu1 %vm405_vm3, %v8308_v10  ;;  %v2841_v18 = vsel %vm405_vm3, %v8308_v10, 0  ;;  %v3024_v19 = vsel %vm405_vm3, %v8310_v16, 0.0 }
 0x202   : > { %6446 = vmatpush3.bf16.xpose.msra.mxu1 %v2841_v18  ;;  %v3290_v17 = vmul.f32 1.442695, %v3282_v53  ;;  %v3284_v18 = vmul.f32 %v8427_v4, %v8436_v24  ;;  %v2827_v53 = vld [vmem:[%s9824_s2 + $0x38] sm:$0xff] }
 0x203   : > { %v2690_v29 = vpop.f32.mrb[4].mxu0 }
 0x204   : > { %3025 = vadd.xlane.f32.xlu0 %v3024_v19  ;;  %v2692_v40 = vpop.f32.mrb[5].mxu0  ;;  %v8374_v60 = vmul.f32 %v2690_v29, %v2690_v29  ;;  %v8448_v19 = vld [vmem:[%s9824_s2 + $0x8] sm:$0xff]  ;;  %7161 = vpow2.f32 %v3290_v17 }
 0x205   : > { %v8322_v46 = vmul.f32 %v2692_v40, %v2692_v40  ;;  %v2694_v28 = vpop.f32.mrb[6].mxu0 }
 0x206   : > { %v8324_v6 = vpack.c.bf16 %v2694_v28, %v2690_v29  ;;  %v2696_v32 = vpop.f32.mrb[7].mxu0  ;;  %9876 = vst [vmem:[#allocation20_spill] sm:$0xff] %v8374_v60  ;;  %v8378_v34 = vmul.f32 %v2694_v28, %v2694_v28  ;;  %v2931_v13 = vsel %vm405_vm3, %v8374_v60, 0.0  ;;  %v8443_v29 = vld [vmem:[%s9824_s2 + $0x18] sm:$0xff] }
 0x207   : > { %9864 = vst [vmem:[#allocation8_spill] sm:$0xff] %v8322_v46  ;;  %v8326_v23 = vpack.c.bf16 %v2696_v32, %v2692_v40  ;;  %v8328_v39 = vmul.f32 %v2696_v32, %v2696_v32  ;;  %v3027_v33 = vsel %vm405_vm3, %v8322_v46, 0.0  ;;  %v3294_v40 = vmul.f32 1.442695, %v3284_v18 }
 0x208   : > { %9865 = vst [vmem:[#allocation9_spill] sm:$0xff] %v8324_v6  ;;  %3028 = vadd.xlane.f32.xlu1 %v3027_v33  ;;  %9877 = vst [vmem:[#allocation21_spill] sm:$0xff] %v8378_v34  ;;  %v2934_v54 = vsel %vm405_vm3, %v8378_v34, 0.0  ;;  %v3285_v28 = vmul.f32 %v8427_v4, %v8443_v29  ;;  %v3283_v32 = vmul.f32 %v8427_v4, %v8448_v19 }
 0x209   : > { %9866 = vst [vmem:[#allocation10_spill] sm:$0xff] %v8328_v39  ;;  %6978 = vmatprep.subr.msk.bf16.mxu1 %vm405_vm3, %v8326_v23  ;;  %v2844_v52 = vsel %vm405_vm3, %v8326_v23, 0  ;;  %v3030_v41 = vsel %vm405_vm3, %v8328_v39, 0.0  ;;  %7163 = vpow2.f32 %v3294_v40 }
 0x20a   : > { %6448 = vmatpush3.bf16.xpose.msra.mxu1 %v2844_v52  ;;  %v3296_v33 = vmul.f32 1.442695, %v3285_v28  ;;  %v3292_v52 = vmul.f32 1.442695, %v3283_v32  ;;  %v3289_v28 = vmul.f32 %v8427_v4, %v2827_v53  ;;  %v2825_v32 = vld [vmem:[%s9824_s2 + $0x28] sm:$0xff] }
 0x20b   : > { %v2700_v9 = vpop.f32.mrb[8].mxu0 }
 0x20c   : > { %3031 = vadd.xlane.f32.xlu1 %v3030_v41  ;;  %v2702_v30 = vpop.f32.mrb[9].mxu0  ;;  %v8382_v1 = vmul.f32 %v2700_v9, %v2700_v9  ;;  %7165 = vpow2.f32 %v3296_v33 }
 0x20d   : > { %v8338_v0 = vmul.f32 %v2702_v30, %v2702_v30  ;;  %v2704_v56 = vpop.f32.mrb[10].mxu0  ;;  %7167 = vpow2.f32 %v3292_v52 }
 0x20e   : > { %v8340_v49 = vpack.c.bf16 %v2704_v56, %v2700_v9  ;;  %v2706_v59 = vpop.f32.mrb[11].mxu0  ;;  %9878 = vst [vmem:[#allocation22_spill] sm:$0xff] %v8382_v1  ;;  %v8386_v22 = vmul.f32 %v2704_v56, %v2704_v56  ;;  %v2937_v3 = vsel %vm405_vm3, %v8382_v1, 0.0  ;;  %v8454_v9 = vpop.eup %7161 }
 0x20f   : > { %9867 = vst [vmem:[#allocation11_spill] sm:$0xff] %v8338_v0  ;;  %v8342_v8 = vpack.c.bf16 %v2706_v59, %v2702_v30  ;;  %v8344_v36 = vmul.f32 %v2706_v59, %v2706_v59  ;;  %v3033_v42 = vsel %vm405_vm3, %v8338_v0, 0.0  ;;  %v3307_v41 = vsel %vm3306_vm7, %v8454_v9, 0.0 }
 0x210   : > { %9868 = vst [vmem:[#allocation12_spill] sm:$0xff] %v8340_v49  ;;  %3034 = vadd.xlane.f32.xlu0 %v3033_v42  ;;  %9879 = vst [vmem:[#allocation23_spill] sm:$0xff] %v8386_v22 }
 0x211   : > { %9869 = vst [vmem:[#allocation13_spill] sm:$0xff] %v8342_v8  ;;  %9870 = vst [vmem:[#allocation14_spill] sm:$0xff] %v8344_v36  ;;  %6979 = vmatprep.subr.msk.bf16.mxu1 %vm405_vm3, %v8342_v8  ;;  %v3036_v43 = vsel %vm405_vm3, %v8344_v36, 0.0  ;;  %v2847_v45 = vsel %vm405_vm3, %v8342_v8, 0 }
 0x212   : > { %3037 = vadd.xlane.f32.xlu1 %v3036_v43  ;;  %6450 = vmatpush3.bf16.xpose.msra.mxu1 %v2847_v45  ;;  %v6439_v43 = vpop.f32.mrb[4].mxu1 }
 0x213   : > { %v2710_v21 = vpop.f32.mrb[12].mxu0  ;;  %v8458_v30 = vpop.eup %7163 }
 0x214   : > { %v6785_v47 = vadd.f32 %v2710_v21, %v482_v2  ;;  %v2712_v25 = vpop.f32.mrb[13].mxu0  ;;  %v3313_v56 = vsel %vm3306_vm7, %v8458_v30, 0.0  ;;  %v2753_v21 = vpop.f32.mrb[5].mxu1 }
 0x215   : > { %v6786_v55 = vadd.f32 %v2712_v25, %v484_v35  ;;  %v2714_v11 = vpop.f32.mrb[14].mxu0  ;;  %v2940_v35 = vsel %vm405_vm3, %v8386_v22, 0.0  ;;  %v6440_v25 = vpop.f32.mrb[6].mxu1 }
 0x216   : > { %v6787_v7 = vadd.f32 %v2714_v11, %v486_v61  ;;  %v2716_v57 = vpop.f32.mrb[15].mxu0  ;;  %v8394_v27 = vmul.f32 %v6785_v47, %v6785_v47  ;;  %v8462_v59 = vpop.eup %7165 }
 0x217   : > { %v8354_v48 = vmul.f32 %v6786_v55, %v6786_v55  ;;  %v6788_v37 = vadd.f32 %v2716_v57, %v488_v20  ;;  %v8464_v42 = vpop.eup %7167  ;;  %v3316_v45 = vsel %vm3306_vm7, %v8462_v59, 0.0  ;;  %v2756_v11 = vpop.f32.mrb[7].mxu1 }
 0x218   : > { %v8356_v5 = vpack.c.bf16 %v6787_v7, %v6785_v47  ;;  %9880 = vst [vmem:[#allocation24_spill] sm:$0xff] %v8394_v27  ;;  %v8398_v2 = vmul.f32 %v6787_v7, %v6787_v7  ;;  %v2943_v61 = vsel %vm405_vm3, %v8394_v27, 0.0  ;;  %v3310_v47 = vsel %vm3306_vm7, %v8464_v42, 0.0  ;;  %v6443_v57 = vpop.f32.mrb[8].mxu1 }
 0x219   : > { %9871 = vst [vmem:[#allocation15_spill] sm:$0xff] %v8354_v48  ;;  %v8360_v50 = vpack.c.bf16 %v6788_v37, %v6786_v55  ;;  %v8362_v51 = vmul.f32 %v6788_v37, %v6788_v37  ;;  %v3039_v14 = vsel %vm405_vm3, %v8354_v48, 0.0  ;;  %v8470_v55 = vpack.c.bf16 %v6440_v25, %v6439_v43  ;;  %v2769_v37 = vpop.f32.mrb[9].mxu1 }
 0x21a   : > { %9872 = vst [vmem:[#allocation16_spill] sm:$0xff] %v8356_v5  ;;  %3040 = vadd.xlane.f32.xlu0 %v3039_v14  ;;  %9881 = vst [vmem:[#allocation25_spill] sm:$0xff] %v8398_v2  ;;  %v2946_v20 = vsel %vm405_vm3, %v8398_v2, 0.0  ;;  %v8472_v7 = vpack.c.bf16 %v2756_v11, %v2753_v21  ;;  %v6444_v14 = vpop.f32.mrb[10].mxu1 }
 0x21b   : > { %9874 = vst [vmem:[#allocation18_spill] sm:$0xff] %v8362_v51  ;;  %6980 = vmatprep.subr.msk.bf16.mxu1 %vm405_vm3, %v8360_v50  ;;  %v3042_v44 = vsel %vm405_vm3, %v8362_v51, 0.0  ;;  %v2850_v58 = vsel %vm405_vm3, %v8360_v50, 0 }
 0x21c   : > { %3043 = vadd.xlane.f32.xlu1 %v3042_v44  ;;  %6452 = vmatpush3.bf16.xpose.msra.mxu1 %v2850_v58  ;;  %v8474_v44 = vpack.c.bf16 %v6444_v14, %v6443_v57  ;;  %v2772_v58 = vpop.f32.mrb[11].mxu1 }
 0x21e   : > { %2926 = vadd.xlane.f32.xlu0 %v2925_v38  ;;  %v8476_v38 = vpack.c.bf16 %v2772_v58, %v2769_v37 }
 0x220   : > { %2929 = vadd.xlane.f32.xlu1 %v2928_v63  ;;  %v2824_v63 = vld [vmem:[%s9824_s2 + $0x20] sm:$0xff] }
 0x222   : > { %2932 = vadd.xlane.f32.xlu0 %v2931_v13  ;;  %v3286_v13 = vmul.f32 %v8427_v4, %v2824_v63 }
 0x223   : > { %6454 = vmatmul.mubr.msk.bf16.vlgmr.msra.gmra.mrb[12].mxu1 %vm405_vm3, %v8324_v6 }
 0x224   : > { %2935 = vadd.xlane.f32.xlu1 %v2934_v54  ;;  %6457 = vmatprep.mubr.msk.bf16.mxu1 %vm405_vm3, %v8340_v49  ;;  %v2826_v54 = vld [vmem:[%s9824_s2 + $0x30] sm:$0xff] }
 0x226   : > { %2938 = vadd.xlane.f32.xlu0 %v2937_v3 }
 0x228   : > { %2941 = vadd.xlane.f32.xlu1 %v2940_v35 }
 0x22a   : > { %2944 = vadd.xlane.f32.xlu0 %v2943_v61  ;;  %v3298_v61 = vmul.f32 1.442695, %v3286_v13 }
 0x22b   : > { %6458 = vmatmul.mubr.msk.bf16.gmra.mrb[16].mxu1 %vm405_vm3, %v8356_v5 }
 0x22c   : > { %2947 = vadd.xlane.f32.xlu1 %v2946_v20  ;;  %v3288_v20 = vmul.f32 %v8427_v4, %v2826_v54 }
 0x22e   : > { %v3302_v40 = vmul.f32 1.442695, %v3288_v20 }
 0x23d   : > { %3679 = vrot.lane.b32.xlu1 %v8310_v16, %s7522_s10 }
 0x240   : > { %3677 = vrot.lane.b32.xlu0 %v8304_v62, %s7522_s10 }
 0x241   : > { %3681 = vrot.lane.b32.xlu1 %v8322_v46, %s7522_s10 }
 0x244   : > { %3685 = vrot.lane.b32.xlu0 %v8338_v0, %s7522_s10 }
 0x245   : > { %3683 = vrot.lane.b32.xlu1 %v8328_v39, %s7522_s10 }
 0x248   : > { %3689 = vrot.lane.b32.xlu0 %v8354_v48, %s7522_s10 }
 0x249   : > { %3687 = vrot.lane.b32.xlu1 %v8344_v36, %s7522_s10 }
 0x24d   : > { %3691 = vrot.lane.b32.xlu1 %v8362_v51, %s7522_s10 }
 0x267   : > { %3308 = vadd.xlane.f32.xlu0 %v3307_v41  ;;  %v3287_v41 = vmul.f32 %v8427_v4, %v2825_v32 }
 0x26b   : > { %3314 = vadd.xlane.f32.xlu0 %v3313_v56  ;;  %v3304_v56 = vmul.f32 1.442695, %v3289_v28 }
 0x26f   : > { %3317 = vadd.xlane.f32.xlu0 %v3316_v45 }
 0x271   : > { %3311 = vadd.xlane.f32.xlu1 %v3310_v47  ;;  %v3300_v47 = vmul.f32 1.442695, %v3287_v41 }
 0x282   : > { %3559 = vrot.lane.b32.xlu1 %v8366_v31, %s7522_s10 }
 0x285   : > { %3557 = vrot.lane.b32.xlu0 %v8358_v12, %s7522_s10 }
 0x286   : > { %3561 = vrot.lane.b32.xlu1 %v8374_v60, %s7522_s10 }
 0x28a   : > { %3563 = vrot.lane.b32.xlu1 %v8378_v34, %s7522_s10 }
 0x28d   : > { %v3023_v3 = vpop.xlane.xlu0 %3022 }
 0x28e   : > { %v3045_v35 = vadd.f32 0.0001, %v3023_v3 }
 0x290   : > { %7169 = vrsqrt.f32 %v3045_v35  ;;  %vm3055_vm8 = vcmp.eq.f32.partialorder %v3045_v35, inf  ;;  %v3058_v63 = vand.u32 2147483648, %v3045_v35  ;;  %vm3057_vm11 = vcmp.eq.f32.partialorder %v3045_v35, 0.0 }
 0x291   : > { %v3026_v17 = vpop.xlane.xlu0 %3025  ;;  %7171 = vpow2.f32 %v3298_v61 }
 0x292   : > { %v3046_v18 = vadd.f32 0.0001, %v3026_v17 }
 0x294   : > { %7173 = vrsqrt.f32 %v3046_v18  ;;  %vm3062_vm10 = vcmp.eq.f32.partialorder %v3046_v18, inf  ;;  %v3065_v3 = vand.u32 2147483648, %v3046_v18  ;;  %vm3064_vm12 = vcmp.eq.f32.partialorder %v3046_v18, 0.0 }
 0x295   : > { %v3029_v33 = vpop.xlane.xlu1 %3028  ;;  %7175 = vpow2.f32 %v3302_v40 }
 0x296   : > { %v8501_v52 = vadd.f32 0.0001, %v3029_v33 }
 0x298   : > { %7177 = vrsqrt.f32 %v8501_v52  ;;  %vm3069_vm14 = vcmp.eq.f32.partialorder %v8501_v52, inf  ;;  %vm3071_vm0 = vcmp.eq.f32.partialorder %v8501_v52, 0.0 }
 0x299   : > { %v3032_v43 = vpop.xlane.xlu1 %3031  ;;  %7179 = vpow2.f32 %v3304_v56 }
 0x29a   : > { %v7170_v45 = vpop.eup %7169  ;;  %v3048_v21 = vadd.f32 0.0001, %v3032_v43 }
 0x29b   : > { %v3054_v25 = vmul.f32 %v7170_v45, %v3045_v35  ;;  %v8505_v11 = vpop.eup %7171 }
 0x29c   : > { %7181 = vrsqrt.f32 %v3048_v21  ;;  %v3319_v20 = vsel %vm3306_vm7, %v8505_v11, 0.0  ;;  %vm3076_vm15 = vcmp.eq.f32.partialorder %v3048_v21, inf  ;;  %vm3078_vm1 = vcmp.eq.f32.partialorder %v3048_v21, 0.0 }
 0x29d   : > { %v3035_v57 = vpop.xlane.xlu0 %3034  ;;  %7183 = vpow2.f32 %v3300_v47  ;;  %v3056_v58 = vsel %vm3055_vm8, %v3045_v35, %v3054_v25 }
 0x29e   : > { %v7174_v37 = vpop.eup %7173  ;;  %v8507_v14 = vadd.f32 0.0001, %v3035_v57  ;;  %v3059_v40 = vsel %vm3057_vm11, %v3058_v63, %v3056_v58 }
 0x29f   : > { %v3038_v4 = vpop.xlane.xlu1 %3037  ;;  %v3061_v13 = vmul.f32 %v7174_v37, %v3046_v18  ;;  %v8512_v61 = vpop.eup %7175  ;;  %v3072_v37 = vand.u32 2147483648, %v8501_v52 }
 0x2a0   : > { %7185 = vrsqrt.f32 %v8507_v14  ;;  %v8510_v54 = vadd.f32 0.0001, %v3038_v4  ;;  %9882 = vst [vmem:[#allocation26_spill] sm:$0xff] %v8512_v61  ;;  %v3325_v35 = vsel %vm3306_vm7, %v8512_v61, 0.0  ;;  %v3079_v4 = vand.u32 2147483648, %v3048_v21 }
 0x2a1   : > { %v3063_v53 = vsel %vm3062_vm10, %v3046_v18, %v3061_v13  ;;  %vm3083_vm2 = vcmp.eq.f32.partialorder %v8507_v14, inf  ;;  %vm3085_vm5 = vcmp.eq.f32.partialorder %v8507_v14, 0.0 }
 0x2a2   : > { %v7178_v17 = vpop.eup %7177  ;;  %7187 = vrsqrt.f32 %v8510_v54  ;;  %v3066_v28 = vsel %vm3064_vm12, %v3065_v3, %v3063_v53  ;;  %vm3090_vm4 = vcmp.eq.f32.partialorder %v8510_v54, inf  ;;  %vm3092_vm6 = vcmp.eq.f32.partialorder %v8510_v54, 0.0 }
 0x2a3   : > { %v6685_v33 = vpack.c.bf16 %v3066_v28, %v3059_v40  ;;  %v3068_v41 = vmul.f32 %v7178_v17, %v8501_v52  ;;  %v8524_v56 = vpop.eup %7179 }
 0x2a4   : > { %3320 = vadd.xlane.f32.xlu0 %v3319_v20  ;;  %v3328_v63 = vsel %vm3306_vm7, %v8524_v56, 0.0 }
 0x2a5   : > { %6687 = vmatprep.subr.msk.bf16.mxu1 %vm8519_vm13, %v6685_v33  ;;  %v3070_v45 = vsel %vm3069_vm14, %v8501_v52, %v3068_v41 }
 0x2a6   : > { %v7182_v18 = vpop.eup %7181  ;;  %6690 = vmatpush3.bf16.xpose.msk.msra.mxu1 %vm8519_vm13, %v6685_v33  ;;  %v3073_v53 = vsel %vm3071_vm0, %v3072_v37, %v3070_v45  ;;  %v3093_v37 = vand.u32 2147483648, %v8510_v54 }
 0x2a7   : > { %v3041_v43 = vpop.xlane.xlu0 %3040  ;;  %v3075_v47 = vmul.f32 %v7182_v18, %v3048_v21  ;;  %v8534_v25 = vpop.eup %7183 }
 0x2a8   : > { %v8536_v57 = vadd.f32 0.0001, %v3041_v43  ;;  %3326 = vadd.xlane.f32.xlu0 %v3325_v35  ;;  %v3322_v33 = vsel %vm3306_vm7, %v8534_v25, 0.0  ;;  %v3086_v43 = vand.u32 2147483648, %v8507_v14 }
 0x2a9   : > { %v3044_v58 = vpop.xlane.xlu1 %3043  ;;  %v3077_v13 = vsel %vm3076_vm15, %v3048_v21, %v3075_v47 }
 0x2aa   : > { %v7186_v3 = vpop.eup %7185  ;;  %7189 = vrsqrt.f32 %v8536_v57  ;;  %v8543_v20 = vadd.f32 0.0001, %v3044_v58  ;;  %v3080_v17 = vsel %vm3078_vm1, %v3079_v4, %v3077_v13  ;;  %vm3097_vm8 = vcmp.eq.f32.partialorder %v8536_v57, inf }
 0x2ab   : > { %v2927_v40 = vpop.xlane.xlu0 %2926  ;;  %v6691_v28 = vpack.c.bf16 %v3080_v17, %v3073_v53  ;;  %v3082_v41 = vmul.f32 %v7186_v3, %v8507_v14  ;;  %vm3099_vm10 = vcmp.eq.f32.partialorder %v8536_v57, 0.0 }
 0x2ac   : > { %v7188_v35 = vpop.eup %7187  ;;  %7191 = vrsqrt.f32 %v8543_v20  ;;  %v8549_v52 = vadd.f32 0.0001, %v2927_v40  ;;  %3329 = vadd.xlane.f32.xlu0 %v3328_v63  ;;  %vm3104_vm11 = vcmp.eq.f32.partialorder %v8543_v20, inf  ;;  %vm3106_vm12 = vcmp.eq.f32.partialorder %v8543_v20, 0.0 }
 0x2ad   : > { %v2930_v21 = vpop.xlane.xlu1 %2929  ;;  %6693 = vmatprep.subr.msk.bf16.mxu1 %vm8519_vm13, %v6691_v28  ;;  %v3084_v18 = vsel %vm3083_vm2, %v8507_v14, %v3082_v41  ;;  %v3089_v45 = vmul.f32 %v7188_v35, %v8510_v54 }
 0x2ae   : > { %7193 = vrsqrt.f32 %v8549_v52  ;;  %v8558_v47 = vadd.f32 0.0001, %v2930_v21  ;;  %3323 = vadd.xlane.f32.xlu1 %v3322_v33  ;;  %6696 = vmatpush3.bf16.xpose.msk.msra.mxu1 %vm8519_vm13, %v6691_v28  ;;  %v3087_v13 = vsel %vm3085_vm5, %v3086_v43, %v3084_v18  ;;  %vm2959_vm14 = vcmp.eq.f32.partialorder %v8549_v52, inf }
 0x2af   : > { %v2933_v4 = vpop.xlane.xlu0 %2932  ;;  %v3091_v58 = vsel %vm3090_vm4, %v8510_v54, %v3089_v45  ;;  %v3100_v45 = vand.u32 2147483648, %v8536_v57  ;;  %vm2961_vm15 = vcmp.eq.f32.partialorder %v8549_v52, 0.0 }
 0x2b0   : > { %7195 = vrsqrt.f32 %v8558_v47  ;;  %v8568_v63 = vadd.f32 0.0001, %v2933_v4  ;;  %v3094_v3 = vsel %vm3092_vm6, %v3093_v37, %v3091_v58  ;;  %vm2966_vm0 = vcmp.eq.f32.partialorder %v8558_v47, inf }
 0x2b1   : > { %v2936_v53 = vpop.xlane.xlu1 %2935  ;;  %v6697_v17 = vpack.c.bf16 %v3094_v3, %v3087_v13  ;;  %v3107_v13 = vand.u32 2147483648, %v8543_v20  ;;  %vm2968_vm2 = vcmp.eq.f32.partialorder %v8558_v47, 0.0 }
 0x2b2   : > { %7197 = vrsqrt.f32 %v8568_v63  ;;  %v8571_v40 = vadd.f32 0.0001, %v2936_v53  ;;  %vm2973_vm1 = vcmp.eq.f32.partialorder %v8568_v63, inf  ;;  %vm2975_vm4 = vcmp.eq.f32.partialorder %v8568_v63, 0.0 }
 0x2b3   : > { %v2939_v28 = vpop.xlane.xlu0 %2938  ;;  %6699 = vmatprep.subr.msk.bf16.mxu1 %vm8519_vm13, %v6697_v17 }
 0x2b4   : > { %v7190_v14 = vpop.eup %7189  ;;  %7199 = vrsqrt.f32 %v8571_v40  ;;  %v8576_v54 = vadd.f32 0.0001, %v2939_v28  ;;  %v2962_v28 = vand.u32 2147483648, %v8549_v52  ;;  %vm2980_vm5 = vcmp.eq.f32.partialorder %v8571_v40, inf }
 0x2b5   : > { %v2942_v33 = vpop.xlane.xlu1 %2941  ;;  %v3096_v41 = vmul.f32 %v7190_v14, %v8536_v57 }
 0x2b6   : > { %v7192_v35 = vpop.eup %7191  ;;  %7201 = vrsqrt.f32 %v8576_v54  ;;  %v8580_v21 = vadd.f32 0.0001, %v2942_v33  ;;  %6702 = vmatpush3.bf16.xpose.msk.msra.mxu1 %vm8519_vm13, %v6697_v17  ;;  %vm2987_vm6 = vcmp.eq.f32.partialorder %v8576_v54, inf }
 0x2b7   : > { %v2945_v18 = vpop.xlane.xlu0 %2944  ;;  %v3098_v43 = vsel %vm3097_vm8, %v8536_v57, %v3096_v41  ;;  %v3103_v37 = vmul.f32 %v7192_v35, %v8543_v20  ;;  %vm2982_vm8 = vcmp.eq.f32.partialorder %v8571_v40, 0.0 }
 0x2b8   : > { %v7194_v4 = vpop.eup %7193  ;;  %7203 = vrsqrt.f32 %v8580_v21  ;;  %v8591_v58 = vadd.f32 0.0001, %v2945_v18  ;;  %v3101_v41 = vsel %vm3099_vm10, %v3100_v45, %v3098_v43  ;;  %vm2989_vm10 = vcmp.eq.f32.partialorder %v8576_v54, 0.0 }
 0x2b9   : > { %v2948_v3 = vpop.xlane.xlu1 %2947  ;;  %v3105_v53 = vsel %vm3104_vm11, %v8543_v20, %v3103_v37  ;;  %v2958_v17 = vmul.f32 %v7194_v4, %v8549_v52  ;;  %vm2994_vm11 = vcmp.eq.f32.partialorder %v8580_v21, inf }
 0x2ba   : > { %v7196_v14 = vpop.eup %7195  ;;  %7205 = vrsqrt.f32 %v8591_v58  ;;  %v8600_v33 = vadd.f32 0.0001, %v2948_v3  ;;  %v3108_v35 = vsel %vm3106_vm12, %v3107_v13, %v3105_v53  ;;  %v2969_v13 = vand.u32 2147483648, %v8558_v47 }
 0x2bb   : > { %v6703_v18 = vpack.c.bf16 %v3108_v35, %v3101_v41  ;;  %v2960_v61 = vsel %vm2959_vm14, %v8549_v52, %v2958_v17  ;;  %v2965_v4 = vmul.f32 %v7196_v14, %v8558_v47  ;;  %vm3001_vm12 = vcmp.eq.f32.partialorder %v8591_v58, inf }
 0x2bc   : > { %v7198_v20 = vpop.eup %7197  ;;  %7207 = vrsqrt.f32 %v8600_v33  ;;  %v2963_v37 = vsel %vm2961_vm15, %v2962_v28, %v2960_v61  ;;  %v2976_v28 = vand.u32 2147483648, %v8568_v63  ;;  %vm2996_vm14 = vcmp.eq.f32.partialorder %v8580_v21, 0.0 }
 0x2bd   : > { %6705 = vmatprep.subr.msk.bf16.mxu1 %vm8519_vm13, %v6703_v18  ;;  %6477 = vmatprep.mubr.msk.f32.mxu1 %vm3109_vm9, %v2963_v37  ;;  %v2972_v57 = vmul.f32 %v7198_v20, %v8568_v63  ;;  %v2967_v61 = vsel %vm2966_vm0, %v8558_v47, %v2965_v4  ;;  %v2983_v47 = vand.u32 2147483648, %v8571_v40  ;;  %vm3003_vm15 = vcmp.eq.f32.partialorder %v8591_v58, 0.0 }
 0x2be   : > { %v7200_v3 = vpop.eup %7199  ;;  %6708 = vmatpush3.bf16.xpose.msk.msra.mxu1 %vm8519_vm13, %v6703_v18  ;;  %v2970_v41 = vsel %vm2968_vm2, %v2969_v13, %v2967_v61  ;;  %vm3008_vm0 = vcmp.eq.f32.partialorder %v8600_v33, inf }
 0x2bf   : > { %3567 = vrot.lane.b32.xlu1 %v8386_v22, %s7522_s10  ;;  %6489 = vmatprep.subr.bf16.mxu1 %v8472_v7  ;;  %v2979_v43 = vmul.f32 %v7200_v3, %v8571_v40  ;;  %v2974_v53 = vsel %vm2973_vm1, %v8568_v63, %v2972_v57  ;;  %v2990_v3 = vand.u32 2147483648, %v8576_v54  ;;  %vm3010_vm1 = vcmp.eq.f32.partialorder %v8600_v33, 0.0 }
 0x2c0   : > { %v7202_v52 = vpop.eup %7201  ;;  %v2977_v35 = vsel %vm2975_vm4, %v2976_v28, %v2974_v53  ;;  %v3678_v28 = vpop.permute.xlu0 %3677 }
 0x2c1   : > { %v2986_v17 = vmul.f32 %v7202_v52, %v8576_v54  ;;  %v2981_v18 = vsel %vm2980_vm5, %v8571_v40, %v2979_v43 }
 0x2c2   : > { %v7204_v45 = vpop.eup %7203  ;;  %3565 = vrot.lane.b32.xlu0 %v8382_v1, %s7522_s10  ;;  %v2984_v57 = vsel %vm2982_vm8, %v2983_v47, %v2981_v18 }
 0x2c3   : > { %3569 = vrot.lane.b32.xlu1 %v8394_v27, %s7522_s10  ;;  %v2993_v20 = vmul.f32 %v7204_v45, %v8580_v21  ;;  %v2988_v63 = vsel %vm2987_vm6, %v8576_v54, %v2986_v17  ;;  %v2997_v54 = vand.u32 2147483648, %v8580_v21  ;;  %v3004_v45 = vand.u32 2147483648, %v8591_v58 }
 0x2c4   : > { %v7206_v14 = vpop.eup %7205  ;;  %v2991_v52 = vsel %vm2989_vm10, %v2990_v3, %v2988_v63 }
 0x2c5   : > { %6478 = vmatmul.mubr.msk.f32.vlgmr.msra.gmra.mrb[20].mxu1 %vm3109_vm9, %v2970_v41  ;;  %v3000_v4 = vmul.f32 %v7206_v14, %v8591_v58  ;;  %v2995_v61 = vsel %vm2994_vm11, %v8580_v21, %v2993_v20  ;;  %v3011_v21 = vand.u32 2147483648, %v8600_v33  ;;  %v3686_v41 = vpop.permute.xlu0 %3685 }
 0x2c6   : > { %v7208_v37 = vpop.eup %7207  ;;  %3452 = vrot.lane.b32.xlu0 %v8308_v10, %s7522_s10  ;;  %6480 = vmatprep.mubr.msk.f32.mxu1 %vm3109_vm9, %v2977_v35  ;;  %v2998_v13 = vsel %vm2996_vm14, %v2997_v54, %v2995_v61 }
 0x2c7   : > { %3571 = vrot.lane.b32.xlu1 %v8398_v2, %s7522_s10  ;;  %6490 = vmatpush3.bf16.msra.mxu1 %v8472_v7  ;;  %v3007_v40 = vmul.f32 %v7208_v37, %v8600_v33  ;;  %v3002_v43 = vsel %vm3001_vm12, %v8591_v58, %v3000_v4 }
 0x2c8   : > { %6491 = vmatprep.subr.bf16.mxu1 %v8470_v55  ;;  %v3005_v53 = vsel %vm3003_vm15, %v3004_v45, %v3002_v43 }
 0x2c9   : > { %6481 = vmatmul.mubr.msk.f32.gmra.mrb[22].mxu1 %vm3109_vm9, %v2984_v57  ;;  %v3009_v17 = vsel %vm3008_vm0, %v8600_v33, %v3007_v40  ;;  %v3680_v33 = vpop.permute.xlu1 %3679  ;;  %v3690_v18 = vpop.permute.xlu0 %3689 }
 0x2ca   : > { %3454 = vrot.lane.b32.xlu0 %v8326_v23, %s7522_s10  ;;  %6483 = vmatprep.mubr.msk.f32.mxu1 %vm3109_vm9, %v2991_v52  ;;  %v3012_v58 = vsel %vm3010_vm1, %v3011_v21, %v3009_v17 }
 0x2cb   : > { %3456 = vrot.lane.b32.xlu1 %v8342_v8, %s7522_s10  ;;  %6492 = vmatpush3.bf16.msra.mxu1 %v8470_v55 }
 0x2cc   : > { %6493 = vmatprep.subr.bf16.mxu1 %v8476_v38 }
 0x2cd   : > { %6484 = vmatmul.mubr.msk.f32.gmra.mrb[24].mxu1 %vm3109_vm9, %v2998_v13  ;;  %v3682_v14 = vpop.permute.xlu1 %3681 }
 0x2ce   : > { %3458 = vrot.lane.b32.xlu0 %v8360_v50, %s7522_s10  ;;  %6486 = vmatprep.mubr.msk.f32.mxu1 %vm3109_vm9, %v3005_v53 }
 0x2cf   : > { %3440 = vrot.lane.b32.xlu1 %v8306_v26, %s7522_s10  ;;  %6494 = vmatpush3.bf16.msra.mxu1 %v8476_v38 }
 0x2d0   : > { %6495 = vmatprep.subr.bf16.mxu1 %v8474_v44 }
 0x2d1   : > { %6487 = vmatmul.mubr.msk.f32.gmra.mrb[26].mxu1 %vm3109_vm9, %v3012_v58  ;;  %v3684_v35 = vpop.permute.xlu1 %3683 }
 0x2d2   : > { %3444 = vrot.lane.b32.xlu0 %v8340_v49, %s7522_s10 }
 0x2d3   : > { %3442 = vrot.lane.b32.xlu1 %v8324_v6, %s7522_s10  ;;  %6496 = vmatpush3.bf16.msra.mxu1 %v8474_v44 }
 0x2d5   : > { %v3688_v37 = vpop.permute.xlu1 %3687 }
 0x2d6   : > { %4347 = vrot.lane.b32.xlu0 %v8304_v62, %s7523_s12 }
 0x2d7   : > { %3446 = vrot.lane.b32.xlu1 %v8356_v5, %s7522_s10 }
 0x2d9   : > { %v3692_v52 = vpop.permute.xlu1 %3691 }
 0x2da   : > { %4351 = vrot.lane.b32.xlu0 %v8322_v46, %s7523_s12 }
 0x2db   : > { %4349 = vrot.lane.b32.xlu1 %v8310_v16, %s7523_s12 }
 0x2de   : > { %4355 = vrot.lane.b32.xlu0 %v8338_v0, %s7523_s12 }
 0x2df   : > { %4353 = vrot.lane.b32.xlu1 %v8328_v39, %s7523_s12 }
 0x2e2   : > { %4359 = vrot.lane.b32.xlu0 %v8354_v48, %s7523_s12 }
 0x2e3   : > { %4357 = vrot.lane.b32.xlu1 %v8344_v36, %s7523_s12 }
 0x2e6   : > { %4235 = vrot.lane.b32.xlu0 %v8358_v12, %s7523_s12  ;;  %v3701_v12 = vsel %vm405_vm3, %v3678_v28, 0.0 }
 0x2e7   : > { %4361 = vrot.lane.b32.xlu1 %v8362_v51, %s7523_s12 }
 0x2ea   : > { %4239 = vrot.lane.b32.xlu0 %v8374_v60, %s7523_s12 }
 0x2eb   : > { %4237 = vrot.lane.b32.xlu1 %v8366_v31, %s7523_s12 }
 0x2ef   : > { %4241 = vrot.lane.b32.xlu1 %v8378_v34, %s7523_s12  ;;  %v3704_v34 = vsel %vm405_vm3, %v3680_v33, 0.0 }
 0x2f4   : > { %v8710_v20 = vpop.xlane.xlu0 %3308 }
 0x2f6   : > { %v8712_v47 = vpop.f32.mrb[12].mxu1 }
 0x2f7   : > { %v8714_v63 = vpop.f32.mrb[13].mxu1 }
 0x2f8   : > { %v8716_v4 = vpop.xlane.xlu0 %3314  ;;  %v8718_v3 = vpop.f32.mrb[14].mxu1 }
 0x2f9   : > { %v8720_v57 = vpop.f32.mrb[15].mxu1 }
 0x2fc   : > { %v8722_v61 = vpop.xlane.xlu0 %3317 }
 0x2fe   : > { %v8724_v40 = vpop.f32.mrb[16].mxu1  ;;  %v8726_v54 = vpop.xlane.xlu1 %3311 }
 0x2ff   : > { %v8728_v43 = vpop.f32.mrb[17].mxu1 }
 0x300   : > { %v8730_v45 = vpop.f32.mrb[18].mxu1  ;;  %v3558_v53 = vpop.permute.xlu0 %3557 }
 0x301   : > { %v8732_v13 = vpop.f32.mrb[19].mxu1  ;;  %v3581_v21 = vsel %vm405_vm3, %v3558_v53, 0.0  ;;  %v3710_v53 = vsel %vm405_vm3, %v3684_v35, 0.0 }
 0x302   : > { %v3560_v17 = vpop.permute.xlu1 %3559 }
 0x303   : > { %v3584_v48 = vsel %vm405_vm3, %v3560_v17, 0.0  ;;  %v3719_v17 = vsel %vm405_vm3, %v3690_v18, 0.0 }
 0x306   : > { %v3562_v58 = vpop.permute.xlu1 %3561 }
 0x307   : > { %v3587_v60 = vsel %vm405_vm3, %v3562_v58, 0.0  ;;  %v3716_v58 = vsel %vm405_vm3, %v3688_v37, 0.0  ;;  %v8769_v37 = vstv %s3959_s14 }
 0x309   : > { %3582 = vadd.xlane.f32.xlu0 %v3581_v21  ;;  %v3707_v21 = vsel %vm405_vm3, %v3682_v14, 0.0  ;;  %v3713_v14 = vsel %vm405_vm3, %v3686_v41, 0.0 }
 0x30a   : > { %v3564_v31 = vpop.permute.xlu1 %3563 }
 0x30b   : > { %v3590_v51 = vsel %vm405_vm3, %v3564_v31, 0.0 }
 0x30d   : > { %3705 = vadd.xlane.f32.xlu0 %v3704_v34 }
 0x311   : > { %3588 = vadd.xlane.f32.xlu0 %v3587_v60 }
 0x313   : > { %3702 = vadd.xlane.f32.xlu1 %v3701_v12 }
 0x315   : > { %3591 = vadd.xlane.f32.xlu0 %v3590_v51 }
 0x317   : > { %3585 = vadd.xlane.f32.xlu1 %v3584_v48 }
 0x319   : > { %3711 = vadd.xlane.f32.xlu0 %v3710_v53 }
 0x31b   : > { %3708 = vadd.xlane.f32.xlu1 %v3707_v21 }
 0x331   : > { %v8742_v34 = vpop.xlane.xlu0 %3320 }
 0x335   : > { %v8744_v33 = vpop.xlane.xlu0 %3326 }
 0x339   : > { %v8746_v60 = vpop.xlane.xlu0 %3329 }
 0x33b   : > { %v8748_v28 = vpop.xlane.xlu1 %3323 }
 0x33d   : > { %v3566_v12 = vpop.permute.xlu0 %3565 }
 0x33e   : > { %v3593_v51 = vsel %vm405_vm3, %v3566_v12, 0.0  ;;  %v3722_v12 = vsel %vm405_vm3, %v3692_v52, 0.0  ;;  %v3961_v52 = vmul.f32 %v8769_v37, %v8425_v15 }
 0x33f   : > { %3594 = vadd.xlane.f32.xlu1 %v3593_v51  ;;  %v3568_v31 = vpop.permute.xlu1 %3567 }
 0x340   : > { %v3596_v48 = vsel %vm405_vm3, %v3568_v31, 0.0 }
 0x341   : > { %v8752_v35 = vpop.permute.xlu0 %3452  ;;  %3597 = vadd.xlane.f32.xlu0 %v3596_v48 }
 0x342   : > { %6981 = vmatprep.subr.msk.bf16.mxu1 %vm405_vm3, %v8752_v35 }
 0x343   : > { %3714 = vadd.xlane.f32.xlu1 %v3713_v14  ;;  %v3570_v53 = vpop.permute.xlu1 %3569 }
 0x344   : > { %v3599_v21 = vsel %vm405_vm3, %v3570_v53, 0.0  ;;  %v3962_v53 = vmul.f32 %v8769_v37, %v8448_v19 }
 0x345   : > { %3720 = vadd.xlane.f32.xlu0 %v3719_v17  ;;  %v8765_v18 = vpop.permute.xlu0 %3454 }
 0x347   : > { %3717 = vadd.xlane.f32.xlu1 %v3716_v58  ;;  %v3572_v41 = vpop.permute.xlu1 %3571  ;;  %v3969_v58 = vmul.f32 1.442695, %v3961_v52 }
 0x349   : > { %v8771_v31 = vpop.permute.xlu0 %3458  ;;  %7209 = vpow2.f32 %v3969_v58 }
 0x34b   : > { %3600 = vadd.xlane.f32.xlu1 %v3599_v21  ;;  %v8767_v51 = vpop.permute.xlu1 %3456  ;;  %v3971_v21 = vmul.f32 1.442695, %v3962_v53 }
 0x34d   : > { %v8777_v14 = vpop.permute.xlu0 %3444  ;;  %7211 = vpow2.f32 %v3971_v21 }
 0x34e   : > { %7213 = vrcp.f32 %v8726_v54 }
 0x34f   : > { %3723 = vadd.xlane.f32.xlu1 %v3722_v12  ;;  %v8773_v48 = vpop.permute.xlu1 %3440  ;;  %v3602_v12 = vsel %vm405_vm3, %v3572_v41, 0.0  ;;  %7215 = vrcp.f32 %v8710_v20 }
 0x353   : > { %v8779_v17 = vpop.permute.xlu1 %3442  ;;  %v8787_v0 = vpop.eup %7209 }
 0x354   : > { %9885 = vst [vmem:[#allocation27_spill] sm:$0xff] %v8787_v0  ;;  %v3985_v19 = vsel %vm3306_vm7, %v8787_v0, 0.0 }
 0x357   : > { %v8794_v41 = vpop.eup %7211 }
 0x358   : > { %9886 = vst [vmem:[#allocation28_spill] sm:$0xff] %v8794_v41 }
 0x35b   : > { %4243 = vrot.lane.b32.xlu0 %v8382_v1, %s7523_s12  ;;  %v8784_v1 = vpop.permute.xlu1 %3446 }
 0x35f   : > { %v4350_v15 = vpop.permute.xlu1 %4349 }
 0x360   : > { %4245 = vrot.lane.b32.xlu1 %v8386_v22, %s7523_s12  ;;  %v4348_v22 = vpop.permute.xlu0 %4347  ;;  %v4374_v52 = vsel %vm405_vm3, %v4350_v15, 0.0 }
 0x361   : > { %v4371_v36 = vsel %vm405_vm3, %v4348_v22, 0.0  ;;  %v3988_v22 = vsel %vm3306_vm7, %v8794_v41, 0.0  ;;  %v3963_v41 = vmul.f32 %v8769_v37, %v8436_v24 }
 0x364   : > { %v8789_v39 = vpop.permute.xlu0 %4351 }
 0x368   : > { %v8796_v58 = vpop.permute.xlu0 %4355 }
 0x36c   : > { %v8802_v53 = vpop.permute.xlu0 %4359 }
 0x37a   : > { %3603 = vadd.xlane.f32.xlu0 %v3602_v12  ;;  %v8806_v12 = vpop.permute.xlu0 %4235 }
 0x37e   : > { %4372 = vadd.xlane.f32.xlu0 %v4371_v36  ;;  %v8800_v36 = vpop.permute.xlu1 %4353 }
 0x382   : > { %v8804_v21 = vpop.permute.xlu1 %4357 }
 0x384   : > { %4375 = vadd.xlane.f32.xlu1 %v4374_v52 }
 0x386   : > { %v8810_v15 = vpop.permute.xlu1 %4361 }
 0x388   : > { %3986 = vadd.xlane.f32.xlu1 %v3985_v19 }
 0x38c   : > { %3989 = vadd.xlane.f32.xlu1 %v3988_v22  ;;  %v8816_v22 = vpop.permute.xlu0 %4239 }
 0x394   : > { %4247 = vrot.lane.b32.xlu0 %v8394_v27, %s7523_s12  ;;  %v8819_v27 = vpop.permute.xlu1 %4237 }
 0x396   : > { %v8824_v24 = vpop.xlane.xlu0 %3582 }
 0x398   : > { %v6479_v52 = vpop.f32.mrb[20].mxu1 }
 0x399   : > { %v3230_v19 = vadd.f32 0.0001, %v6479_v52  ;;  %v3224_v0 = vpop.f32.mrb[21].mxu1  ;;  %v3973_v52 = vmul.f32 1.442695, %v3963_v41 }
 0x39a   : > { %v3225_v46 = vadd.f32 0.0001, %v3224_v0  ;;  %v3706_v5 = vpop.xlane.xlu0 %3705 }
 0x39b   : > { %7217 = vrcp.f32 %v3230_v19 }
 0x39c   : > { %7219 = vrcp.f32 %v3225_v46  ;;  %v6482_v16 = vpop.f32.mrb[22].mxu1 }
 0x39d   : > { %7221 = vrcp.f32 %v8722_v61  ;;  %v3240_v62 = vadd.f32 0.0001, %v6482_v16  ;;  %4249 = vrot.lane.b32.xlu1 %v8398_v2, %s7523_s12  ;;  %v3234_v54 = vpop.f32.mrb[23].mxu1  ;;  %v7214_v16 = vpop.eup %7213 }
 0x39e   : > { %7223 = vrcp.f32 %v8716_v4  ;;  %v3235_v20 = vadd.f32 0.0001, %v3234_v54  ;;  %v8828_v2 = vpop.permute.xlu1 %4241  ;;  %v7216_v41 = vpop.eup %7215 }
 0x39f   : > { %7225 = vrcp.f32 %v3240_v62 }
 0x3a0   : > { %7227 = vrcp.f32 %v3235_v20  ;;  %v6485_v0 = vpop.f32.mrb[24].mxu1 }
 0x3a1   : > { %v3250_v46 = vadd.f32 0.0001, %v6485_v0  ;;  %v3244_v19 = vpop.f32.mrb[25].mxu1  ;;  %7229 = vpow2.f32 %v3973_v52  ;;  %v3334_v0 = vmul.f32 %v7214_v16, %v8464_v42 }
 0x3a2   : > { %7231 = vrcp.f32 %v8748_v28  ;;  %v3245_v61 = vadd.f32 0.0001, %v3244_v19  ;;  %v3703_v8 = vpop.xlane.xlu1 %3702 }
 0x3a3   : > { %7233 = vrcp.f32 %v8742_v34 }
 0x3a4   : > { %7235 = vrcp.f32 %v3250_v46  ;;  %v6488_v4 = vpop.f32.mrb[26].mxu1  ;;  %v3332_v46 = vmul.f32 %v7216_v41, %v8454_v9 }
 0x3a5   : > { %v7218_v49 = vpop.eup %7217  ;;  %7237 = vrcp.f32 %v3245_v61  ;;  %v3260_v62 = vadd.f32 0.0001, %v6488_v4  ;;  %v3254_v54 = vpop.f32.mrb[27].mxu1 }
 0x3a6   : > { %v7220_v20 = vpop.eup %7219  ;;  %7239 = vrcp.f32 %v8746_v60  ;;  %v3255_v52 = vadd.f32 0.0001, %v3254_v54  ;;  %v3266_v28 = vmul.f32 %v7218_v49, %v8720_v57  ;;  %v3964_v60 = vmul.f32 %v8769_v37, %v8443_v29 }
 0x3a7   : > { %v7222_v19 = vpop.eup %7221  ;;  %7241 = vrcp.f32 %v8744_v33  ;;  %v3264_v34 = vmul.f32 %v7220_v20, %v8714_v63  ;;  %v8840_v33 = vpop.xlane.xlu0 %3588 }
 0x3a8   : > { %v7224_v6 = vpop.eup %7223  ;;  %7243 = vrcp.f32 %v3260_v62  ;;  %v3348_v61 = vmul.f32 %v3334_v0, %v3266_v28  ;;  %v3338_v42 = vmul.f32 %v7222_v19, %v8462_v59  ;;  %v3975_v29 = vmul.f32 1.442695, %v3964_v60  ;;  %v8847_v59 = vpop.xlane.xlu1 %3585 }
 0x3a9   : > { %v7226_v4 = vpop.eup %7225  ;;  %7245 = vrcp.f32 %v3255_v52  ;;  %v3347_v26 = vmul.f32 %v3332_v46, %v3264_v34  ;;  %v3336_v9 = vmul.f32 %v7224_v6, %v8458_v30  ;;  %v8849_v19 = vadd.f32 0.0001, %v3703_v8 }
 0x3aa   : > { %v7228_v49 = vpop.eup %7227  ;;  %v3270_v57 = vmul.f32 %v7226_v4, %v8718_v3  ;;  %v8859_v60 = vadd.f32 0.0001, %v3706_v5  ;;  %v3473_v8 = vsel %vm405_vm3, %v8752_v35, 0  ;;  %7247 = vpow2.f32 %v3975_v29 }
 0x3ab   : > { %v8842_v63 = vpop.eup %7229  ;;  %v3268_v16 = vmul.f32 %v7228_v49, %v8712_v47  ;;  %v3355_v41 = vpack.c.bf16 %v3348_v61, %v3347_v26  ;;  %v8853_v26 = vpop.xlane.xlu0 %3591  ;;  %7249 = vrsqrt.f32 %v8849_v19  ;;  %vm3735_vm2 = vcmp.eq.f32.partialorder %v8849_v19, inf }
 0x3ac   : > { %v7232_v62 = vpop.eup %7231  ;;  %v3350_v54 = vmul.f32 %v3338_v42, %v3270_v57  ;;  %v3991_v47 = vsel %vm3306_vm7, %v8842_v63, 0.0  ;;  %7251 = vrsqrt.f32 %v8859_v60  ;;  %vm3742_vm4 = vcmp.eq.f32.partialorder %v8859_v60, inf }
 0x3ad   : > { %v7234_v20 = vpop.eup %7233  ;;  %v3349_v52 = vmul.f32 %v3336_v9, %v3268_v16  ;;  %6497 = vmatprep.mubr.msk.bf16.mxu1 %vm3306_vm7, %v3355_v41  ;;  %v3342_v6 = vmul.f32 %v7232_v62, %v8534_v25  ;;  %v9887_v9 = vld [vmem:[#allocation26_spill] sm:$0xff]  ;;  %vm3737_vm5 = vcmp.eq.f32.partialorder %v8849_v19, 0.0  ;;  %vm3744_vm6 = vcmp.eq.f32.partialorder %v8859_v60, 0.0 }
 0x3ae   : > { %v7236_v28 = vpop.eup %7235  ;;  %v3340_v61 = vmul.f32 %v7234_v20, %v8505_v11 }
 0x3af   : > { %v7238_v3 = vpop.eup %7237  ;;  %v3356_v0 = vpack.c.bf16 %v3350_v54, %v3349_v52  ;;  %v3274_v34 = vmul.f32 %v7236_v28, %v8732_v13  ;;  %v3712_v62 = vpop.xlane.xlu0 %3711  ;;  %v4377_v54 = vsel %vm405_vm3, %v8789_v39, 0.0  ;;  %v4380_v39 = vsel %vm405_vm3, %v8800_v36, 0.0 }
 0x3b0   : > { %v7240_v30 = vpop.eup %7239  ;;  %v3272_v46 = vmul.f32 %v7238_v3, %v8728_v43  ;;  %v3709_v43 = vpop.xlane.xlu1 %3708 }
 0x3b1   : > { %v7242_v4 = vpop.eup %7241  ;;  %6498 = vmatmul.mubr.msk.bf16.vlgmr.msra.gmra.mrb[28].mxu1 %vm3306_vm7, %v3356_v0  ;;  %v3352_v13 = vmul.f32 %v3342_v6, %v3274_v34  ;;  %v3346_v11 = vmul.f32 %v7240_v30, %v8524_v56  ;;  %v3727_v52 = vadd.f32 0.0001, %v3709_v43  ;;  %v3728_v56 = vadd.f32 0.0001, %v3712_v62 }
 0x3b2   : > { %v7244_v25 = vpop.eup %7243  ;;  %6506 = vmatpush3.bf16.xpose.msra.mxu1 %v3473_v8  ;;  %v3351_v49 = vmul.f32 %v3340_v61, %v3272_v46  ;;  %v3344_v16 = vmul.f32 %v7242_v4, %v9887_v9  ;;  %v3605_v34 = vadd.f32 0.0001, %v8824_v24  ;;  %v3745_v61 = vand.u32 2147483648, %v8859_v60 }
 0x3b3   : > { %v7246_v42 = vpop.eup %7245  ;;  %6982 = vmatprep.subr.msk.bf16.mxu1 %vm405_vm3, %v8765_v18  ;;  %3992 = vadd.xlane.f32.xlu0 %v3991_v47  ;;  %v3278_v5 = vmul.f32 %v7244_v25, %v8730_v45  ;;  %7253 = vrsqrt.f32 %v3727_v52  ;;  %v3738_v47 = vand.u32 2147483648, %v8849_v19  ;;  %vm3749_vm8 = vcmp.eq.f32.partialorder %v3727_v52, inf }
 0x3b4   : > { %v3357_v57 = vpack.c.bf16 %v3352_v13, %v3351_v49  ;;  %v3276_v35 = vmul.f32 %v7246_v42, %v8724_v40  ;;  %v3476_v40 = vsel %vm405_vm3, %v8765_v18, 0  ;;  %v8878_v29 = vpop.eup %7247  ;;  %7255 = vrsqrt.f32 %v3728_v56 }
 0x3b5   : > { %v3354_v41 = vmul.f32 %v3346_v11, %v3278_v5  ;;  %v7250_v28 = vpop.eup %7249  ;;  %v3994_v3 = vsel %vm3306_vm7, %v8878_v29, 0.0  ;;  %7257 = vrsqrt.f32 %v3605_v34  ;;  %v3482_v13 = vsel %vm405_vm3, %v8771_v31, 0 }
 0x3b6   : > { %6501 = vmatprep.mubr.msk.bf16.mxu1 %vm3306_vm7, %v3357_v57  ;;  %v3353_v20 = vmul.f32 %v3344_v16, %v3276_v35  ;;  %v7252_v18 = vpop.eup %7251  ;;  %v3734_v0 = vmul.f32 %v7250_v28, %v8849_v19  ;;  %v3752_v5 = vand.u32 2147483648, %v3727_v52  ;;  %vm3756_vm10 = vcmp.eq.f32.partialorder %v3728_v56, inf }
 0x3b7   : > { %4378 = vadd.xlane.f32.xlu0 %v4377_v54  ;;  %v3741_v36 = vmul.f32 %v7252_v18, %v8859_v60  ;;  %vm3751_vm11 = vcmp.eq.f32.partialorder %v3727_v52, 0.0  ;;  %v3759_v57 = vand.u32 2147483648, %v3728_v56  ;;  %vm3758_vm12 = vcmp.eq.f32.partialorder %v3728_v56, 0.0 }
 0x3b8   : > { %v3358_v45 = vpack.c.bf16 %v3354_v41, %v3353_v20  ;;  %v3736_v6 = vsel %vm3735_vm2, %v8849_v19, %v3734_v0  ;;  %vm3615_vm14 = vcmp.eq.f32.partialorder %v3605_v34, inf  ;;  %vm3617_vm15 = vcmp.eq.f32.partialorder %v3605_v34, 0.0 }
 0x3b9   : > { %v3739_v46 = vsel %vm3737_vm5, %v3738_v47, %v3736_v6  ;;  %v8925_v18 = vadd.f32 0.0001, %v8840_v33 }
 0x3ba   : > { %6502 = vmatmul.mubr.msk.bf16.gmra.mrb[32].mxu1 %vm3306_vm7, %v3358_v45 }
 0x3bb   : > { %6508 = vmatpush3.bf16.xpose.msra.mxu1 %v3476_v40  ;;  %6513 = vmatprep.mubr.msk.bf16.mxu1 %vm405_vm3, %v8773_v48  ;;  %v3479_v48 = vsel %vm405_vm3, %v8767_v51, 0  ;;  %v3618_v40 = vand.u32 2147483648, %v3605_v34 }
 0x3bc   : > { %6983 = vmatprep.subr.msk.bf16.mxu1 %vm405_vm3, %v8767_v51  ;;  %4381 = vadd.xlane.f32.xlu0 %v4380_v39  ;;  %v3743_v51 = vsel %vm3742_vm4, %v8859_v60, %v3741_v36 }
 0x3bd   : > { %v7254_v30 = vpop.eup %7253  ;;  %v3746_v8 = vsel %vm3744_vm6, %v3745_v61, %v3743_v51 }
 0x3be   : > { %v7256_v24 = vpop.eup %7255  ;;  %v3748_v4 = vmul.f32 %v7254_v30, %v3727_v52  ;;  %v6709_v25 = vpack.c.bf16 %v3746_v8, %v3739_v46 }
 0x3bf   : > { %v3755_v49 = vmul.f32 %v7256_v24, %v3728_v56  ;;  %v7258_v35 = vpop.eup %7257 }
 0x3c0   : > { %v3750_v42 = vsel %vm3749_vm8, %v3727_v52, %v3748_v4  ;;  %v3614_v54 = vmul.f32 %v7258_v35, %v3605_v34 }
 0x3c1   : > { %3995 = vadd.xlane.f32.xlu1 %v3994_v3  ;;  %v3757_v43 = vsel %vm3756_vm10, %v3728_v56, %v3755_v49  ;;  %v3753_v60 = vsel %vm3751_vm11, %v3752_v5, %v3750_v42 }
 0x3c2   : > { %v3760_v16 = vsel %vm3758_vm12, %v3759_v57, %v3757_v43  ;;  %v3616_v45 = vsel %vm3615_vm14, %v3605_v34, %v3614_v54  ;;  %vm3629_vm12 = vcmp.eq.f32.partialorder %v8925_v18, inf }
 0x3c3   : > { %6510 = vmatpush3.bf16.xpose.msra.mxu1 %v3479_v48  ;;  %v6715_v62 = vpack.c.bf16 %v3760_v16, %v3753_v60  ;;  %v8928_v48 = vadd.f32 0.0001, %v8847_v59 }
 0x3c4   : > { %6984 = vmatprep.subr.msk.bf16.mxu1 %vm405_vm3, %v8771_v31 }
 0x3c5   : > { %vm3622_vm11 = vcmp.eq.f32.partialorder %v8928_v48, inf  ;;  %vm3624_vm14 = vcmp.eq.f32.partialorder %v8928_v48, 0.0 }
 0x3cb   : > { %6512 = vmatpush3.bf16.xpose.msra.mxu1 %v3482_v13 }
 0x3cc   : > { %6711 = vmatprep.subr.msk.bf16.mxu1 %vm8519_vm13, %v6709_v25  ;;  %v3595_v19 = vpop.xlane.xlu1 %3594 }
 0x3cd   : > { %v8935_v51 = vadd.f32 0.0001, %v3595_v19 }
 0x3ce   : > { %v3598_v11 = vpop.xlane.xlu0 %3597 }
 0x3d0   : > { %v3715_v9 = vpop.xlane.xlu1 %3714 }
 0x3d1   : > { %v3729_v31 = vadd.f32 0.0001, %v3715_v9  ;;  %v4383_v9 = vsel %vm405_vm3, %v8796_v58, 0.0 }
 0x3d2   : > { %6514 = vmatmul.mubr.msk.bf16.vlgmr.msra.gmra.mrb[36].mxu1 %vm405_vm3, %v8779_v17  ;;  %4041 = vrot.lane.b32.xlu0 %v8472_v7, %s7522_s10  ;;  %v3721_v41 = vpop.xlane.xlu0 %3720 }
 0x3d3   : > { %7259 = vrsqrt.f32 %v3729_v31  ;;  %6517 = vmatprep.mubr.msk.bf16.mxu1 %vm405_vm3, %v8777_v14  ;;  %6714 = vmatpush3.bf16.xpose.msk.msra.mxu1 %vm8519_vm13, %v6709_v25  ;;  %v3731_v20 = vadd.f32 0.0001, %v3721_v41  ;;  %v3619_v14 = vsel %vm3617_vm15, %v3618_v40, %v3616_v45  ;;  %vm3763_vm0 = vcmp.eq.f32.partialorder %v3729_v31, inf }
 0x3d4   : > { %4043 = vrot.lane.b32.xlu1 %v8470_v55, %s7522_s10  ;;  %6717 = vmatprep.subr.msk.bf16.mxu1 %vm8519_vm13, %v6715_v62  ;;  %v3718_v17 = vpop.xlane.xlu1 %3717  ;;  %v3766_v47 = vand.u32 2147483648, %v3729_v31  ;;  %vm3765_vm2 = vcmp.eq.f32.partialorder %v3729_v31, 0.0  ;;  %v3632_v40 = vand.u32 2147483648, %v8925_v18  ;;  %vm3631_vm15 = vcmp.eq.f32.partialorder %v8925_v18, 0.0 }
 0x3d5   : > { %v3730_v52 = vadd.f32 0.0001, %v3718_v17  ;;  %vm3777_vm5 = vcmp.eq.f32.partialorder %v3731_v20, inf  ;;  %v3780_v19 = vand.u32 2147483648, %v3731_v20  ;;  %vm3779_vm8 = vcmp.eq.f32.partialorder %v3731_v20, 0.0 }
 0x3d7   : > { %7261 = vrsqrt.f32 %v3730_v52  ;;  %vm3770_vm1 = vcmp.eq.f32.partialorder %v3730_v52, inf  ;;  %v3773_v33 = vand.u32 2147483648, %v3730_v52  ;;  %vm3772_vm4 = vcmp.eq.f32.partialorder %v3730_v52, 0.0 }
 0x3d8   : > { %v3601_v56 = vpop.xlane.xlu1 %3600  ;;  %7263 = vrsqrt.f32 %v3731_v20 }
 0x3d9   : > { %v8941_v8 = vadd.f32 0.0001, %v3601_v56 }
 0x3da   : > { %6518 = vmatmul.mubr.msk.bf16.gmra.mrb[40].mxu1 %vm405_vm3, %v8784_v1  ;;  %v8932_v1 = vadd.f32 0.0001, %v8853_v26  ;;  %v8938_v26 = vadd.f32 0.0001, %v3598_v11 }
 0x3db   : > { %6720 = vmatpush3.bf16.xpose.msk.msra.mxu1 %vm8519_vm13, %v6715_v62  ;;  %6537 = vmatprep.mubr.msk.f32.mxu1 %vm3109_vm9, %v3619_v14  ;;  %v4386_v14 = vsel %vm405_vm3, %v8804_v21, 0.0 }
 0x3dc   : > { %v3724_v39 = vpop.xlane.xlu1 %3723 }
 0x3dd   : > { %v7260_v28 = vpop.eup %7259  ;;  %v3732_v3 = vadd.f32 0.0001, %v3724_v39 }
 0x3de   : > { %v3762_v0 = vmul.f32 %v7260_v28, %v3729_v31 }
 0x3df   : > { %7265 = vrsqrt.f32 %v3732_v3  ;;  %vm3784_vm6 = vcmp.eq.f32.partialorder %v3732_v3, inf  ;;  %v3787_v42 = vand.u32 2147483648, %v3732_v3  ;;  %vm3786_vm10 = vcmp.eq.f32.partialorder %v3732_v3, 0.0 }
 0x3e0   : > { %7267 = vrsqrt.f32 %v8925_v18  ;;  %v3764_v36 = vsel %vm3763_vm0, %v3729_v31, %v3762_v0  ;;  %vm3636_vm0 = vcmp.eq.f32.partialorder %v8932_v1, inf }
 0x3e1   : > { %v7262_v34 = vpop.eup %7261  ;;  %7269 = vrsqrt.f32 %v8928_v48  ;;  %v3767_v24 = vsel %vm3765_vm2, %v3766_v47, %v3764_v36  ;;  %vm3638_vm2 = vcmp.eq.f32.partialorder %v8932_v1, 0.0  ;;  %v3653_v47 = vand.u32 2147483648, %v8938_v26 }
 0x3e2   : > { %v3769_v6 = vmul.f32 %v7262_v34, %v3730_v52  ;;  %v7264_v30 = vpop.eup %7263  ;;  %7271 = vrsqrt.f32 %v8932_v1  ;;  %v3646_v34 = vand.u32 2147483648, %v8935_v51 }
 0x3e3   : > { %v3776_v4 = vmul.f32 %v7264_v30, %v3731_v20  ;;  %7273 = vrsqrt.f32 %v8935_v51 }
 0x3e4   : > { %v3771_v59 = vsel %vm3770_vm1, %v3730_v52, %v3769_v6  ;;  %7275 = vrsqrt.f32 %v8938_v26  ;;  %vm3643_vm1 = vcmp.eq.f32.partialorder %v8935_v51, inf }
 0x3e5   : > { %v3774_v46 = vsel %vm3772_vm4, %v3773_v33, %v3771_v59  ;;  %v3778_v25 = vsel %vm3777_vm5, %v3731_v20, %v3776_v4  ;;  %7277 = vrsqrt.f32 %v8941_v8  ;;  %v3625_v20 = vand.u32 2147483648, %v8928_v48  ;;  %v9002_v4 = vld [vmem:[%s9824_s2 + $0x20] sm:$0xff] }
 0x3e6   : > { %v6721_v61 = vpack.c.bf16 %v3774_v46, %v3767_v24  ;;  %v3781_v60 = vsel %vm3779_vm8, %v3780_v19, %v3778_v25  ;;  %vm3645_vm4 = vcmp.eq.f32.partialorder %v8935_v51, 0.0  ;;  %vm3650_vm5 = vcmp.eq.f32.partialorder %v8938_v26, inf  ;;  %v8993_v24 = vpop.permute.xlu0 %4243  ;;  %v9009_v19 = vld [vmem:[%s9824_s2 + $0x28] sm:$0xff] }
 0x3e7   : > { %vm3652_vm8 = vcmp.eq.f32.partialorder %v8938_v26, 0.0  ;;  %v3660_v33 = vand.u32 2147483648, %v8941_v8 }
 0x3e8   : > { %6723 = vmatprep.subr.msk.bf16.mxu1 %vm8519_vm13, %v6721_v61 }
 0x3e9   : > { %v7266_v13 = vpop.eup %7265  ;;  %6726 = vmatpush3.bf16.xpose.msk.msra.mxu1 %vm8519_vm13, %v6721_v61 }
 0x3ea   : > { %v3783_v49 = vmul.f32 %v7266_v13, %v3732_v3  ;;  %v7268_v5 = vpop.eup %7267 }
 0x3eb   : > { %v7270_v43 = vpop.eup %7269  ;;  %v3628_v41 = vmul.f32 %v7268_v5, %v8925_v18 }
 0x3ec   : > { %v3785_v11 = vsel %vm3784_vm6, %v3732_v3, %v3783_v49  ;;  %v3621_v31 = vmul.f32 %v7270_v43, %v8928_v48  ;;  %v7272_v16 = vpop.eup %7271  ;;  %vm3657_vm6 = vcmp.eq.f32.partialorder %v8941_v8, inf  ;;  %v9017_v43 = vld [vmem:[%s9824_s2 + $0x38] sm:$0xff] }
 0x3ed   : > { %v3788_v57 = vsel %vm3786_vm10, %v3787_v42, %v3785_v11  ;;  %v7274_v62 = vpop.eup %7273  ;;  %v3635_v58 = vmul.f32 %v7272_v16, %v8932_v1  ;;  %v3630_v52 = vsel %vm3629_vm12, %v8925_v18, %v3628_v41  ;;  %vm3659_vm10 = vcmp.eq.f32.partialorder %v8941_v8, 0.0 }
 0x3ee   : > { %v6727_v35 = vpack.c.bf16 %v3788_v57, %v3781_v60  ;;  %v3623_v54 = vsel %vm3622_vm11, %v8928_v48, %v3621_v31  ;;  %v7276_v17 = vpop.eup %7275  ;;  %v3642_v45 = vmul.f32 %v7274_v62, %v8935_v51  ;;  %v3633_v28 = vsel %vm3631_vm15, %v3632_v40, %v3630_v52 }
 0x3ef   : > { %v7278_v56 = vpop.eup %7277  ;;  %v3626_v39 = vsel %vm3624_vm14, %v3625_v20, %v3623_v54  ;;  %v3637_v3 = vsel %vm3636_vm0, %v8932_v1, %v3635_v58  ;;  %v3649_v0 = vmul.f32 %v7276_v17, %v8938_v26  ;;  %v3639_v48 = vand.u32 2147483648, %v8932_v1 }
 0x3f0   : > { %6729 = vmatprep.subr.msk.bf16.mxu1 %vm8519_vm13, %v6727_v35  ;;  %v3644_v21 = vsel %vm3643_vm1, %v8935_v51, %v3642_v45  ;;  %v3656_v18 = vmul.f32 %v7278_v56, %v8941_v8  ;;  %v3966_v42 = vmul.f32 %v9009_v19, %v8769_v37  ;;  %v3968_v60 = vmul.f32 %v9017_v43, %v8769_v37  ;;  %v4246_v56 = vpop.permute.xlu1 %4245 }
 0x3f1   : > { %4384 = vadd.xlane.f32.xlu0 %v4383_v9  ;;  %6732 = vmatpush3.bf16.xpose.msk.msra.mxu1 %vm8519_vm13, %v6727_v35  ;;  %v3640_v36 = vsel %vm3638_vm2, %v3639_v48, %v3637_v3  ;;  %v3647_v6 = vsel %vm3645_vm4, %v3646_v34, %v3644_v21  ;;  %v3651_v30 = vsel %vm3650_vm5, %v8938_v26, %v3649_v0  ;;  %v9024_v35 = vld [vmem:[%s9824_s2 + $0x30] sm:$0xff]  ;;  %v4389_v62 = vsel %vm405_vm3, %v8802_v53, 0.0 }
 0x3f2   : > { %v3658_v1 = vsel %vm3657_vm6, %v8941_v8, %v3656_v18  ;;  %v3654_v51 = vsel %vm3652_vm8, %v3653_v47, %v3651_v30  ;;  %v3965_v26 = vmul.f32 %v9002_v4, %v8769_v37  ;;  %v3979_v57 = vmul.f32 1.442695, %v3966_v42 }
 0x3f3   : > { %v3661_v59 = vsel %vm3659_vm10, %v3660_v33, %v3658_v1  ;;  %v3967_v9 = vmul.f32 %v9024_v35, %v8769_v37  ;;  %v3983_v31 = vmul.f32 1.442695, %v3968_v60  ;;  %v4392_v52 = vsel %vm405_vm3, %v8810_v15, 0.0 }
 0x3f4   : > { %v3977_v49 = vmul.f32 1.442695, %v3965_v26  ;;  %v4262_v40 = vsel %vm405_vm3, %v8819_v27, 0.0  ;;  %v4265_v3 = vsel %vm405_vm3, %v8816_v22, 0.0  ;;  %v4274_v30 = vsel %vm405_vm3, %v4246_v56, 0.0 }
 0x3f5   : > { %v3981_v16 = vmul.f32 1.442695, %v3967_v9 }
 0x3f8   : > { %4387 = vadd.xlane.f32.xlu1 %v4386_v14  ;;  %6538 = vmatmul.mubr.msk.f32.vlgmr.msra.gmra.mrb[44].mxu1 %vm3109_vm9, %v3626_v39  ;;  %v4259_v14 = vsel %vm405_vm3, %v8806_v12, 0.0 }
 0x3f9   : > { %6540 = vmatprep.mubr.msk.f32.mxu1 %vm3109_vm9, %v3633_v28  ;;  %v4268_v28 = vsel %vm405_vm3, %v8828_v2, 0.0 }
 0x3fc   : > { %6541 = vmatmul.mubr.msk.f32.gmra.mrb[46].mxu1 %vm3109_vm9, %v3640_v36 }
 0x3fd   : > { %6543 = vmatprep.mubr.msk.f32.mxu1 %vm3109_vm9, %v3647_v6  ;;  %v4271_v6 = vsel %vm405_vm3, %v8993_v24, 0.0 }
 0x400   : > { %6544 = vmatmul.mubr.msk.f32.gmra.mrb[48].mxu1 %vm3109_vm9, %v3654_v51 }
 0x401   : > { %6546 = vmatprep.mubr.msk.f32.mxu1 %vm3109_vm9, %v3661_v59 }
 0x407   : > { %4045 = vrot.lane.b32.xlu0 %v8476_v38, %s7522_s10  ;;  %v3604_v46 = vpop.xlane.xlu0 %3603 }
 0x408   : > { %v3612_v61 = vadd.f32 0.0001, %v3604_v46 }
 0x409   : > { %4047 = vrot.lane.b32.xlu1 %v8474_v44, %s7522_s10 }
 0x40a   : > { %7279 = vrsqrt.f32 %v3612_v61  ;;  %vm3664_vm11 = vcmp.eq.f32.partialorder %v3612_v61, inf  ;;  %v3667_v25 = vand.u32 2147483648, %v3612_v61  ;;  %vm3666_vm12 = vcmp.eq.f32.partialorder %v3612_v61, 0.0 }
 0x40b   : > { %7281 = vpow2.f32 %v3977_v49  ;;  %v4373_v39 = vpop.xlane.xlu0 %4372 }
 0x40c   : > { %7283 = vpow2.f32 %v3979_v57  ;;  %v4395_v1 = vadd.f32 0.0001, %v4373_v39  ;;  %v9891_v57 = vld [vmem:[#allocation6_spill] sm:$0xff] }
 0x40d   : > { %7285 = vpow2.f32 %v3983_v31 }
 0x40e   : > { %7287 = vpow2.f32 %v3981_v16  ;;  %vm4405_vm15 = vcmp.eq.f32.partialorder %v4395_v1, inf  ;;  %v4408_v31 = vand.u32 2147483648, %v4395_v1  ;;  %vm4407_vm1 = vcmp.eq.f32.partialorder %v4395_v1, 0.0 }
 0x40f   : > { %v4248_v0 = vpop.permute.xlu0 %4247 }
 0x410   : > { %v4277_v51 = vsel %vm405_vm3, %v4248_v0, 0.0  ;;  %v9903_v0 = vld [vmem:[#allocation8_spill] sm:$0xff] }
 0x411   : > { %v4376_v15 = vpop.xlane.xlu1 %4375 }
 0x412   : > { %v4396_v47 = vadd.f32 0.0001, %v4376_v15 }
 0x414   : > { %v7280_v8 = vpop.eup %7279  ;;  %7289 = vrsqrt.f32 %v4396_v47  ;;  %vm4412_vm14 = vcmp.eq.f32.partialorder %v4396_v47, inf  ;;  %vm4414_vm0 = vcmp.eq.f32.partialorder %v4396_v47, 0.0 }
 0x415   : > { %v3663_v13 = vmul.f32 %v7280_v8, %v3612_v61  ;;  %v9028_v41 = vpop.eup %7281  ;;  %v9056_v48 = vpop.xlane.xlu1 %3986  ;;  %7291 = vrsqrt.f32 %v4395_v1 }
 0x416   : > { %v3997_v54 = vsel %vm3306_vm7, %v9028_v41, 0.0  ;;  %v9034_v58 = vpop.eup %7283  ;;  %7293 = vrcp.f32 %v9056_v48 }
 0x417   : > { %v3665_v5 = vsel %vm3664_vm11, %v3612_v61, %v3663_v13  ;;  %v9036_v17 = vpop.eup %7285  ;;  %v4000_v37 = vsel %vm3306_vm7, %v9034_v58, 0.0 }
 0x418   : > { %v3668_v11 = vsel %vm3666_vm12, %v3667_v25, %v3665_v5  ;;  %v9040_v20 = vpop.eup %7287  ;;  %v4006_v53 = vsel %vm3306_vm7, %v9036_v17, 0.0  ;;  %v4415_v5 = vand.u32 2147483648, %v4396_v47 }
 0x419   : > { %6547 = vmatmul.mubr.msk.f32.gmra.mrb[50].mxu1 %vm3109_vm9, %v3668_v11  ;;  %v4003_v45 = vsel %vm3306_vm7, %v9040_v20, 0.0  ;;  %v9060_v27 = vpop.xlane.xlu1 %3989 }
 0x41a   : > { %7295 = vrcp.f32 %v9060_v27 }
 0x41d   : > { %v4250_v34 = vpop.permute.xlu1 %4249 }
 0x41e   : > { %v4280_v33 = vsel %vm405_vm3, %v4250_v34, 0.0  ;;  %v7290_v59 = vpop.eup %7289  ;;  %v9904_v34 = vld [vmem:[#allocation10_spill] sm:$0xff] }
 0x41f   : > { %v7292_v61 = vpop.eup %7291  ;;  %v4411_v26 = vmul.f32 %v7290_v59, %v4396_v47 }
 0x420   : > { %v4404_v8 = vmul.f32 %v7292_v61, %v4395_v1  ;;  %v9912_v61 = vld [vmem:[#allocation21_spill] sm:$0xff] }
 0x421   : > { %v4413_v25 = vsel %vm4412_vm14, %v4396_v47, %v4411_v26  ;;  %v9909_v47 = vld [vmem:[#allocation17_spill] sm:$0xff] }
 0x422   : > { %v4406_v60 = vsel %vm4405_vm15, %v4395_v1, %v4404_v8  ;;  %v4416_v16 = vsel %vm4414_vm0, %v4415_v5, %v4413_v25  ;;  %v9910_v1 = vld [vmem:[#allocation19_spill] sm:$0xff]  ;;  %v9913_v8 = vld [vmem:[#allocation22_spill] sm:$0xff] }
 0x423   : > { %v9914_v25 = vld [vmem:[#allocation23_spill] sm:$0xff] }
 0x426   : > { %4390 = vadd.xlane.f32.xlu0 %v4389_v62 }
 0x42a   : > { %3998 = vadd.xlane.f32.xlu0 %v3997_v54  ;;  %v9893_v54 = vld [vmem:[#allocation13_spill] sm:$0xff] }
 0x42d   : > { %4393 = vadd.xlane.f32.xlu1 %v4392_v52 }
 0x42e   : > { %4001 = vadd.xlane.f32.xlu0 %v4000_v37  ;;  %v4409_v37 = vsel %vm4407_vm1, %v4408_v31, %v4406_v60  ;;  %v9915_v60 = vld [vmem:[#allocation24_spill] sm:$0xff] }
 0x42f   : > { %v9095_v52 = vpack.c.bf16 %v4416_v16, %v4409_v37  ;;  %v9916_v16 = vld [vmem:[#allocation25_spill] sm:$0xff] }
 0x431   : > { %4007 = vadd.xlane.f32.xlu1 %v4006_v53  ;;  %v9894_v53 = vld [vmem:[#allocation9_spill] sm:$0xff] }
 0x432   : > { %4004 = vadd.xlane.f32.xlu0 %v4003_v45  ;;  %v9895_v45 = vld [vmem:[#allocation12_spill] sm:$0xff] }
 0x435   : > { %4263 = vadd.xlane.f32.xlu1 %v4262_v40 }
 0x436   : > { %4260 = vadd.xlane.f32.xlu0 %v4259_v14  ;;  %v9898_v14 = vld [vmem:[#allocation16_spill] sm:$0xff] }
 0x439   : > { %4269 = vadd.xlane.f32.xlu1 %v4268_v28  ;;  %v9901_v28 = vld [vmem:[#allocation5_spill] sm:$0xff] }
 0x43a   : > { %4266 = vadd.xlane.f32.xlu0 %v4265_v3  ;;  %v9902_v3 = vld [vmem:[#allocation7_spill] sm:$0xff] }
 0x440   : > { %v9058_v21 = vpop.xlane.xlu0 %3992 }
 0x441   : > { %7297 = vrcp.f32 %v9058_v21 }
 0x444   : > { %v9062_v18 = vpop.xlane.xlu0 %4378 }
 0x449   : > { %v9064_v12 = vpop.xlane.xlu0 %4381 }
 0x44a   : > { %4140 = vrot.lane.b32.xlu1 %v8326_v23, %s7523_s12 }
 0x44d   : > { %v4042_v2 = vpop.permute.xlu0 %4041 }
 0x44e   : > { %6549 = vmatprep.subr.bf16.mxu0 %v4042_v2  ;;  %v9068_v36 = vpop.xlane.xlu1 %3995 }
 0x44f   : > { %6550 = vmatpush3.bf16.msra.mxu0 %v4042_v2  ;;  %v9905_v2 = vld [vmem:[#allocation11_spill] sm:$0xff] }
 0x450   : > { %4138 = vrot.lane.b32.xlu0 %v8308_v10, %s7523_s12 }
 0x452   : > { %v4044_v22 = vpop.permute.xlu1 %4043 }
 0x453   : > { %6551 = vmatprep.subr.bf16.mxu0 %v4044_v22 }
 0x454   : > { %6552 = vmatpush3.bf16.msra.mxu0 %v4044_v22  ;;  %v9906_v22 = vld [vmem:[#allocation14_spill] sm:$0xff] }
 0x46e   : > { %4272 = vadd.xlane.f32.xlu1 %v4271_v6  ;;  %v9907_v6 = vld [vmem:[#allocation15_spill] sm:$0xff] }
 0x46f   : > { %4275 = vadd.xlane.f32.xlu0 %v4274_v30  ;;  %v9908_v30 = vld [vmem:[#allocation18_spill] sm:$0xff] }
 0x472   : > { %4281 = vadd.xlane.f32.xlu1 %v4280_v33 }
 0x473   : > { %4278 = vadd.xlane.f32.xlu0 %v4277_v51  ;;  %v9911_v51 = vld [vmem:[#allocation20_spill] sm:$0xff] }
 0x47e   : > { %v9077_v46 = vpop.xlane.xlu0 %4384 }
 0x482   : > { %v4046_v24 = vpop.permute.xlu0 %4045 }
 0x483   : > { %4144 = vrot.lane.b32.xlu1 %v8360_v50, %s7523_s12  ;;  %6553 = vmatprep.subr.bf16.mxu0 %v4046_v24 }
 0x484   : > { %6554 = vmatpush3.bf16.msra.mxu0 %v4046_v24  ;;  %v9081_v13 = vpop.f32.mrb[28].mxu1 }
 0x485   : > { %9888 = vst [vmem:[#allocation26_spill] sm:$0xff] %v9081_v13  ;;  %v9083_v49 = vpop.xlane.xlu1 %4387  ;;  %v9085_v42 = vpop.f32.mrb[29].mxu1 }
 0x486   : > { %9889 = vst [vmem:[#allocation29_spill] sm:$0xff] %v9085_v42  ;;  %v9087_v11 = vpop.f32.mrb[30].mxu1  ;;  %v9194_v27 = vadd.f32 0.0001, %v9083_v49  ;;  %v9917_v42 = vld [vmem:[#allocation28_spill] sm:$0xff] }
 0x487   : > { %9890 = vst [vmem:[#allocation30_spill] sm:$0xff] %v9087_v11  ;;  %4130 = vrot.lane.b32.xlu1 %v9891_v57, %s7523_s12  ;;  %v9091_v9 = vpop.f32.mrb[31].mxu1 }
 0x488   : > { %9892 = vst [vmem:[#allocation6_spill] sm:$0xff] %v9091_v9  ;;  %vm4440_vm8 = vcmp.eq.f32.partialorder %v9194_v27, inf  ;;  %vm4442_vm11 = vcmp.eq.f32.partialorder %v9194_v27, 0.0 }
 0x489   : > { %v4048_v62 = vpop.permute.xlu1 %4047  ;;  %4142 = vrot.lane.b32.xlu0 %v9893_v54, %s7523_s12 }
 0x48a   : > { %6555 = vmatprep.subr.bf16.mxu0 %v4048_v62 }
 0x48b   : > { %4132 = vrot.lane.b32.xlu1 %v9894_v53, %s7523_s12  ;;  %6556 = vmatpush3.bf16.msra.mxu0 %v4048_v62 }
 0x48c   : > { %6735 = vmatprep.subr.msk.bf16.mxu0 %vm8519_vm13, %v9095_v52 }
 0x48d   : > { %4134 = vrot.lane.b32.xlu0 %v9895_v45, %s7523_s12  ;;  %v9104_v56 = vpop.f32.mrb[32].mxu1 }
 0x48e   : > { %9896 = vst [vmem:[#allocation13_spill] sm:$0xff] %v9104_v56  ;;  %v9106_v40 = vpop.f32.mrb[33].mxu1 }
 0x48f   : > { %9897 = vst [vmem:[#allocation31_spill] sm:$0xff] %v9106_v40  ;;  %4136 = vrot.lane.b32.xlu1 %v9898_v14, %s7523_s12  ;;  %v9110_v39 = vpop.f32.mrb[34].mxu1 }
 0x490   : > { %9899 = vst [vmem:[#allocation32_spill] sm:$0xff] %v9110_v39  ;;  %v9112_v15 = vpop.f32.mrb[35].mxu1  ;;  %v7294_v39 = vpop.eup %7293 }
 0x491   : > { %9900 = vst [vmem:[#allocation33_spill] sm:$0xff] %v9112_v15  ;;  %5013 = vrot.lane.b32.xlu0 %v9901_v28, %s7524_s25 }
 0x493   : > { %5015 = vrot.lane.b32.xlu1 %v9902_v3, %s7524_s25 }
 0x495   : > { %5017 = vrot.lane.b32.xlu0 %v9903_v0, %s7524_s25 }
 0x497   : > { %5019 = vrot.lane.b32.xlu1 %v9904_v34, %s7524_s25 }
 0x499   : > { %5021 = vrot.lane.b32.xlu0 %v9905_v2, %s7524_s25 }
 0x49b   : > { %5023 = vrot.lane.b32.xlu1 %v9906_v22, %s7524_s25 }
 0x49d   : > { %5025 = vrot.lane.b32.xlu0 %v9907_v6, %s7524_s25 }
 0x49f   : > { %5027 = vrot.lane.b32.xlu1 %v9908_v30, %s7524_s25 }
 0x4a1   : > { %4901 = vrot.lane.b32.xlu0 %v9909_v47, %s7524_s25  ;;  %v9173_v47 = vadd.f32 0.0001, %v9062_v18  ;;  %v9188_v18 = vadd.f32 0.0001, %v9077_v46 }
 0x4a3   : > { %4903 = vrot.lane.b32.xlu1 %v9910_v1, %s7524_s25  ;;  %7299 = vrsqrt.f32 %v9173_v47  ;;  %vm4419_vm4 = vcmp.eq.f32.partialorder %v9173_v47, inf  ;;  %vm4421_vm5 = vcmp.eq.f32.partialorder %v9173_v47, 0.0  ;;  %vm4433_vm10 = vcmp.eq.f32.partialorder %v9188_v18, inf }
 0x4a4   : > { %vm4435_vm12 = vcmp.eq.f32.partialorder %v9188_v18, 0.0 }
 0x4a5   : > { %v9134_v33 = vpop.f32.mrb[36].mxu1  ;;  %4905 = vrot.lane.b32.xlu0 %v9911_v51, %s7524_s25 }
 0x4a6   : > { %v9138_v59 = vpop.f32.mrb[37].mxu1 }
 0x4a7   : > { %4907 = vrot.lane.b32.xlu1 %v9912_v61, %s7524_s25  ;;  %v9142_v26 = vpop.f32.mrb[38].mxu1  ;;  %v9181_v61 = vadd.f32 0.0001, %v9064_v12 }
 0x4a8   : > { %v9144_v24 = vpop.f32.mrb[39].mxu1 }
 0x4a9   : > { %4909 = vrot.lane.b32.xlu0 %v9913_v8, %s7524_s25  ;;  %7301 = vrsqrt.f32 %v9181_v61  ;;  %vm4426_vm2 = vcmp.eq.f32.partialorder %v9181_v61, inf  ;;  %vm4428_vm6 = vcmp.eq.f32.partialorder %v9181_v61, 0.0 }
 0x4aa   : > { %7303 = vrcp.f32 %v9068_v36  ;;  %v7296_v36 = vpop.eup %7295 }
 0x4ab   : > { %4911 = vrot.lane.b32.xlu1 %v9914_v25, %s7524_s25  ;;  %v7298_v40 = vpop.eup %7297 }
 0x4ad   : > { %v9150_v5 = vpop.f32.mrb[40].mxu1  ;;  %4913 = vrot.lane.b32.xlu0 %v9915_v60, %s7524_s25 }
 0x4ae   : > { %v9154_v31 = vpop.f32.mrb[41].mxu1 }
 0x4af   : > { %4915 = vrot.lane.b32.xlu1 %v9916_v16, %s7524_s25  ;;  %v9158_v62 = vpop.f32.mrb[42].mxu1 }
 0x4b0   : > { %v9160_v37 = vpop.f32.mrb[43].mxu1 }
 0x4b3   : > { %v9162_v28 = vpop.xlane.xlu0 %4390 }
 0x4b7   : > { %v3999_v3 = vpop.xlane.xlu0 %3998 }
 0x4ba   : > { %v4394_v0 = vpop.xlane.xlu1 %4393 }
 0x4bb   : > { %v4002_v34 = vpop.xlane.xlu0 %4001 }
 0x4be   : > { %v9164_v2 = vpop.xlane.xlu1 %4007 }
 0x4bf   : > { %v9166_v22 = vpop.xlane.xlu0 %4004 }
 0x4c2   : > { %v9168_v6 = vpop.xlane.xlu1 %4263 }
 0x4c3   : > { %v9170_v30 = vpop.xlane.xlu0 %4260 }
 0x4c6   : > { %v9175_v1 = vpop.xlane.xlu1 %4269 }
 0x4c7   : > { %v9177_v51 = vpop.xlane.xlu0 %4266 }
 0x4ca   : > { %v4141_v21 = vpop.permute.xlu1 %4140 }
 0x4cb   : > { %v4139_v8 = vpop.permute.xlu0 %4138  ;;  %v6539_v25 = vpop.f32.mrb[44].mxu1 }
 0x4cc   : > { %v4159_v60 = vsel %vm405_vm3, %v4139_v8, 0  ;;  %v3909_v16 = vadd.f32 0.0001, %v6539_v25  ;;  %6985 = vmatprep.subr.msk.bf16.mxu1 %vm405_vm3, %v4139_v8  ;;  %v3903_v48 = vpop.f32.mrb[45].mxu1 }
 0x4cd   : > { %v3904_v12 = vadd.f32 0.0001, %v3903_v48  ;;  %6566 = vmatpush3.bf16.xpose.msra.mxu1 %v4159_v60  ;;  %v4162_v60 = vsel %vm405_vm3, %v4141_v21, 0 }
 0x4ce   : > { %7305 = vrcp.f32 %v3909_v16  ;;  %6986 = vmatprep.subr.msk.bf16.mxu1 %vm405_vm3, %v4141_v21 }
 0x4cf   : > { %7307 = vrcp.f32 %v3904_v12  ;;  %v6542_v46 = vpop.f32.mrb[46].mxu1  ;;  %v7300_v12 = vpop.eup %7299 }
 0x4d0   : > { %7309 = vrsqrt.f32 %v9188_v18  ;;  %v3919_v56 = vadd.f32 0.0001, %v6542_v46  ;;  %v3913_v25 = vpop.f32.mrb[47].mxu1  ;;  %v7302_v46 = vpop.eup %7301 }
 0x4d1   : > { %7311 = vrsqrt.f32 %v9194_v27  ;;  %v3914_v8 = vadd.f32 0.0001, %v3913_v25  ;;  %v7304_v13 = vpop.eup %7303 }
 0x4d2   : > { %7313 = vrcp.f32 %v3919_v56  ;;  %v9200_v56 = vadd.f32 0.0001, %v4394_v0  ;;  %v4418_v0 = vmul.f32 %v7300_v12, %v9173_v47 }
 0x4d3   : > { %7315 = vrcp.f32 %v3914_v8  ;;  %v6545_v49 = vpop.f32.mrb[48].mxu1 }
 0x4d4   : > { %7317 = vrcp.f32 %v4002_v34  ;;  %v3929_v16 = vadd.f32 0.0001, %v6545_v49  ;;  %v3923_v48 = vpop.f32.mrb[49].mxu1  ;;  %v4012_v34 = vmul.f32 %v7296_v36, %v9917_v42  ;;  %v9918_v49 = vld [vmem:[#allocation27_spill] sm:$0xff]  ;;  %vm4454_vm14 = vcmp.eq.f32.partialorder %v9200_v56, inf }
 0x4d5   : > { %7319 = vrcp.f32 %v3999_v3  ;;  %v3924_v15 = vadd.f32 0.0001, %v3923_v48  ;;  %6568 = vmatpush3.bf16.xpose.msra.mxu1 %v4162_v60  ;;  %v4010_v14 = vmul.f32 %v7294_v39, %v9918_v49  ;;  %v4425_v3 = vmul.f32 %v7302_v46, %v9181_v61 }
 0x4d6   : > { %7321 = vrcp.f32 %v3929_v16  ;;  %v9208_v16 = vadd.f32 0.0001, %v9162_v28  ;;  %v4014_v39 = vmul.f32 %v7298_v40, %v8842_v63  ;;  %v4420_v46 = vsel %vm4419_vm4, %v9173_v47, %v4418_v0 }
 0x4d7   : > { %7323 = vrcp.f32 %v3924_v15  ;;  %v4427_v36 = vsel %vm4426_vm2, %v9181_v61, %v4425_v3  ;;  %vm4456_vm0 = vcmp.eq.f32.partialorder %v9200_v56, 0.0 }
 0x4d8   : > { %v7306_v25 = vpop.eup %7305  ;;  %7325 = vrsqrt.f32 %v9200_v56  ;;  %vm4447_vm15 = vcmp.eq.f32.partialorder %v9208_v16, inf  ;;  %vm4449_vm1 = vcmp.eq.f32.partialorder %v9208_v16, 0.0 }
 0x4d9   : > { %v7308_v11 = vpop.eup %7307  ;;  %v3945_v8 = vmul.f32 %v7306_v25, %v9144_v24  ;;  %v4016_v24 = vmul.f32 %v7304_v13, %v8878_v29  ;;  %7327 = vrsqrt.f32 %v9208_v16  ;;  %v4429_v29 = vand.u32 2147483648, %v9181_v61 }
 0x4da   : > { %v7310_v9 = vpop.eup %7309  ;;  %v3943_v21 = vmul.f32 %v7308_v11, %v9138_v59  ;;  %7329 = vrcp.f32 %v9164_v2 }
 0x4db   : > { %v7312_v60 = vpop.eup %7311  ;;  %v4026_v15 = vmul.f32 %v4012_v34, %v3945_v8 }
 0x4dc   : > { %v7314_v48 = vpop.eup %7313  ;;  %v4025_v45 = vmul.f32 %v4010_v14, %v3943_v21  ;;  %v4439_v21 = vmul.f32 %v7312_v60, %v9194_v27  ;;  %v9246_v60 = vadd.f32 0.0001, %v9170_v30 }
 0x4dd   : > { %v7316_v53 = vpop.eup %7315  ;;  %v3949_v42 = vmul.f32 %v7314_v48, %v9142_v26  ;;  %v4436_v48 = vand.u32 2147483648, %v9188_v18 }
 0x4de   : > { %v7318_v11 = vpop.eup %7317  ;;  %v3947_v59 = vmul.f32 %v7316_v53, %v9134_v33  ;;  %v4033_v28 = vpack.c.bf16 %v4026_v15, %v4025_v45  ;;  %v4422_v53 = vand.u32 2147483648, %v9173_v47  ;;  %v4430_v45 = vsel %vm4428_vm6, %v4429_v29, %v4427_v36 }
 0x4df   : > { %v7320_v14 = vpop.eup %7319  ;;  %v4028_v12 = vmul.f32 %v4016_v24, %v3949_v42  ;;  %v4020_v33 = vmul.f32 %v7318_v11, %v9034_v58  ;;  %v4432_v47 = vmul.f32 %v7310_v9, %v9188_v18  ;;  %v4441_v58 = vsel %vm4440_vm8, %v9194_v27, %v4439_v21 }
 0x4e0   : > { %v7322_v13 = vpop.eup %7321  ;;  %v4027_v26 = vmul.f32 %v4014_v39, %v3947_v59  ;;  %6557 = vmatprep.mubr.msk.bf16.mxu0 %vm3306_vm7, %v4033_v28  ;;  %v4018_v34 = vmul.f32 %v7320_v14, %v9028_v41  ;;  %v4423_v49 = vsel %vm4421_vm5, %v4422_v53, %v4420_v46  ;;  %7331 = vrsqrt.f32 %v9246_v60 }
 0x4e1   : > { %v7324_v63 = vpop.eup %7323  ;;  %v3953_v40 = vmul.f32 %v7322_v13, %v9160_v37  ;;  %v6739_v61 = vpack.c.bf16 %v4430_v45, %v4423_v49  ;;  %v4443_v37 = vand.u32 2147483648, %v9194_v27  ;;  %v4434_v9 = vsel %vm4433_vm10, %v9188_v18, %v4432_v47 }
 0x4e2   : > { %v4034_v25 = vpack.c.bf16 %v4028_v12, %v4027_v26  ;;  %v3951_v8 = vmul.f32 %v7324_v63, %v9154_v31  ;;  %v7326_v31 = vpop.eup %7325  ;;  %v4437_v42 = vsel %vm4435_vm12, %v4436_v48, %v4434_v9  ;;  %7333 = vrcp.f32 %v9166_v22 }
 0x4e3   : > { %v4030_v3 = vmul.f32 %v4020_v33, %v3953_v40  ;;  %v4444_v0 = vsel %vm4442_vm11, %v4443_v37, %v4441_v58  ;;  %v4453_v24 = vmul.f32 %v7326_v31, %v9200_v56  ;;  %v4457_v28 = vand.u32 2147483648, %v9200_v56 }
 0x4e4   : > { %6558 = vmatmul.mubr.msk.bf16.vlgmr.msra.gmra.mrb[16].mxu0 %vm3306_vm7, %v4034_v25  ;;  %v4029_v15 = vmul.f32 %v4018_v34, %v3951_v8  ;;  %v6745_v39 = vpack.c.bf16 %v4444_v0, %v4437_v42  ;;  %v9266_v36 = vadd.f32 0.0001, %v9168_v6  ;;  %v9271_v22 = vadd.f32 0.0001, %v9177_v51  ;;  %v9324_v0 = vld [vmem:[%s9824_s2 + $0x18] sm:$0xff] }
 0x4e5   : > { %6738 = vmatpush3.bf16.xpose.msk.msra.mxu0 %vm8519_vm13, %v9095_v52  ;;  %v7328_v52 = vpop.eup %7327  ;;  %v4455_v2 = vsel %vm4454_vm14, %v9200_v56, %v4453_v24  ;;  %v4450_v12 = vand.u32 2147483648, %v9208_v16  ;;  %v9278_v6 = vadd.f32 0.0001, %v9175_v1  ;;  %v9285_v56 = vstv %s4629_s27  ;;  %v9291_v1 = vld [vmem:[%s9824_s2] sm:$0xff] }
 0x4e6   : > { %6741 = vmatprep.subr.msk.bf16.mxu0 %vm8519_vm13, %v6739_v61  ;;  %v4035_v41 = vpack.c.bf16 %v4030_v3, %v4029_v15  ;;  %v4446_v27 = vmul.f32 %v7328_v52, %v9208_v16  ;;  %v4458_v29 = vsel %vm4456_vm0, %v4457_v28, %v4455_v2  ;;  %v7330_v51 = vpop.eup %7329  ;;  %v4631_v53 = vmul.f32 %v9291_v1, %v9285_v56 }
 0x4e7   : > { %v4024_v33 = vmul.f32 %v7330_v51, %v9036_v17  ;;  %vm4293_vm2 = vcmp.eq.f32.partialorder %v9246_v60, inf  ;;  %v4296_v9 = vand.u32 2147483648, %v9246_v60  ;;  %vm4295_vm4 = vcmp.eq.f32.partialorder %v9246_v60, 0.0 }
 0x4e8   : > { %6561 = vmatprep.mubr.msk.bf16.mxu0 %vm3306_vm7, %v4035_v41  ;;  %v4448_v14 = vsel %vm4447_vm15, %v9208_v16, %v4446_v27  ;;  %v4639_v17 = vmul.f32 1.442695, %v4631_v53  ;;  %v4634_v24 = vmul.f32 %v9324_v0, %v9285_v56  ;;  %vm4300_vm5 = vcmp.eq.f32.partialorder %v9266_v36, inf }
 0x4e9   : > { %v4451_v13 = vsel %vm4449_vm1, %v4450_v12, %v4448_v14  ;;  %vm4307_vm6 = vcmp.eq.f32.partialorder %v9271_v22, inf  ;;  %vm4302_vm8 = vcmp.eq.f32.partialorder %v9266_v36, 0.0  ;;  %vm4309_vm10 = vcmp.eq.f32.partialorder %v9271_v22, 0.0 }
 0x4ea   : > { %v6751_v26 = vpack.c.bf16 %v4458_v29, %v4451_v13  ;;  %v7332_v16 = vpop.eup %7331  ;;  %v4645_v14 = vmul.f32 1.442695, %v4634_v24  ;;  %vm4314_vm11 = vcmp.eq.f32.partialorder %v9278_v6, inf  ;;  %vm4316_vm14 = vcmp.eq.f32.partialorder %v9278_v6, 0.0 }
 0x4eb   : > { %v4292_v25 = vmul.f32 %v7332_v16, %v9246_v60 }
 0x4ec   : > { %v6548_v11 = vpop.f32.mrb[50].mxu1  ;;  %v7334_v46 = vpop.eup %7333 }
 0x4ed   : > { %v3939_v30 = vadd.f32 0.0001, %v6548_v11  ;;  %6744 = vmatpush3.bf16.xpose.msk.msra.mxu0 %vm8519_vm13, %v6739_v61  ;;  %v3933_v59 = vpop.f32.mrb[51].mxu1  ;;  %v4022_v21 = vmul.f32 %v7334_v46, %v9040_v20  ;;  %v9312_v20 = vld [vmem:[%s9824_s2 + $0x8] sm:$0xff] }
 0x4ee   : > { %v3934_v18 = vadd.f32 0.0001, %v3933_v59  ;;  %6747 = vmatprep.subr.msk.bf16.mxu0 %vm8519_vm13, %v6745_v39  ;;  %v4632_v41 = vmul.f32 %v9312_v20, %v9285_v56  ;;  %v9338_v59 = vld [vmem:[%s9824_s2 + $0x10] sm:$0xff] }
 0x4ef   : > { %7335 = vrcp.f32 %v3939_v30 }
 0x4f0   : > { %7337 = vrcp.f32 %v3934_v18  ;;  %v4641_v30 = vmul.f32 1.442695, %v4632_v41  ;;  %v4633_v18 = vmul.f32 %v9338_v59, %v9285_v56 }
 0x4f1   : > { %7339 = vrsqrt.f32 %v9266_v36 }
 0x4f2   : > { %7341 = vrsqrt.f32 %v9271_v22  ;;  %v4643_v16 = vmul.f32 1.442695, %v4633_v18 }
 0x4f3   : > { %7343 = vrsqrt.f32 %v9278_v6 }
 0x4f5   : > { %6750 = vmatpush3.bf16.xpose.msk.msra.mxu0 %vm8519_vm13, %v6745_v39 }
 0x4f6   : > { %6753 = vmatprep.subr.msk.bf16.mxu0 %vm8519_vm13, %v6751_v26 }
 0x4f9   : > { %v7336_v63 = vpop.eup %7335 }
 0x4fa   : > { %v7338_v45 = vpop.eup %7337  ;;  %v3957_v40 = vmul.f32 %v7336_v63, %v9158_v62  ;;  %v4310_v63 = vand.u32 2147483648, %v9271_v22 }
 0x4fb   : > { %v4273_v8 = vpop.xlane.xlu1 %4272  ;;  %v3955_v34 = vmul.f32 %v7338_v45, %v9150_v5  ;;  %v7340_v62 = vpop.eup %7339  ;;  %v4294_v5 = vsel %vm4293_vm2, %v9246_v60, %v4292_v25 }
 0x4fc   : > { %v9300_v49 = vadd.f32 0.0001, %v4273_v8  ;;  %v4276_v3 = vpop.xlane.xlu0 %4275  ;;  %v4032_v61 = vmul.f32 %v4024_v33, %v3957_v40  ;;  %v7342_v58 = vpop.eup %7341  ;;  %v4297_v11 = vsel %vm4295_vm4, %v4296_v9, %v4294_v5  ;;  %v4299_v39 = vmul.f32 %v7340_v62, %v9266_v36 }
 0x4fd   : > { %v9302_v15 = vadd.f32 0.0001, %v4276_v3  ;;  %6756 = vmatpush3.bf16.xpose.msk.msra.mxu0 %vm8519_vm13, %v6751_v26  ;;  %v4031_v47 = vmul.f32 %v4022_v21, %v3955_v34  ;;  %v7344_v27 = vpop.eup %7343  ;;  %v4306_v60 = vmul.f32 %v7342_v58, %v9271_v22  ;;  %v4303_v26 = vand.u32 2147483648, %v9266_v36 }
 0x4fe   : > { %7345 = vrsqrt.f32 %v9300_v49  ;;  %v4301_v29 = vsel %vm4300_vm5, %v9266_v36, %v4299_v39  ;;  %v4313_v13 = vmul.f32 %v7344_v27, %v9278_v6  ;;  %v4317_v36 = vand.u32 2147483648, %v9278_v6 }
 0x4ff   : > { %7347 = vrsqrt.f32 %v9302_v15  ;;  %v4282_v31 = vpop.xlane.xlu1 %4281  ;;  %v4036_v37 = vpack.c.bf16 %v4032_v61, %v4031_v47  ;;  %v4308_v51 = vsel %vm4307_vm6, %v9271_v22, %v4306_v60  ;;  %v4304_v40 = vsel %vm4302_vm8, %v4303_v26, %v4301_v29 }
 0x500   : > { %v9318_v52 = vadd.f32 0.0001, %v4282_v31  ;;  %v4279_v48 = vpop.xlane.xlu0 %4278  ;;  %7349 = vpow2.f32 %v4639_v17  ;;  %v4311_v25 = vsel %vm4309_vm10, %v4310_v63, %v4308_v51  ;;  %v4315_v8 = vsel %vm4314_vm11, %v9278_v6, %v4313_v13 }
 0x501   : > { %v9328_v42 = vadd.f32 0.0001, %v4279_v48  ;;  %6562 = vmatmul.mubr.msk.bf16.gmra.mrb[20].mxu0 %vm3306_vm7, %v4036_v37  ;;  %vm4321_vm12 = vcmp.eq.f32.partialorder %v9300_v49, inf  ;;  %v4318_v62 = vsel %vm4316_vm14, %v4317_v36, %v4315_v8  ;;  %v4324_v5 = vand.u32 2147483648, %v9300_v49 }
 0x502   : > { %7351 = vrsqrt.f32 %v9318_v52  ;;  %6597 = vmatprep.mubr.msk.f32.mxu0 %vm3109_vm9, %v4297_v11  ;;  %vm4328_vm15 = vcmp.eq.f32.partialorder %v9302_v15, inf  ;;  %vm4323_vm0 = vcmp.eq.f32.partialorder %v9300_v49, 0.0  ;;  %v4331_v48 = vand.u32 2147483648, %v9302_v15 }
 0x503   : > { %7353 = vrsqrt.f32 %v9328_v42  ;;  %v4145_v2 = vpop.permute.xlu1 %4144  ;;  %vm4330_vm1 = vcmp.eq.f32.partialorder %v9302_v15, 0.0  ;;  %vm4335_vm2 = vcmp.eq.f32.partialorder %v9328_v42, inf  ;;  %vm4337_vm4 = vcmp.eq.f32.partialorder %v9328_v42, 0.0 }
 0x504   : > { %v4143_v28 = vpop.permute.xlu0 %4142  ;;  %7355 = vpow2.f32 %v4641_v30  ;;  %v4168_v58 = vsel %vm405_vm3, %v4145_v2, 0  ;;  %vm4342_vm5 = vcmp.eq.f32.partialorder %v9318_v52, inf  ;;  %v4345_v29 = vand.u32 2147483648, %v9318_v52 }
 0x505   : > { %v4165_v12 = vsel %vm405_vm3, %v4143_v28, 0  ;;  %6987 = vmatprep.subr.msk.bf16.mxu1 %vm405_vm3, %v4143_v28  ;;  %7357 = vpow2.f32 %v4645_v14  ;;  %vm4344_vm6 = vcmp.eq.f32.partialorder %v9318_v52, 0.0  ;;  %v4635_v8 = vmul.f32 %v9002_v4, %v9285_v56 }
 0x506   : > { %6570 = vmatpush3.bf16.xpose.msra.mxu1 %v4165_v12  ;;  %7359 = vpow2.f32 %v4643_v16  ;;  %v4638_v36 = vmul.f32 %v9017_v43, %v9285_v56 }
 0x507   : > { %v4131_v46 = vpop.permute.xlu1 %4130  ;;  %6988 = vmatprep.subr.msk.bf16.mxu1 %vm405_vm3, %v4145_v2 }
 0x508   : > { %v7346_v53 = vpop.eup %7345  ;;  %6573 = vmatprep.mubr.msk.bf16.mxu1 %vm405_vm3, %v4131_v46  ;;  %v4135_v45 = vpop.permute.xlu0 %4134 }
 0x509   : > { %v7348_v33 = vpop.eup %7347  ;;  %6598 = vmatmul.mubr.msk.f32.vlgmr.msra.gmra.mrb[24].mxu0 %vm3109_vm9, %v4304_v40  ;;  %v4320_v34 = vmul.f32 %v7346_v53, %v9300_v49 }
 0x50a   : > { %6600 = vmatprep.mubr.msk.f32.mxu0 %vm3109_vm9, %v4311_v25  ;;  %v4327_v21 = vmul.f32 %v7348_v33, %v9302_v15  ;;  %v9364_v22 = vpop.eup %7349  ;;  %v4636_v25 = vmul.f32 %v9009_v19, %v9285_v56 }
 0x50b   : > { %v4133_v3 = vpop.permute.xlu1 %4132  ;;  %v4322_v61 = vsel %vm4321_vm12, %v9300_v49, %v4320_v34  ;;  %v4655_v9 = vsel %vm3306_vm7, %v9364_v22, 0.0  ;;  %v4338_v49 = vand.u32 2147483648, %v9328_v42 }
 0x50c   : > { %v7352_v47 = vpop.eup %7351  ;;  %v5014_v17 = vpop.permute.xlu0 %5013  ;;  %v4329_v6 = vsel %vm4328_vm15, %v9302_v15, %v4327_v21  ;;  %v4325_v37 = vsel %vm4323_vm0, %v4324_v5, %v4322_v61  ;;  %v4649_v34 = vmul.f32 1.442695, %v4636_v25  ;;  %v4647_v21 = vmul.f32 1.442695, %v4635_v8 }
 0x50d   : > { %v7354_v41 = vpop.eup %7353  ;;  %v5037_v31 = vsel %vm405_vm3, %v5014_v17, 0.0  ;;  %6601 = vmatmul.mubr.msk.f32.gmra.mrb[26].mxu0 %vm3109_vm9, %v4318_v62  ;;  %v4341_v39 = vmul.f32 %v7352_v47, %v9318_v52  ;;  %v4332_v60 = vsel %vm4330_vm1, %v4331_v48, %v4329_v6  ;;  %v4653_v61 = vmul.f32 1.442695, %v4638_v36  ;;  %v9919_v36 = vld [vmem:[#allocation9_spill] sm:$0xff] }
 0x50e   : > { %5038 = vadd.xlane.f32.xlu0 %v5037_v31  ;;  %6572 = vmatpush3.bf16.xpose.msra.mxu1 %v4168_v58  ;;  %v4334_v24 = vmul.f32 %v7354_v41, %v9328_v42  ;;  %v9384_v27 = vpop.eup %7355  ;;  %7361 = vpow2.f32 %v4649_v34 }
 0x50f   : > { %v4137_v11 = vpop.permute.xlu1 %4136  ;;  %6603 = vmatprep.mubr.msk.f32.mxu0 %vm3109_vm9, %v4325_v37  ;;  %v9391_v15 = vpop.eup %7357  ;;  %v4658_v28 = vsel %vm3306_vm7, %v9384_v27, 0.0  ;;  %v4343_v14 = vsel %vm4342_vm5, %v9318_v52, %v4341_v39  ;;  %7363 = vpow2.f32 %v4647_v21  ;;  %v9921_v21 = vld [vmem:[#allocation16_spill] sm:$0xff] }
 0x510   : > { %v4336_v30 = vsel %vm4335_vm2, %v9328_v42, %v4334_v24  ;;  %v9396_v12 = vpop.eup %7359  ;;  %v4346_v13 = vsel %vm4344_vm6, %v4345_v29, %v4343_v14  ;;  %v4664_v26 = vsel %vm3306_vm7, %v9391_v15, 0.0  ;;  %v5018_v46 = vpop.permute.xlu0 %5017  ;;  %7365 = vpow2.f32 %v4653_v61 }
 0x511   : > { %6604 = vmatmul.mubr.msk.f32.gmra.mrb[28].mxu0 %vm3109_vm9, %v4332_v60  ;;  %v4339_v18 = vsel %vm4337_vm4, %v4338_v49, %v4336_v30  ;;  %v4661_v51 = vsel %vm3306_vm7, %v9396_v12, 0.0  ;;  %v5043_v52 = vsel %vm405_vm3, %v5018_v46, 0.0 }
 0x512   : > { %4656 = vadd.xlane.f32.xlu0 %v4655_v9  ;;  %6606 = vmatprep.mubr.msk.f32.mxu0 %vm3109_vm9, %v4339_v18 }
 0x513   : > { %v5016_v2 = vpop.permute.xlu1 %5015 }
 0x514   : > { %v5040_v42 = vsel %vm405_vm3, %v5016_v2, 0.0  ;;  %v5022_v53 = vpop.permute.xlu0 %5021 }
 0x515   : > { %5041 = vadd.xlane.f32.xlu1 %v5040_v42  ;;  %6574 = vmatmul.mubr.msk.bf16.vlgmr.msra.gmra.mrb[52].mxu1 %vm405_vm3, %v4133_v3  ;;  %v5049_v40 = vsel %vm405_vm3, %v5022_v53, 0.0  ;;  %v4637_v3 = vmul.f32 %v9024_v35, %v9285_v56 }
 0x516   : > { %4659 = vadd.xlane.f32.xlu0 %v4658_v28  ;;  %6577 = vmatprep.mubr.msk.bf16.mxu1 %vm405_vm3, %v4135_v45 }
 0x517   : > { %6607 = vmatmul.mubr.msk.f32.gmra.mrb[30].mxu0 %vm3109_vm9, %v4346_v13  ;;  %v5020_v16 = vpop.permute.xlu1 %5019  ;;  %v4651_v47 = vmul.f32 1.442695, %v4637_v3  ;;  %v5296_v3 = vstv %s5295_s13 }
 0x518   : > { %v5046_v63 = vsel %vm405_vm3, %v5020_v16, 0.0  ;;  %v5026_v17 = vpop.permute.xlu0 %5025  ;;  %v9429_v19 = vpop.eup %7361  ;;  %v5299_v61 = vmul.f32 %v9338_v59, %v5296_v3 }
 0x519   : > { %4665 = vadd.xlane.f32.xlu1 %v4664_v26  ;;  %7367 = vpow2.f32 %v4651_v47  ;;  %v9431_v4 = vpop.eup %7363  ;;  %v5055_v41 = vsel %vm405_vm3, %v5026_v17, 0.0  ;;  %v4670_v35 = vsel %vm3306_vm7, %v9429_v19, 0.0  ;;  %v5298_v17 = vmul.f32 %v9312_v20, %v5296_v3 }
 0x51a   : > { %4662 = vadd.xlane.f32.xlu0 %v4661_v51  ;;  %v9437_v56 = vpop.eup %7365  ;;  %v4667_v31 = vsel %vm3306_vm7, %v9431_v4, 0.0 }
 0x51b   : > { %v5024_v45 = vpop.permute.xlu1 %5023  ;;  %v4676_v9 = vsel %vm3306_vm7, %v9437_v56, 0.0 }
 0x51c   : > { %v5052_v33 = vsel %vm405_vm3, %v5024_v45, 0.0  ;;  %v4902_v5 = vpop.permute.xlu0 %4901 }
 0x51d   : > { %5047 = vadd.xlane.f32.xlu1 %v5046_v63  ;;  %6578 = vmatmul.mubr.msk.bf16.gmra.mrb[56].mxu1 %vm405_vm3, %v4137_v11  ;;  %v4925_v39 = vsel %vm405_vm3, %v4902_v5, 0.0  ;;  %v5309_v5 = vmul.f32 1.442695, %v5299_v61 }
 0x51e   : > { %5044 = vadd.xlane.f32.xlu0 %v5043_v52 }
 0x51f   : > { %v5028_v62 = vpop.permute.xlu1 %5027 }
 0x520   : > { %v5058_v43 = vsel %vm405_vm3, %v5028_v62, 0.0  ;;  %v4906_v37 = vpop.permute.xlu0 %4905  ;;  %v5300_v62 = vmul.f32 %v9324_v0, %v5296_v3 }
 0x521   : > { %v4931_v18 = vsel %vm405_vm3, %v4906_v37, 0.0 }
 0x523   : > { %v4904_v58 = vpop.permute.xlu1 %4903  ;;  %v9441_v6 = vpop.eup %7367 }
 0x524   : > { %v4673_v48 = vsel %vm3306_vm7, %v9441_v6, 0.0  ;;  %v4910_v11 = vpop.permute.xlu0 %4909  ;;  %v4928_v49 = vsel %vm405_vm3, %v4904_v58, 0.0 }
 0x525   : > { %v4937_v14 = vsel %vm405_vm3, %v4910_v11, 0.0 }
 0x527   : > { %v4908_v24 = vpop.permute.xlu1 %4907 }
 0x528   : > { %v4934_v30 = vsel %vm405_vm3, %v4908_v24, 0.0  ;;  %v4914_v2 = vpop.permute.xlu0 %4913  ;;  %v7492_v24 = vld [vmem:[%s9824_s2 + $0x30] sm:$0xff] }
 0x529   : > { %v4943_v26 = vsel %vm405_vm3, %v4914_v2, 0.0  ;;  %v5303_v11 = vmul.f32 %v7492_v24, %v5296_v3 }
 0x52b   : > { %v4912_v60 = vpop.permute.xlu1 %4911 }
 0x52c   : > { %v4940_v28 = vsel %vm405_vm3, %v4912_v60, 0.0 }
 0x52e   : > { %4709 = vrot.lane.b32.xlu1 %v8470_v55, %s7523_s12 }
 0x52f   : > { %v4916_v42 = vpop.permute.xlu1 %4915 }
 0x530   : > { %v4946_v13 = vsel %vm405_vm3, %v4916_v42, 0.0 }
 0x534   : > { %4707 = vrot.lane.b32.xlu0 %v8472_v7, %s7523_s12 }
 0x552   : > { %5050 = vadd.xlane.f32.xlu1 %v5049_v40 }
 0x553   : > { %5053 = vadd.xlane.f32.xlu0 %v5052_v33 }
 0x563   : > { %4713 = vrot.lane.b32.xlu1 %v8474_v44, %s7523_s12 }
 0x569   : > { %4711 = vrot.lane.b32.xlu0 %v8476_v38, %s7523_s12 }
 0x587   : > { %5056 = vadd.xlane.f32.xlu1 %v5055_v41  ;;  %v5307_v41 = vmul.f32 1.442695, %v5298_v17 }
 0x588   : > { %5059 = vadd.xlane.f32.xlu0 %v5058_v43  ;;  %v7489_v43 = vld [vmem:[%s9824_s2 + $0x28] sm:$0xff] }
 0x58b   : > { %4671 = vadd.xlane.f32.xlu1 %v4670_v35  ;;  %v5302_v35 = vmul.f32 %v7489_v43, %v5296_v3 }
 0x58c   : > { %4668 = vadd.xlane.f32.xlu0 %v4667_v31  ;;  %v5311_v31 = vmul.f32 1.442695, %v5300_v62 }
 0x58d   : > { %v5315_v20 = vmul.f32 1.442695, %v5302_v35 }
 0x58f   : > { %4677 = vadd.xlane.f32.xlu1 %v4676_v9  ;;  %v7491_v9 = vld [vmem:[%s9824_s2 + $0x38] sm:$0xff] }
 0x590   : > { %4674 = vadd.xlane.f32.xlu0 %v4673_v48  ;;  %v5304_v48 = vmul.f32 %v7491_v9, %v5296_v3 }
 0x593   : > { %4929 = vadd.xlane.f32.xlu1 %v4928_v49 }
 0x594   : > { %4926 = vadd.xlane.f32.xlu0 %v4925_v39 }
 0x597   : > { %4935 = vadd.xlane.f32.xlu1 %v4934_v30  ;;  %v5319_v30 = vmul.f32 1.442695, %v5304_v48 }
 0x598   : > { %4932 = vadd.xlane.f32.xlu0 %v4931_v18 }
 0x59b   : > { %4941 = vadd.xlane.f32.xlu1 %v4940_v28  ;;  %v5039_v29 = vpop.xlane.xlu0 %5038 }
 0x59c   : > { %4938 = vadd.xlane.f32.xlu0 %v4937_v14  ;;  %v9505_v37 = vadd.f32 0.0001, %v5039_v29  ;;  %v5317_v14 = vmul.f32 1.442695, %v5303_v11 }
 0x59e   : > { %vm5071_vm10 = vcmp.eq.f32.partialorder %v9505_v37, inf  ;;  %vm5073_vm12 = vcmp.eq.f32.partialorder %v9505_v37, 0.0 }
 0x59f   : > { %4947 = vadd.xlane.f32.xlu1 %v4946_v13  ;;  %v9455_v51 = vpop.xlane.xlu0 %4656 }
 0x5a0   : > { %4944 = vadd.xlane.f32.xlu0 %v4943_v26 }
 0x5a2   : > { %v5042_v16 = vpop.xlane.xlu1 %5041 }
 0x5a3   : > { %v9457_v46 = vpop.xlane.xlu0 %4659  ;;  %v9500_v58 = vadd.f32 0.0001, %v5042_v16 }
 0x5a5   : > { %vm5078_vm8 = vcmp.eq.f32.partialorder %v9500_v58, inf  ;;  %vm5080_vm11 = vcmp.eq.f32.partialorder %v9500_v58, 0.0 }
 0x5a6   : > { %v9459_v63 = vpop.xlane.xlu1 %4665 }
 0x5a7   : > { %v9461_v52 = vpop.xlane.xlu0 %4662 }
 0x5aa   : > { %v9463_v53 = vpop.xlane.xlu1 %5047 }
 0x5ab   : > { %v5045_v45 = vpop.xlane.xlu0 %5044 }
 0x5ac   : > { %v9531_v13 = vadd.f32 0.0001, %v5045_v45 }
 0x5ae   : > { %v4710_v33 = vpop.permute.xlu1 %4709  ;;  %vm5085_vm14 = vcmp.eq.f32.partialorder %v9531_v13, inf  ;;  %vm5087_vm0 = vcmp.eq.f32.partialorder %v9531_v13, 0.0 }
 0x5af   : > { %v4708_v40 = vpop.permute.xlu0 %4707 }
 0x5b0   : > { %4806 = vrot.lane.b32.xlu1 %v8326_v23, %s7524_s25  ;;  %6609 = vmatprep.subr.bf16.mxu1 %v4708_v40 }
 0x5b1   : > { %6610 = vmatpush3.bf16.msra.mxu1 %v4708_v40 }
 0x5b2   : > { %6611 = vmatprep.subr.bf16.mxu1 %v4710_v33 }
 0x5b4   : > { %4808 = vrot.lane.b32.xlu1 %v9893_v54, %s7524_s25 }
 0x5b5   : > { %6612 = vmatpush3.bf16.msra.mxu1 %v4710_v33 }
 0x5b6   : > { %4804 = vrot.lane.b32.xlu0 %v8308_v10, %s7524_s25 }
 0x5b7   : > { %v9471_v25 = vpop.f32.mrb[16].mxu0 }
 0x5b8   : > { %4810 = vrot.lane.b32.xlu1 %v8360_v50, %s7524_s25  ;;  %v9475_v8 = vpop.f32.mrb[17].mxu0  ;;  %v9920_v50 = vld [vmem:[#allocation12_spill] sm:$0xff] }
 0x5b9   : > { %v9477_v23 = vpop.f32.mrb[18].mxu0 }
 0x5ba   : > { %4796 = vrot.lane.b32.xlu0 %v9891_v57, %s7524_s25  ;;  %v7017_v54 = vpack.i.bf16 %v9477_v23, %v9471_v25  ;;  %v9483_v34 = vpop.f32.mrb[19].mxu0  ;;  %v5297_v57 = vmul.f32 %v9291_v1, %v5296_v3  ;;  %v7490_v1 = vld [vmem:[%s9824_s2 + $0x20] sm:$0xff] }
 0x5bb   : > { %v7022_v10 = vpack.i.bf16 %v9483_v34, %v9475_v8  ;;  %v5301_v59 = vmul.f32 %v7490_v1, %v5296_v3 }
 0x5bc   : > { %4798 = vrot.lane.b32.xlu1 %v9919_v36, %s7524_s25  ;;  %v5305_v47 = vmul.f32 1.442695, %v5297_v57 }
 0x5bd   : > { %v5313_v0 = vmul.f32 1.442695, %v5301_v59 }
 0x5be   : > { %4800 = vrot.lane.b32.xlu0 %v9920_v50, %s7524_s25  ;;  %7369 = vpow2.f32 %v5305_v47  ;;  %v9542_v50 = vadd.f32 0.0001, %v9463_v53 }
 0x5bf   : > { %7371 = vpow2.f32 %v5309_v5 }
 0x5c0   : > { %4802 = vrot.lane.b32.xlu1 %v9921_v21, %s7524_s25  ;;  %7373 = vpow2.f32 %v5307_v41  ;;  %vm5092_vm15 = vcmp.eq.f32.partialorder %v9542_v50, inf  ;;  %vm5094_vm1 = vcmp.eq.f32.partialorder %v9542_v50, 0.0 }
 0x5c1   : > { %7375 = vrsqrt.f32 %v9500_v58 }
 0x5c2   : > { %7377 = vpow2.f32 %v5311_v31 }
 0x5c3   : > { %7379 = vrsqrt.f32 %v9505_v37 }
 0x5c4   : > { %7381 = vpow2.f32 %v5315_v20 }
 0x5c5   : > { %7383 = vpow2.f32 %v5313_v0 }
 0x5c6   : > { %7385 = vpow2.f32 %v5319_v30 }
 0x5c7   : > { %7387 = vpow2.f32 %v5317_v14 }
 0x5c8   : > { %v9521_v18 = vpop.eup %7369  ;;  %7389 = vrcp.f32 %v9455_v51 }
 0x5c9   : > { %v9529_v29 = vpop.eup %7371  ;;  %v5321_v26 = vsel %vm3306_vm7, %v9521_v18, 0.0  ;;  %7391 = vrcp.f32 %v9457_v46 }
 0x5ca   : > { %v9535_v16 = vpop.eup %7373  ;;  %7393 = vrsqrt.f32 %v9531_v13  ;;  %v5327_v61 = vsel %vm3306_vm7, %v9529_v29, 0.0 }
 0x5cb   : > { %v7376_v40 = vpop.eup %7375  ;;  %v5324_v5 = vsel %vm3306_vm7, %v9535_v16, 0.0 }
 0x5cc   : > { %v9538_v36 = vpop.eup %7377  ;;  %v5077_v17 = vmul.f32 %v7376_v40, %v9500_v58 }
 0x5cd   : > { %v7380_v3 = vpop.eup %7379  ;;  %v5330_v35 = vsel %vm3306_vm7, %v9538_v36, 0.0 }
 0x5ce   : > { %v9547_v47 = vpop.eup %7381  ;;  %v5070_v1 = vmul.f32 %v7380_v3, %v9505_v37  ;;  %v5079_v9 = vsel %vm5078_vm8, %v9500_v58, %v5077_v17  ;;  %v5074_v3 = vand.u32 2147483648, %v9505_v37 }
 0x5cf   : > { %v9550_v46 = vpop.eup %7383  ;;  %v5336_v20 = vsel %vm3306_vm7, %v9547_v47, 0.0 }
 0x5d0   : > { %v5333_v0 = vsel %vm3306_vm7, %v9550_v46, 0.0  ;;  %v9568_v48 = vpop.eup %7385  ;;  %v5072_v40 = vsel %vm5071_vm10, %v9505_v37, %v5070_v1 }
 0x5d1   : > { %v9573_v11 = vpop.eup %7387 }
 0x5d2   : > { %v5339_v37 = vsel %vm3306_vm7, %v9573_v11, 0.0 }
 0x5d4   : > { %v9515_v49 = vpop.f32.mrb[20].mxu0 }
 0x5d5   : > { %v9517_v39 = vpop.f32.mrb[21].mxu0 }
 0x5d6   : > { %v9519_v60 = vpop.f32.mrb[22].mxu0 }
 0x5d7   : > { %v7027_v2 = vpack.i.bf16 %v9519_v60, %v9515_v49  ;;  %v9525_v28 = vpop.f32.mrb[23].mxu0 }
 0x5d8   : > { %v7032_v42 = vpack.i.bf16 %v9525_v28, %v9517_v39 }
 0x5dc   : > { %v6599_v33 = vpop.f32.mrb[24].mxu0 }
 0x5dd   : > { %5322 = vadd.xlane.f32.xlu0 %v5321_v26  ;;  %v4579_v45 = vadd.f32 0.0001, %v6599_v33  ;;  %v4573_v21 = vpop.f32.mrb[25].mxu0  ;;  %v7390_v33 = vpop.eup %7389 }
 0x5de   : > { %v4574_v57 = vadd.f32 0.0001, %v4573_v21 }
 0x5df   : > { %7395 = vrcp.f32 %v4579_v45  ;;  %v5051_v51 = vpop.xlane.xlu1 %5050 }
 0x5e0   : > { %7397 = vrcp.f32 %v4574_v57  ;;  %v5054_v53 = vpop.xlane.xlu0 %5053  ;;  %v6602_v62 = vpop.f32.mrb[26].mxu0  ;;  %v9575_v30 = vadd.f32 0.0001, %v5051_v51 }
 0x5e1   : > { %7399 = vrsqrt.f32 %v9542_v50  ;;  %5328 = vadd.xlane.f32.xlu0 %v5327_v61  ;;  %v4589_v41 = vadd.f32 0.0001, %v6602_v62  ;;  %v4583_v43 = vpop.f32.mrb[27].mxu0  ;;  %v9559_v59 = vadd.f32 0.0001, %v5054_v53  ;;  %v7392_v61 = vpop.eup %7391  ;;  %v5075_v53 = vsel %vm5073_vm12, %v5074_v3, %v5072_v40 }
 0x5e2   : > { %7401 = vrcp.f32 %v9459_v63  ;;  %v4584_v31 = vadd.f32 0.0001, %v4583_v43  ;;  %v7394_v51 = vpop.eup %7393  ;;  %v4682_v40 = vmul.f32 %v7392_v61, %v9384_v27  ;;  %vm5099_vm4 = vcmp.eq.f32.partialorder %v9575_v30, inf }
 0x5e3   : > { %7403 = vrcp.f32 %v9461_v52  ;;  %v5081_v52 = vand.u32 2147483648, %v9500_v58  ;;  %v4714_v45 = vpop.permute.xlu1 %4713  ;;  %vm5106_vm2 = vcmp.eq.f32.partialorder %v9559_v59, inf  ;;  %vm5108_vm5 = vcmp.eq.f32.partialorder %v9559_v59, 0.0 }
 0x5e4   : > { %7405 = vrcp.f32 %v4589_v41  ;;  %5325 = vadd.xlane.f32.xlu1 %v5324_v5  ;;  %v4712_v63 = vpop.permute.xlu0 %4711  ;;  %v6605_v24 = vpop.f32.mrb[28].mxu0  ;;  %v5342_v41 = vsel %vm3306_vm7, %v9568_v48, 0.0  ;;  %vm5101_vm6 = vcmp.eq.f32.partialorder %v9575_v30, 0.0 }
 0x5e5   : > { %7407 = vrcp.f32 %v4584_v31  ;;  %5331 = vadd.xlane.f32.xlu0 %v5330_v35  ;;  %v4599_v14 = vadd.f32 0.0001, %v6605_v24  ;;  %6613 = vmatprep.subr.bf16.mxu1 %v4712_v63  ;;  %v4593_v26 = vpop.f32.mrb[29].mxu0  ;;  %v5082_v57 = vsel %vm5080_vm11, %v5081_v52, %v5079_v9  ;;  %v4680_v9 = vmul.f32 %v7390_v33, %v9364_v22 }
 0x5e6   : > { %7409 = vrsqrt.f32 %v9559_v59  ;;  %v4594_v21 = vadd.f32 0.0001, %v4593_v26  ;;  %6614 = vmatpush3.bf16.msra.mxu1 %v4712_v63  ;;  %v6757_v58 = vpack.c.bf16 %v5082_v57, %v5075_v53 }
 0x5e7   : > { %7411 = vrcp.f32 %v4599_v14  ;;  %6615 = vmatprep.subr.bf16.mxu1 %v4714_v45 }
 0x5e8   : > { %7413 = vrcp.f32 %v4594_v21  ;;  %5337 = vadd.xlane.f32.xlu1 %v5336_v20  ;;  %v6575_v17 = vpop.f32.mrb[52].mxu1 }
 0x5e9   : > { %v7396_v62 = vpop.eup %7395  ;;  %7415 = vrsqrt.f32 %v9575_v30  ;;  %5334 = vadd.xlane.f32.xlu0 %v5333_v0  ;;  %v4204_v5 = vpop.f32.mrb[53].mxu1 }
 0x5ea   : > { %v7398_v43 = vpop.eup %7397  ;;  %v6608_v35 = vpop.f32.mrb[30].mxu0  ;;  %6616 = vmatpush3.bf16.msra.mxu1 %v4714_v45  ;;  %v5084_v45 = vmul.f32 %v7394_v51, %v9531_v13 }
 0x5eb   : > { %v6576_v1 = vpop.f32.mrb[54].mxu1  ;;  %v7400_v31 = vpop.eup %7399  ;;  %v4613_v20 = vmul.f32 %v7398_v43, %v4204_v5  ;;  %v4609_v63 = vadd.f32 0.0001, %v6608_v35  ;;  %6759 = vmatprep.subr.msk.bf16.mxu1 %vm8519_vm13, %v6757_v58 }
 0x5ec   : > { %v4603_v24 = vpop.f32.mrb[31].mxu0  ;;  %v4207_v52 = vpop.f32.mrb[55].mxu1  ;;  %5343 = vadd.xlane.f32.xlu1 %v5342_v41  ;;  %v5091_v33 = vmul.f32 %v7400_v31, %v9542_v50  ;;  %v5086_v35 = vsel %vm5085_vm14, %v9531_v13, %v5084_v45 }
 0x5ed   : > { %v7402_v0 = vpop.eup %7401  ;;  %v4604_v14 = vadd.f32 0.0001, %v4603_v24  ;;  %v4615_v26 = vmul.f32 %v7396_v62, %v4207_v52  ;;  %v4695_v3 = vmul.f32 %v4680_v9, %v4613_v20  ;;  %7417 = vrcp.f32 %v4609_v63  ;;  %5340 = vadd.xlane.f32.xlu0 %v5339_v37 }
 0x5ee   : > { %v7404_v21 = vpop.eup %7403  ;;  %v4686_v43 = vmul.f32 %v7402_v0, %v9391_v15  ;;  %v5088_v63 = vand.u32 2147483648, %v9531_v13 }
 0x5ef   : > { %v7406_v57 = vpop.eup %7405  ;;  %7419 = vrcp.f32 %v4604_v14  ;;  %v4696_v22 = vmul.f32 %v4682_v40, %v4615_v26  ;;  %v4684_v27 = vmul.f32 %v7404_v21, %v9396_v12  ;;  %v5093_v12 = vsel %vm5092_vm15, %v9542_v50, %v5091_v33 }
 0x5f0   : > { %v7408_v53 = vpop.eup %7407  ;;  %v4619_v5 = vmul.f32 %v7406_v57, %v6576_v1  ;;  %v6579_v51 = vpop.f32.mrb[56].mxu1  ;;  %v5089_v0 = vsel %vm5087_vm0, %v5088_v63, %v5086_v35  ;;  %v5095_v14 = vand.u32 2147483648, %v9542_v50 }
 0x5f1   : > { %v7410_v62 = vpop.eup %7409  ;;  %v4617_v41 = vmul.f32 %v7408_v53, %v6575_v17  ;;  %v4703_v61 = vpack.c.bf16 %v4696_v22, %v4695_v3  ;;  %v4220_v9 = vpop.f32.mrb[57].mxu1 }
 0x5f2   : > { %v7412_v37 = vpop.eup %7411  ;;  %v4698_v20 = vmul.f32 %v4686_v43, %v4619_v5  ;;  %v6580_v15 = vpop.f32.mrb[58].mxu1  ;;  %v5105_v45 = vmul.f32 %v7410_v62, %v9559_v59  ;;  %v5096_v21 = vsel %vm5094_vm1, %v5095_v14, %v5093_v12  ;;  %v5109_v5 = vand.u32 2147483648, %v9559_v59 }
 0x5f3   : > { %v7414_v1 = vpop.eup %7413  ;;  %v4697_v31 = vmul.f32 %v4684_v27, %v4617_v41  ;;  %6617 = vmatprep.mubr.msk.bf16.mxu1 %vm3306_vm7, %v4703_v61  ;;  %v4223_v52 = vpop.f32.mrb[59].mxu1  ;;  %v6763_v13 = vpack.c.bf16 %v5096_v21, %v5089_v0 }
 0x5f4   : > { %v7416_v17 = vpop.eup %7415  ;;  %v9603_v24 = vmul.f32 %v7414_v1, %v4220_v9  ;;  %v9606_v40 = vmul.f32 %v7412_v37, %v4223_v52  ;;  %v5107_v50 = vsel %vm5106_vm2, %v9559_v59, %v5105_v45 }
 0x5f5   : > { %v4704_v26 = vpack.c.bf16 %v4698_v20, %v4697_v31  ;;  %v5098_v3 = vmul.f32 %v7416_v17, %v9575_v30  ;;  %v5110_v62 = vsel %vm5108_vm5, %v5109_v5, %v5107_v50 }
 0x5f7   : > { %6618 = vmatmul.mubr.msk.bf16.vlgmr.msra.gmra.mrb[60].mxu1 %vm3306_vm7, %v4704_v26  ;;  %v7418_v57 = vpop.eup %7417  ;;  %v5100_v43 = vsel %vm5099_vm4, %v9575_v30, %v5098_v3 }
 0x5f8   : > { %6762 = vmatpush3.bf16.xpose.msk.msra.mxu1 %vm8519_vm13, %v6757_v58  ;;  %v9615_v33 = vmul.f32 %v7418_v57, %v6580_v15  ;;  %v5102_v58 = vand.u32 2147483648, %v9575_v30 }
 0x5f9   : > { %v7420_v22 = vpop.eup %7419  ;;  %6765 = vmatprep.subr.msk.bf16.mxu1 %vm8519_vm13, %v6763_v13 }
 0x5fa   : > { %v9620_v53 = vmul.f32 %v7420_v22, %v6579_v51  ;;  %v5103_v41 = vsel %vm5101_vm6, %v5102_v58, %v5100_v43 }
 0x5fb   : > { %v6769_v27 = vpack.c.bf16 %v5110_v62, %v5103_v41 }
 0x5fd   : > { %5375 = vrot.lane.b32.xlu1 %v8470_v55, %s7524_s25 }
 0x600   : > { %6768 = vmatpush3.bf16.xpose.msk.msra.mxu1 %vm8519_vm13, %v6763_v13 }
 0x601   : > { %6771 = vmatprep.subr.msk.bf16.mxu1 %vm8519_vm13, %v6769_v27  ;;  %5377 = vrot.lane.b32.xlu1 %v8476_v38, %s7524_s25 }
 0x603   : > { %5373 = vrot.lane.b32.xlu0 %v8472_v7, %s7524_s25 }
 0x605   : > { %5379 = vrot.lane.b32.xlu1 %v8474_v44, %s7524_s25 }
 0x607   : > { %7023 = vrot.lane.b32.xlu0 %v7022_v10, %s7524_s25 }
 0x608   : > { %6774 = vmatpush3.bf16.xpose.msk.msra.mxu1 %vm8519_vm13, %v6769_v27 }
 0x609   : > { %7018 = vrot.lane.b32.xlu1 %v7017_v54, %s7524_s25 }
 0x60b   : > { %7033 = vrot.lane.b32.xlu0 %v7032_v42, %s7524_s25 }
 0x60d   : > { %7028 = vrot.lane.b32.xlu1 %v7027_v2, %s7524_s25 }
 0x614   : > { %v5057_v55 = vpop.xlane.xlu1 %5056 }
 0x615   : > { %v5067_v7 = vadd.f32 0.0001, %v5057_v55  ;;  %v5060_v44 = vpop.xlane.xlu0 %5059 }
 0x616   : > { %v5068_v38 = vadd.f32 0.0001, %v5060_v44 }
 0x617   : > { %7421 = vrsqrt.f32 %v5067_v7  ;;  %vm5113_vm8 = vcmp.eq.f32.partialorder %v5067_v7, inf  ;;  %vm5115_vm10 = vcmp.eq.f32.partialorder %v5067_v7, 0.0  ;;  %v5116_v59 = vand.u32 2147483648, %v5067_v7 }
 0x618   : > { %7423 = vrsqrt.f32 %v5068_v38  ;;  %v4672_v8 = vpop.xlane.xlu1 %4671  ;;  %vm5120_vm11 = vcmp.eq.f32.partialorder %v5068_v38, inf  ;;  %v5123_v37 = vand.u32 2147483648, %v5068_v38  ;;  %vm5122_vm12 = vcmp.eq.f32.partialorder %v5068_v38, 0.0 }
 0x619   : > { %7425 = vrcp.f32 %v4672_v8  ;;  %v4669_v25 = vpop.xlane.xlu0 %4668 }
 0x61a   : > { %7427 = vrcp.f32 %v4669_v25 }
 0x61c   : > { %v4678_v23 = vpop.xlane.xlu1 %4677 }
 0x61d   : > { %7429 = vrcp.f32 %v4678_v23  ;;  %v4675_v54 = vpop.xlane.xlu0 %4674 }
 0x61e   : > { %7431 = vrcp.f32 %v4675_v54 }
 0x620   : > { %v4930_v34 = vpop.xlane.xlu1 %4929 }
 0x621   : > { %v7422_v10 = vpop.eup %7421  ;;  %v9658_v39 = vadd.f32 0.0001, %v4930_v34  ;;  %v4927_v49 = vpop.xlane.xlu0 %4926 }
 0x622   : > { %v7424_v60 = vpop.eup %7423  ;;  %v9660_v2 = vadd.f32 0.0001, %v4927_v49  ;;  %v5112_v28 = vmul.f32 %v7422_v10, %v5067_v7 }
 0x623   : > { %v7426_v42 = vpop.eup %7425  ;;  %7433 = vrsqrt.f32 %v9658_v39  ;;  %v5119_v30 = vmul.f32 %v7424_v60, %v5068_v38  ;;  %vm4966_vm15 = vcmp.eq.f32.partialorder %v9658_v39, inf  ;;  %v4969_v34 = vand.u32 2147483648, %v9658_v39 }
 0x624   : > { %v7428_v61 = vpop.eup %7427  ;;  %7435 = vrsqrt.f32 %v9660_v2  ;;  %v4936_v51 = vpop.xlane.xlu1 %4935  ;;  %v5114_v35 = vsel %vm5113_vm8, %v5067_v7, %v5112_v28  ;;  %v4690_v20 = vmul.f32 %v7426_v42, %v9429_v19  ;;  %vm4961_vm14 = vcmp.eq.f32.partialorder %v9660_v2, 0.0 }
 0x625   : > { %v9665_v9 = vadd.f32 0.0001, %v4936_v51  ;;  %v4933_v63 = vpop.xlane.xlu0 %4932  ;;  %v5121_v1 = vsel %vm5120_vm11, %v5068_v38, %v5119_v30  ;;  %v4688_v31 = vmul.f32 %v7428_v61, %v9431_v4  ;;  %v5117_v12 = vsel %vm5115_vm10, %v5116_v59, %v5114_v35 }
 0x626   : > { %v9668_v15 = vadd.f32 0.0001, %v4933_v63  ;;  %v5124_v17 = vsel %vm5122_vm12, %v5123_v37, %v5121_v1  ;;  %v4700_v19 = vmul.f32 %v4690_v20, %v9606_v40  ;;  %vm4968_vm1 = vcmp.eq.f32.partialorder %v9658_v39, 0.0 }
 0x627   : > { %v7430_v52 = vpop.eup %7429  ;;  %7437 = vrsqrt.f32 %v9665_v9  ;;  %v6775_v0 = vpack.c.bf16 %v5124_v17, %v5117_v12  ;;  %v4699_v14 = vmul.f32 %v4688_v31, %v9603_v24  ;;  %vm4980_vm4 = vcmp.eq.f32.partialorder %v9665_v9, inf }
 0x628   : > { %v7432_v26 = vpop.eup %7431  ;;  %7439 = vrsqrt.f32 %v9668_v15  ;;  %v4942_v45 = vpop.xlane.xlu1 %4941  ;;  %v4694_v21 = vmul.f32 %v7430_v52, %v9437_v56  ;;  %vm4973_vm0 = vcmp.eq.f32.partialorder %v9668_v15, inf  ;;  %v4976_v10 = vand.u32 2147483648, %v9668_v15 }
 0x629   : > { %v9676_v4 = vadd.f32 0.0001, %v4942_v45  ;;  %v4939_v13 = vpop.xlane.xlu0 %4938  ;;  %6777 = vmatprep.subr.msk.bf16.mxu1 %vm8519_vm13, %v6775_v0  ;;  %v4705_v3 = vpack.c.bf16 %v4700_v19, %v4699_v14  ;;  %v4692_v57 = vmul.f32 %v7432_v26, %v9441_v6  ;;  %vm4975_vm2 = vcmp.eq.f32.partialorder %v9668_v15, 0.0 }
 0x62a   : > { %v9681_v22 = vadd.f32 0.0001, %v4939_v13  ;;  %6780 = vmatpush3.bf16.xpose.msk.msra.mxu1 %vm8519_vm13, %v6775_v0  ;;  %v4702_v24 = vmul.f32 %v4694_v21, %v9615_v33  ;;  %vm4959_vm13 = vcmp.eq.f32.partialorder %v9660_v2, inf  ;;  %v4962_v33 = vand.u32 2147483648, %v9660_v2 }
 0x62b   : > { %7441 = vrsqrt.f32 %v9676_v4  ;;  %6621 = vmatprep.mubr.msk.bf16.mxu1 %vm3306_vm7, %v4705_v3  ;;  %v4701_v56 = vmul.f32 %v4692_v57, %v9620_v53  ;;  %vm4982_vm6 = vcmp.eq.f32.partialorder %v9665_v9, 0.0  ;;  %vm4994_vm10 = vcmp.eq.f32.partialorder %v9676_v4, inf }
 0x62c   : > { %7443 = vrsqrt.f32 %v9681_v22  ;;  %v4948_v40 = vpop.xlane.xlu1 %4947  ;;  %vm4987_vm5 = vcmp.eq.f32.partialorder %v9681_v22, inf  ;;  %v4990_v35 = vand.u32 2147483648, %v9681_v22  ;;  %vm4989_vm8 = vcmp.eq.f32.partialorder %v9681_v22, 0.0 }
 0x62d   : > { %v7434_v50 = vpop.eup %7433  ;;  %v9690_v5 = vadd.f32 0.0001, %v4948_v40  ;;  %v4945_v6 = vpop.xlane.xlu0 %4944  ;;  %v4706_v43 = vpack.c.bf16 %v4702_v24, %v4701_v56  ;;  %v4997_v0 = vand.u32 2147483648, %v9676_v4  ;;  %vm4996_vm12 = vcmp.eq.f32.partialorder %v9676_v4, 0.0 }
 0x62e   : > { %v7436_v58 = vpop.eup %7435  ;;  %v9692_v62 = vadd.f32 0.0001, %v4945_v6  ;;  %v4965_v53 = vmul.f32 %v7434_v50, %v9658_v39 }
 0x62f   : > { %7445 = vrsqrt.f32 %v9690_v5  ;;  %6622 = vmatmul.mubr.msk.bf16.gmra.mrb[64].mxu1 %vm3306_vm7, %v4706_v43  ;;  %v4958_v32 = vmul.f32 %v7436_v58, %v9660_v2  ;;  %v5011_v13 = vand.u32 2147483648, %v9690_v5 }
 0x630   : > { %7447 = vrsqrt.f32 %v9692_v62  ;;  %v4807_v8 = vpop.permute.xlu1 %4806  ;;  %v4967_v25 = vsel %vm4966_vm15, %v9658_v39, %v4965_v53  ;;  %v4983_v39 = vand.u32 2147483648, %v9665_v9  ;;  %vm5001_vm11 = vcmp.eq.f32.partialorder %v9692_v62, inf }
 0x631   : > { %v7438_v41 = vpop.eup %7437  ;;  %v4805_v27 = vpop.permute.xlu0 %4804  ;;  %v4960_v55 = vsel %vm4959_vm13, %v9660_v2, %v4958_v32  ;;  %v4970_v42 = vsel %vm4968_vm1, %v4969_v34, %v4967_v25  ;;  %v4828_v1 = vsel %vm405_vm3, %v4807_v8, 0  ;;  %v5004_v14 = vand.u32 2147483648, %v9692_v62 }
 0x632   : > { %v7440_v7 = vpop.eup %7439  ;;  %v4825_v44 = vsel %vm405_vm3, %v4805_v27, 0  ;;  %6989 = vmatprep.subr.msk.bf16.mxu0 %vm405_vm3, %v4805_v27  ;;  %v4963_v38 = vsel %vm4961_vm14, %v4962_v33, %v4960_v55  ;;  %v4979_v54 = vmul.f32 %v7438_v41, %v9665_v9  ;;  %vm5003_vm13 = vcmp.eq.f32.partialorder %v9692_v62, 0.0 }
 0x633   : > { %6626 = vmatpush3.bf16.xpose.msra.mxu0 %v4825_v44  ;;  %6657 = vmatprep.mubr.msk.f32.mxu1 %vm3109_vm9, %v4963_v38  ;;  %v4972_v23 = vmul.f32 %v7440_v7, %v9668_v15  ;;  %vm5008_vm14 = vcmp.eq.f32.partialorder %v9690_v5, inf  ;;  %vm5010_vm15 = vcmp.eq.f32.partialorder %v9690_v5, 0.0 }
 0x634   : > { %6990 = vmatprep.subr.msk.bf16.mxu0 %vm405_vm3, %v4807_v8  ;;  %v4981_v30 = vsel %vm4980_vm4, %v9665_v9, %v4979_v54  ;;  %v4809_v12 = vpop.permute.xlu1 %4808 }
 0x635   : > { %v7442_v49 = vpop.eup %7441  ;;  %v4797_v60 = vpop.permute.xlu0 %4796  ;;  %v4974_v2 = vsel %vm4973_vm0, %v9668_v15, %v4972_v23  ;;  %v4984_v31 = vsel %vm4982_vm6, %v4983_v39, %v4981_v30 }
 0x636   : > { %v7444_v28 = vpop.eup %7443  ;;  %6633 = vmatprep.mubr.msk.bf16.mxu0 %vm405_vm3, %v4797_v60  ;;  %v4977_v59 = vsel %vm4975_vm2, %v4976_v10, %v4974_v2  ;;  %v4993_v51 = vmul.f32 %v7442_v49, %v9676_v4 }
 0x637   : > { %6658 = vmatmul.mubr.msk.f32.vlgmr.msra.gmra.mrb[68].mxu1 %vm3109_vm9, %v4970_v42  ;;  %v4986_v61 = vmul.f32 %v7444_v28, %v9681_v22 }
 0x638   : > { %6660 = vmatprep.mubr.msk.f32.mxu1 %vm3109_vm9, %v4977_v59  ;;  %v4995_v17 = vsel %vm4994_vm10, %v9676_v4, %v4993_v51  ;;  %v4831_v4 = vsel %vm405_vm3, %v4809_v12, 0  ;;  %v4811_v57 = vpop.permute.xlu1 %4810 }
 0x639   : > { %v7446_v37 = vpop.eup %7445  ;;  %v4988_v20 = vsel %vm4987_vm5, %v9681_v22, %v4986_v61  ;;  %v4998_v26 = vsel %vm4996_vm12, %v4997_v0, %v4995_v17  ;;  %v4834_v22 = vsel %vm405_vm3, %v4811_v57, 0  ;;  %v4801_v24 = vpop.permute.xlu0 %4800 }
 0x63a   : > { %v7448_v63 = vpop.eup %7447  ;;  %v4991_v15 = vsel %vm4989_vm8, %v4990_v35, %v4988_v20  ;;  %v5007_v9 = vmul.f32 %v7446_v37, %v9690_v5 }
 0x63b   : > { %6628 = vmatpush3.bf16.xpose.msra.mxu0 %v4828_v1  ;;  %6661 = vmatmul.mubr.msk.f32.gmra.mrb[70].mxu1 %vm3109_vm9, %v4984_v31  ;;  %v5000_v52 = vmul.f32 %v7448_v63, %v9692_v62 }
 0x63c   : > { %6991 = vmatprep.subr.msk.bf16.mxu0 %vm405_vm3, %v4809_v12  ;;  %6663 = vmatprep.mubr.msk.f32.mxu1 %vm3109_vm9, %v4991_v15  ;;  %v5009_v21 = vsel %vm5008_vm14, %v9690_v5, %v5007_v9  ;;  %v4799_v56 = vpop.permute.xlu1 %4798 }
 0x63d   : > { %v5002_v19 = vsel %vm5001_vm11, %v9692_v62, %v5000_v52  ;;  %v5012_v3 = vsel %vm5010_vm15, %v5011_v13, %v5009_v21 }
 0x63e   : > { %v5005_v45 = vsel %vm5003_vm13, %v5004_v14, %v5002_v19 }
 0x63f   : > { %6664 = vmatmul.mubr.msk.f32.gmra.mrb[72].mxu1 %vm3109_vm9, %v4998_v26 }
 0x640   : > { %6666 = vmatprep.mubr.msk.f32.mxu1 %vm3109_vm9, %v5005_v45  ;;  %v4803_v40 = vpop.permute.xlu1 %4802 }
 0x643   : > { %6630 = vmatpush3.bf16.xpose.msra.mxu0 %v4831_v4  ;;  %6667 = vmatmul.mubr.msk.f32.gmra.mrb[74].mxu1 %vm3109_vm9, %v5012_v3  ;;  %vm5574_vm9 = vcmask 785408  }
 0x644   : > { %6992 = vmatprep.subr.msk.bf16.mxu0 %vm405_vm3, %v4811_v57 }
 0x64b   : > { %6632 = vmatpush3.bf16.xpose.msra.mxu0 %v4834_v22 }
 0x652   : > { %6634 = vmatmul.mubr.msk.bf16.vlgmr.msra.gmra.mrb[32].mxu0 %vm405_vm3, %v4799_v56 }
 0x653   : > { %6637 = vmatprep.mubr.msk.bf16.mxu0 %vm405_vm3, %v4801_v24 }
 0x65a   : > { %6638 = vmatmul.mubr.msk.bf16.gmra.mrb[36].mxu0 %vm405_vm3, %v4803_v40 }
 0x66a   : > { %v5323_v50 = vpop.xlane.xlu0 %5322 }
 0x66b   : > { %7449 = vrcp.f32 %v5323_v50 }
 0x66e   : > { %v5329_v5 = vpop.xlane.xlu0 %5328 }
 0x66f   : > { %7451 = vrcp.f32 %v5329_v5 }
 0x671   : > { %v5326_v6 = vpop.xlane.xlu1 %5325 }
 0x672   : > { %v5332_v43 = vpop.xlane.xlu0 %5331  ;;  %7453 = vrcp.f32 %v5326_v6 }
 0x673   : > { %7455 = vrcp.f32 %v5332_v43 }
 0x675   : > { %v5338_v58 = vpop.xlane.xlu1 %5337  ;;  %v7450_v12 = vpop.eup %7449 }
 0x676   : > { %v5335_v62 = vpop.xlane.xlu0 %5334  ;;  %v5346_v22 = vmul.f32 %v7450_v12, %v9521_v18 }
 0x679   : > { %v5344_v32 = vpop.xlane.xlu1 %5343  ;;  %v7452_v52 = vpop.eup %7451 }
 0x67a   : > { %v5341_v53 = vpop.xlane.xlu0 %5340  ;;  %v5350_v13 = vmul.f32 %v7452_v52, %v9529_v29 }
 0x67c   : > { %v7454_v0 = vpop.eup %7453 }
 0x67d   : > { %v5376_v33 = vpop.permute.xlu1 %5375  ;;  %v7456_v14 = vpop.eup %7455 }
 0x67e   : > { %v5374_v41 = vpop.permute.xlu0 %5373  ;;  %v5352_v5 = vmul.f32 %v7456_v14, %v9538_v36 }
 0x67f   : > { %6669 = vmatprep.subr.bf16.mxu0 %v5374_v41 }
 0x680   : > { %6670 = vmatpush3.bf16.msra.mxu0 %v5374_v41 }
 0x681   : > { %6671 = vmatprep.subr.bf16.mxu0 %v5376_v33  ;;  %v5378_v27 = vpop.permute.xlu1 %5377 }
 0x684   : > { %6672 = vmatpush3.bf16.msra.mxu0 %v5376_v33 }
 0x685   : > { %6673 = vmatprep.subr.bf16.mxu0 %v5378_v27  ;;  %v5380_v55 = vpop.permute.xlu1 %5379 }
 0x688   : > { %6674 = vmatpush3.bf16.msra.mxu0 %v5378_v27 }
 0x689   : > { %6675 = vmatprep.subr.bf16.mxu0 %v5380_v55  ;;  %v7019_v52 = vpop.permute.xlu1 %7018 }
 0x68c   : > { %6676 = vmatpush3.bf16.msra.mxu0 %v5380_v55 }
 0x6ca   : > { %v6619_v7 = vpop.f32.mrb[60].mxu1 }
 0x6cb   : > { %v4765_v44 = vpop.f32.mrb[61].mxu1 }
 0x6cc   : > { %v6620_v38 = vpop.f32.mrb[62].mxu1 }
 0x6cd   : > { %v7037_v8 = vpack.i.bf16 %v6620_v38, %v6619_v7  ;;  %v4768_v25 = vpop.f32.mrb[63].mxu1 }
 0x6ce   : > { %v7042_v23 = vpack.i.bf16 %v4768_v25, %v4765_v44 }
 0x6cf   : > { %7038 = vrot.lane.b32.xlu1 %v7037_v8, %s7523_s12 }
 0x6d0   : > { %7043 = vrot.lane.b32.xlu0 %v7042_v23, %s7523_s12 }
 0x702   : > { %v6623_v54 = vpop.f32.mrb[64].mxu1 }
 0x703   : > { %v4781_v34 = vpop.f32.mrb[65].mxu1 }
 0x704   : > { %v6624_v10 = vpop.f32.mrb[66].mxu1 }
 0x705   : > { %v7047_v49 = vpack.i.bf16 %v6624_v10, %v6623_v54  ;;  %v4784_v60 = vpop.f32.mrb[67].mxu1 }
 0x706   : > { %v7052_v2 = vpack.i.bf16 %v4784_v60, %v4781_v34 }
 0x707   : > { %7048 = vrot.lane.b32.xlu1 %v7047_v49, %s7523_s12 }
 0x708   : > { %7053 = vrot.lane.b32.xlu0 %v7052_v2, %s7523_s12 }
 0x70a   : > { %v6659_v28 = vpop.f32.mrb[68].mxu1 }
 0x70b   : > { %v5239_v42 = vpop.f32.mrb[69].mxu1  ;;  %v5245_v1 = vadd.f32 0.0001, %v6659_v28 }
 0x70c   : > { %v5240_v20 = vadd.f32 0.0001, %v5239_v42 }
 0x70e   : > { %v6662_v59 = vpop.f32.mrb[70].mxu1 }
 0x70f   : > { %v5249_v30 = vpop.f32.mrb[71].mxu1  ;;  %v5255_v63 = vadd.f32 0.0001, %v6662_v59 }
 0x710   : > { %v5250_v35 = vadd.f32 0.0001, %v5249_v30 }
 0x712   : > { %v6665_v61 = vpop.f32.mrb[72].mxu1  ;;  %7457 = vrcp.f32 %v5250_v35 }
 0x713   : > { %v5259_v51 = vpop.f32.mrb[73].mxu1  ;;  %7459 = vrcp.f32 %v5240_v20  ;;  %v5265_v9 = vadd.f32 0.0001, %v6665_v61 }
 0x714   : > { %7461 = vrcp.f32 %v5255_v63  ;;  %v5260_v15 = vadd.f32 0.0001, %v5259_v51 }
 0x715   : > { %7463 = vrcp.f32 %v5245_v1 }
 0x716   : > { %v6668_v39 = vpop.f32.mrb[74].mxu1  ;;  %7465 = vrcp.f32 %v5338_v58 }
 0x717   : > { %v5269_v37 = vpop.f32.mrb[75].mxu1  ;;  %7467 = vrcp.f32 %v5335_v62  ;;  %v5275_v17 = vadd.f32 0.0001, %v6668_v39 }
 0x718   : > { %v5270_v31 = vadd.f32 0.0001, %v5269_v37  ;;  %7469 = vrcp.f32 %v5341_v53 }
 0x719   : > { %7471 = vrcp.f32 %v5344_v32  ;;  %v5348_v32 = vmul.f32 %v7454_v0, %v9535_v16  ;;  %v7029_v0 = vpop.permute.xlu1 %7028 }
 0x71a   : > { %7473 = vrcp.f32 %v5270_v31 }
 0x71b   : > { %7475 = vrcp.f32 %v5260_v15 }
 0x71c   : > { %v7458_v19 = vpop.eup %7457  ;;  %7477 = vrcp.f32 %v5275_v17 }
 0x71d   : > { %v7460_v45 = vpop.eup %7459  ;;  %7479 = vrcp.f32 %v5265_v9  ;;  %v7024_v9 = vpop.permute.xlu0 %7023 }
 0x71e   : > { %v7462_v3 = vpop.eup %7461 }
 0x71f   : > { %v7464_v24 = vpop.eup %7463 }
 0x720   : > { %v7466_v43 = vpop.eup %7465 }
 0x721   : > { %v7468_v53 = vpop.eup %7467  ;;  %v7034_v14 = vpop.permute.xlu0 %7033 }
 0x722   : > { %v7470_v29 = vpop.eup %7469  ;;  %v5354_v34 = vmul.f32 %v7468_v53, %v9550_v46 }
 0x723   : > { %v7472_v27 = vpop.eup %7471  ;;  %v5358_v25 = vmul.f32 %v7470_v29, %v9573_v11  ;;  %v5356_v11 = vmul.f32 %v7466_v43, %v9547_v47 }
 0x724   : > { %v7474_v7 = vpop.eup %7473  ;;  %v5360_v2 = vmul.f32 %v7472_v27, %v9568_v48 }
 0x725   : > { %v6635_v26 = vpop.f32.mrb[32].mxu0  ;;  %v7476_v38 = vpop.eup %7475 }
 0x726   : > { %v5283_v21 = vmul.f32 %v7458_v19, %v6635_v26  ;;  %v4870_v4 = vpop.f32.mrb[33].mxu0  ;;  %v7478_v23 = vpop.eup %7477 }
 0x727   : > { %v5279_v57 = vmul.f32 %v7460_v45, %v4870_v4  ;;  %v6636_v56 = vpop.f32.mrb[34].mxu0  ;;  %v7480_v16 = vpop.eup %7479  ;;  %v7026_v45 = vunpack.i.h.bf16 %v7024_v9  ;;  %v7021_v4 = vunpack.i.h.bf16 %v7019_v52 }
 0x728   : > { %v5363_v40 = vmul.f32 %v5350_v13, %v5283_v21  ;;  %v5285_v50 = vmul.f32 %v7462_v3, %v6636_v56  ;;  %v4873_v6 = vpop.f32.mrb[35].mxu0  ;;  %v7025_v21 = vunpack.i.l.bf16 %v7024_v9  ;;  %v7020_v3 = vunpack.i.l.bf16 %v7019_v52 }
 0x729   : > { %v5361_v58 = vmul.f32 %v5346_v22, %v5279_v57  ;;  %v5281_v62 = vmul.f32 %v7464_v24, %v4873_v6  ;;  %v9923_v6 = vld [vmem:[#allocation29_spill] sm:$0xff] }
 0x72a   : > { %v5364_v33 = vmul.f32 %v5352_v5, %v5285_v50  ;;  %v9922_v50 = vld [vmem:[#allocation6_spill] sm:$0xff]  ;;  %v5558_v43 = vsel %vm405_vm3, %v9923_v6, %v7025_v21 }
 0x72b   : > { %v5362_v41 = vmul.f32 %v5348_v32, %v5281_v62  ;;  %v5559_v5 = vsel %vm405_vm3, %v9922_v50, %v7026_v45  ;;  %v9924_v32 = vld [vmem:[#allocation30_spill] sm:$0xff] }
 0x72c   : > { %v5370_v55 = vpack.c.bf16 %v5364_v33, %v5363_v40  ;;  %v5561_v53 = vsel %vm405_vm3, %v9924_v32, %v7021_v4  ;;  %v9925_v33 = vld [vmem:[#allocation26_spill] sm:$0xff] }
 0x72d   : > { %v5369_v18 = vpack.c.bf16 %v5362_v41, %v5361_v58  ;;  %v6639_v44 = vpop.f32.mrb[36].mxu0  ;;  %v7036_v58 = vunpack.i.h.bf16 %v7034_v14  ;;  %v5560_v29 = vsel %vm405_vm3, %v9925_v33, %v7020_v3 }
 0x72e   : > { %v5291_v8 = vmul.f32 %v7474_v7, %v6639_v44  ;;  %v4886_v36 = vpop.f32.mrb[37].mxu0 }
 0x72f   : > { %v5287_v54 = vmul.f32 %v7476_v38, %v4886_v36  ;;  %v6640_v10 = vpop.f32.mrb[38].mxu0  ;;  %6677 = vmatprep.mubr.msk.bf16.mxu0 %vm3306_vm7, %v5369_v18 }
 0x730   : > { %v5367_v49 = vmul.f32 %v5358_v25, %v5291_v8  ;;  %v5293_v60 = vmul.f32 %v7478_v23, %v6640_v10  ;;  %v4889_v28 = vpop.f32.mrb[39].mxu0  ;;  %6678 = vmatmul.mubr.msk.bf16.vlgmr.msra.gmra.mrb[40].mxu0 %vm3306_vm7, %v5370_v55 }
 0x731   : > { %v5365_v42 = vmul.f32 %v5354_v34, %v5287_v54  ;;  %v5289_v59 = vmul.f32 %v7480_v16, %v4889_v28  ;;  %v7035_v54 = vunpack.i.l.bf16 %v7034_v14 }
 0x732   : > { %v5368_v30 = vmul.f32 %v5360_v2, %v5293_v60  ;;  %v7030_v60 = vunpack.i.l.bf16 %v7029_v0 }
 0x733   : > { %v5366_v61 = vmul.f32 %v5356_v11, %v5289_v59 }
 0x734   : > { %v5372_v51 = vpack.c.bf16 %v5368_v30, %v5367_v49  ;;  %v7031_v49 = vunpack.i.h.bf16 %v7029_v0  ;;  %v9926_v30 = vld [vmem:[#allocation33_spill] sm:$0xff] }
 0x735   : > { %v5371_v39 = vpack.c.bf16 %v5366_v61, %v5365_v42  ;;  %v5563_v61 = vsel %vm405_vm3, %v9926_v30, %v7036_v58 }
 0x737   : > { %6681 = vmatprep.mubr.msk.bf16.mxu0 %vm3306_vm7, %v5371_v39 }
 0x738   : > { %6682 = vmatmul.mubr.msk.bf16.gmra.mrb[44].mxu0 %vm3306_vm7, %v5372_v51  ;;  %v9927_v51 = vld [vmem:[#allocation31_spill] sm:$0xff] }
 0x739   : > { %v5562_v39 = vsel %vm405_vm3, %v9927_v51, %v7035_v54 }
 0x741   : > { %v7039_v19 = vpop.permute.xlu1 %7038 }
 0x742   : > { %v7044_v26 = vpop.permute.xlu0 %7043  ;;  %v7041_v22 = vunpack.i.h.bf16 %v7039_v19  ;;  %v7040_v56 = vunpack.i.l.bf16 %v7039_v19 }
 0x743   : > { %v7046_v24 = vunpack.i.h.bf16 %v7044_v26  ;;  %v7045_v40 = vunpack.i.l.bf16 %v7044_v26 }
 0x744   : > { %v5569_v7 = vsel %vm3306_vm7, %v5561_v53, %v7041_v22  ;;  %v5568_v18 = vsel %vm3306_vm7, %v5560_v29, %v7040_v56 }
 0x745   : > { %v5567_v8 = vsel %vm3306_vm7, %v5559_v5, %v7046_v24  ;;  %v5566_v25 = vsel %vm3306_vm7, %v5558_v43, %v7045_v40 }
 0x779   : > { %v7049_v13 = vpop.permute.xlu1 %7048 }
 0x77a   : > { %v7054_v57 = vpop.permute.xlu0 %7053  ;;  %v7051_v28 = vunpack.i.h.bf16 %v7049_v13  ;;  %v7050_v42 = vunpack.i.l.bf16 %v7049_v13 }
 0x77b   : > { %v7056_v59 = vunpack.i.h.bf16 %v7054_v57  ;;  %v7055_v11 = vunpack.i.l.bf16 %v7054_v57 }
 0x77d   : > { %v5571_v52 = vsel %vm3306_vm7, %v5563_v61, %v7056_v59  ;;  %v5570_v9 = vsel %vm3306_vm7, %v5562_v39, %v7055_v11 }
 0x803   : > { %v6679_v46 = vpop.f32.mrb[40].mxu0 }
 0x804   : > { %v5431_v35 = vpop.f32.mrb[41].mxu0 }
 0x805   : > { %v6680_v37 = vpop.f32.mrb[42].mxu0 }
 0x806   : > { %v7057_v20 = vpack.i.bf16 %v6680_v37, %v6679_v46  ;;  %v5434_v48 = vpop.f32.mrb[43].mxu0 }
 0x807   : > { %v7062_v63 = vpack.i.bf16 %v5434_v48, %v5431_v35  ;;  %v9928_v35 = vld [vmem:[#allocation32_spill] sm:$0xff] }
 0x808   : > { %7058 = vrot.lane.b32.xlu1 %v7057_v20, %s7522_s10  ;;  %v5565_v37 = vsel %vm405_vm3, %v9928_v35, %v7031_v49  ;;  %v9929_v20 = vld [vmem:[#allocation13_spill] sm:$0xff] }
 0x809   : > { %7063 = vrot.lane.b32.xlu0 %v7062_v63, %s7522_s10  ;;  %v5564_v48 = vsel %vm405_vm3, %v9929_v20, %v7030_v60 }
 0x80b   : > { %v6683_v1 = vpop.f32.mrb[44].mxu0 }
 0x80c   : > { %v5447_v47 = vpop.f32.mrb[45].mxu0 }
 0x80d   : > { %v6684_v31 = vpop.f32.mrb[46].mxu0 }
 0x80e   : > { %v7072_v15 = vpack.i.bf16 %v6684_v31, %v6683_v1  ;;  %v5450_v12 = vpop.f32.mrb[47].mxu0  ;;  %v5573_v31 = vsel %vm3306_vm7, %v5565_v37, %v7051_v28 }
 0x80f   : > { %v7067_v17 = vpack.i.bf16 %v5450_v12, %v5447_v47 }
 0x810   : > { %7073 = vrot.lane.b32.xlu1 %v7072_v15, %s7522_s10  ;;  %v5572_v15 = vsel %vm3306_vm7, %v5564_v48, %v7050_v42 }
 0x811   : > { %7068 = vrot.lane.b32.xlu0 %v7067_v17, %s7522_s10  ;;  %s6123_s10 = sshll.u32 %s9931_s16, 5 }
 0x812   : > { %s9793_s24 = scalar_lea.vmem %s9826_s4, %s6123_s10 }
 0x87a   : > { %v7059_v62 = vpop.permute.xlu1 %7058 }
 0x87b   : > { %v7061_v41 = vunpack.i.h.bf16 %v7059_v62  ;;  %v7060_v27 = vunpack.i.l.bf16 %v7059_v62  ;;  %v7064_v55 = vpop.permute.xlu0 %7063 }
 0x87c   : > { %v7066_v44 = vunpack.i.h.bf16 %v7064_v55  ;;  %v7065_v38 = vunpack.i.l.bf16 %v7064_v55 }
 0x87d   : > { %v5578_v36 = vsel %vm5574_vm9, %v5569_v7, %v7061_v41  ;;  %v5577_v23 = vsel %vm5574_vm9, %v5568_v18, %v7060_v27 }
 0x87e   : > { %v6140_v34 = vpack.c.bf16 %v5578_v36, %v5577_v23  ;;  %v5576_v10 = vsel %vm5574_vm9, %v5567_v8, %v7066_v44  ;;  %v5575_v16 = vsel %vm5574_vm9, %v5566_v25, %v7065_v38 }
 0x87f   : > { %v6135_v2 = vpack.c.bf16 %v5576_v10, %v5575_v16 }
 0x880   : > { %6152 = vst [vmem:[%s9793_s24 + $0x8] sm:$0xff] %v6140_v34  }
 0x881   : > { %6136 = vst [vmem:[%s9793_s24] sm:$0xff] %v6135_v2  }
 0x882   : > { %v7074_v46 = vpop.permute.xlu1 %7073 }
 0x883   : > { %v7076_v63 = vunpack.i.h.bf16 %v7074_v46  ;;  %v7075_v1 = vunpack.i.l.bf16 %v7074_v46  ;;  %v7069_v47 = vpop.permute.xlu0 %7068 }
 0x884   : > { %v7071_v12 = vunpack.i.h.bf16 %v7069_v47  ;;  %v7070_v17 = vunpack.i.l.bf16 %v7069_v47 }
 0x885   : > { %v5582_v0 = vsel %vm5574_vm9, %v5573_v31, %v7076_v63  ;;  %v5581_v14 = vsel %vm5574_vm9, %v5572_v15, %v7075_v1 }
 0x886   : > { %v6150_v19 = vpack.c.bf16 %v5582_v0, %v5581_v14  ;;  %v5580_v26 = vsel %vm5574_vm9, %v5571_v52, %v7071_v12  ;;  %v5579_v45 = vsel %vm5574_vm9, %v5570_v9, %v7070_v17 }
 0x887   : > { %v6145_v21 = vpack.c.bf16 %v5580_v26, %v5579_v45 }
 0x888   : > { %6154 = vst [vmem:[%s9793_s24 + $0x18] sm:$0xff] %v6150_v19  }
 0x889   : > { %6153 = vst [vmem:[%s9793_s24 + $0x10] sm:$0xff] %v6145_v21  }
 0x88a PF: > { %s15_s15 = sadd.s32 1, %s7518_s15  }
 0x88b   : > { %p12_p1 = scmp.ge.s32.totalorder %s15_s15, 4  }
 0x88d   :  { %14 = sbr.rel (!%p12_p1) target bundleno = 1 (0x1), region = 81 }
 0x894   :  { %5644 = vsyncpa [#allocation3], 1 }
 0x895   :  { %5646 = vsyncpa [#allocation3 + $0x1], 1 }

</bundles_post_ra>
